<compile_context>
chip_gen: v7x
topology: tpu7x:2x2x1
jax: 0.10.0
libtpu: 0.0.40
codegen_flags: <defaults>
</compile_context>

<pallas_src>
import functools

import numpy as np
import jax
import jax.numpy as jnp
from jax.experimental import pallas as pl
from jax.experimental.pallas import tpu as pltpu

# ----------------------------- model hyper-params -----------------------------
N_CLASS     = 8              # cfg.MODEL.N_CLASS
LEAKY       = 0.0            # cfg.GAN.LEAKYRELU
POOL_SCALES = (1, 2, 3, 6)   # cfg.MODEL.POOL_SCALES
PPM_DIM     = 32             # per-scale reduced channels inside PPM
STEM_DIM    = 32             # conv1 output channels
FC_DIM      = 64             # backbone output channels (cfg.MODEL.PPM_IN)
LAST_DIM    = 64             # PPM conv_last channels
SEGSIZE     = 32             # cfg.MODEL.SEGSIZE
IMG         = 32             # input spatial size
IN_CH       = 3              # RGB

H1 = W1 = IMG // 2                                # 16 after conv1 (stride 2)
H2 = W2 = IMG // 4                                # 8  after conv2 (stride 2)
P1 = H1 * W1                                      # 256 conv1 output positions
P2 = H2 * W2                                      # 64  backbone output positions
PSEG = SEGSIZE * SEGSIZE                          # 1024 output positions
K1PAD = 32                                        # conv1 im2col dim 27 padded to 32
CAT_DIM = FC_DIM + len(POOL_SCALES) * PPM_DIM     # 192 channels into conv_last
PPM_LANES = len(POOL_SCALES) * PPM_DIM            # 128
PPM_ROWS = sum(s * s for s in POOL_SCALES)        # 50 pooled rows (all scales)

CONST_NAMES = ("w1", "b1", "s2", "w2", "b2",
               "p_all", "wr", "br", "mask", "u_all",
               "s3", "w3", "b3", "wc", "bc", "msegT")


# --------------------------- host-side matrix builders ---------------------------
def adaptive_pool_1d(in_size, out_size):
    """PyTorch AdaptiveAvgPool 1-D matrix (out_size, in_size)."""
    P = np.zeros((out_size, in_size), np.float32)
    for i in range(out_size):
        a = (i * in_size) // out_size
        b = -(-((i + 1) * in_size) // out_size)        # ceil
        P[i, a:b] = 1.0 / (b - a)
    return P


def bilinear_1d(in_size, out_size):
    """PyTorch F.interpolate(mode='bilinear', align_corners=False) 1-D matrix."""
    A = np.zeros((out_size, in_size), np.float32)
    scale = in_size / out_size
    for o in range(out_size):
        src = max((o + 0.5) * scale - 0.5, 0.0)
        i0 = min(int(np.floor(src)), in_size - 1)
        i1 = min(i0 + 1, in_size - 1)
        w = src - i0
        A[o, i0] += 1.0 - w
        A[o, i1] += w
    return A


def conv_shift_matrices(hi, wi, ho, wo, stride, pad):
    """0/1 tap-selection matrices S[t, oh*wo+ow, ih*wi+iw] for a 3x3 conv."""
    S = np.zeros((9, ho * wo, hi * wi), np.float32)
    for kh in range(3):
        for kw in range(3):
            t = kh * 3 + kw
            for oh in range(ho):
                ih = stride * oh + kh - pad
                if not (0 <= ih < hi):
                    continue
                for ow in range(wo):
                    iw = stride * ow + kw - pad
                    if not (0 <= iw < wi):
                        continue
                    S[t, oh * wo + ow, ih * wi + iw] = 1.0
    return S


# ------------------------------- parameter init --------------------------------
def init_params(key):
    ks = jax.random.split(key, 12)
    scale = 0.05

    def w(k, shape):
        return scale * jax.random.normal(k, shape, jnp.float32)

    p = {
        "conv1_w": w(ks[0], (3, 3, IN_CH, STEM_DIM)),
        "conv1_b": jnp.zeros((STEM_DIM,), jnp.float32),
        "conv2_w": w(ks[1], (3, 3, STEM_DIM, FC_DIM)),
        "conv2_b": jnp.zeros((FC_DIM,), jnp.float32),
        "last_w":  w(ks[2], (3, 3, CAT_DIM, LAST_DIM)),
        "last_b":  jnp.zeros((LAST_DIM,), jnp.float32),
        "cls_w":   w(ks[3], (LAST_DIM, N_CLASS)),
        "cls_b":   jnp.zeros((N_CLASS,), jnp.float32),
    }
    for i, s in enumerate(POOL_SCALES):
        p[f"ppm{s}_w"] = w(ks[4 + i], (FC_DIM, PPM_DIM))
        p[f"ppm{s}_b"] = jnp.zeros((PPM_DIM,), jnp.float32)
    return p


def build_constants(params):
    """Fold the weights into the matmul form consumed by the fused kernel."""
    f32, bf16 = jnp.float32, jnp.bfloat16
    npa = lambda a: np.asarray(a, np.float32)
    c = {}

    # conv1: im2col'd 3x3 stride-2 -> (32, 32) matmul weight (K padded 27 -> 32)
    w1 = np.zeros((K1PAD, STEM_DIM), np.float32)
    w1[:9 * IN_CH] = npa(params["conv1_w"]).reshape(9 * IN_CH, STEM_DIM)
    c["w1"] = jnp.asarray(w1, bf16)
    c["b1"] = jnp.asarray(npa(params["conv1_b"]).reshape(1, STEM_DIM), f32)

    # conv2: 3x3 stride-2 as 9 spatial-shift taps (kept entirely in VMEM)
    c["s2"] = jnp.asarray(conv_shift_matrices(H1, W1, H2, W2, 2, 1), bf16)
    c["w2"] = jnp.asarray(npa(params["conv2_w"]).reshape(9, STEM_DIM, FC_DIM), bf16)
    c["b2"] = jnp.asarray(npa(params["conv2_b"]).reshape(1, FC_DIM), f32)

    # PPM: all 4 scales consolidated into lane-dense (128-wide) matmuls
    offs = np.cumsum([0] + [s * s for s in POOL_SCALES])[:-1]
    P_all = np.zeros((PPM_ROWS, P2), np.float32)
    U_all = np.zeros((P2, PPM_ROWS), np.float32)
    mask = np.zeros((PPM_ROWS, PPM_LANES), np.float32)
    Wr = np.zeros((FC_DIM, PPM_LANES), np.float32)
    br = np.zeros((1, PPM_LANES), np.float32)
    for j, s in enumerate(POOL_SCALES):
        o = int(offs[j])
        P_all[o:o + s * s, :] = np.kron(adaptive_pool_1d(H2, s), adaptive_pool_1d(W2, s))
        U_all[:, o:o + s * s] = np.kron(bilinear_1d(s, H2), bilinear_1d(s, W2))
        mask[o:o + s * s, j * PPM_DIM:(j + 1) * PPM_DIM] = 1.0
        Wr[:, j * PPM_DIM:(j + 1) * PPM_DIM] = npa(params[f"ppm{s}_w"])
        br[0, j * PPM_DIM:(j + 1) * PPM_DIM] = npa(params[f"ppm{s}_b"])
    c["p_all"] = jnp.asarray(P_all, bf16)
    c["wr"] = jnp.asarray(Wr, bf16)
    c["br"] = jnp.asarray(br, f32)
    c["mask"] = jnp.asarray(mask, f32)
    c["u_all"] = jnp.asarray(U_all, bf16)

    # conv_last: 3x3 stride-1 as 9 taps; single merged (9, 192, 64) weight
    # (the [feat | ppm] channel concat is materialized once per image, 24 KiB).
    c["s3"] = jnp.asarray(conv_shift_matrices(H2, W2, H2, W2, 1, 1), bf16)
    c["w3"] = jnp.asarray(npa(params["last_w"]).reshape(9, CAT_DIM, LAST_DIM), bf16)
    c["b3"] = jnp.asarray(npa(params["last_b"]).reshape(1, LAST_DIM), f32)

    # classifier
    c["wc"] = jnp.asarray(npa(params["cls_w"]), bf16)
    c["bc"] = jnp.asarray(npa(params["cls_b"]).reshape(1, N_CLASS), f32)

    # final bilinear, stored TRANSPOSED and bf16 so the kernel can emit the
    # output class-major in one lane-dense matmul (f32 accumulate).
    mseg = np.kron(bilinear_1d(H2, SEGSIZE), bilinear_1d(W2, SEGSIZE))  # (1024, 64)
    c["msegT"] = jnp.asarray(np.ascontiguousarray(mseg.T), bf16)        # (64, 1024)
    return c


# ------------------------------- fused Pallas kernel -------------------------------
def _act(y):
    if LEAKY == 0.0:
        return jnp.maximum(y, 0.0)
    return jnp.where(y >= 0, y, LEAKY * y)


def _fused_fwd_kernel(patch_ref, w1_ref, b1_ref, s2_ref, w2_ref, b2_ref,
                      p_all_ref, wr_ref, br_ref, mask_ref, u_all_ref,
                      s3_ref, w3_ref, b3_ref, wc_ref, bc_ref,
                      msegT_ref, out_ref, *, b_tile):
    f32, bf16 = jnp.float32, jnp.bfloat16

    # ---- conv1: batch folded into M, one bf16 matmul ----
    patches = patch_ref[...].reshape(b_tile * P1, K1PAD)                       # (B*256, 32)
    h1_all = jnp.dot(patches, w1_ref[...], preferred_element_type=f32)
    h1_all = _act(h1_all + b1_ref[...]).astype(bf16)

    h_last_list = []
    for b in range(b_tile):                      # small unrolled per-image loop
        h1 = h1_all[b * P1:(b + 1) * P1]                                       # (256, 32)

        # ---- conv2: 3x3 stride-2 via 9 spatial-shift matmuls, VMEM resident ----
        acc = jnp.zeros((P2, FC_DIM), f32)
        for t in range(9):
            shifted = jnp.dot(s2_ref[t], h1, preferred_element_type=f32)       # (64, 32)
            acc = acc + jnp.dot(shifted.astype(bf16), w2_ref[t],
                                preferred_element_type=f32)                    # (64, 64)
        feat = _act(acc + b2_ref[...])                                         # (64, 64) f32
        featb = feat.astype(bf16)

        # ---- PPM: all 4 scales batched into three lane-dense matmuls ----
        pooled = jnp.dot(p_all_ref[...], featb, preferred_element_type=f32)    # (50, 64)
        red = jnp.dot(pooled.astype(bf16), wr_ref[...],
                      preferred_element_type=f32)                              # (50, 128)
        red = _act(red + br_ref[...]) * mask_ref[...]
        up = jnp.dot(u_all_ref[...], red.astype(bf16),
                     preferred_element_type=f32)                               # (64, 128)
        upb = up.astype(bf16)

        # ---- conv_last: 3x3 stride-1 via 9 taps; one merged (192 -> 64) weight ----
        cat = jnp.concatenate([featb, upb], axis=-1)                           # (64, 192)
        acc = jnp.zeros((P2, LAST_DIM), f32)
        for t in range(9):
            part = jnp.dot(cat, w3_ref[t], preferred_element_type=f32)         # (64, 64)
            acc = acc + jnp.dot(s3_ref[t], part.astype(bf16),
                                preferred_element_type=f32)
        h_last_list.append(_act(acc + b3_ref[...]).astype(bf16))               # (64, 64)

    # ---- classifier + softmax over channels (dim=1 of NCHW), batched over images ----
    hl_all = jnp.concatenate(h_last_list, axis=0) if b_tile > 1 else h_last_list[0]
    logits = jnp.dot(hl_all, wc_ref[...], preferred_element_type=f32) + bc_ref[...]
    m = jnp.max(logits, axis=-1, keepdims=True)
    e = jnp.exp(logits - m)
    prob = e / jnp.sum(e, axis=-1, keepdims=True)                              # (B*64, 8) f32

    # ---- transposed bilinear upsample: output is produced class-major ----
    probT_list = [jnp.transpose(prob[b * P2:(b + 1) * P2]).astype(bf16)        # (8, 64)
                  for b in range(b_tile)]
    probT = jnp.concatenate(probT_list, axis=0) if b_tile > 1 else probT_list[0]
    out = jnp.dot(probT, msegT_ref[...], preferred_element_type=f32)           # (B*8, 1024)
    out_ref[...] = out.reshape(b_tile, N_CLASS, PSEG)


# --------------------------------- wrapper / glue ---------------------------------
def _im2col_conv1(x):
    """XLA-side (jit-fused) im2col of the tiny 3-channel input for conv1 only."""
    n, h, w, c = x.shape
    xp = jnp.pad(x, ((0, 0), (1, 1), (1, 1), (0, 0)))
    ho, wo = h // 2, w // 2
    cols = []
    for kh in range(3):
        for kw in range(3):
            cols.append(xp[:, kh:kh + 2 * ho:2, kw:kw + 2 * wo:2, :])
    pat = jnp.concatenate(cols, axis=-1).reshape(n, ho * wo, 9 * c)   # (N, 256, 27)
    # zero-pad the im2col feature dim (27) to 32 for aligned DMA / MXU tiles
    return jnp.pad(pat, ((0, 0), (0, 0), (0, K1PAD - 9 * c)))


def _pick_b_tile(n_batch):
    """Largest batch tile that still leaves >= 2 grid steps (keeps both v7x TCs busy)."""
    for bt in (8, 4, 2):
        if n_batch % bt == 0 and n_batch // bt >= 2:
            return bt
    return 1


def make_forward(consts, n_batch):
    const_list = [consts[k] for k in CONST_NAMES]
    b_tile = _pick_b_tile(n_batch)
    grid = (n_batch // b_tile,)

    in_specs = [pl.BlockSpec((b_tile, P1, K1PAD), lambda b: (b, 0, 0))]
    for a in const_list:
        in_specs.append(pl.BlockSpec(a.shape, lambda b, _nd=a.ndim: (0,) * _nd))

    fused_call = pl.pallas_call(
        functools.partial(_fused_fwd_kernel, b_tile=b_tile),
        out_shape=jax.ShapeDtypeStruct((n_batch, N_CLASS, PSEG), jnp.float32),
        grid=grid,
        in_specs=in_specs,
        # class-major (8, 1024) per image: (8,128)-legal, fully lane-dense stores
        out_specs=pl.BlockSpec((b_tile, N_CLASS, PSEG), lambda b: (b, 0, 0)),
        compiler_params=pltpu.CompilerParams(
            dimension_semantics=("parallel",),      # v7x: grid steps split across TCs
        ),
    )

    @jax.jit
    def _forward(image_nchw):
        x = jnp.transpose(image_nchw, (0, 2, 3, 1)).astype(jnp.float32)   # NHWC
        patches = _im2col_conv1(x).astype(jnp.bfloat16)                   # (N, 256, 32)
        out = fused_call(patches, *const_list)                            # (N, 8, 1024)
        # already class-major -> plain reshape gives NCHW, no slice/transpose needed
        return out.reshape(n_batch, N_CLASS, SEGSIZE, SEGSIZE)

    def forward(image_nchw, epoch_i=0):
        del epoch_i  # FOCUS_DECODER disabled (cfg.MODEL.FOCUS_DECODER = False)
        return _forward(image_nchw)

    return forward


# ----------------------------------- main ---------------------------------------
if __name__ == "__main__":
    key = jax.random.PRNGKey(0)
    k_param, k_img = jax.random.split(key)

    params = init_params(k_param)
    consts = build_constants(params)

    n_batch = 4                                   # exercises B_TILE=2, grid=(2,)
    image = jax.random.normal(k_img, (n_batch, IN_CH, IMG, IMG), jnp.float32)  # NCHW

    forward = make_forward(consts, n_batch=n_batch)
    out = forward(image, epoch_i=0)
    out = jax.block_until_ready(out)

    assert out.shape == (n_batch, N_CLASS, SEGSIZE, SEGSIZE), out.shape
    # softmax-then-bilinear-resize preserves per-pixel channel sums == 1
    # (bf16 weights/probs in the final matmul add only ~5e-3 worst-case drift)
    sums = jnp.sum(out, axis=1)
    assert bool(jnp.all(jnp.abs(sums - 1.0) < 1e-2)), float(jnp.max(jnp.abs(sums - 1.0)))
    print("KERNEL_OK")
</pallas_src>

<mosaic_0001>
module attributes {stable_mosaic.version = 11 : i64} {
  func.func @_fused_fwd_kernel(%arg0: i32, %arg1: memref<2x256x32xbf16, #tpu.memory_space<vmem>>, %arg2: memref<32x32xbf16, #tpu.memory_space<vmem>>, %arg3: memref<1x32xf32, #tpu.memory_space<vmem>>, %arg4: memref<9x64x256xbf16, #tpu.memory_space<vmem>>, %arg5: memref<9x32x64xbf16, #tpu.memory_space<vmem>>, %arg6: memref<1x64xf32, #tpu.memory_space<vmem>>, %arg7: memref<50x64xbf16, #tpu.memory_space<vmem>>, %arg8: memref<64x128xbf16, #tpu.memory_space<vmem>>, %arg9: memref<1x128xf32, #tpu.memory_space<vmem>>, %arg10: memref<50x128xf32, #tpu.memory_space<vmem>>, %arg11: memref<64x50xbf16, #tpu.memory_space<vmem>>, %arg12: memref<9x64x64xbf16, #tpu.memory_space<vmem>>, %arg13: memref<9x192x64xbf16, #tpu.memory_space<vmem>>, %arg14: memref<1x64xf32, #tpu.memory_space<vmem>>, %arg15: memref<64x8xbf16, #tpu.memory_space<vmem>>, %arg16: memref<1x8xf32, #tpu.memory_space<vmem>>, %arg17: memref<64x1024xbf16, #tpu.memory_space<vmem>>, %arg18: memref<2x8x1024xf32, #tpu.memory_space<vmem>>) attributes {dimension_semantics = [#tpu.dimension_semantics<parallel>], iteration_bounds = array<i64: 2>, scalar_prefetch = 0 : i64, scratch_operands = 0 : i64, tpu.core_type = #tpu.core_type<tc>, window_params = [{transform_indices = @transform_0, window_bounds = array<i64: 2, 256, 32>}, {pipeline_mode = #tpu.pipeline_mode<synchronous>, transform_indices = @transform_1, window_bounds = array<i64: 32, 32>}, {pipeline_mode = #tpu.pipeline_mode<synchronous>, transform_indices = @transform_2, window_bounds = array<i64: 1, 32>}, {pipeline_mode = #tpu.pipeline_mode<synchronous>, transform_indices = @transform_3, window_bounds = array<i64: 9, 64, 256>}, {pipeline_mode = #tpu.pipeline_mode<synchronous>, transform_indices = @transform_4, window_bounds = array<i64: 9, 32, 64>}, {pipeline_mode = #tpu.pipeline_mode<synchronous>, transform_indices = @transform_5, window_bounds = array<i64: 1, 64>}, {pipeline_mode = #tpu.pipeline_mode<synchronous>, transform_indices = @transform_6, window_bounds = array<i64: 50, 64>}, {pipeline_mode = #tpu.pipeline_mode<synchronous>, transform_indices = @transform_7, window_bounds = array<i64: 64, 128>}, {pipeline_mode = #tpu.pipeline_mode<synchronous>, transform_indices = @transform_8, window_bounds = array<i64: 1, 128>}, {pipeline_mode = #tpu.pipeline_mode<synchronous>, transform_indices = @transform_9, window_bounds = array<i64: 50, 128>}, {pipeline_mode = #tpu.pipeline_mode<synchronous>, transform_indices = @transform_10, window_bounds = array<i64: 64, 50>}, {pipeline_mode = #tpu.pipeline_mode<synchronous>, transform_indices = @transform_11, window_bounds = array<i64: 9, 64, 64>}, {pipeline_mode = #tpu.pipeline_mode<synchronous>, transform_indices = @transform_12, window_bounds = array<i64: 9, 192, 64>}, {pipeline_mode = #tpu.pipeline_mode<synchronous>, transform_indices = @transform_13, window_bounds = array<i64: 1, 64>}, {pipeline_mode = #tpu.pipeline_mode<synchronous>, transform_indices = @transform_14, window_bounds = array<i64: 64, 8>}, {pipeline_mode = #tpu.pipeline_mode<synchronous>, transform_indices = @transform_15, window_bounds = array<i64: 1, 8>}, {pipeline_mode = #tpu.pipeline_mode<synchronous>, transform_indices = @transform_16, window_bounds = array<i64: 64, 1024>}, {transform_indices = @transform_17, window_bounds = array<i64: 2, 8, 1024>}]} {
    %c0 = arith.constant 0 : index
    %c0_0 = arith.constant 0 : index
    %c0_1 = arith.constant 0 : index
    %0 = vector.load %arg1[%c0, %c0_0, %c0_1] : memref<2x256x32xbf16, #tpu.memory_space<vmem>>, vector<2x256x32xbf16>
    %1 = vector.shape_cast %0 : vector<2x256x32xbf16> to vector<512x32xbf16>
    %c0_2 = arith.constant 0 : index
    %c0_3 = arith.constant 0 : index
    %2 = vector.load %arg2[%c0_2, %c0_3] : memref<32x32xbf16, #tpu.memory_space<vmem>>, vector<32x32xbf16>
    %cst = arith.constant dense<0.000000e+00> : vector<512x32xf32>
    %3 = tpu.matmul %1, %2, %cst {dimension_numbers = #tpu.dot_dimension_numbers<[1], [0], [0], [1], [0, 0, 1, 1], [], []>} : vector<512x32xbf16>, vector<32x32xbf16>, vector<512x32xf32> -> vector<512x32xf32>
    %c0_4 = arith.constant 0 : index
    %c0_5 = arith.constant 0 : index
    %4 = vector.load %arg3[%c0_4, %c0_5] : memref<1x32xf32, #tpu.memory_space<vmem>>, vector<1x32xf32>
    %5 = vector.broadcast %4 : vector<1x32xf32> to vector<512x32xf32>
    %6 = arith.addf %3, %5 : vector<512x32xf32>
    %cst_6 = arith.constant 0.000000e+00 : f32
    %7 = vector.broadcast %cst_6 : f32 to vector<512x32xf32>
    %8 = arith.maximumf %6, %7 : vector<512x32xf32>
    %9 = arith.truncf %8 : vector<512x32xf32> to vector<512x32xbf16>
    %10 = vector.extract_strided_slice %9 {offsets = [0, 0], sizes = [256, 32], strides = [1, 1]} : vector<512x32xbf16> to vector<256x32xbf16>
    %cst_7 = arith.constant 0.000000e+00 : f32
    %11 = vector.broadcast %cst_7 : f32 to vector<64x64xf32>
    %c0_8 = arith.constant 0 : index
    %c0_9 = arith.constant 0 : index
    %c0_10 = arith.constant 0 : index
    %12 = vector.load %arg4[%c0_8, %c0_9, %c0_10] : memref<9x64x256xbf16, #tpu.memory_space<vmem>>, vector<1x64x256xbf16>
    %13 = vector.shape_cast %12 : vector<1x64x256xbf16> to vector<64x256xbf16>
    %cst_11 = arith.constant dense<0.000000e+00> : vector<64x32xf32>
    %14 = tpu.matmul %13, %10, %cst_11 {dimension_numbers = #tpu.dot_dimension_numbers<[1], [0], [0], [1], [0, 0, 1, 1], [], []>} : vector<64x256xbf16>, vector<256x32xbf16>, vector<64x32xf32> -> vector<64x32xf32>
    %15 = arith.truncf %14 : vector<64x32xf32> to vector<64x32xbf16>
    %c0_12 = arith.constant 0 : index
    %c0_13 = arith.constant 0 : index
    %c0_14 = arith.constant 0 : index
    %16 = vector.load %arg5[%c0_12, %c0_13, %c0_14] : memref<9x32x64xbf16, #tpu.memory_space<vmem>>, vector<1x32x64xbf16>
    %17 = vector.shape_cast %16 : vector<1x32x64xbf16> to vector<32x64xbf16>
    %cst_15 = arith.constant dense<0.000000e+00> : vector<64x64xf32>
    %18 = tpu.matmul %15, %17, %cst_15 {dimension_numbers = #tpu.dot_dimension_numbers<[1], [0], [0], [1], [0, 0, 1, 1], [], []>} : vector<64x32xbf16>, vector<32x64xbf16>, vector<64x64xf32> -> vector<64x64xf32>
    %19 = arith.addf %11, %18 : vector<64x64xf32>
    %c1 = arith.constant 1 : index
    %c0_16 = arith.constant 0 : index
    %c0_17 = arith.constant 0 : index
    %20 = vector.load %arg4[%c1, %c0_16, %c0_17] : memref<9x64x256xbf16, #tpu.memory_space<vmem>>, vector<1x64x256xbf16>
    %21 = vector.shape_cast %20 : vector<1x64x256xbf16> to vector<64x256xbf16>
    %cst_18 = arith.constant dense<0.000000e+00> : vector<64x32xf32>
    %22 = tpu.matmul %21, %10, %cst_18 {dimension_numbers = #tpu.dot_dimension_numbers<[1], [0], [0], [1], [0, 0, 1, 1], [], []>} : vector<64x256xbf16>, vector<256x32xbf16>, vector<64x32xf32> -> vector<64x32xf32>
    %23 = arith.truncf %22 : vector<64x32xf32> to vector<64x32xbf16>
    %c1_19 = arith.constant 1 : index
    %c0_20 = arith.constant 0 : index
    %c0_21 = arith.constant 0 : index
    %24 = vector.load %arg5[%c1_19, %c0_20, %c0_21] : memref<9x32x64xbf16, #tpu.memory_space<vmem>>, vector<1x32x64xbf16>
    %25 = vector.shape_cast %24 : vector<1x32x64xbf16> to vector<32x64xbf16>
    %cst_22 = arith.constant dense<0.000000e+00> : vector<64x64xf32>
    %26 = tpu.matmul %23, %25, %cst_22 {dimension_numbers = #tpu.dot_dimension_numbers<[1], [0], [0], [1], [0, 0, 1, 1], [], []>} : vector<64x32xbf16>, vector<32x64xbf16>, vector<64x64xf32> -> vector<64x64xf32>
    %27 = arith.addf %19, %26 : vector<64x64xf32>
    %c2 = arith.constant 2 : index
    %c0_23 = arith.constant 0 : index
    %c0_24 = arith.constant 0 : index
    %28 = vector.load %arg4[%c2, %c0_23, %c0_24] : memref<9x64x256xbf16, #tpu.memory_space<vmem>>, vector<1x64x256xbf16>
    %29 = vector.shape_cast %28 : vector<1x64x256xbf16> to vector<64x256xbf16>
    %cst_25 = arith.constant dense<0.000000e+00> : vector<64x32xf32>
    %30 = tpu.matmul %29, %10, %cst_25 {dimension_numbers = #tpu.dot_dimension_numbers<[1], [0], [0], [1], [0, 0, 1, 1], [], []>} : vector<64x256xbf16>, vector<256x32xbf16>, vector<64x32xf32> -> vector<64x32xf32>
    %31 = arith.truncf %30 : vector<64x32xf32> to vector<64x32xbf16>
    %c2_26 = arith.constant 2 : index
    %c0_27 = arith.constant 0 : index
    %c0_28 = arith.constant 0 : index
    %32 = vector.load %arg5[%c2_26, %c0_27, %c0_28] : memref<9x32x64xbf16, #tpu.memory_space<vmem>>, vector<1x32x64xbf16>
    %33 = vector.shape_cast %32 : vector<1x32x64xbf16> to vector<32x64xbf16>
    %cst_29 = arith.constant dense<0.000000e+00> : vector<64x64xf32>
    %34 = tpu.matmul %31, %33, %cst_29 {dimension_numbers = #tpu.dot_dimension_numbers<[1], [0], [0], [1], [0, 0, 1, 1], [], []>} : vector<64x32xbf16>, vector<32x64xbf16>, vector<64x64xf32> -> vector<64x64xf32>
    %35 = arith.addf %27, %34 : vector<64x64xf32>
    %c3 = arith.constant 3 : index
    %c0_30 = arith.constant 0 : index
    %c0_31 = arith.constant 0 : index
    %36 = vector.load %arg4[%c3, %c0_30, %c0_31] : memref<9x64x256xbf16, #tpu.memory_space<vmem>>, vector<1x64x256xbf16>
    %37 = vector.shape_cast %36 : vector<1x64x256xbf16> to vector<64x256xbf16>
    %cst_32 = arith.constant dense<0.000000e+00> : vector<64x32xf32>
    %38 = tpu.matmul %37, %10, %cst_32 {dimension_numbers = #tpu.dot_dimension_numbers<[1], [0], [0], [1], [0, 0, 1, 1], [], []>} : vector<64x256xbf16>, vector<256x32xbf16>, vector<64x32xf32> -> vector<64x32xf32>
    %39 = arith.truncf %38 : vector<64x32xf32> to vector<64x32xbf16>
    %c3_33 = arith.constant 3 : index
    %c0_34 = arith.constant 0 : index
    %c0_35 = arith.constant 0 : index
    %40 = vector.load %arg5[%c3_33, %c0_34, %c0_35] : memref<9x32x64xbf16, #tpu.memory_space<vmem>>, vector<1x32x64xbf16>
    %41 = vector.shape_cast %40 : vector<1x32x64xbf16> to vector<32x64xbf16>
    %cst_36 = arith.constant dense<0.000000e+00> : vector<64x64xf32>
    %42 = tpu.matmul %39, %41, %cst_36 {dimension_numbers = #tpu.dot_dimension_numbers<[1], [0], [0], [1], [0, 0, 1, 1], [], []>} : vector<64x32xbf16>, vector<32x64xbf16>, vector<64x64xf32> -> vector<64x64xf32>
    %43 = arith.addf %35, %42 : vector<64x64xf32>
    %c4 = arith.constant 4 : index
    %c0_37 = arith.constant 0 : index
    %c0_38 = arith.constant 0 : index
    %44 = vector.load %arg4[%c4, %c0_37, %c0_38] : memref<9x64x256xbf16, #tpu.memory_space<vmem>>, vector<1x64x256xbf16>
    %45 = vector.shape_cast %44 : vector<1x64x256xbf16> to vector<64x256xbf16>
    %cst_39 = arith.constant dense<0.000000e+00> : vector<64x32xf32>
    %46 = tpu.matmul %45, %10, %cst_39 {dimension_numbers = #tpu.dot_dimension_numbers<[1], [0], [0], [1], [0, 0, 1, 1], [], []>} : vector<64x256xbf16>, vector<256x32xbf16>, vector<64x32xf32> -> vector<64x32xf32>
    %47 = arith.truncf %46 : vector<64x32xf32> to vector<64x32xbf16>
    %c4_40 = arith.constant 4 : index
    %c0_41 = arith.constant 0 : index
    %c0_42 = arith.constant 0 : index
    %48 = vector.load %arg5[%c4_40, %c0_41, %c0_42] : memref<9x32x64xbf16, #tpu.memory_space<vmem>>, vector<1x32x64xbf16>
    %49 = vector.shape_cast %48 : vector<1x32x64xbf16> to vector<32x64xbf16>
    %cst_43 = arith.constant dense<0.000000e+00> : vector<64x64xf32>
    %50 = tpu.matmul %47, %49, %cst_43 {dimension_numbers = #tpu.dot_dimension_numbers<[1], [0], [0], [1], [0, 0, 1, 1], [], []>} : vector<64x32xbf16>, vector<32x64xbf16>, vector<64x64xf32> -> vector<64x64xf32>
    %51 = arith.addf %43, %50 : vector<64x64xf32>
    %c5 = arith.constant 5 : index
    %c0_44 = arith.constant 0 : index
    %c0_45 = arith.constant 0 : index
    %52 = vector.load %arg4[%c5, %c0_44, %c0_45] : memref<9x64x256xbf16, #tpu.memory_space<vmem>>, vector<1x64x256xbf16>
    %53 = vector.shape_cast %52 : vector<1x64x256xbf16> to vector<64x256xbf16>
    %cst_46 = arith.constant dense<0.000000e+00> : vector<64x32xf32>
    %54 = tpu.matmul %53, %10, %cst_46 {dimension_numbers = #tpu.dot_dimension_numbers<[1], [0], [0], [1], [0, 0, 1, 1], [], []>} : vector<64x256xbf16>, vector<256x32xbf16>, vector<64x32xf32> -> vector<64x32xf32>
    %55 = arith.truncf %54 : vector<64x32xf32> to vector<64x32xbf16>
    %c5_47 = arith.constant 5 : index
    %c0_48 = arith.constant 0 : index
    %c0_49 = arith.constant 0 : index
    %56 = vector.load %arg5[%c5_47, %c0_48, %c0_49] : memref<9x32x64xbf16, #tpu.memory_space<vmem>>, vector<1x32x64xbf16>
    %57 = vector.shape_cast %56 : vector<1x32x64xbf16> to vector<32x64xbf16>
    %cst_50 = arith.constant dense<0.000000e+00> : vector<64x64xf32>
    %58 = tpu.matmul %55, %57, %cst_50 {dimension_numbers = #tpu.dot_dimension_numbers<[1], [0], [0], [1], [0, 0, 1, 1], [], []>} : vector<64x32xbf16>, vector<32x64xbf16>, vector<64x64xf32> -> vector<64x64xf32>
    %59 = arith.addf %51, %58 : vector<64x64xf32>
    %c6 = arith.constant 6 : index
    %c0_51 = arith.constant 0 : index
    %c0_52 = arith.constant 0 : index
    %60 = vector.load %arg4[%c6, %c0_51, %c0_52] : memref<9x64x256xbf16, #tpu.memory_space<vmem>>, vector<1x64x256xbf16>
    %61 = vector.shape_cast %60 : vector<1x64x256xbf16> to vector<64x256xbf16>
    %cst_53 = arith.constant dense<0.000000e+00> : vector<64x32xf32>
    %62 = tpu.matmul %61, %10, %cst_53 {dimension_numbers = #tpu.dot_dimension_numbers<[1], [0], [0], [1], [0, 0, 1, 1], [], []>} : vector<64x256xbf16>, vector<256x32xbf16>, vector<64x32xf32> -> vector<64x32xf32>
    %63 = arith.truncf %62 : vector<64x32xf32> to vector<64x32xbf16>
    %c6_54 = arith.constant 6 : index
    %c0_55 = arith.constant 0 : index
    %c0_56 = arith.constant 0 : index
    %64 = vector.load %arg5[%c6_54, %c0_55, %c0_56] : memref<9x32x64xbf16, #tpu.memory_space<vmem>>, vector<1x32x64xbf16>
    %65 = vector.shape_cast %64 : vector<1x32x64xbf16> to vector<32x64xbf16>
    %cst_57 = arith.constant dense<0.000000e+00> : vector<64x64xf32>
    %66 = tpu.matmul %63, %65, %cst_57 {dimension_numbers = #tpu.dot_dimension_numbers<[1], [0], [0], [1], [0, 0, 1, 1], [], []>} : vector<64x32xbf16>, vector<32x64xbf16>, vector<64x64xf32> -> vector<64x64xf32>
    %67 = arith.addf %59, %66 : vector<64x64xf32>
    %c7 = arith.constant 7 : index
    %c0_58 = arith.constant 0 : index
    %c0_59 = arith.constant 0 : index
    %68 = vector.load %arg4[%c7, %c0_58, %c0_59] : memref<9x64x256xbf16, #tpu.memory_space<vmem>>, vector<1x64x256xbf16>
    %69 = vector.shape_cast %68 : vector<1x64x256xbf16> to vector<64x256xbf16>
    %cst_60 = arith.constant dense<0.000000e+00> : vector<64x32xf32>
    %70 = tpu.matmul %69, %10, %cst_60 {dimension_numbers = #tpu.dot_dimension_numbers<[1], [0], [0], [1], [0, 0, 1, 1], [], []>} : vector<64x256xbf16>, vector<256x32xbf16>, vector<64x32xf32> -> vector<64x32xf32>
    %71 = arith.truncf %70 : vector<64x32xf32> to vector<64x32xbf16>
    %c7_61 = arith.constant 7 : index
    %c0_62 = arith.constant 0 : index
    %c0_63 = arith.constant 0 : index
    %72 = vector.load %arg5[%c7_61, %c0_62, %c0_63] : memref<9x32x64xbf16, #tpu.memory_space<vmem>>, vector<1x32x64xbf16>
    %73 = vector.shape_cast %72 : vector<1x32x64xbf16> to vector<32x64xbf16>
    %cst_64 = arith.constant dense<0.000000e+00> : vector<64x64xf32>
    %74 = tpu.matmul %71, %73, %cst_64 {dimension_numbers = #tpu.dot_dimension_numbers<[1], [0], [0], [1], [0, 0, 1, 1], [], []>} : vector<64x32xbf16>, vector<32x64xbf16>, vector<64x64xf32> -> vector<64x64xf32>
    %75 = arith.addf %67, %74 : vector<64x64xf32>
    %c8 = arith.constant 8 : index
    %c0_65 = arith.constant 0 : index
    %c0_66 = arith.constant 0 : index
    %76 = vector.load %arg4[%c8, %c0_65, %c0_66] : memref<9x64x256xbf16, #tpu.memory_space<vmem>>, vector<1x64x256xbf16>
    %77 = vector.shape_cast %76 : vector<1x64x256xbf16> to vector<64x256xbf16>
    %cst_67 = arith.constant dense<0.000000e+00> : vector<64x32xf32>
    %78 = tpu.matmul %77, %10, %cst_67 {dimension_numbers = #tpu.dot_dimension_numbers<[1], [0], [0], [1], [0, 0, 1, 1], [], []>} : vector<64x256xbf16>, vector<256x32xbf16>, vector<64x32xf32> -> vector<64x32xf32>
    %79 = arith.truncf %78 : vector<64x32xf32> to vector<64x32xbf16>
    %c8_68 = arith.constant 8 : index
    %c0_69 = arith.constant 0 : index
    %c0_70 = arith.constant 0 : index
    %80 = vector.load %arg5[%c8_68, %c0_69, %c0_70] : memref<9x32x64xbf16, #tpu.memory_space<vmem>>, vector<1x32x64xbf16>
    %81 = vector.shape_cast %80 : vector<1x32x64xbf16> to vector<32x64xbf16>
    %cst_71 = arith.constant dense<0.000000e+00> : vector<64x64xf32>
    %82 = tpu.matmul %79, %81, %cst_71 {dimension_numbers = #tpu.dot_dimension_numbers<[1], [0], [0], [1], [0, 0, 1, 1], [], []>} : vector<64x32xbf16>, vector<32x64xbf16>, vector<64x64xf32> -> vector<64x64xf32>
    %83 = arith.addf %75, %82 : vector<64x64xf32>
    %c0_72 = arith.constant 0 : index
    %c0_73 = arith.constant 0 : index
    %84 = vector.load %arg6[%c0_72, %c0_73] : memref<1x64xf32, #tpu.memory_space<vmem>>, vector<1x64xf32>
    %85 = vector.broadcast %84 : vector<1x64xf32> to vector<64x64xf32>
    %86 = arith.addf %83, %85 : vector<64x64xf32>
    %cst_74 = arith.constant 0.000000e+00 : f32
    %87 = vector.broadcast %cst_74 : f32 to vector<64x64xf32>
    %88 = arith.maximumf %86, %87 : vector<64x64xf32>
    %89 = arith.truncf %88 : vector<64x64xf32> to vector<64x64xbf16>
    %c0_75 = arith.constant 0 : index
    %c0_76 = arith.constant 0 : index
    %90 = vector.load %arg7[%c0_75, %c0_76] : memref<50x64xbf16, #tpu.memory_space<vmem>>, vector<50x64xbf16>
    %cst_77 = arith.constant dense<0.000000e+00> : vector<50x64xf32>
    %91 = tpu.matmul %90, %89, %cst_77 {dimension_numbers = #tpu.dot_dimension_numbers<[1], [0], [0], [1], [0, 0, 1, 1], [], []>} : vector<50x64xbf16>, vector<64x64xbf16>, vector<50x64xf32> -> vector<50x64xf32>
    %92 = arith.truncf %91 : vector<50x64xf32> to vector<50x64xbf16>
    %c0_78 = arith.constant 0 : index
    %c0_79 = arith.constant 0 : index
    %93 = vector.load %arg8[%c0_78, %c0_79] : memref<64x128xbf16, #tpu.memory_space<vmem>>, vector<64x128xbf16>
    %cst_80 = arith.constant dense<0.000000e+00> : vector<50x128xf32>
    %94 = tpu.matmul %92, %93, %cst_80 {dimension_numbers = #tpu.dot_dimension_numbers<[1], [0], [0], [1], [0, 0, 1, 1], [], []>} : vector<50x64xbf16>, vector<64x128xbf16>, vector<50x128xf32> -> vector<50x128xf32>
    %c0_81 = arith.constant 0 : index
    %c0_82 = arith.constant 0 : index
    %95 = vector.load %arg9[%c0_81, %c0_82] : memref<1x128xf32, #tpu.memory_space<vmem>>, vector<1x128xf32>
    %96 = vector.broadcast %95 : vector<1x128xf32> to vector<50x128xf32>
    %97 = arith.addf %94, %96 : vector<50x128xf32>
    %cst_83 = arith.constant 0.000000e+00 : f32
    %98 = vector.broadcast %cst_83 : f32 to vector<50x128xf32>
    %99 = arith.maximumf %97, %98 : vector<50x128xf32>
    %c0_84 = arith.constant 0 : index
    %c0_85 = arith.constant 0 : index
    %100 = vector.load %arg10[%c0_84, %c0_85] : memref<50x128xf32, #tpu.memory_space<vmem>>, vector<50x128xf32>
    %101 = arith.mulf %99, %100 : vector<50x128xf32>
    %c0_86 = arith.constant 0 : index
    %c0_87 = arith.constant 0 : index
    %102 = vector.load %arg11[%c0_86, %c0_87] : memref<64x50xbf16, #tpu.memory_space<vmem>>, vector<64x50xbf16>
    %103 = arith.truncf %101 : vector<50x128xf32> to vector<50x128xbf16>
    %cst_88 = arith.constant dense<0.000000e+00> : vector<64x128xf32>
    %104 = tpu.matmul %102, %103, %cst_88 {dimension_numbers = #tpu.dot_dimension_numbers<[1], [0], [0], [1], [0, 0, 1, 1], [], []>} : vector<64x50xbf16>, vector<50x128xbf16>, vector<64x128xf32> -> vector<64x128xf32>
    %105 = arith.truncf %104 : vector<64x128xf32> to vector<64x128xbf16>
    %106 = tpu.concatenate %89, %105 in 1 : vector<64x64xbf16>, vector<64x128xbf16> -> vector<64x192xbf16>
    %cst_89 = arith.constant 0.000000e+00 : f32
    %107 = vector.broadcast %cst_89 : f32 to vector<64x64xf32>
    %c0_90 = arith.constant 0 : index
    %c0_91 = arith.constant 0 : index
    %c0_92 = arith.constant 0 : index
    %108 = vector.load %arg13[%c0_90, %c0_91, %c0_92] : memref<9x192x64xbf16, #tpu.memory_space<vmem>>, vector<1x192x64xbf16>
    %109 = vector.shape_cast %108 : vector<1x192x64xbf16> to vector<192x64xbf16>
    %cst_93 = arith.constant dense<0.000000e+00> : vector<64x64xf32>
    %110 = tpu.matmul %106, %109, %cst_93 {dimension_numbers = #tpu.dot_dimension_numbers<[1], [0], [0], [1], [0, 0, 1, 1], [], []>} : vector<64x192xbf16>, vector<192x64xbf16>, vector<64x64xf32> -> vector<64x64xf32>
    %c0_94 = arith.constant 0 : index
    %c0_95 = arith.constant 0 : index
    %c0_96 = arith.constant 0 : index
    %111 = vector.load %arg12[%c0_94, %c0_95, %c0_96] : memref<9x64x64xbf16, #tpu.memory_space<vmem>>, vector<1x64x64xbf16>
    %112 = vector.shape_cast %111 : vector<1x64x64xbf16> to vector<64x64xbf16>
    %113 = arith.truncf %110 : vector<64x64xf32> to vector<64x64xbf16>
    %cst_97 = arith.constant dense<0.000000e+00> : vector<64x64xf32>
    %114 = tpu.matmul %112, %113, %cst_97 {dimension_numbers = #tpu.dot_dimension_numbers<[1], [0], [0], [1], [0, 0, 1, 1], [], []>} : vector<64x64xbf16>, vector<64x64xbf16>, vector<64x64xf32> -> vector<64x64xf32>
    %115 = arith.addf %107, %114 : vector<64x64xf32>
    %c1_98 = arith.constant 1 : index
    %c0_99 = arith.constant 0 : index
    %c0_100 = arith.constant 0 : index
    %116 = vector.load %arg13[%c1_98, %c0_99, %c0_100] : memref<9x192x64xbf16, #tpu.memory_space<vmem>>, vector<1x192x64xbf16>
    %117 = vector.shape_cast %116 : vector<1x192x64xbf16> to vector<192x64xbf16>
    %cst_101 = arith.constant dense<0.000000e+00> : vector<64x64xf32>
    %118 = tpu.matmul %106, %117, %cst_101 {dimension_numbers = #tpu.dot_dimension_numbers<[1], [0], [0], [1], [0, 0, 1, 1], [], []>} : vector<64x192xbf16>, vector<192x64xbf16>, vector<64x64xf32> -> vector<64x64xf32>
    %c1_102 = arith.constant 1 : index
    %c0_103 = arith.constant 0 : index
    %c0_104 = arith.constant 0 : index
    %119 = vector.load %arg12[%c1_102, %c0_103, %c0_104] : memref<9x64x64xbf16, #tpu.memory_space<vmem>>, vector<1x64x64xbf16>
    %120 = vector.shape_cast %119 : vector<1x64x64xbf16> to vector<64x64xbf16>
    %121 = arith.truncf %118 : vector<64x64xf32> to vector<64x64xbf16>
    %cst_105 = arith.constant dense<0.000000e+00> : vector<64x64xf32>
    %122 = tpu.matmul %120, %121, %cst_105 {dimension_numbers = #tpu.dot_dimension_numbers<[1], [0], [0], [1], [0, 0, 1, 1], [], []>} : vector<64x64xbf16>, vector<64x64xbf16>, vector<64x64xf32> -> vector<64x64xf32>
    %123 = arith.addf %115, %122 : vector<64x64xf32>
    %c2_106 = arith.constant 2 : index
    %c0_107 = arith.constant 0 : index
    %c0_108 = arith.constant 0 : index
    %124 = vector.load %arg13[%c2_106, %c0_107, %c0_108] : memref<9x192x64xbf16, #tpu.memory_space<vmem>>, vector<1x192x64xbf16>
    %125 = vector.shape_cast %124 : vector<1x192x64xbf16> to vector<192x64xbf16>
    %cst_109 = arith.constant dense<0.000000e+00> : vector<64x64xf32>
    %126 = tpu.matmul %106, %125, %cst_109 {dimension_numbers = #tpu.dot_dimension_numbers<[1], [0], [0], [1], [0, 0, 1, 1], [], []>} : vector<64x192xbf16>, vector<192x64xbf16>, vector<64x64xf32> -> vector<64x64xf32>
    %c2_110 = arith.constant 2 : index
    %c0_111 = arith.constant 0 : index
    %c0_112 = arith.constant 0 : index
    %127 = vector.load %arg12[%c2_110, %c0_111, %c0_112] : memref<9x64x64xbf16, #tpu.memory_space<vmem>>, vector<1x64x64xbf16>
    %128 = vector.shape_cast %127 : vector<1x64x64xbf16> to vector<64x64xbf16>
    %129 = arith.truncf %126 : vector<64x64xf32> to vector<64x64xbf16>
    %cst_113 = arith.constant dense<0.000000e+00> : vector<64x64xf32>
    %130 = tpu.matmul %128, %129, %cst_113 {dimension_numbers = #tpu.dot_dimension_numbers<[1], [0], [0], [1], [0, 0, 1, 1], [], []>} : vector<64x64xbf16>, vector<64x64xbf16>, vector<64x64xf32> -> vector<64x64xf32>
    %131 = arith.addf %123, %130 : vector<64x64xf32>
    %c3_114 = arith.constant 3 : index
    %c0_115 = arith.constant 0 : index
    %c0_116 = arith.constant 0 : index
    %132 = vector.load %arg13[%c3_114, %c0_115, %c0_116] : memref<9x192x64xbf16, #tpu.memory_space<vmem>>, vector<1x192x64xbf16>
    %133 = vector.shape_cast %132 : vector<1x192x64xbf16> to vector<192x64xbf16>
    %cst_117 = arith.constant dense<0.000000e+00> : vector<64x64xf32>
    %134 = tpu.matmul %106, %133, %cst_117 {dimension_numbers = #tpu.dot_dimension_numbers<[1], [0], [0], [1], [0, 0, 1, 1], [], []>} : vector<64x192xbf16>, vector<192x64xbf16>, vector<64x64xf32> -> vector<64x64xf32>
    %c3_118 = arith.constant 3 : index
    %c0_119 = arith.constant 0 : index
    %c0_120 = arith.constant 0 : index
    %135 = vector.load %arg12[%c3_118, %c0_119, %c0_120] : memref<9x64x64xbf16, #tpu.memory_space<vmem>>, vector<1x64x64xbf16>
    %136 = vector.shape_cast %135 : vector<1x64x64xbf16> to vector<64x64xbf16>
    %137 = arith.truncf %134 : vector<64x64xf32> to vector<64x64xbf16>
    %cst_121 = arith.constant dense<0.000000e+00> : vector<64x64xf32>
    %138 = tpu.matmul %136, %137, %cst_121 {dimension_numbers = #tpu.dot_dimension_numbers<[1], [0], [0], [1], [0, 0, 1, 1], [], []>} : vector<64x64xbf16>, vector<64x64xbf16>, vector<64x64xf32> -> vector<64x64xf32>
    %139 = arith.addf %131, %138 : vector<64x64xf32>
    %c4_122 = arith.constant 4 : index
    %c0_123 = arith.constant 0 : index
    %c0_124 = arith.constant 0 : index
    %140 = vector.load %arg13[%c4_122, %c0_123, %c0_124] : memref<9x192x64xbf16, #tpu.memory_space<vmem>>, vector<1x192x64xbf16>
    %141 = vector.shape_cast %140 : vector<1x192x64xbf16> to vector<192x64xbf16>
    %cst_125 = arith.constant dense<0.000000e+00> : vector<64x64xf32>
    %142 = tpu.matmul %106, %141, %cst_125 {dimension_numbers = #tpu.dot_dimension_numbers<[1], [0], [0], [1], [0, 0, 1, 1], [], []>} : vector<64x192xbf16>, vector<192x64xbf16>, vector<64x64xf32> -> vector<64x64xf32>
    %c4_126 = arith.constant 4 : index
    %c0_127 = arith.constant 0 : index
    %c0_128 = arith.constant 0 : index
    %143 = vector.load %arg12[%c4_126, %c0_127, %c0_128] : memref<9x64x64xbf16, #tpu.memory_space<vmem>>, vector<1x64x64xbf16>
    %144 = vector.shape_cast %143 : vector<1x64x64xbf16> to vector<64x64xbf16>
    %145 = arith.truncf %142 : vector<64x64xf32> to vector<64x64xbf16>
    %cst_129 = arith.constant dense<0.000000e+00> : vector<64x64xf32>
    %146 = tpu.matmul %144, %145, %cst_129 {dimension_numbers = #tpu.dot_dimension_numbers<[1], [0], [0], [1], [0, 0, 1, 1], [], []>} : vector<64x64xbf16>, vector<64x64xbf16>, vector<64x64xf32> -> vector<64x64xf32>
    %147 = arith.addf %139, %146 : vector<64x64xf32>
    %c5_130 = arith.constant 5 : index
    %c0_131 = arith.constant 0 : index
    %c0_132 = arith.constant 0 : index
    %148 = vector.load %arg13[%c5_130, %c0_131, %c0_132] : memref<9x192x64xbf16, #tpu.memory_space<vmem>>, vector<1x192x64xbf16>
    %149 = vector.shape_cast %148 : vector<1x192x64xbf16> to vector<192x64xbf16>
    %cst_133 = arith.constant dense<0.000000e+00> : vector<64x64xf32>
    %150 = tpu.matmul %106, %149, %cst_133 {dimension_numbers = #tpu.dot_dimension_numbers<[1], [0], [0], [1], [0, 0, 1, 1], [], []>} : vector<64x192xbf16>, vector<192x64xbf16>, vector<64x64xf32> -> vector<64x64xf32>
    %c5_134 = arith.constant 5 : index
    %c0_135 = arith.constant 0 : index
    %c0_136 = arith.constant 0 : index
    %151 = vector.load %arg12[%c5_134, %c0_135, %c0_136] : memref<9x64x64xbf16, #tpu.memory_space<vmem>>, vector<1x64x64xbf16>
    %152 = vector.shape_cast %151 : vector<1x64x64xbf16> to vector<64x64xbf16>
    %153 = arith.truncf %150 : vector<64x64xf32> to vector<64x64xbf16>
    %cst_137 = arith.constant dense<0.000000e+00> : vector<64x64xf32>
    %154 = tpu.matmul %152, %153, %cst_137 {dimension_numbers = #tpu.dot_dimension_numbers<[1], [0], [0], [1], [0, 0, 1, 1], [], []>} : vector<64x64xbf16>, vector<64x64xbf16>, vector<64x64xf32> -> vector<64x64xf32>
    %155 = arith.addf %147, %154 : vector<64x64xf32>
    %c6_138 = arith.constant 6 : index
    %c0_139 = arith.constant 0 : index
    %c0_140 = arith.constant 0 : index
    %156 = vector.load %arg13[%c6_138, %c0_139, %c0_140] : memref<9x192x64xbf16, #tpu.memory_space<vmem>>, vector<1x192x64xbf16>
    %157 = vector.shape_cast %156 : vector<1x192x64xbf16> to vector<192x64xbf16>
    %cst_141 = arith.constant dense<0.000000e+00> : vector<64x64xf32>
    %158 = tpu.matmul %106, %157, %cst_141 {dimension_numbers = #tpu.dot_dimension_numbers<[1], [0], [0], [1], [0, 0, 1, 1], [], []>} : vector<64x192xbf16>, vector<192x64xbf16>, vector<64x64xf32> -> vector<64x64xf32>
    %c6_142 = arith.constant 6 : index
    %c0_143 = arith.constant 0 : index
    %c0_144 = arith.constant 0 : index
    %159 = vector.load %arg12[%c6_142, %c0_143, %c0_144] : memref<9x64x64xbf16, #tpu.memory_space<vmem>>, vector<1x64x64xbf16>
    %160 = vector.shape_cast %159 : vector<1x64x64xbf16> to vector<64x64xbf16>
    %161 = arith.truncf %158 : vector<64x64xf32> to vector<64x64xbf16>
    %cst_145 = arith.constant dense<0.000000e+00> : vector<64x64xf32>
    %162 = tpu.matmul %160, %161, %cst_145 {dimension_numbers = #tpu.dot_dimension_numbers<[1], [0], [0], [1], [0, 0, 1, 1], [], []>} : vector<64x64xbf16>, vector<64x64xbf16>, vector<64x64xf32> -> vector<64x64xf32>
    %163 = arith.addf %155, %162 : vector<64x64xf32>
    %c7_146 = arith.constant 7 : index
    %c0_147 = arith.constant 0 : index
    %c0_148 = arith.constant 0 : index
    %164 = vector.load %arg13[%c7_146, %c0_147, %c0_148] : memref<9x192x64xbf16, #tpu.memory_space<vmem>>, vector<1x192x64xbf16>
    %165 = vector.shape_cast %164 : vector<1x192x64xbf16> to vector<192x64xbf16>
    %cst_149 = arith.constant dense<0.000000e+00> : vector<64x64xf32>
    %166 = tpu.matmul %106, %165, %cst_149 {dimension_numbers = #tpu.dot_dimension_numbers<[1], [0], [0], [1], [0, 0, 1, 1], [], []>} : vector<64x192xbf16>, vector<192x64xbf16>, vector<64x64xf32> -> vector<64x64xf32>
    %c7_150 = arith.constant 7 : index
    %c0_151 = arith.constant 0 : index
    %c0_152 = arith.constant 0 : index
    %167 = vector.load %arg12[%c7_150, %c0_151, %c0_152] : memref<9x64x64xbf16, #tpu.memory_space<vmem>>, vector<1x64x64xbf16>
    %168 = vector.shape_cast %167 : vector<1x64x64xbf16> to vector<64x64xbf16>
    %169 = arith.truncf %166 : vector<64x64xf32> to vector<64x64xbf16>
    %cst_153 = arith.constant dense<0.000000e+00> : vector<64x64xf32>
    %170 = tpu.matmul %168, %169, %cst_153 {dimension_numbers = #tpu.dot_dimension_numbers<[1], [0], [0], [1], [0, 0, 1, 1], [], []>} : vector<64x64xbf16>, vector<64x64xbf16>, vector<64x64xf32> -> vector<64x64xf32>
    %171 = arith.addf %163, %170 : vector<64x64xf32>
    %c8_154 = arith.constant 8 : index
    %c0_155 = arith.constant 0 : index
    %c0_156 = arith.constant 0 : index
    %172 = vector.load %arg13[%c8_154, %c0_155, %c0_156] : memref<9x192x64xbf16, #tpu.memory_space<vmem>>, vector<1x192x64xbf16>
    %173 = vector.shape_cast %172 : vector<1x192x64xbf16> to vector<192x64xbf16>
    %cst_157 = arith.constant dense<0.000000e+00> : vector<64x64xf32>
    %174 = tpu.matmul %106, %173, %cst_157 {dimension_numbers = #tpu.dot_dimension_numbers<[1], [0], [0], [1], [0, 0, 1, 1], [], []>} : vector<64x192xbf16>, vector<192x64xbf16>, vector<64x64xf32> -> vector<64x64xf32>
    %c8_158 = arith.constant 8 : index
    %c0_159 = arith.constant 0 : index
    %c0_160 = arith.constant 0 : index
    %175 = vector.load %arg12[%c8_158, %c0_159, %c0_160] : memref<9x64x64xbf16, #tpu.memory_space<vmem>>, vector<1x64x64xbf16>
    %176 = vector.shape_cast %175 : vector<1x64x64xbf16> to vector<64x64xbf16>
    %177 = arith.truncf %174 : vector<64x64xf32> to vector<64x64xbf16>
    %cst_161 = arith.constant dense<0.000000e+00> : vector<64x64xf32>
    %178 = tpu.matmul %176, %177, %cst_161 {dimension_numbers = #tpu.dot_dimension_numbers<[1], [0], [0], [1], [0, 0, 1, 1], [], []>} : vector<64x64xbf16>, vector<64x64xbf16>, vector<64x64xf32> -> vector<64x64xf32>
    %179 = arith.addf %171, %178 : vector<64x64xf32>
    %c0_162 = arith.constant 0 : index
    %c0_163 = arith.constant 0 : index
    %180 = vector.load %arg14[%c0_162, %c0_163] : memref<1x64xf32, #tpu.memory_space<vmem>>, vector<1x64xf32>
    %181 = vector.broadcast %180 : vector<1x64xf32> to vector<64x64xf32>
    %182 = arith.addf %179, %181 : vector<64x64xf32>
    %cst_164 = arith.constant 0.000000e+00 : f32
    %183 = vector.broadcast %cst_164 : f32 to vector<64x64xf32>
    %184 = arith.maximumf %182, %183 : vector<64x64xf32>
    %185 = arith.truncf %184 : vector<64x64xf32> to vector<64x64xbf16>
    %186 = vector.extract_strided_slice %9 {offsets = [256, 0], sizes = [256, 32], strides = [1, 1]} : vector<512x32xbf16> to vector<256x32xbf16>
    %cst_165 = arith.constant 0.000000e+00 : f32
    %187 = vector.broadcast %cst_165 : f32 to vector<64x64xf32>
    %c0_166 = arith.constant 0 : index
    %c0_167 = arith.constant 0 : index
    %c0_168 = arith.constant 0 : index
    %188 = vector.load %arg4[%c0_166, %c0_167, %c0_168] : memref<9x64x256xbf16, #tpu.memory_space<vmem>>, vector<1x64x256xbf16>
    %189 = vector.shape_cast %188 : vector<1x64x256xbf16> to vector<64x256xbf16>
    %cst_169 = arith.constant dense<0.000000e+00> : vector<64x32xf32>
    %190 = tpu.matmul %189, %186, %cst_169 {dimension_numbers = #tpu.dot_dimension_numbers<[1], [0], [0], [1], [0, 0, 1, 1], [], []>} : vector<64x256xbf16>, vector<256x32xbf16>, vector<64x32xf32> -> vector<64x32xf32>
    %191 = arith.truncf %190 : vector<64x32xf32> to vector<64x32xbf16>
    %c0_170 = arith.constant 0 : index
    %c0_171 = arith.constant 0 : index
    %c0_172 = arith.constant 0 : index
    %192 = vector.load %arg5[%c0_170, %c0_171, %c0_172] : memref<9x32x64xbf16, #tpu.memory_space<vmem>>, vector<1x32x64xbf16>
    %193 = vector.shape_cast %192 : vector<1x32x64xbf16> to vector<32x64xbf16>
    %cst_173 = arith.constant dense<0.000000e+00> : vector<64x64xf32>
    %194 = tpu.matmul %191, %193, %cst_173 {dimension_numbers = #tpu.dot_dimension_numbers<[1], [0], [0], [1], [0, 0, 1, 1], [], []>} : vector<64x32xbf16>, vector<32x64xbf16>, vector<64x64xf32> -> vector<64x64xf32>
    %195 = arith.addf %187, %194 : vector<64x64xf32>
    %c1_174 = arith.constant 1 : index
    %c0_175 = arith.constant 0 : index
    %c0_176 = arith.constant 0 : index
    %196 = vector.load %arg4[%c1_174, %c0_175, %c0_176] : memref<9x64x256xbf16, #tpu.memory_space<vmem>>, vector<1x64x256xbf16>
    %197 = vector.shape_cast %196 : vector<1x64x256xbf16> to vector<64x256xbf16>
    %cst_177 = arith.constant dense<0.000000e+00> : vector<64x32xf32>
    %198 = tpu.matmul %197, %186, %cst_177 {dimension_numbers = #tpu.dot_dimension_numbers<[1], [0], [0], [1], [0, 0, 1, 1], [], []>} : vector<64x256xbf16>, vector<256x32xbf16>, vector<64x32xf32> -> vector<64x32xf32>
    %199 = arith.truncf %198 : vector<64x32xf32> to vector<64x32xbf16>
    %c1_178 = arith.constant 1 : index
    %c0_179 = arith.constant 0 : index
    %c0_180 = arith.constant 0 : index
    %200 = vector.load %arg5[%c1_178, %c0_179, %c0_180] : memref<9x32x64xbf16, #tpu.memory_space<vmem>>, vector<1x32x64xbf16>
    %201 = vector.shape_cast %200 : vector<1x32x64xbf16> to vector<32x64xbf16>
    %cst_181 = arith.constant dense<0.000000e+00> : vector<64x64xf32>
    %202 = tpu.matmul %199, %201, %cst_181 {dimension_numbers = #tpu.dot_dimension_numbers<[1], [0], [0], [1], [0, 0, 1, 1], [], []>} : vector<64x32xbf16>, vector<32x64xbf16>, vector<64x64xf32> -> vector<64x64xf32>
    %203 = arith.addf %195, %202 : vector<64x64xf32>
    %c2_182 = arith.constant 2 : index
    %c0_183 = arith.constant 0 : index
    %c0_184 = arith.constant 0 : index
    %204 = vector.load %arg4[%c2_182, %c0_183, %c0_184] : memref<9x64x256xbf16, #tpu.memory_space<vmem>>, vector<1x64x256xbf16>
    %205 = vector.shape_cast %204 : vector<1x64x256xbf16> to vector<64x256xbf16>
    %cst_185 = arith.constant dense<0.000000e+00> : vector<64x32xf32>
    %206 = tpu.matmul %205, %186, %cst_185 {dimension_numbers = #tpu.dot_dimension_numbers<[1], [0], [0], [1], [0, 0, 1, 1], [], []>} : vector<64x256xbf16>, vector<256x32xbf16>, vector<64x32xf32> -> vector<64x32xf32>
    %207 = arith.truncf %206 : vector<64x32xf32> to vector<64x32xbf16>
    %c2_186 = arith.constant 2 : index
    %c0_187 = arith.constant 0 : index
    %c0_188 = arith.constant 0 : index
    %208 = vector.load %arg5[%c2_186, %c0_187, %c0_188] : memref<9x32x64xbf16, #tpu.memory_space<vmem>>, vector<1x32x64xbf16>
    %209 = vector.shape_cast %208 : vector<1x32x64xbf16> to vector<32x64xbf16>
    %cst_189 = arith.constant dense<0.000000e+00> : vector<64x64xf32>
    %210 = tpu.matmul %207, %209, %cst_189 {dimension_numbers = #tpu.dot_dimension_numbers<[1], [0], [0], [1], [0, 0, 1, 1], [], []>} : vector<64x32xbf16>, vector<32x64xbf16>, vector<64x64xf32> -> vector<64x64xf32>
    %211 = arith.addf %203, %210 : vector<64x64xf32>
    %c3_190 = arith.constant 3 : index
    %c0_191 = arith.constant 0 : index
    %c0_192 = arith.constant 0 : index
    %212 = vector.load %arg4[%c3_190, %c0_191, %c0_192] : memref<9x64x256xbf16, #tpu.memory_space<vmem>>, vector<1x64x256xbf16>
    %213 = vector.shape_cast %212 : vector<1x64x256xbf16> to vector<64x256xbf16>
    %cst_193 = arith.constant dense<0.000000e+00> : vector<64x32xf32>
    %214 = tpu.matmul %213, %186, %cst_193 {dimension_numbers = #tpu.dot_dimension_numbers<[1], [0], [0], [1], [0, 0, 1, 1], [], []>} : vector<64x256xbf16>, vector<256x32xbf16>, vector<64x32xf32> -> vector<64x32xf32>
    %215 = arith.truncf %214 : vector<64x32xf32> to vector<64x32xbf16>
    %c3_194 = arith.constant 3 : index
    %c0_195 = arith.constant 0 : index
    %c0_196 = arith.constant 0 : index
    %216 = vector.load %arg5[%c3_194, %c0_195, %c0_196] : memref<9x32x64xbf16, #tpu.memory_space<vmem>>, vector<1x32x64xbf16>
    %217 = vector.shape_cast %216 : vector<1x32x64xbf16> to vector<32x64xbf16>
    %cst_197 = arith.constant dense<0.000000e+00> : vector<64x64xf32>
    %218 = tpu.matmul %215, %217, %cst_197 {dimension_numbers = #tpu.dot_dimension_numbers<[1], [0], [0], [1], [0, 0, 1, 1], [], []>} : vector<64x32xbf16>, vector<32x64xbf16>, vector<64x64xf32> -> vector<64x64xf32>
    %219 = arith.addf %211, %218 : vector<64x64xf32>
    %c4_198 = arith.constant 4 : index
    %c0_199 = arith.constant 0 : index
    %c0_200 = arith.constant 0 : index
    %220 = vector.load %arg4[%c4_198, %c0_199, %c0_200] : memref<9x64x256xbf16, #tpu.memory_space<vmem>>, vector<1x64x256xbf16>
    %221 = vector.shape_cast %220 : vector<1x64x256xbf16> to vector<64x256xbf16>
    %cst_201 = arith.constant dense<0.000000e+00> : vector<64x32xf32>
    %222 = tpu.matmul %221, %186, %cst_201 {dimension_numbers = #tpu.dot_dimension_numbers<[1], [0], [0], [1], [0, 0, 1, 1], [], []>} : vector<64x256xbf16>, vector<256x32xbf16>, vector<64x32xf32> -> vector<64x32xf32>
    %223 = arith.truncf %222 : vector<64x32xf32> to vector<64x32xbf16>
    %c4_202 = arith.constant 4 : index
    %c0_203 = arith.constant 0 : index
    %c0_204 = arith.constant 0 : index
    %224 = vector.load %arg5[%c4_202, %c0_203, %c0_204] : memref<9x32x64xbf16, #tpu.memory_space<vmem>>, vector<1x32x64xbf16>
    %225 = vector.shape_cast %224 : vector<1x32x64xbf16> to vector<32x64xbf16>
    %cst_205 = arith.constant dense<0.000000e+00> : vector<64x64xf32>
    %226 = tpu.matmul %223, %225, %cst_205 {dimension_numbers = #tpu.dot_dimension_numbers<[1], [0], [0], [1], [0, 0, 1, 1], [], []>} : vector<64x32xbf16>, vector<32x64xbf16>, vector<64x64xf32> -> vector<64x64xf32>
    %227 = arith.addf %219, %226 : vector<64x64xf32>
    %c5_206 = arith.constant 5 : index
    %c0_207 = arith.constant 0 : index
    %c0_208 = arith.constant 0 : index
    %228 = vector.load %arg4[%c5_206, %c0_207, %c0_208] : memref<9x64x256xbf16, #tpu.memory_space<vmem>>, vector<1x64x256xbf16>
    %229 = vector.shape_cast %228 : vector<1x64x256xbf16> to vector<64x256xbf16>
    %cst_209 = arith.constant dense<0.000000e+00> : vector<64x32xf32>
    %230 = tpu.matmul %229, %186, %cst_209 {dimension_numbers = #tpu.dot_dimension_numbers<[1], [0], [0], [1], [0, 0, 1, 1], [], []>} : vector<64x256xbf16>, vector<256x32xbf16>, vector<64x32xf32> -> vector<64x32xf32>
    %231 = arith.truncf %230 : vector<64x32xf32> to vector<64x32xbf16>
    %c5_210 = arith.constant 5 : index
    %c0_211 = arith.constant 0 : index
    %c0_212 = arith.constant 0 : index
    %232 = vector.load %arg5[%c5_210, %c0_211, %c0_212] : memref<9x32x64xbf16, #tpu.memory_space<vmem>>, vector<1x32x64xbf16>
    %233 = vector.shape_cast %232 : vector<1x32x64xbf16> to vector<32x64xbf16>
    %cst_213 = arith.constant dense<0.000000e+00> : vector<64x64xf32>
    %234 = tpu.matmul %231, %233, %cst_213 {dimension_numbers = #tpu.dot_dimension_numbers<[1], [0], [0], [1], [0, 0, 1, 1], [], []>} : vector<64x32xbf16>, vector<32x64xbf16>, vector<64x64xf32> -> vector<64x64xf32>
    %235 = arith.addf %227, %234 : vector<64x64xf32>
    %c6_214 = arith.constant 6 : index
    %c0_215 = arith.constant 0 : index
    %c0_216 = arith.constant 0 : index
    %236 = vector.load %arg4[%c6_214, %c0_215, %c0_216] : memref<9x64x256xbf16, #tpu.memory_space<vmem>>, vector<1x64x256xbf16>
    %237 = vector.shape_cast %236 : vector<1x64x256xbf16> to vector<64x256xbf16>
    %cst_217 = arith.constant dense<0.000000e+00> : vector<64x32xf32>
    %238 = tpu.matmul %237, %186, %cst_217 {dimension_numbers = #tpu.dot_dimension_numbers<[1], [0], [0], [1], [0, 0, 1, 1], [], []>} : vector<64x256xbf16>, vector<256x32xbf16>, vector<64x32xf32> -> vector<64x32xf32>
    %239 = arith.truncf %238 : vector<64x32xf32> to vector<64x32xbf16>
    %c6_218 = arith.constant 6 : index
    %c0_219 = arith.constant 0 : index
    %c0_220 = arith.constant 0 : index
    %240 = vector.load %arg5[%c6_218, %c0_219, %c0_220] : memref<9x32x64xbf16, #tpu.memory_space<vmem>>, vector<1x32x64xbf16>
    %241 = vector.shape_cast %240 : vector<1x32x64xbf16> to vector<32x64xbf16>
    %cst_221 = arith.constant dense<0.000000e+00> : vector<64x64xf32>
    %242 = tpu.matmul %239, %241, %cst_221 {dimension_numbers = #tpu.dot_dimension_numbers<[1], [0], [0], [1], [0, 0, 1, 1], [], []>} : vector<64x32xbf16>, vector<32x64xbf16>, vector<64x64xf32> -> vector<64x64xf32>
    %243 = arith.addf %235, %242 : vector<64x64xf32>
    %c7_222 = arith.constant 7 : index
    %c0_223 = arith.constant 0 : index
    %c0_224 = arith.constant 0 : index
    %244 = vector.load %arg4[%c7_222, %c0_223, %c0_224] : memref<9x64x256xbf16, #tpu.memory_space<vmem>>, vector<1x64x256xbf16>
    %245 = vector.shape_cast %244 : vector<1x64x256xbf16> to vector<64x256xbf16>
    %cst_225 = arith.constant dense<0.000000e+00> : vector<64x32xf32>
    %246 = tpu.matmul %245, %186, %cst_225 {dimension_numbers = #tpu.dot_dimension_numbers<[1], [0], [0], [1], [0, 0, 1, 1], [], []>} : vector<64x256xbf16>, vector<256x32xbf16>, vector<64x32xf32> -> vector<64x32xf32>
    %247 = arith.truncf %246 : vector<64x32xf32> to vector<64x32xbf16>
    %c7_226 = arith.constant 7 : index
    %c0_227 = arith.constant 0 : index
    %c0_228 = arith.constant 0 : index
    %248 = vector.load %arg5[%c7_226, %c0_227, %c0_228] : memref<9x32x64xbf16, #tpu.memory_space<vmem>>, vector<1x32x64xbf16>
    %249 = vector.shape_cast %248 : vector<1x32x64xbf16> to vector<32x64xbf16>
    %cst_229 = arith.constant dense<0.000000e+00> : vector<64x64xf32>
    %250 = tpu.matmul %247, %249, %cst_229 {dimension_numbers = #tpu.dot_dimension_numbers<[1], [0], [0], [1], [0, 0, 1, 1], [], []>} : vector<64x32xbf16>, vector<32x64xbf16>, vector<64x64xf32> -> vector<64x64xf32>
    %251 = arith.addf %243, %250 : vector<64x64xf32>
    %c8_230 = arith.constant 8 : index
    %c0_231 = arith.constant 0 : index
    %c0_232 = arith.constant 0 : index
    %252 = vector.load %arg4[%c8_230, %c0_231, %c0_232] : memref<9x64x256xbf16, #tpu.memory_space<vmem>>, vector<1x64x256xbf16>
    %253 = vector.shape_cast %252 : vector<1x64x256xbf16> to vector<64x256xbf16>
    %cst_233 = arith.constant dense<0.000000e+00> : vector<64x32xf32>
    %254 = tpu.matmul %253, %186, %cst_233 {dimension_numbers = #tpu.dot_dimension_numbers<[1], [0], [0], [1], [0, 0, 1, 1], [], []>} : vector<64x256xbf16>, vector<256x32xbf16>, vector<64x32xf32> -> vector<64x32xf32>
    %255 = arith.truncf %254 : vector<64x32xf32> to vector<64x32xbf16>
    %c8_234 = arith.constant 8 : index
    %c0_235 = arith.constant 0 : index
    %c0_236 = arith.constant 0 : index
    %256 = vector.load %arg5[%c8_234, %c0_235, %c0_236] : memref<9x32x64xbf16, #tpu.memory_space<vmem>>, vector<1x32x64xbf16>
    %257 = vector.shape_cast %256 : vector<1x32x64xbf16> to vector<32x64xbf16>
    %cst_237 = arith.constant dense<0.000000e+00> : vector<64x64xf32>
    %258 = tpu.matmul %255, %257, %cst_237 {dimension_numbers = #tpu.dot_dimension_numbers<[1], [0], [0], [1], [0, 0, 1, 1], [], []>} : vector<64x32xbf16>, vector<32x64xbf16>, vector<64x64xf32> -> vector<64x64xf32>
    %259 = arith.addf %251, %258 : vector<64x64xf32>
    %c0_238 = arith.constant 0 : index
    %c0_239 = arith.constant 0 : index
    %260 = vector.load %arg6[%c0_238, %c0_239] : memref<1x64xf32, #tpu.memory_space<vmem>>, vector<1x64xf32>
    %261 = vector.broadcast %260 : vector<1x64xf32> to vector<64x64xf32>
    %262 = arith.addf %259, %261 : vector<64x64xf32>
    %cst_240 = arith.constant 0.000000e+00 : f32
    %263 = vector.broadcast %cst_240 : f32 to vector<64x64xf32>
    %264 = arith.maximumf %262, %263 : vector<64x64xf32>
    %265 = arith.truncf %264 : vector<64x64xf32> to vector<64x64xbf16>
    %c0_241 = arith.constant 0 : index
    %c0_242 = arith.constant 0 : index
    %266 = vector.load %arg7[%c0_241, %c0_242] : memref<50x64xbf16, #tpu.memory_space<vmem>>, vector<50x64xbf16>
    %cst_243 = arith.constant dense<0.000000e+00> : vector<50x64xf32>
    %267 = tpu.matmul %266, %265, %cst_243 {dimension_numbers = #tpu.dot_dimension_numbers<[1], [0], [0], [1], [0, 0, 1, 1], [], []>} : vector<50x64xbf16>, vector<64x64xbf16>, vector<50x64xf32> -> vector<50x64xf32>
    %268 = arith.truncf %267 : vector<50x64xf32> to vector<50x64xbf16>
    %c0_244 = arith.constant 0 : index
    %c0_245 = arith.constant 0 : index
    %269 = vector.load %arg8[%c0_244, %c0_245] : memref<64x128xbf16, #tpu.memory_space<vmem>>, vector<64x128xbf16>
    %cst_246 = arith.constant dense<0.000000e+00> : vector<50x128xf32>
    %270 = tpu.matmul %268, %269, %cst_246 {dimension_numbers = #tpu.dot_dimension_numbers<[1], [0], [0], [1], [0, 0, 1, 1], [], []>} : vector<50x64xbf16>, vector<64x128xbf16>, vector<50x128xf32> -> vector<50x128xf32>
    %c0_247 = arith.constant 0 : index
    %c0_248 = arith.constant 0 : index
    %271 = vector.load %arg9[%c0_247, %c0_248] : memref<1x128xf32, #tpu.memory_space<vmem>>, vector<1x128xf32>
    %272 = vector.broadcast %271 : vector<1x128xf32> to vector<50x128xf32>
    %273 = arith.addf %270, %272 : vector<50x128xf32>
    %cst_249 = arith.constant 0.000000e+00 : f32
    %274 = vector.broadcast %cst_249 : f32 to vector<50x128xf32>
    %275 = arith.maximumf %273, %274 : vector<50x128xf32>
    %c0_250 = arith.constant 0 : index
    %c0_251 = arith.constant 0 : index
    %276 = vector.load %arg10[%c0_250, %c0_251] : memref<50x128xf32, #tpu.memory_space<vmem>>, vector<50x128xf32>
    %277 = arith.mulf %275, %276 : vector<50x128xf32>
    %c0_252 = arith.constant 0 : index
    %c0_253 = arith.constant 0 : index
    %278 = vector.load %arg11[%c0_252, %c0_253] : memref<64x50xbf16, #tpu.memory_space<vmem>>, vector<64x50xbf16>
    %279 = arith.truncf %277 : vector<50x128xf32> to vector<50x128xbf16>
    %cst_254 = arith.constant dense<0.000000e+00> : vector<64x128xf32>
    %280 = tpu.matmul %278, %279, %cst_254 {dimension_numbers = #tpu.dot_dimension_numbers<[1], [0], [0], [1], [0, 0, 1, 1], [], []>} : vector<64x50xbf16>, vector<50x128xbf16>, vector<64x128xf32> -> vector<64x128xf32>
    %281 = arith.truncf %280 : vector<64x128xf32> to vector<64x128xbf16>
    %282 = tpu.concatenate %265, %281 in 1 : vector<64x64xbf16>, vector<64x128xbf16> -> vector<64x192xbf16>
    %cst_255 = arith.constant 0.000000e+00 : f32
    %283 = vector.broadcast %cst_255 : f32 to vector<64x64xf32>
    %c0_256 = arith.constant 0 : index
    %c0_257 = arith.constant 0 : index
    %c0_258 = arith.constant 0 : index
    %284 = vector.load %arg13[%c0_256, %c0_257, %c0_258] : memref<9x192x64xbf16, #tpu.memory_space<vmem>>, vector<1x192x64xbf16>
    %285 = vector.shape_cast %284 : vector<1x192x64xbf16> to vector<192x64xbf16>
    %cst_259 = arith.constant dense<0.000000e+00> : vector<64x64xf32>
    %286 = tpu.matmul %282, %285, %cst_259 {dimension_numbers = #tpu.dot_dimension_numbers<[1], [0], [0], [1], [0, 0, 1, 1], [], []>} : vector<64x192xbf16>, vector<192x64xbf16>, vector<64x64xf32> -> vector<64x64xf32>
    %c0_260 = arith.constant 0 : index
    %c0_261 = arith.constant 0 : index
    %c0_262 = arith.constant 0 : index
    %287 = vector.load %arg12[%c0_260, %c0_261, %c0_262] : memref<9x64x64xbf16, #tpu.memory_space<vmem>>, vector<1x64x64xbf16>
    %288 = vector.shape_cast %287 : vector<1x64x64xbf16> to vector<64x64xbf16>
    %289 = arith.truncf %286 : vector<64x64xf32> to vector<64x64xbf16>
    %cst_263 = arith.constant dense<0.000000e+00> : vector<64x64xf32>
    %290 = tpu.matmul %288, %289, %cst_263 {dimension_numbers = #tpu.dot_dimension_numbers<[1], [0], [0], [1], [0, 0, 1, 1], [], []>} : vector<64x64xbf16>, vector<64x64xbf16>, vector<64x64xf32> -> vector<64x64xf32>
    %291 = arith.addf %283, %290 : vector<64x64xf32>
    %c1_264 = arith.constant 1 : index
    %c0_265 = arith.constant 0 : index
    %c0_266 = arith.constant 0 : index
    %292 = vector.load %arg13[%c1_264, %c0_265, %c0_266] : memref<9x192x64xbf16, #tpu.memory_space<vmem>>, vector<1x192x64xbf16>
    %293 = vector.shape_cast %292 : vector<1x192x64xbf16> to vector<192x64xbf16>
    %cst_267 = arith.constant dense<0.000000e+00> : vector<64x64xf32>
    %294 = tpu.matmul %282, %293, %cst_267 {dimension_numbers = #tpu.dot_dimension_numbers<[1], [0], [0], [1], [0, 0, 1, 1], [], []>} : vector<64x192xbf16>, vector<192x64xbf16>, vector<64x64xf32> -> vector<64x64xf32>
    %c1_268 = arith.constant 1 : index
    %c0_269 = arith.constant 0 : index
    %c0_270 = arith.constant 0 : index
    %295 = vector.load %arg12[%c1_268, %c0_269, %c0_270] : memref<9x64x64xbf16, #tpu.memory_space<vmem>>, vector<1x64x64xbf16>
    %296 = vector.shape_cast %295 : vector<1x64x64xbf16> to vector<64x64xbf16>
    %297 = arith.truncf %294 : vector<64x64xf32> to vector<64x64xbf16>
    %cst_271 = arith.constant dense<0.000000e+00> : vector<64x64xf32>
    %298 = tpu.matmul %296, %297, %cst_271 {dimension_numbers = #tpu.dot_dimension_numbers<[1], [0], [0], [1], [0, 0, 1, 1], [], []>} : vector<64x64xbf16>, vector<64x64xbf16>, vector<64x64xf32> -> vector<64x64xf32>
    %299 = arith.addf %291, %298 : vector<64x64xf32>
    %c2_272 = arith.constant 2 : index
    %c0_273 = arith.constant 0 : index
    %c0_274 = arith.constant 0 : index
    %300 = vector.load %arg13[%c2_272, %c0_273, %c0_274] : memref<9x192x64xbf16, #tpu.memory_space<vmem>>, vector<1x192x64xbf16>
    %301 = vector.shape_cast %300 : vector<1x192x64xbf16> to vector<192x64xbf16>
    %cst_275 = arith.constant dense<0.000000e+00> : vector<64x64xf32>
    %302 = tpu.matmul %282, %301, %cst_275 {dimension_numbers = #tpu.dot_dimension_numbers<[1], [0], [0], [1], [0, 0, 1, 1], [], []>} : vector<64x192xbf16>, vector<192x64xbf16>, vector<64x64xf32> -> vector<64x64xf32>
    %c2_276 = arith.constant 2 : index
    %c0_277 = arith.constant 0 : index
    %c0_278 = arith.constant 0 : index
    %303 = vector.load %arg12[%c2_276, %c0_277, %c0_278] : memref<9x64x64xbf16, #tpu.memory_space<vmem>>, vector<1x64x64xbf16>
    %304 = vector.shape_cast %303 : vector<1x64x64xbf16> to vector<64x64xbf16>
    %305 = arith.truncf %302 : vector<64x64xf32> to vector<64x64xbf16>
    %cst_279 = arith.constant dense<0.000000e+00> : vector<64x64xf32>
    %306 = tpu.matmul %304, %305, %cst_279 {dimension_numbers = #tpu.dot_dimension_numbers<[1], [0], [0], [1], [0, 0, 1, 1], [], []>} : vector<64x64xbf16>, vector<64x64xbf16>, vector<64x64xf32> -> vector<64x64xf32>
    %307 = arith.addf %299, %306 : vector<64x64xf32>
    %c3_280 = arith.constant 3 : index
    %c0_281 = arith.constant 0 : index
    %c0_282 = arith.constant 0 : index
    %308 = vector.load %arg13[%c3_280, %c0_281, %c0_282] : memref<9x192x64xbf16, #tpu.memory_space<vmem>>, vector<1x192x64xbf16>
    %309 = vector.shape_cast %308 : vector<1x192x64xbf16> to vector<192x64xbf16>
    %cst_283 = arith.constant dense<0.000000e+00> : vector<64x64xf32>
    %310 = tpu.matmul %282, %309, %cst_283 {dimension_numbers = #tpu.dot_dimension_numbers<[1], [0], [0], [1], [0, 0, 1, 1], [], []>} : vector<64x192xbf16>, vector<192x64xbf16>, vector<64x64xf32> -> vector<64x64xf32>
    %c3_284 = arith.constant 3 : index
    %c0_285 = arith.constant 0 : index
    %c0_286 = arith.constant 0 : index
    %311 = vector.load %arg12[%c3_284, %c0_285, %c0_286] : memref<9x64x64xbf16, #tpu.memory_space<vmem>>, vector<1x64x64xbf16>
    %312 = vector.shape_cast %311 : vector<1x64x64xbf16> to vector<64x64xbf16>
    %313 = arith.truncf %310 : vector<64x64xf32> to vector<64x64xbf16>
    %cst_287 = arith.constant dense<0.000000e+00> : vector<64x64xf32>
    %314 = tpu.matmul %312, %313, %cst_287 {dimension_numbers = #tpu.dot_dimension_numbers<[1], [0], [0], [1], [0, 0, 1, 1], [], []>} : vector<64x64xbf16>, vector<64x64xbf16>, vector<64x64xf32> -> vector<64x64xf32>
    %315 = arith.addf %307, %314 : vector<64x64xf32>
    %c4_288 = arith.constant 4 : index
    %c0_289 = arith.constant 0 : index
    %c0_290 = arith.constant 0 : index
    %316 = vector.load %arg13[%c4_288, %c0_289, %c0_290] : memref<9x192x64xbf16, #tpu.memory_space<vmem>>, vector<1x192x64xbf16>
    %317 = vector.shape_cast %316 : vector<1x192x64xbf16> to vector<192x64xbf16>
    %cst_291 = arith.constant dense<0.000000e+00> : vector<64x64xf32>
    %318 = tpu.matmul %282, %317, %cst_291 {dimension_numbers = #tpu.dot_dimension_numbers<[1], [0], [0], [1], [0, 0, 1, 1], [], []>} : vector<64x192xbf16>, vector<192x64xbf16>, vector<64x64xf32> -> vector<64x64xf32>
    %c4_292 = arith.constant 4 : index
    %c0_293 = arith.constant 0 : index
    %c0_294 = arith.constant 0 : index
    %319 = vector.load %arg12[%c4_292, %c0_293, %c0_294] : memref<9x64x64xbf16, #tpu.memory_space<vmem>>, vector<1x64x64xbf16>
    %320 = vector.shape_cast %319 : vector<1x64x64xbf16> to vector<64x64xbf16>
    %321 = arith.truncf %318 : vector<64x64xf32> to vector<64x64xbf16>
    %cst_295 = arith.constant dense<0.000000e+00> : vector<64x64xf32>
    %322 = tpu.matmul %320, %321, %cst_295 {dimension_numbers = #tpu.dot_dimension_numbers<[1], [0], [0], [1], [0, 0, 1, 1], [], []>} : vector<64x64xbf16>, vector<64x64xbf16>, vector<64x64xf32> -> vector<64x64xf32>
    %323 = arith.addf %315, %322 : vector<64x64xf32>
    %c5_296 = arith.constant 5 : index
    %c0_297 = arith.constant 0 : index
    %c0_298 = arith.constant 0 : index
    %324 = vector.load %arg13[%c5_296, %c0_297, %c0_298] : memref<9x192x64xbf16, #tpu.memory_space<vmem>>, vector<1x192x64xbf16>
    %325 = vector.shape_cast %324 : vector<1x192x64xbf16> to vector<192x64xbf16>
    %cst_299 = arith.constant dense<0.000000e+00> : vector<64x64xf32>
    %326 = tpu.matmul %282, %325, %cst_299 {dimension_numbers = #tpu.dot_dimension_numbers<[1], [0], [0], [1], [0, 0, 1, 1], [], []>} : vector<64x192xbf16>, vector<192x64xbf16>, vector<64x64xf32> -> vector<64x64xf32>
    %c5_300 = arith.constant 5 : index
    %c0_301 = arith.constant 0 : index
    %c0_302 = arith.constant 0 : index
    %327 = vector.load %arg12[%c5_300, %c0_301, %c0_302] : memref<9x64x64xbf16, #tpu.memory_space<vmem>>, vector<1x64x64xbf16>
    %328 = vector.shape_cast %327 : vector<1x64x64xbf16> to vector<64x64xbf16>
    %329 = arith.truncf %326 : vector<64x64xf32> to vector<64x64xbf16>
    %cst_303 = arith.constant dense<0.000000e+00> : vector<64x64xf32>
    %330 = tpu.matmul %328, %329, %cst_303 {dimension_numbers = #tpu.dot_dimension_numbers<[1], [0], [0], [1], [0, 0, 1, 1], [], []>} : vector<64x64xbf16>, vector<64x64xbf16>, vector<64x64xf32> -> vector<64x64xf32>
    %331 = arith.addf %323, %330 : vector<64x64xf32>
    %c6_304 = arith.constant 6 : index
    %c0_305 = arith.constant 0 : index
    %c0_306 = arith.constant 0 : index
    %332 = vector.load %arg13[%c6_304, %c0_305, %c0_306] : memref<9x192x64xbf16, #tpu.memory_space<vmem>>, vector<1x192x64xbf16>
    %333 = vector.shape_cast %332 : vector<1x192x64xbf16> to vector<192x64xbf16>
    %cst_307 = arith.constant dense<0.000000e+00> : vector<64x64xf32>
    %334 = tpu.matmul %282, %333, %cst_307 {dimension_numbers = #tpu.dot_dimension_numbers<[1], [0], [0], [1], [0, 0, 1, 1], [], []>} : vector<64x192xbf16>, vector<192x64xbf16>, vector<64x64xf32> -> vector<64x64xf32>
    %c6_308 = arith.constant 6 : index
    %c0_309 = arith.constant 0 : index
    %c0_310 = arith.constant 0 : index
    %335 = vector.load %arg12[%c6_308, %c0_309, %c0_310] : memref<9x64x64xbf16, #tpu.memory_space<vmem>>, vector<1x64x64xbf16>
    %336 = vector.shape_cast %335 : vector<1x64x64xbf16> to vector<64x64xbf16>
    %337 = arith.truncf %334 : vector<64x64xf32> to vector<64x64xbf16>
    %cst_311 = arith.constant dense<0.000000e+00> : vector<64x64xf32>
    %338 = tpu.matmul %336, %337, %cst_311 {dimension_numbers = #tpu.dot_dimension_numbers<[1], [0], [0], [1], [0, 0, 1, 1], [], []>} : vector<64x64xbf16>, vector<64x64xbf16>, vector<64x64xf32> -> vector<64x64xf32>
    %339 = arith.addf %331, %338 : vector<64x64xf32>
    %c7_312 = arith.constant 7 : index
    %c0_313 = arith.constant 0 : index
    %c0_314 = arith.constant 0 : index
    %340 = vector.load %arg13[%c7_312, %c0_313, %c0_314] : memref<9x192x64xbf16, #tpu.memory_space<vmem>>, vector<1x192x64xbf16>
    %341 = vector.shape_cast %340 : vector<1x192x64xbf16> to vector<192x64xbf16>
    %cst_315 = arith.constant dense<0.000000e+00> : vector<64x64xf32>
    %342 = tpu.matmul %282, %341, %cst_315 {dimension_numbers = #tpu.dot_dimension_numbers<[1], [0], [0], [1], [0, 0, 1, 1], [], []>} : vector<64x192xbf16>, vector<192x64xbf16>, vector<64x64xf32> -> vector<64x64xf32>
    %c7_316 = arith.constant 7 : index
    %c0_317 = arith.constant 0 : index
    %c0_318 = arith.constant 0 : index
    %343 = vector.load %arg12[%c7_316, %c0_317, %c0_318] : memref<9x64x64xbf16, #tpu.memory_space<vmem>>, vector<1x64x64xbf16>
    %344 = vector.shape_cast %343 : vector<1x64x64xbf16> to vector<64x64xbf16>
    %345 = arith.truncf %342 : vector<64x64xf32> to vector<64x64xbf16>
    %cst_319 = arith.constant dense<0.000000e+00> : vector<64x64xf32>
    %346 = tpu.matmul %344, %345, %cst_319 {dimension_numbers = #tpu.dot_dimension_numbers<[1], [0], [0], [1], [0, 0, 1, 1], [], []>} : vector<64x64xbf16>, vector<64x64xbf16>, vector<64x64xf32> -> vector<64x64xf32>
    %347 = arith.addf %339, %346 : vector<64x64xf32>
    %c8_320 = arith.constant 8 : index
    %c0_321 = arith.constant 0 : index
    %c0_322 = arith.constant 0 : index
    %348 = vector.load %arg13[%c8_320, %c0_321, %c0_322] : memref<9x192x64xbf16, #tpu.memory_space<vmem>>, vector<1x192x64xbf16>
    %349 = vector.shape_cast %348 : vector<1x192x64xbf16> to vector<192x64xbf16>
    %cst_323 = arith.constant dense<0.000000e+00> : vector<64x64xf32>
    %350 = tpu.matmul %282, %349, %cst_323 {dimension_numbers = #tpu.dot_dimension_numbers<[1], [0], [0], [1], [0, 0, 1, 1], [], []>} : vector<64x192xbf16>, vector<192x64xbf16>, vector<64x64xf32> -> vector<64x64xf32>
    %c8_324 = arith.constant 8 : index
    %c0_325 = arith.constant 0 : index
    %c0_326 = arith.constant 0 : index
    %351 = vector.load %arg12[%c8_324, %c0_325, %c0_326] : memref<9x64x64xbf16, #tpu.memory_space<vmem>>, vector<1x64x64xbf16>
    %352 = vector.shape_cast %351 : vector<1x64x64xbf16> to vector<64x64xbf16>
    %353 = arith.truncf %350 : vector<64x64xf32> to vector<64x64xbf16>
    %cst_327 = arith.constant dense<0.000000e+00> : vector<64x64xf32>
    %354 = tpu.matmul %352, %353, %cst_327 {dimension_numbers = #tpu.dot_dimension_numbers<[1], [0], [0], [1], [0, 0, 1, 1], [], []>} : vector<64x64xbf16>, vector<64x64xbf16>, vector<64x64xf32> -> vector<64x64xf32>
    %355 = arith.addf %347, %354 : vector<64x64xf32>
    %c0_328 = arith.constant 0 : index
    %c0_329 = arith.constant 0 : index
    %356 = vector.load %arg14[%c0_328, %c0_329] : memref<1x64xf32, #tpu.memory_space<vmem>>, vector<1x64xf32>
    %357 = vector.broadcast %356 : vector<1x64xf32> to vector<64x64xf32>
    %358 = arith.addf %355, %357 : vector<64x64xf32>
    %cst_330 = arith.constant 0.000000e+00 : f32
    %359 = vector.broadcast %cst_330 : f32 to vector<64x64xf32>
    %360 = arith.maximumf %358, %359 : vector<64x64xf32>
    %361 = arith.truncf %360 : vector<64x64xf32> to vector<64x64xbf16>
    %362 = tpu.concatenate %185, %361 in 0 : vector<64x64xbf16>, vector<64x64xbf16> -> vector<128x64xbf16>
    %c0_331 = arith.constant 0 : index
    %c0_332 = arith.constant 0 : index
    %363 = vector.load %arg15[%c0_331, %c0_332] : memref<64x8xbf16, #tpu.memory_space<vmem>>, vector<64x8xbf16>
    %cst_333 = arith.constant dense<0.000000e+00> : vector<128x8xf32>
    %364 = tpu.matmul %362, %363, %cst_333 {dimension_numbers = #tpu.dot_dimension_numbers<[1], [0], [0], [1], [0, 0, 1, 1], [], []>} : vector<128x64xbf16>, vector<64x8xbf16>, vector<128x8xf32> -> vector<128x8xf32>
    %c0_334 = arith.constant 0 : index
    %c0_335 = arith.constant 0 : index
    %365 = vector.load %arg16[%c0_334, %c0_335] : memref<1x8xf32, #tpu.memory_space<vmem>>, vector<1x8xf32>
    %366 = vector.broadcast %365 : vector<1x8xf32> to vector<128x8xf32>
    %367 = arith.addf %364, %366 : vector<128x8xf32>
    %cst_336 = arith.constant dense<0xFF800000> : vector<128xf32>
    %368 = vector.multi_reduction <maximumf>, %367, %cst_336 [1] : vector<128x8xf32> to vector<128xf32>
    %369 = vector.shape_cast %368 : vector<128xf32> to vector<128x1xf32>
    %370 = vector.broadcast %369 : vector<128x1xf32> to vector<128x8xf32>
    %371 = arith.subf %367, %370 : vector<128x8xf32>
    %372 = math.exp %371 : vector<128x8xf32>
    %cst_337 = arith.constant dense<0.000000e+00> : vector<128xf32>
    %373 = vector.multi_reduction <add>, %372, %cst_337 [1] : vector<128x8xf32> to vector<128xf32>
    %374 = vector.shape_cast %373 : vector<128xf32> to vector<128x1xf32>
    %375 = vector.broadcast %374 : vector<128x1xf32> to vector<128x8xf32>
    %376 = arith.divf %372, %375 : vector<128x8xf32>
    %377 = vector.extract_strided_slice %376 {offsets = [0, 0], sizes = [64, 8], strides = [1, 1]} : vector<128x8xf32> to vector<64x8xf32>
    %378 = tpu.transpose %377, [1, 0] : vector<64x8xf32> -> vector<8x64xf32>
    %379 = arith.truncf %378 : vector<8x64xf32> to vector<8x64xbf16>
    %380 = vector.extract_strided_slice %376 {offsets = [64, 0], sizes = [64, 8], strides = [1, 1]} : vector<128x8xf32> to vector<64x8xf32>
    %381 = tpu.transpose %380, [1, 0] : vector<64x8xf32> -> vector<8x64xf32>
    %382 = arith.truncf %381 : vector<8x64xf32> to vector<8x64xbf16>
    %383 = tpu.concatenate %379, %382 in 0 : vector<8x64xbf16>, vector<8x64xbf16> -> vector<16x64xbf16>
    %c0_338 = arith.constant 0 : index
    %c0_339 = arith.constant 0 : index
    %384 = vector.load %arg17[%c0_338, %c0_339] : memref<64x1024xbf16, #tpu.memory_space<vmem>>, vector<64x1024xbf16>
    %cst_340 = arith.constant dense<0.000000e+00> : vector<16x1024xf32>
    %385 = tpu.matmul %383, %384, %cst_340 {dimension_numbers = #tpu.dot_dimension_numbers<[1], [0], [0], [1], [0, 0, 1, 1], [], []>} : vector<16x64xbf16>, vector<64x1024xbf16>, vector<16x1024xf32> -> vector<16x1024xf32>
    %386 = vector.shape_cast %385 : vector<16x1024xf32> to vector<2x8x1024xf32>
    %c0_341 = arith.constant 0 : index
    %c0_342 = arith.constant 0 : index
    %c0_343 = arith.constant 0 : index
    %387 = vector.load %arg18[%c0_341, %c0_342, %c0_343] : memref<2x8x1024xf32, #tpu.memory_space<vmem>>, vector<2x8x1024xf32>
    tpu.vector_store %arg18[%c0_341, %c0_342, %c0_343], %386 {strides = array<i32>} : memref<2x8x1024xf32, #tpu.memory_space<vmem>>, vector<2x8x1024xf32>,
    return
  }
  func.func @transform_0(%arg0: i32) -> (i32, i32, i32) {
    %c0_i32 = arith.constant 0 : i32
    %c0_i32_0 = arith.constant 0 : i32
    %c0_i32_1 = arith.constant 0 : i32
    return %arg0, %c0_i32, %c0_i32_0 : i32, i32, i32
  }
  func.func @transform_1(%arg0: i32) -> (i32, i32) {
    %c0_i32 = arith.constant 0 : i32
    %c0_i32_0 = arith.constant 0 : i32
    %c0_i32_1 = arith.constant 0 : i32
    return %c0_i32, %c0_i32_0 : i32, i32
  }
  func.func @transform_2(%arg0: i32) -> (i32, i32) {
    %c0_i32 = arith.constant 0 : i32
    %c0_i32_0 = arith.constant 0 : i32
    %c0_i32_1 = arith.constant 0 : i32
    return %c0_i32, %c0_i32_0 : i32, i32
  }
  func.func @transform_3(%arg0: i32) -> (i32, i32, i32) {
    %c0_i32 = arith.constant 0 : i32
    %c0_i32_0 = arith.constant 0 : i32
    %c0_i32_1 = arith.constant 0 : i32
    %c0_i32_2 = arith.constant 0 : i32
    return %c0_i32, %c0_i32_0, %c0_i32_1 : i32, i32, i32
  }
  func.func @transform_4(%arg0: i32) -> (i32, i32, i32) {
    %c0_i32 = arith.constant 0 : i32
    %c0_i32_0 = arith.constant 0 : i32
    %c0_i32_1 = arith.constant 0 : i32
    %c0_i32_2 = arith.constant 0 : i32
    return %c0_i32, %c0_i32_0, %c0_i32_1 : i32, i32, i32
  }
  func.func @transform_5(%arg0: i32) -> (i32, i32) {
    %c0_i32 = arith.constant 0 : i32
    %c0_i32_0 = arith.constant 0 : i32
    %c0_i32_1 = arith.constant 0 : i32
    return %c0_i32, %c0_i32_0 : i32, i32
  }
  func.func @transform_6(%arg0: i32) -> (i32, i32) {
    %c0_i32 = arith.constant 0 : i32
    %c0_i32_0 = arith.constant 0 : i32
    %c0_i32_1 = arith.constant 0 : i32
    return %c0_i32, %c0_i32_0 : i32, i32
  }
  func.func @transform_7(%arg0: i32) -> (i32, i32) {
    %c0_i32 = arith.constant 0 : i32
    %c0_i32_0 = arith.constant 0 : i32
    %c0_i32_1 = arith.constant 0 : i32
    return %c0_i32, %c0_i32_0 : i32, i32
  }
  func.func @transform_8(%arg0: i32) -> (i32, i32) {
    %c0_i32 = arith.constant 0 : i32
    %c0_i32_0 = arith.constant 0 : i32
    %c0_i32_1 = arith.constant 0 : i32
    return %c0_i32, %c0_i32_0 : i32, i32
  }
  func.func @transform_9(%arg0: i32) -> (i32, i32) {
    %c0_i32 = arith.constant 0 : i32
    %c0_i32_0 = arith.constant 0 : i32
    %c0_i32_1 = arith.constant 0 : i32
    return %c0_i32, %c0_i32_0 : i32, i32
  }
  func.func @transform_10(%arg0: i32) -> (i32, i32) {
    %c0_i32 = arith.constant 0 : i32
    %c0_i32_0 = arith.constant 0 : i32
    %c0_i32_1 = arith.constant 0 : i32
    return %c0_i32, %c0_i32_0 : i32, i32
  }
  func.func @transform_11(%arg0: i32) -> (i32, i32, i32) {
    %c0_i32 = arith.constant 0 : i32
    %c0_i32_0 = arith.constant 0 : i32
    %c0_i32_1 = arith.constant 0 : i32
    %c0_i32_2 = arith.constant 0 : i32
    return %c0_i32, %c0_i32_0, %c0_i32_1 : i32, i32, i32
  }
  func.func @transform_12(%arg0: i32) -> (i32, i32, i32) {
    %c0_i32 = arith.constant 0 : i32
    %c0_i32_0 = arith.constant 0 : i32
    %c0_i32_1 = arith.constant 0 : i32
    %c0_i32_2 = arith.constant 0 : i32
    return %c0_i32, %c0_i32_0, %c0_i32_1 : i32, i32, i32
  }
  func.func @transform_13(%arg0: i32) -> (i32, i32) {
    %c0_i32 = arith.constant 0 : i32
    %c0_i32_0 = arith.constant 0 : i32
    %c0_i32_1 = arith.constant 0 : i32
    return %c0_i32, %c0_i32_0 : i32, i32
  }
  func.func @transform_14(%arg0: i32) -> (i32, i32) {
    %c0_i32 = arith.constant 0 : i32
    %c0_i32_0 = arith.constant 0 : i32
    %c0_i32_1 = arith.constant 0 : i32
    return %c0_i32, %c0_i32_0 : i32, i32
  }
  func.func @transform_15(%arg0: i32) -> (i32, i32) {
    %c0_i32 = arith.constant 0 : i32
    %c0_i32_0 = arith.constant 0 : i32
    %c0_i32_1 = arith.constant 0 : i32
    return %c0_i32, %c0_i32_0 : i32, i32
  }
  func.func @transform_16(%arg0: i32) -> (i32, i32) {
    %c0_i32 = arith.constant 0 : i32
    %c0_i32_0 = arith.constant 0 : i32
    %c0_i32_1 = arith.constant 0 : i32
    return %c0_i32, %c0_i32_0 : i32, i32
  }
  func.func @transform_17(%arg0: i32) -> (i32, i32, i32) {
    %c0_i32 = arith.constant 0 : i32
    %c0_i32_0 = arith.constant 0 : i32
    %c0_i32_1 = arith.constant 0 : i32
    return %arg0, %c0_i32, %c0_i32_0 : i32, i32, i32
  }
}

</mosaic_0001>

<bundles_post_ra>
// kernel: _forward.1
= control target key start
LH: loop header
LB: loop body
LE: loop exit
PB: predicated region body
PF: predicated region fallthrough
CT: control target
= control target key end

     0   :  { %s13752_s24 = smov 0   ;;  %s17445_s0 = inlined_call_operand.vmem [shape: bf16[4,256,32], index: 0, kind: input, shape index: {}]   ;;  %s17446_s1 = inlined_call_operand.vmem [shape: bf16[32,32], index: 1, kind: input, shape index: {}]   ;;  %s17447_s2 = inlined_call_operand.vmem [shape: f32[1,32], index: 2, kind: input, shape index: {}]   ;;  %s17448_s3 = inlined_call_operand.vmem [shape: bf16[9,64,256], index: 3, kind: input, shape index: {}]   ;;  %s17449_s4 = inlined_call_operand.vmem [shape: bf16[9,32,64], index: 4, kind: input, shape index: {}]   ;;  %s17450_s5 = inlined_call_operand.vmem [shape: f32[1,64], index: 5, kind: input, shape index: {}, may-alias: {5,13}]   ;;  %s17451_s6 = inlined_call_operand.vmem [shape: bf16[50,64], index: 6, kind: input, shape index: {}]   ;;  %s17452_s7 = inlined_call_operand.vmem [shape: bf16[64,128], index: 7, kind: input, shape index: {}]   ;;  %s17453_s8 = inlined_call_operand.vmem [shape: f32[1,128], index: 8, kind: input, shape index: {}]   ;;  %s17454_s9 = inlined_call_operand.vmem [shape: f32[50,128], index: 9, kind: input, shape index: {}]   ;;  %s17455_s10 = inlined_call_operand.vmem [shape: bf16[64,50], index: 10, kind: input, shape index: {}]   ;;  %s17456_s11 = inlined_call_operand.vmem [shape: bf16[9,64,64], index: 11, kind: input, shape index: {}]   ;;  %s17457_s12 = inlined_call_operand.vmem [shape: bf16[9,192,64], index: 12, kind: input, shape index: {}]   ;;  %s17458_s13 = inlined_call_operand.vmem [shape: f32[1,64], index: 13, kind: input, shape index: {}, may-alias: {5,13}]   ;;  %s17459_s14 = inlined_call_operand.vmem [shape: bf16[64,8], index: 14, kind: input, shape index: {}]   ;;  %s17460_s15 = inlined_call_operand.vmem [shape: f32[1,8], index: 15, kind: input, shape index: {}]   ;;  %s17461_s16 = inlined_call_operand.vmem [shape: bf16[64,1024], index: 16, kind: input, shape index: {}]   ;;  %s17462_s17 = inlined_call_operand.vmem [shape: f32[4,8,1024], index: 17, kind: output, shape index: {}]  }
   0x1   :  { %17484 = sst [smem:[#allocation19_spill]] %s17445_s0 }
   0x2   :  { %17485 = sst [smem:[#allocation20_spill]] %s17446_s1 }
   0x3 LB: > { %s9992_s25 = sadd.s32 4294967295, %s13658_s24   ;;  %p9996_p0 = scmp.ge.s32.totalorder %s13658_s24, 1  ;;  %s13658_s24 = sphi %s13752_s24, %s27_s24  }
   0x4   : > { %p489_p1 = scmp.lt.s32.totalorder %s13658_s24, 3 }
   0x6   : > { %p490_p2 = pnand %p9996_p0, %p489_p1 }
   0x8   : > { %493 = sbr.rel (%p490_p2) target bundleno = 6984 (0x1b48), region = 88 }
   0xf   : > { %s17486_s28 = sld [smem:[#allocation20_spill]]  ;;  %s9997_s29 = sshll.u32 %s9992_s25, 1  ;;  %vm805_vm0 = vcmask 261120   ;;  %v13048_v34 = vld [vmem:[%s17448_s3 + $0x4] ss:$8 sps:$4 sm:$0xff]   ;;  %vm3301_vm1 = vcmask 523264  }
  0x10   : > { %p544_p3 = scmp.lt.s32.totalorder %s9997_s29, 3  ;;  %s17487_s20 = sld [smem:[#allocation19_spill]]  ;;  %v13051_v35 = vld [vmem:[%s17448_s3 + $0x84] ss:$8 sps:$4 sm:$0xff]   ;;  %1367 = vmatprep.mubr.bf16.mxu1 %v13048_v34  ;;  %v13847_v36 = vld [vmem:[%s17447_s2] ss:$0 sm:$0xff] }
  0x11   : > { %vm3550_vm2 = vcmask 408576   ;;  %vm3563_vm3 = vcmask 1040384   ;;  %s13661_s19 = smov 64   ;;  %vm9303_vm4 = vcmask 64512   ;;  %vm9548_vm5 = vcmask 1043456  }
  0x12   : > { %s17581_s29 = smov (!%p544_p3, %s9997_s29), 3 }
  0x13   : > { %s10962_s18 = sshll.u32 %s17581_s29, 7  ;;  %s10963_s30 = sshll.u32 %s17581_s29, 6 }
  0x15   : > { %v13012_v0 = vld [vmem:[%s17486_s28] sm:$0xff]   ;;  %v13013_v1 = vld [vmem:[%s17486_s28 + $0x8] sm:$0xff]  }
  0x16   : > { %12030 = vmatprep.subr.bf16.mxu0 %v13012_v0  ;;  %s13772_s21 = scalar_lea.vmem %s17487_s20, %s10962_s18  ;;  %s17424_s20 = scalar_lea.vmem %s17462_s17, %s10963_s30 }
  0x17   : > { %12031 = vmatpush3.bf16.msra.mxu0 %v13012_v0  ;;  %v13014_v2 = vld [vmem:[%s13772_s21] sm:$0xff]   ;;  %v13015_v3 = vld [vmem:[%s13772_s21 + $0x8] sm:$0xff]   ;;  %v13016_v4 = vld [vmem:[%s13772_s21 + $0x10] sm:$0xff]  }
  0x18   : > { %12032 = vmatprep.subr.bf16.mxu0 %v13013_v1  ;;  %12034 = vmatprep.mubr.msk.bf16.mxu0 %vm805_vm0, %v13014_v2  ;;  %v13017_v5 = vld [vmem:[%s13772_s21 + $0x18] sm:$0xff]   ;;  %v13018_v6 = vld [vmem:[%s13772_s21 + $0x20] sm:$0xff]   ;;  %v13019_v7 = vld [vmem:[%s13772_s21 + $0x28] sm:$0xff]  }
  0x19   : > { %v13020_v8 = vld [vmem:[%s13772_s21 + $0x30] sm:$0xff]   ;;  %v13021_v9 = vld [vmem:[%s13772_s21 + $0x38] sm:$0xff]   ;;  %v13022_v10 = vld [vmem:[%s13772_s21 + $0x40] sm:$0xff]  }
  0x1a   : > { %v13023_v11 = vld [vmem:[%s13772_s21 + $0x48] sm:$0xff]   ;;  %v13024_v12 = vld [vmem:[%s13772_s21 + $0x50] sm:$0xff]   ;;  %v13025_v13 = vld [vmem:[%s13772_s21 + $0x58] sm:$0xff]  }
  0x1b   : > { %12033 = vmatpush3.bf16.msra.mxu0 %v13013_v1  ;;  %v13026_v14 = vld [vmem:[%s13772_s21 + $0x60] sm:$0xff]   ;;  %v13027_v15 = vld [vmem:[%s13772_s21 + $0x68] sm:$0xff]   ;;  %v13028_v16 = vld [vmem:[%s13772_s21 + $0x70] sm:$0xff]  }
  0x1c   : > { %v13029_v17 = vld [vmem:[%s13772_s21 + $0x78] sm:$0xff]   ;;  %v13030_v18 = vld [vmem:[%s13772_s21 + $0x80] sm:$0xff]   ;;  %v13031_v19 = vld [vmem:[%s13772_s21 + $0x88] sm:$0xff]  }
  0x1d   : > { %v13032_v20 = vld [vmem:[%s13772_s21 + $0x90] sm:$0xff]   ;;  %v13033_v21 = vld [vmem:[%s13772_s21 + $0x98] sm:$0xff]   ;;  %v13034_v22 = vld [vmem:[%s13772_s21 + $0xa0] sm:$0xff]  }
  0x1e   : > { %12035 = vmatmul.mubr.msk.bf16.vlgmr.msra.gmra.mrb[0].mxu0 %vm805_vm0, %v13015_v3  ;;  %v13035_v23 = vld [vmem:[%s13772_s21 + $0xa8] sm:$0xff]   ;;  %v13036_v24 = vld [vmem:[%s13772_s21 + $0xb0] sm:$0xff]   ;;  %v13037_v25 = vld [vmem:[%s13772_s21 + $0xb8] sm:$0xff]  }
  0x1f   : > { %12038 = vmatprep.mubr.msk.bf16.mxu0 %vm805_vm0, %v13016_v4  ;;  %v13038_v26 = vld [vmem:[%s13772_s21 + $0xc0] sm:$0xff]   ;;  %v13039_v27 = vld [vmem:[%s13772_s21 + $0xc8] sm:$0xff]   ;;  %v13040_v28 = vld [vmem:[%s13772_s21 + $0xd0] sm:$0xff]  }
  0x20   : > { %v13041_v29 = vld [vmem:[%s13772_s21 + $0xd8] sm:$0xff]   ;;  %v13042_v30 = vld [vmem:[%s13772_s21 + $0xe0] sm:$0xff]   ;;  %v13043_v31 = vld [vmem:[%s13772_s21 + $0xe8] sm:$0xff]  }
  0x21   : > { %v13044_v32 = vld [vmem:[%s13772_s21 + $0xf0] sm:$0xff]   ;;  %v13045_v33 = vld [vmem:[%s13772_s21 + $0xf8] sm:$0xff]  }
  0x26   : > { %12039 = vmatmul.mubr.msk.bf16.gmra.mrb[4].mxu0 %vm805_vm0, %v13017_v5 }
  0x27   : > { %12042 = vmatprep.mubr.msk.bf16.mxu0 %vm805_vm0, %v13018_v6 }
  0x2e   : > { %12043 = vmatmul.mubr.msk.bf16.gmra.mrb[8].mxu0 %vm805_vm0, %v13019_v7 }
  0x2f   : > { %12046 = vmatprep.mubr.msk.bf16.mxu0 %vm805_vm0, %v13020_v8 }
  0x36   : > { %12047 = vmatmul.mubr.msk.bf16.gmra.mrb[12].mxu0 %vm805_vm0, %v13021_v9 }
  0x37   : > { %12050 = vmatprep.mubr.msk.bf16.mxu0 %vm805_vm0, %v13022_v10 }
  0x3e   : > { %12051 = vmatmul.mubr.msk.bf16.gmra.mrb[16].mxu0 %vm805_vm0, %v13023_v11 }
  0x3f   : > { %12054 = vmatprep.mubr.msk.bf16.mxu0 %vm805_vm0, %v13024_v12 }
  0x46   : > { %12055 = vmatmul.mubr.msk.bf16.gmra.mrb[20].mxu0 %vm805_vm0, %v13025_v13 }
  0x47   : > { %12058 = vmatprep.mubr.msk.bf16.mxu0 %vm805_vm0, %v13026_v14 }
  0x4e   : > { %12059 = vmatmul.mubr.msk.bf16.gmra.mrb[24].mxu0 %vm805_vm0, %v13027_v15 }
  0x4f   : > { %12062 = vmatprep.mubr.msk.bf16.mxu0 %vm805_vm0, %v13028_v16 }
  0x56   : > { %12063 = vmatmul.mubr.msk.bf16.gmra.mrb[28].mxu0 %vm805_vm0, %v13029_v17 }
  0x57   : > { %12066 = vmatprep.mubr.msk.bf16.mxu0 %vm805_vm0, %v13030_v18 }
  0x5e   : > { %12067 = vmatmul.mubr.msk.bf16.gmra.mrb[32].mxu0 %vm805_vm0, %v13031_v19 }
  0x5f   : > { %12070 = vmatprep.mubr.msk.bf16.mxu0 %vm805_vm0, %v13032_v20 }
  0x66   : > { %12071 = vmatmul.mubr.msk.bf16.gmra.mrb[36].mxu0 %vm805_vm0, %v13033_v21 }
  0x67   : > { %12074 = vmatprep.mubr.msk.bf16.mxu0 %vm805_vm0, %v13034_v22 }
  0x6e   : > { %12075 = vmatmul.mubr.msk.bf16.gmra.mrb[40].mxu0 %vm805_vm0, %v13035_v23 }
  0x6f   : > { %12078 = vmatprep.mubr.msk.bf16.mxu0 %vm805_vm0, %v13036_v24 }
  0x76   : > { %12079 = vmatmul.mubr.msk.bf16.gmra.mrb[44].mxu0 %vm805_vm0, %v13037_v25 }
  0x77   : > { %12082 = vmatprep.mubr.msk.bf16.mxu0 %vm805_vm0, %v13038_v26 }
  0x7e   : > { %12083 = vmatmul.mubr.msk.bf16.gmra.mrb[48].mxu0 %vm805_vm0, %v13039_v27 }
  0x7f   : > { %12086 = vmatprep.mubr.msk.bf16.mxu0 %vm805_vm0, %v13040_v28 }
  0x86   : > { %12087 = vmatmul.mubr.msk.bf16.gmra.mrb[52].mxu0 %vm805_vm0, %v13041_v29 }
  0x87   : > { %12090 = vmatprep.mubr.msk.bf16.mxu0 %vm805_vm0, %v13042_v30 }
  0x8e   : > { %12091 = vmatmul.mubr.msk.bf16.gmra.mrb[56].mxu0 %vm805_vm0, %v13043_v31 }
  0x8f   : > { %12094 = vmatprep.mubr.msk.bf16.mxu0 %vm805_vm0, %v13044_v32 }
  0x96   : > { %12095 = vmatmul.mubr.msk.bf16.gmra.mrb[60].mxu0 %vm805_vm0, %v13045_v33 }
  0x97   : > { %1790 = vmatprep.mubr.bf16.mxu0 %v13051_v35 }
  0xf1   : > { %v12036_v37 = vpop.f32.mrb[0].mxu0 }
  0xf2   : > { %v945_v38 = vadd.f32 %v12036_v37, %v13847_v36  ;;  %v936_v39 = vpop.f32.mrb[1].mxu0 }
  0xf3   : > { %v937_v40 = vadd.f32 %v13847_v36, %v936_v39  ;;  %v12037_v41 = vpop.f32.mrb[2].mxu0 }
  0xf4   : > { %v948_v42 = vadd.f32 %v12037_v41, %v13847_v36  ;;  %v939_v43 = vpop.f32.mrb[3].mxu0  ;;  %v1193_v45 = vmax.f32 %v945_v38, 0.0 }
  0xf5   : > { %v940_v44 = vadd.f32 %v13847_v36, %v939_v43  ;;  %v1191_v47 = vmax.f32 %v937_v40, 0.0 }
  0xf6   : > { %v1194_v46 = vmax.f32 %v948_v42, 0.0 }
  0xf7   : > { %v1192_v48 = vmax.f32 %v940_v44, 0.0 }
  0xf8   : > { %v13853_v49 = vpack.c.bf16 %v1194_v46, %v1193_v45 }
  0xf9   : > { %v13855_v50 = vpack.c.bf16 %v1192_v48, %v1191_v47  ;;  %v12040_v51 = vpop.f32.mrb[4].mxu0 }
  0xfa   : > { %v961_v52 = vadd.f32 %v12040_v51, %v13847_v36  ;;  %v952_v53 = vpop.f32.mrb[5].mxu0 }
  0xfb   : > { %v953_v54 = vadd.f32 %v13847_v36, %v952_v53  ;;  %v12041_v55 = vpop.f32.mrb[6].mxu0 }
  0xfc   : > { %v964_v56 = vadd.f32 %v12041_v55, %v13847_v36  ;;  %v955_v57 = vpop.f32.mrb[7].mxu0  ;;  %v1197_v59 = vmax.f32 %v961_v52, 0.0 }
  0xfd   : > { %v956_v58 = vadd.f32 %v13847_v36, %v955_v57  ;;  %v1195_v61 = vmax.f32 %v953_v54, 0.0 }
  0xfe   : > { %v1198_v60 = vmax.f32 %v964_v56, 0.0 }
  0xff   : > { %v1196_v62 = vmax.f32 %v956_v58, 0.0 }
 0x100   : > { %v13861_v63 = vpack.c.bf16 %v1198_v60, %v1197_v59 }
 0x101   : > { %v13863_v0 = vpack.c.bf16 %v1196_v62, %v1195_v61  ;;  %v12044_v1 = vpop.f32.mrb[8].mxu0 }
 0x102   : > { %v977_v2 = vadd.f32 %v12044_v1, %v13847_v36  ;;  %v968_v3 = vpop.f32.mrb[9].mxu0 }
 0x103   : > { %v969_v4 = vadd.f32 %v13847_v36, %v968_v3  ;;  %v12045_v5 = vpop.f32.mrb[10].mxu0 }
 0x104   : > { %v980_v6 = vadd.f32 %v12045_v5, %v13847_v36  ;;  %v971_v7 = vpop.f32.mrb[11].mxu0  ;;  %v1201_v9 = vmax.f32 %v977_v2, 0.0 }
 0x105   : > { %v972_v8 = vadd.f32 %v13847_v36, %v971_v7  ;;  %v1199_v11 = vmax.f32 %v969_v4, 0.0 }
 0x106   : > { %v1202_v10 = vmax.f32 %v980_v6, 0.0 }
 0x107   : > { %v1200_v12 = vmax.f32 %v972_v8, 0.0 }
 0x108   : > { %v13869_v13 = vpack.c.bf16 %v1202_v10, %v1201_v9 }
 0x109   : > { %v13871_v14 = vpack.c.bf16 %v1200_v12, %v1199_v11  ;;  %v12048_v15 = vpop.f32.mrb[12].mxu0 }
 0x10a   : > { %v993_v16 = vadd.f32 %v12048_v15, %v13847_v36  ;;  %v984_v17 = vpop.f32.mrb[13].mxu0 }
 0x10b   : > { %v985_v18 = vadd.f32 %v13847_v36, %v984_v17  ;;  %v12049_v19 = vpop.f32.mrb[14].mxu0 }
 0x10c   : > { %v996_v20 = vadd.f32 %v12049_v19, %v13847_v36  ;;  %v987_v21 = vpop.f32.mrb[15].mxu0  ;;  %v1205_v23 = vmax.f32 %v993_v16, 0.0 }
 0x10d   : > { %v988_v22 = vadd.f32 %v13847_v36, %v987_v21  ;;  %v1203_v25 = vmax.f32 %v985_v18, 0.0 }
 0x10e   : > { %v1206_v24 = vmax.f32 %v996_v20, 0.0 }
 0x10f   : > { %v1204_v26 = vmax.f32 %v988_v22, 0.0 }
 0x110   : > { %v13877_v27 = vpack.c.bf16 %v1206_v24, %v1205_v23 }
 0x111   : > { %v13879_v28 = vpack.c.bf16 %v1204_v26, %v1203_v25  ;;  %v12052_v29 = vpop.f32.mrb[16].mxu0 }
 0x112   : > { %17488 = vst [vmem:[#allocation2_spill] sm:$0xff] %v13877_v27  ;;  %v1009_v30 = vadd.f32 %v12052_v29, %v13847_v36  ;;  %v1000_v31 = vpop.f32.mrb[17].mxu0 }
 0x113   : > { %v1001_v32 = vadd.f32 %v13847_v36, %v1000_v31  ;;  %v12053_v33 = vpop.f32.mrb[18].mxu0  ;;  %v13049_v31 = vld [vmem:[%s17448_s3 + $0x80] ss:$8 sps:$4 sm:$0xff]  }
 0x114   : > { %v1012_v34 = vadd.f32 %v12053_v33, %v13847_v36  ;;  %v1003_v35 = vpop.f32.mrb[19].mxu0  ;;  %v1209_v38 = vmax.f32 %v1009_v30, 0.0  ;;  %v13046_v30 = vld [vmem:[%s17448_s3] ss:$8 sps:$4 sm:$0xff]   ;;  %v13055_v33 = vld [vmem:[%s17448_s3 + $0x94] ss:$8 sps:$4 sm:$0xff]  }
 0x115   : > { %v1004_v37 = vadd.f32 %v13847_v36, %v1003_v35  ;;  %v1207_v40 = vmax.f32 %v1001_v32, 0.0  ;;  %v13052_v32 = vld [vmem:[%s17448_s3 + $0x14] ss:$8 sps:$4 sm:$0xff]   ;;  %v13057_v35 = vld [vmem:[%s17448_s3 + $0x90] ss:$8 sps:$4 sm:$0xff]  }
 0x116   : > { %v1210_v39 = vmax.f32 %v1012_v34, 0.0  ;;  %v13054_v34 = vld [vmem:[%s17448_s3 + $0x10] ss:$8 sps:$4 sm:$0xff]  }
 0x117   : > { %v1208_v41 = vmax.f32 %v1004_v37, 0.0  ;;  %v13058_v37 = vld [vmem:[%s17448_s3 + $0x24] ss:$8 sps:$4 sm:$0xff]  }
 0x118   : > { %v13885_v42 = vpack.c.bf16 %v1210_v39, %v1209_v38  ;;  %v13061_v38 = vld [vmem:[%s17448_s3 + $0xa4] ss:$8 sps:$4 sm:$0xff]   ;;  %v13060_v39 = vld [vmem:[%s17448_s3 + $0x20] ss:$8 sps:$4 sm:$0xff]  }
 0x119   : > { %v13887_v43 = vpack.c.bf16 %v1208_v41, %v1207_v40  ;;  %v12056_v44 = vpop.f32.mrb[20].mxu0  ;;  %v13063_v40 = vld [vmem:[%s17448_s3 + $0xa0] ss:$8 sps:$4 sm:$0xff]   ;;  %v13064_v41 = vld [vmem:[%s17448_s3 + $0x34] ss:$8 sps:$4 sm:$0xff]  }
 0x11a   : > { %v1025_v45 = vadd.f32 %v12056_v44, %v13847_v36  ;;  %v1016_v46 = vpop.f32.mrb[21].mxu0  ;;  %v13067_v44 = vld [vmem:[%s17448_s3 + $0xb4] ss:$8 sps:$4 sm:$0xff]  }
 0x11b   : > { %v1017_v47 = vadd.f32 %v13847_v36, %v1016_v46  ;;  %v12057_v48 = vpop.f32.mrb[22].mxu0  ;;  %10998 = vmatprep.subr.bf16.mxu1 %v13887_v43  ;;  %11090 = vmatprep.subr.bf16.mxu0 %v13887_v43  ;;  %v13069_v46 = vld [vmem:[%s17448_s3 + $0xb0] ss:$8 sps:$4 sm:$0xff]  }
 0x11c   : > { %v1028_v51 = vadd.f32 %v12057_v48, %v13847_v36  ;;  %v1019_v52 = vpop.f32.mrb[23].mxu0  ;;  %10999 = vmatpush3.bf16.msra.mxu1 %v13855_v50  ;;  %11091 = vmatpush3.bf16.msra.mxu0 %v13855_v50  ;;  %v1213_v54 = vmax.f32 %v1025_v45, 0.0  ;;  %v13066_v45 = vld [vmem:[%s17448_s3 + $0x30] ss:$8 sps:$4 sm:$0xff]   ;;  %v13075_v48 = vld [vmem:[%s17448_s3 + $0x104] ss:$8 sps:$4 sm:$0xff]  }
 0x11d   : > { %v1020_v53 = vadd.f32 %v13847_v36, %v1019_v52  ;;  %11000 = vmatprep.subr.bf16.mxu1 %v13885_v42  ;;  %11092 = vmatprep.subr.bf16.mxu0 %v13885_v42  ;;  %v1211_v56 = vmax.f32 %v1017_v47, 0.0  ;;  %v13072_v47 = vld [vmem:[%s17448_s3 + $0x44] ss:$8 sps:$4 sm:$0xff]   ;;  %v13073_v52 = vld [vmem:[%s17448_s3 + $0x100] ss:$8 sps:$4 sm:$0xff]  }
 0x11e   : > { %v1214_v55 = vmax.f32 %v1028_v51, 0.0  ;;  %v13070_v51 = vld [vmem:[%s17448_s3 + $0x40] ss:$8 sps:$4 sm:$0xff]  }
 0x11f   : > { %v1212_v57 = vmax.f32 %v1020_v53, 0.0  ;;  %v13076_v53 = vld [vmem:[%s17448_s3 + $0x54] ss:$8 sps:$4 sm:$0xff]  }
 0x120   : > { %v13899_v58 = vpack.c.bf16 %v1214_v55, %v1213_v54  ;;  %11001 = vmatpush3.bf16.msra.mxu1 %v13853_v49  ;;  %11093 = vmatpush3.bf16.msra.mxu0 %v13853_v49  ;;  %v13079_v54 = vld [vmem:[%s17448_s3 + $0x114] ss:$8 sps:$4 sm:$0xff]   ;;  %v13078_v55 = vld [vmem:[%s17448_s3 + $0x50] ss:$8 sps:$4 sm:$0xff]  }
 0x121   : > { %v13903_v59 = vpack.c.bf16 %v1212_v57, %v1211_v56  ;;  %v12060_v60 = vpop.f32.mrb[24].mxu0  ;;  %v13081_v56 = vld [vmem:[%s17448_s3 + $0x110] ss:$8 sps:$4 sm:$0xff]   ;;  %v13082_v57 = vld [vmem:[%s17448_s3 + $0x64] ss:$8 sps:$4 sm:$0xff]  }
 0x122   : > { %v1041_v61 = vadd.f32 %v12060_v60, %v13847_v36  ;;  %v1032_v62 = vpop.f32.mrb[25].mxu0  ;;  %v13085_v60 = vld [vmem:[%s17448_s3 + $0x124] ss:$8 sps:$4 sm:$0xff]  }
 0x123   : > { %v1033_v1 = vadd.f32 %v13847_v36, %v1032_v62  ;;  %v12061_v2 = vpop.f32.mrb[26].mxu0  ;;  %11002 = vmatprep.subr.bf16.mxu1 %v13903_v59  ;;  %11094 = vmatprep.subr.bf16.mxu0 %v13903_v59  ;;  %v13087_v62 = vld [vmem:[%s17448_s3 + $0x120] ss:$8 sps:$4 sm:$0xff]  }
 0x124   : > { %v1044_v3 = vadd.f32 %v12061_v2, %v13847_v36  ;;  %v1035_v4 = vpop.f32.mrb[27].mxu0  ;;  %11003 = vmatpush3.bf16.msra.mxu1 %v13863_v0  ;;  %11095 = vmatpush3.bf16.msra.mxu0 %v13863_v0  ;;  %v1217_v6 = vmax.f32 %v1041_v61, 0.0  ;;  %v13084_v61 = vld [vmem:[%s17448_s3 + $0x60] ss:$8 sps:$4 sm:$0xff]   ;;  %v13091_v2 = vld [vmem:[%s17448_s3 + $0x134] ss:$8 sps:$4 sm:$0xff]  }
 0x125   : > { %v1036_v5 = vadd.f32 %v13847_v36, %v1035_v4  ;;  %11004 = vmatprep.subr.bf16.mxu1 %v13899_v58  ;;  %11096 = vmatprep.subr.bf16.mxu0 %v13899_v58  ;;  %v1215_v8 = vmax.f32 %v1033_v1, 0.0  ;;  %v13088_v1 = vld [vmem:[%s17448_s3 + $0x74] ss:$8 sps:$4 sm:$0xff]   ;;  %v13093_v4 = vld [vmem:[%s17448_s3 + $0x130] ss:$8 sps:$4 sm:$0xff]  }
 0x126   : > { %v1218_v7 = vmax.f32 %v1044_v3, 0.0  ;;  %v13090_v3 = vld [vmem:[%s17448_s3 + $0x70] ss:$8 sps:$4 sm:$0xff]  }
 0x127   : > { %v1216_v9 = vmax.f32 %v1036_v5, 0.0  ;;  %v13096_v5 = vld [vmem:[%s17448_s3 + $0x144] ss:$8 sps:$4 sm:$0xff]  }
 0x128   : > { %v13915_v10 = vpack.c.bf16 %v1218_v7, %v1217_v6  ;;  %11005 = vmatpush3.bf16.msra.mxu1 %v13861_v63  ;;  %11097 = vmatpush3.bf16.msra.mxu0 %v13861_v63  ;;  %v13094_v6 = vld [vmem:[%s17448_s3 + $0x140] ss:$8 sps:$4 sm:$0xff]   ;;  %v13097_v7 = vld [vmem:[%s17448_s3 + $0x154] ss:$8 sps:$4 sm:$0xff]  }
 0x129   : > { %v13919_v11 = vpack.c.bf16 %v1216_v9, %v1215_v8  ;;  %v12064_v12 = vpop.f32.mrb[28].mxu0  ;;  %v13099_v8 = vld [vmem:[%s17448_s3 + $0x150] ss:$8 sps:$4 sm:$0xff]   ;;  %v13100_v9 = vld [vmem:[%s17448_s3 + $0x164] ss:$8 sps:$4 sm:$0xff]  }
 0x12a   : > { %v1057_v15 = vadd.f32 %v12064_v12, %v13847_v36  ;;  %v1048_v16 = vpop.f32.mrb[29].mxu0  ;;  %v13102_v12 = vld [vmem:[%s17448_s3 + $0x160] ss:$8 sps:$4 sm:$0xff]  }
 0x12b   : > { %v1049_v17 = vadd.f32 %v13847_v36, %v1048_v16  ;;  %v12065_v18 = vpop.f32.mrb[30].mxu0  ;;  %11006 = vmatprep.subr.bf16.mxu1 %v13919_v11  ;;  %11098 = vmatprep.subr.bf16.mxu0 %v13919_v11  ;;  %v13105_v16 = vld [vmem:[%s17448_s3 + $0x170] ss:$8 sps:$4 sm:$0xff]  }
 0x12c   : > { %v1060_v19 = vadd.f32 %v12065_v18, %v13847_v36  ;;  %v1051_v20 = vpop.f32.mrb[31].mxu0  ;;  %11007 = vmatpush3.bf16.msra.mxu1 %v13871_v14  ;;  %11099 = vmatpush3.bf16.msra.mxu0 %v13871_v14  ;;  %v1221_v22 = vmax.f32 %v1057_v15, 0.0  ;;  %v13103_v15 = vld [vmem:[%s17448_s3 + $0x174] ss:$8 sps:$4 sm:$0xff]  }
 0x12d   : > { %v1052_v21 = vadd.f32 %v13847_v36, %v1051_v20  ;;  %11008 = vmatprep.subr.bf16.mxu1 %v13915_v10  ;;  %11100 = vmatprep.subr.bf16.mxu0 %v13915_v10  ;;  %v1219_v24 = vmax.f32 %v1049_v17, 0.0  ;;  %v13108_v17 = vld [vmem:[%s17448_s3 + $0x184] ss:$8 sps:$4 sm:$0xff]  }
 0x12e   : > { %v1222_v23 = vmax.f32 %v1060_v19, 0.0 }
 0x12f   : > { %v1220_v25 = vmax.f32 %v1052_v21, 0.0 }
 0x130   : > { %v13931_v26 = vpack.c.bf16 %v1222_v23, %v1221_v22  ;;  %11009 = vmatpush3.bf16.msra.mxu1 %v13869_v13  ;;  %11101 = vmatpush3.bf16.msra.mxu0 %v13869_v13 }
 0x131   : > { %v13935_v29 = vpack.c.bf16 %v1220_v25, %v1219_v24  ;;  %v12068_v18 = vpop.f32.mrb[32].mxu0  ;;  %v13106_v24 = vld [vmem:[%s17448_s3 + $0x180] ss:$8 sps:$4 sm:$0xff]  }
 0x132   : > { %v1073_v19 = vadd.f32 %v12068_v18, %v13847_v36  ;;  %v1064_v20 = vpop.f32.mrb[33].mxu0 }
 0x133   : > { %11010 = vmatprep.subr.bf16.mxu1 %v13935_v29  ;;  %11102 = vmatprep.subr.bf16.mxu0 %v13935_v29  ;;  %v12069_v21 = vpop.f32.mrb[34].mxu0  ;;  %v1065_v22 = vadd.f32 %v13847_v36, %v1064_v20 }
 0x134   : > { %11011 = vmatpush3.bf16.msra.mxu1 %v13879_v28  ;;  %11103 = vmatpush3.bf16.msra.mxu0 %v13879_v28  ;;  %v1067_v23 = vpop.f32.mrb[35].mxu0  ;;  %v1225_v25 = vmax.f32 %v1073_v19, 0.0 }
 0x135   : > { %11012 = vmatprep.subr.bf16.mxu1 %v13931_v26  ;;  %11104 = vmatprep.subr.bf16.mxu0 %v13931_v26 }
 0x138   : > { %11013 = vmatpush3.bf16.msra.mxu1 %v13877_v27  ;;  %11105 = vmatpush3.bf16.msra.mxu0 %v13877_v27 }
 0x139   : > { %11038 = vmatprep.subr.bf16.mxu1 %v13887_v43  ;;  %11182 = vmatprep.subr.bf16.mxu0 %v13887_v43 }
 0x13b   : > { %1368 = vmatmul.mubr.bf16.vlgmr.msra.gmra.mrb[0].mxu1 %v13046_v30  ;;  %1791 = vmatmul.mubr.bf16.vlgmr.msra.gmra.mrb[64].mxu0 %v13049_v31  ;;  %v1076_v30 = vadd.f32 %v12069_v21, %v13847_v36  ;;  %v1068_v31 = vadd.f32 %v13847_v36, %v1067_v23 }
 0x13c   : > { %11039 = vmatpush3.bf16.msra.mxu1 %v13855_v50  ;;  %11183 = vmatpush3.bf16.msra.mxu0 %v13855_v50 }
 0x13d   : > { %11040 = vmatprep.subr.bf16.mxu1 %v13885_v42  ;;  %11184 = vmatprep.subr.bf16.mxu0 %v13885_v42 }
 0x13e   : > { %1375 = vmatprep.mubr.bf16.mxu1 %v13052_v32  ;;  %1798 = vmatprep.mubr.bf16.mxu0 %v13055_v33  ;;  %v1223_v32 = vmax.f32 %v1065_v22, 0.0  ;;  %v1226_v33 = vmax.f32 %v1076_v30, 0.0 }
 0x140   : > { %11041 = vmatpush3.bf16.msra.mxu1 %v13853_v49  ;;  %11185 = vmatpush3.bf16.msra.mxu0 %v13853_v49 }
 0x141   : > { %11042 = vmatprep.subr.bf16.mxu1 %v13903_v59  ;;  %11186 = vmatprep.subr.bf16.mxu0 %v13903_v59 }
 0x143   : > { %1376 = vmatmul.mubr.bf16.gmra.mrb[4].mxu1 %v13054_v34  ;;  %1799 = vmatmul.mubr.bf16.gmra.mrb[68].mxu0 %v13057_v35  ;;  %v1224_v34 = vmax.f32 %v1068_v31, 0.0  ;;  %v14134_v35 = vpack.c.bf16 %v1226_v33, %v1225_v25  ;;  %v13109_v33 = vld [vmem:[%s17449_s4 + $0x10] sm:$0xff]  }
 0x144   : > { %11043 = vmatpush3.bf16.msra.mxu1 %v13863_v0  ;;  %11187 = vmatpush3.bf16.msra.mxu0 %v13863_v0 }
 0x145   : > { %11044 = vmatprep.subr.bf16.mxu1 %v13899_v58  ;;  %11188 = vmatprep.subr.bf16.mxu0 %v13899_v58  ;;  %17489 = vst [vmem:[#allocation3_spill] sm:$0xff] %v14134_v35 }
 0x146   : > { %1383 = vmatprep.mubr.bf16.mxu1 %v13058_v37  ;;  %1806 = vmatprep.mubr.bf16.mxu0 %v13061_v38  ;;  %v14136_v37 = vpack.c.bf16 %v1224_v34, %v1223_v32  ;;  %v12072_v38 = vpop.f32.mrb[36].mxu0 }
 0x148   : > { %11045 = vmatpush3.bf16.msra.mxu1 %v13861_v63  ;;  %11189 = vmatpush3.bf16.msra.mxu0 %v13861_v63  ;;  %17490 = vst [vmem:[#allocation4_spill] sm:$0xff] %v14136_v37 }
 0x149   : > { %11046 = vmatprep.subr.bf16.mxu1 %v13919_v11  ;;  %11190 = vmatprep.subr.bf16.mxu0 %v13919_v11 }
 0x14b   : > { %1384 = vmatmul.mubr.bf16.gmra.mrb[8].mxu1 %v13060_v39  ;;  %1807 = vmatmul.mubr.bf16.gmra.mrb[72].mxu0 %v13063_v40  ;;  %v1089_v39 = vadd.f32 %v12072_v38, %v13847_v36  ;;  %v1080_v40 = vpop.f32.mrb[37].mxu0 }
 0x14c   : > { %11047 = vmatpush3.bf16.msra.mxu1 %v13871_v14  ;;  %11191 = vmatpush3.bf16.msra.mxu0 %v13871_v14 }
 0x14d   : > { %11048 = vmatprep.subr.bf16.mxu1 %v13915_v10  ;;  %11192 = vmatprep.subr.bf16.mxu0 %v13915_v10 }
 0x14e   : > { %1391 = vmatprep.mubr.bf16.mxu1 %v13064_v41  ;;  %1814 = vmatprep.mubr.bf16.mxu0 %v13067_v44  ;;  %v12073_v41 = vpop.f32.mrb[38].mxu0  ;;  %v1081_v44 = vadd.f32 %v13847_v36, %v1080_v40 }
 0x150   : > { %11049 = vmatpush3.bf16.msra.mxu1 %v13869_v13  ;;  %11193 = vmatpush3.bf16.msra.mxu0 %v13869_v13 }
 0x151   : > { %11050 = vmatprep.subr.bf16.mxu1 %v13935_v29  ;;  %11194 = vmatprep.subr.bf16.mxu0 %v13935_v29 }
 0x153   : > { %1392 = vmatmul.mubr.bf16.gmra.mrb[12].mxu1 %v13066_v45  ;;  %1815 = vmatmul.mubr.bf16.gmra.mrb[76].mxu0 %v13069_v46  ;;  %v1083_v45 = vpop.f32.mrb[39].mxu0  ;;  %v1229_v46 = vmax.f32 %v1089_v39, 0.0 }
 0x154   : > { %11051 = vmatpush3.bf16.msra.mxu1 %v13879_v28  ;;  %11195 = vmatpush3.bf16.msra.mxu0 %v13879_v28 }
 0x155   : > { %11052 = vmatprep.subr.bf16.mxu1 %v13931_v26  ;;  %11196 = vmatprep.subr.bf16.mxu0 %v13931_v26 }
 0x156   : > { %1489 = vmatprep.mubr.bf16.mxu1 %v13072_v47  ;;  %2230 = vmatprep.mubr.bf16.mxu0 %v13075_v48  ;;  %v1092_v47 = vadd.f32 %v12073_v41, %v13847_v36  ;;  %v1084_v48 = vadd.f32 %v13847_v36, %v1083_v45 }
 0x158   : > { %11053 = vmatpush3.bf16.msra.mxu1 %v13877_v27  ;;  %11197 = vmatpush3.bf16.msra.mxu0 %v13877_v27 }
 0x159   : > { %11228 = vmatprep.subr.bf16.mxu0 %v13887_v43  ;;  %12098 = vmatprep.subr.bf16.mxu1 %v13109_v33 }
 0x15b   : > { %1490 = vmatmul.mubr.bf16.vlgmr.msra.gmra.mrb[16].mxu1 %v13070_v51  ;;  %2231 = vmatmul.mubr.bf16.vlgmr.msra.gmra.mrb[80].mxu0 %v13073_v52  ;;  %v1227_v51 = vmax.f32 %v1081_v44, 0.0  ;;  %v1230_v52 = vmax.f32 %v1092_v47, 0.0 }
 0x15c   : > { %11229 = vmatpush3.bf16.msra.mxu0 %v13855_v50  ;;  %1497 = vmatprep.mubr.bf16.mxu1 %v13076_v53  ;;  %v1228_v53 = vmax.f32 %v1084_v48, 0.0 }
 0x15d   : > { %11230 = vmatprep.subr.bf16.mxu0 %v13885_v42  ;;  %2238 = vmatprep.mubr.bf16.mxu0 %v13079_v54  ;;  %v14146_v54 = vpack.c.bf16 %v1230_v52, %v1229_v46  ;;  %v13110_v46 = vld [vmem:[%s17449_s4 + $0x18] sm:$0xff]  }
 0x15e   : > { %12099 = vmatpush3.bf16.msra.mxu1 %v13109_v33 }
 0x15f   : > { %17491 = vst [vmem:[#allocation5_spill] sm:$0xff] %v14146_v54  ;;  %12100 = vmatprep.subr.bf16.mxu1 %v13110_v46 }
 0x160   : > { %11231 = vmatpush3.bf16.msra.mxu0 %v13853_v49 }
 0x161   : > { %11232 = vmatprep.subr.bf16.mxu0 %v13903_v59 }
 0x162   : > { %12101 = vmatpush3.bf16.msra.mxu1 %v13110_v46 }
 0x163   : > { %1498 = vmatmul.mubr.bf16.gmra.mrb[20].mxu1 %v13078_v55  ;;  %2239 = vmatmul.mubr.bf16.gmra.mrb[84].mxu0 %v13081_v56  ;;  %v14148_v55 = vpack.c.bf16 %v1228_v53, %v1227_v51  ;;  %v12076_v56 = vpop.f32.mrb[40].mxu0 }
 0x164   : > { %11233 = vmatpush3.bf16.msra.mxu0 %v13863_v0  ;;  %1505 = vmatprep.mubr.bf16.mxu1 %v13082_v57  ;;  %v1105_v57 = vadd.f32 %v12076_v56, %v13847_v36 }
 0x165   : > { %11234 = vmatprep.subr.bf16.mxu0 %v13899_v58  ;;  %2246 = vmatprep.mubr.bf16.mxu0 %v13085_v60  ;;  %17492 = vst [vmem:[#allocation6_spill] sm:$0xff] %v14148_v55  ;;  %v1096_v60 = vpop.f32.mrb[41].mxu0 }
 0x168   : > { %11235 = vmatpush3.bf16.msra.mxu0 %v13861_v63 }
 0x169   : > { %11236 = vmatprep.subr.bf16.mxu0 %v13919_v11 }
 0x16b   : > { %1506 = vmatmul.mubr.bf16.gmra.mrb[24].mxu1 %v13084_v61  ;;  %2247 = vmatmul.mubr.bf16.gmra.mrb[88].mxu0 %v13087_v62  ;;  %v12077_v61 = vpop.f32.mrb[42].mxu0  ;;  %v1097_v62 = vadd.f32 %v13847_v36, %v1096_v60 }
 0x16c   : > { %11237 = vmatpush3.bf16.msra.mxu0 %v13871_v14  ;;  %1513 = vmatprep.mubr.bf16.mxu1 %v13088_v1  ;;  %v1099_v1 = vpop.f32.mrb[43].mxu0 }
 0x16d   : > { %11238 = vmatprep.subr.bf16.mxu0 %v13915_v10  ;;  %2254 = vmatprep.mubr.bf16.mxu0 %v13091_v2  ;;  %v1233_v2 = vmax.f32 %v1105_v57, 0.0 }
 0x170   : > { %11239 = vmatpush3.bf16.msra.mxu0 %v13869_v13 }
 0x171   : > { %11240 = vmatprep.subr.bf16.mxu0 %v13935_v29 }
 0x173   : > { %1514 = vmatmul.mubr.bf16.gmra.mrb[28].mxu1 %v13090_v3  ;;  %2255 = vmatmul.mubr.bf16.gmra.mrb[92].mxu0 %v13093_v4  ;;  %v1108_v3 = vadd.f32 %v12077_v61, %v13847_v36  ;;  %v1100_v4 = vadd.f32 %v13847_v36, %v1099_v1 }
 0x174   : > { %11241 = vmatpush3.bf16.msra.mxu0 %v13879_v28  ;;  %2450 = vmatprep.mubr.bf16.mxu0 %v13096_v5  ;;  %v1231_v5 = vmax.f32 %v1097_v62, 0.0 }
 0x175   : > { %11242 = vmatprep.subr.bf16.mxu0 %v13931_v26 }
 0x178   : > { %11243 = vmatpush3.bf16.msra.mxu0 %v13877_v27 }
 0x179   : > { %11274 = vmatprep.subr.bf16.mxu0 %v13887_v43 }
 0x17b   : > { %2451 = vmatmul.mubr.bf16.vlgmr.msra.gmra.mrb[96].mxu0 %v13094_v6  ;;  %v1234_v6 = vmax.f32 %v1108_v3, 0.0 }
 0x17c   : > { %11275 = vmatpush3.bf16.msra.mxu0 %v13855_v50  ;;  %2458 = vmatprep.mubr.bf16.mxu0 %v13097_v7  ;;  %v1232_v7 = vmax.f32 %v1100_v4, 0.0 }
 0x17d   : > { %11276 = vmatprep.subr.bf16.mxu0 %v13885_v42 }
 0x180   : > { %11277 = vmatpush3.bf16.msra.mxu0 %v13853_v49 }
 0x181   : > { %11278 = vmatprep.subr.bf16.mxu0 %v13903_v59 }
 0x183   : > { %2459 = vmatmul.mubr.bf16.gmra.mrb[100].mxu0 %v13099_v8  ;;  %v14158_v8 = vpack.c.bf16 %v1234_v6, %v1233_v2 }
 0x184   : > { %11279 = vmatpush3.bf16.msra.mxu0 %v13863_v0  ;;  %2466 = vmatprep.mubr.bf16.mxu0 %v13100_v9  ;;  %v14160_v9 = vpack.c.bf16 %v1232_v7, %v1231_v5 }
 0x185   : > { %11280 = vmatprep.subr.bf16.mxu0 %v13899_v58  ;;  %17493 = vst [vmem:[#allocation7_spill] sm:$0xff] %v14158_v8 }
 0x186   : > { %17494 = vst [vmem:[#allocation8_spill] sm:$0xff] %v14160_v9 }
 0x188   : > { %11281 = vmatpush3.bf16.msra.mxu0 %v13861_v63 }
 0x189   : > { %11282 = vmatprep.subr.bf16.mxu0 %v13919_v11 }
 0x18b   : > { %2467 = vmatmul.mubr.bf16.gmra.mrb[104].mxu0 %v13102_v12  ;;  %v12080_v12 = vpop.f32.mrb[44].mxu0 }
 0x18c   : > { %11283 = vmatpush3.bf16.msra.mxu0 %v13871_v14  ;;  %2474 = vmatprep.mubr.bf16.mxu0 %v13103_v15  ;;  %v1112_v15 = vpop.f32.mrb[45].mxu0 }
 0x18d   : > { %11284 = vmatprep.subr.bf16.mxu0 %v13915_v10  ;;  %v1113_v19 = vadd.f32 %v13847_v36, %v1112_v15 }
 0x18f   : > { %v1235_v23 = vmax.f32 %v1113_v19, 0.0 }
 0x190   : > { %11285 = vmatpush3.bf16.msra.mxu0 %v13869_v13 }
 0x191   : > { %11286 = vmatprep.subr.bf16.mxu0 %v13935_v29 }
 0x193   : > { %2475 = vmatmul.mubr.bf16.gmra.mrb[108].mxu0 %v13105_v16  ;;  %v12081_v16 = vpop.f32.mrb[46].mxu0 }
 0x194   : > { %11287 = vmatpush3.bf16.msra.mxu0 %v13879_v28  ;;  %2670 = vmatprep.mubr.bf16.mxu0 %v13108_v17  ;;  %v1121_v17 = vadd.f32 %v12080_v12, %v13847_v36  ;;  %v1115_v18 = vpop.f32.mrb[47].mxu0  ;;  %v1124_v20 = vadd.f32 %v12081_v16, %v13847_v36 }
 0x195   : > { %11288 = vmatprep.subr.bf16.mxu0 %v13931_v26  ;;  %v1116_v21 = vadd.f32 %v13847_v36, %v1115_v18  ;;  %v12084_v32 = vpop.f32.mrb[48].mxu0 }
 0x196   : > { %v1237_v22 = vmax.f32 %v1121_v17, 0.0  ;;  %v1128_v34 = vpop.f32.mrb[49].mxu0  ;;  %v1137_v40 = vadd.f32 %v12084_v32, %v13847_v36 }
 0x197   : > { %v1236_v25 = vmax.f32 %v1116_v21, 0.0  ;;  %v12085_v38 = vpop.f32.mrb[50].mxu0  ;;  %v1129_v41 = vadd.f32 %v13847_v36, %v1128_v34 }
 0x198   : > { %11289 = vmatpush3.bf16.msra.mxu0 %v13877_v27  ;;  %v1131_v39 = vpop.f32.mrb[51].mxu0  ;;  %v1140_v44 = vadd.f32 %v12085_v38, %v13847_v36  ;;  %v1241_v47 = vmax.f32 %v1137_v40, 0.0  ;;  %v14206_v38 = vld [vmem:[%s17449_s4] sm:$0xff]  }
 0x199   : > { %11320 = vmatprep.subr.bf16.mxu0 %v13887_v43  ;;  %v14172_v31 = vpack.c.bf16 %v1236_v25, %v1235_v23  ;;  %v1132_v45 = vadd.f32 %v13847_v36, %v1131_v39  ;;  %v1239_v48 = vmax.f32 %v1129_v41, 0.0  ;;  %v12088_v57 = vpop.f32.mrb[52].mxu0  ;;  %12110 = vmatprep.subr.bf16.mxu1 %v14206_v38 }
 0x19a   : > { %v1242_v51 = vmax.f32 %v1140_v44, 0.0  ;;  %v1144_v60 = vpop.f32.mrb[53].mxu0  ;;  %v1153_v1 = vadd.f32 %v12088_v57, %v13847_v36 }
 0x19b   : > { %2671 = vmatmul.mubr.bf16.vlgmr.msra.gmra.mrb[112].mxu0 %v13106_v24  ;;  %v1238_v24 = vmax.f32 %v1124_v20, 0.0  ;;  %17496 = vst [vmem:[#allocation10_spill] sm:$0xff] %v14172_v31  ;;  %v1240_v52 = vmax.f32 %v1132_v45, 0.0  ;;  %v12089_v61 = vpop.f32.mrb[54].mxu0  ;;  %v1145_v2 = vadd.f32 %v13847_v36, %v1144_v60  ;;  %v13112_v31 = vld [vmem:[%s17449_s4 + $0x8] sm:$0xff]  }
 0x19c   : > { %11321 = vmatpush3.bf16.msra.mxu0 %v13855_v50  ;;  %v14187_v53 = vpack.c.bf16 %v1242_v51, %v1241_v47  ;;  %v1147_v62 = vpop.f32.mrb[55].mxu0  ;;  %v1156_v3 = vadd.f32 %v12089_v61, %v13847_v36  ;;  %v1245_v5 = vmax.f32 %v1153_v1, 0.0 }
 0x19d   : > { %11322 = vmatprep.subr.bf16.mxu0 %v13885_v42  ;;  %v14170_v30 = vpack.c.bf16 %v1238_v24, %v1237_v22  ;;  %v14189_v56 = vpack.c.bf16 %v1240_v52, %v1239_v48  ;;  %v1148_v4 = vadd.f32 %v13847_v36, %v1147_v62  ;;  %v1243_v6 = vmax.f32 %v1145_v2, 0.0  ;;  %v12092_v17 = vpop.f32.mrb[56].mxu0 }
 0x19e   : > { %17497 = vst [vmem:[#allocation11_spill] sm:$0xff] %v14187_v53  ;;  %v1246_v7 = vmax.f32 %v1156_v3, 0.0  ;;  %v1160_v18 = vpop.f32.mrb[57].mxu0  ;;  %v1169_v21 = vadd.f32 %v12092_v17, %v13847_v36 }
 0x19f   : > { %17495 = vst [vmem:[#allocation9_spill] sm:$0xff] %v14170_v30  ;;  %17498 = vst [vmem:[#allocation12_spill] sm:$0xff] %v14189_v56  ;;  %v1244_v12 = vmax.f32 %v1148_v4, 0.0  ;;  %v12093_v19 = vpop.f32.mrb[58].mxu0  ;;  %v1161_v22 = vadd.f32 %v13847_v36, %v1160_v18 }
 0x1a0   : > { %11323 = vmatpush3.bf16.msra.mxu0 %v13853_v49  ;;  %v14195_v15 = vpack.c.bf16 %v1246_v7, %v1245_v5  ;;  %v1163_v20 = vpop.f32.mrb[59].mxu0  ;;  %v1172_v23 = vadd.f32 %v12093_v19, %v13847_v36  ;;  %v1249_v25 = vmax.f32 %v1169_v21, 0.0 }
 0x1a1   : > { %11324 = vmatprep.subr.bf16.mxu0 %v13903_v59  ;;  %v14197_v16 = vpack.c.bf16 %v1244_v12, %v1243_v6  ;;  %v1164_v24 = vadd.f32 %v13847_v36, %v1163_v20  ;;  %v1247_v32 = vmax.f32 %v1161_v22, 0.0  ;;  %v12096_v41 = vpop.f32.mrb[60].mxu0 }
 0x1a2   : > { %17499 = vst [vmem:[#allocation13_spill] sm:$0xff] %v14195_v15  ;;  %v1250_v33 = vmax.f32 %v1172_v23, 0.0  ;;  %v1176_v44 = vpop.f32.mrb[61].mxu0  ;;  %v1185_v46 = vadd.f32 %v12096_v41, %v13847_v36 }
 0x1a3   : > { %17500 = vst [vmem:[#allocation14_spill] sm:$0xff] %v14197_v16  ;;  %v1248_v34 = vmax.f32 %v1164_v24, 0.0  ;;  %v12097_v45 = vpop.f32.mrb[62].mxu0  ;;  %v1177_v48 = vadd.f32 %v13847_v36, %v1176_v44 }
 0x1a4   : > { %11325 = vmatpush3.bf16.msra.mxu0 %v13863_v0  ;;  %v14208_v39 = vpack.c.bf16 %v1250_v33, %v1249_v25  ;;  %v1179_v47 = vpop.f32.mrb[63].mxu0  ;;  %v1188_v51 = vadd.f32 %v12097_v45, %v13847_v36  ;;  %v1253_v57 = vmax.f32 %v1185_v46, 0.0 }
 0x1a5   : > { %11326 = vmatprep.subr.bf16.mxu0 %v13899_v58  ;;  %v14210_v40 = vpack.c.bf16 %v1248_v34, %v1247_v32  ;;  %v1180_v52 = vadd.f32 %v13847_v36, %v1179_v47  ;;  %v1251_v60 = vmax.f32 %v1177_v48, 0.0 }
 0x1a6   : > { %17501 = vst [vmem:[#allocation15_spill] sm:$0xff] %v14208_v39  ;;  %v1254_v61 = vmax.f32 %v1188_v51, 0.0 }
 0x1a7   : > { %17502 = vst [vmem:[#allocation16_spill] sm:$0xff] %v14210_v40  ;;  %v1252_v62 = vmax.f32 %v1180_v52, 0.0 }
 0x1a8   : > { %11327 = vmatpush3.bf16.msra.mxu0 %v13861_v63  ;;  %v14217_v1 = vpack.c.bf16 %v1254_v61, %v1253_v57 }
 0x1a9   : > { %11328 = vmatprep.subr.bf16.mxu0 %v13919_v11  ;;  %v14219_v2 = vpack.c.bf16 %v1252_v62, %v1251_v60  ;;  %v13127_v62 = vld [vmem:[%s17448_s3 + $0x194] ss:$8 sps:$4 sm:$0xff]  }
 0x1aa   : > { %17503 = vst [vmem:[#allocation17_spill] sm:$0xff] %v14217_v1  ;;  %2678 = vmatprep.mubr.bf16.mxu0 %v13127_v62  ;;  %v13136_v1 = vld [vmem:[%s17448_s3 + $0x1c0] ss:$8 sps:$4 sm:$0xff]  }
 0x1ab   : > { %17504 = vst [vmem:[#allocation18_spill] sm:$0xff] %v14219_v2 }
 0x1ac   : > { %11329 = vmatpush3.bf16.msra.mxu0 %v13871_v14 }
 0x1ad   : > { %11330 = vmatprep.subr.bf16.mxu0 %v13915_v10 }
 0x1b0   : > { %11331 = vmatpush3.bf16.msra.mxu0 %v13869_v13 }
 0x1b1   : > { %11332 = vmatprep.subr.bf16.mxu0 %v13935_v29 }
 0x1b4   : > { %11333 = vmatpush3.bf16.msra.mxu0 %v13879_v28 }
 0x1b5   : > { %11334 = vmatprep.subr.bf16.mxu0 %v13931_v26 }
 0x1b8   : > { %11335 = vmatpush3.bf16.msra.mxu0 %v13877_v27 }
 0x20e   : > { %v11014_v3 = vpop.f32.mrb[0].mxu1  ;;  %v11106_v4 = vpop.f32.mrb[64].mxu0 }
 0x20f   : > { %v11015_v5 = vpop.f32.mrb[1].mxu1  ;;  %v11107_v6 = vpop.f32.mrb[65].mxu0 }
 0x210   : > { %v14221_v7 = vadd.f32 %v11015_v5, %v11014_v3  ;;  %v11017_v12 = vpop.f32.mrb[2].mxu1  ;;  %v14223_v17 = vadd.f32 %v11107_v6, %v11106_v4  ;;  %v11109_v18 = vpop.f32.mrb[66].mxu0  ;;  %v13129_v3 = vld [vmem:[%s17448_s3 + $0x190] ss:$8 sps:$4 sm:$0xff]   ;;  %v13130_v6 = vld [vmem:[%s17448_s3 + $0x1a4] ss:$8 sps:$4 sm:$0xff]  }
 0x211   : > { %v11018_v19 = vpop.f32.mrb[3].mxu1  ;;  %v11110_v36 = vpop.f32.mrb[67].mxu0  ;;  %2679 = vmatmul.mubr.bf16.gmra.mrb[116].mxu0 %v13129_v3 }
 0x212   : > { %v14225_v20 = vadd.f32 %v11018_v19, %v11017_v12  ;;  %v14227_v21 = vadd.f32 %v11110_v36, %v11109_v18  ;;  %2686 = vmatprep.mubr.bf16.mxu0 %v13130_v6 }
 0x216   : > { %v11020_v24 = vpop.f32.mrb[4].mxu1  ;;  %v11112_v25 = vpop.f32.mrb[68].mxu0 }
 0x217   : > { %v11021_v32 = vpop.f32.mrb[5].mxu1  ;;  %v11113_v33 = vpop.f32.mrb[69].mxu0 }
 0x218   : > { %v14233_v34 = vadd.f32 %v11021_v32, %v11020_v24  ;;  %v11023_v41 = vpop.f32.mrb[6].mxu1  ;;  %v14235_v44 = vadd.f32 %v11113_v33, %v11112_v25  ;;  %v11115_v45 = vpop.f32.mrb[70].mxu0 }
 0x219   : > { %v11024_v46 = vpop.f32.mrb[7].mxu1  ;;  %v11116_v47 = vpop.f32.mrb[71].mxu0 }
 0x21a   : > { %v14237_v48 = vadd.f32 %v11024_v46, %v11023_v41  ;;  %v14239_v51 = vadd.f32 %v11116_v47, %v11115_v45  ;;  %v13132_v46 = vld [vmem:[%s17448_s3 + $0x1a0] ss:$8 sps:$4 sm:$0xff]  }
 0x21b   : > { %2687 = vmatmul.mubr.bf16.gmra.mrb[120].mxu0 %v13132_v46  ;;  %v13138_v46 = vld [vmem:[%s17448_s3 + $0x1c4] ss:$8 sps:$4 sm:$0xff]  }
 0x21e   : > { %v11026_v60 = vpop.f32.mrb[8].mxu1  ;;  %v11118_v61 = vpop.f32.mrb[72].mxu0 }
 0x21f   : > { %v11027_v4 = vpop.f32.mrb[9].mxu1  ;;  %v11119_v5 = vpop.f32.mrb[73].mxu0 }
 0x220   : > { %v14254_v12 = vadd.f32 %v11027_v4, %v11026_v60  ;;  %v11029_v18 = vpop.f32.mrb[10].mxu1  ;;  %v14256_v19 = vadd.f32 %v11119_v5, %v11118_v61  ;;  %v11121_v36 = vpop.f32.mrb[74].mxu0  ;;  %v13133_v61 = vld [vmem:[%s17448_s3 + $0x1b4] ss:$8 sps:$4 sm:$0xff]  }
 0x221   : > { %v11030_v24 = vpop.f32.mrb[11].mxu1  ;;  %v11122_v25 = vpop.f32.mrb[75].mxu0  ;;  %2694 = vmatprep.mubr.bf16.mxu0 %v13133_v61 }
 0x222   : > { %v14258_v32 = vadd.f32 %v11030_v24, %v11029_v18  ;;  %v14260_v33 = vadd.f32 %v11122_v25, %v11121_v36 }
 0x226   : > { %v11032_v47 = vpop.f32.mrb[12].mxu1  ;;  %v11124_v60 = vpop.f32.mrb[76].mxu0 }
 0x227   : > { %v11033_v62 = vpop.f32.mrb[13].mxu1  ;;  %v11125_v3 = vpop.f32.mrb[77].mxu0 }
 0x228   : > { %v14272_v4 = vadd.f32 %v11033_v62, %v11032_v47  ;;  %v11035_v5 = vpop.f32.mrb[14].mxu1  ;;  %v14274_v6 = vadd.f32 %v11125_v3, %v11124_v60  ;;  %v11127_v18 = vpop.f32.mrb[78].mxu0  ;;  %v13135_v47 = vld [vmem:[%s17448_s3 + $0x1b0] ss:$8 sps:$4 sm:$0xff]  }
 0x229   : > { %v11036_v36 = vpop.f32.mrb[15].mxu1  ;;  %v11128_v24 = vpop.f32.mrb[79].mxu0  ;;  %2695 = vmatmul.mubr.bf16.gmra.mrb[124].mxu0 %v13135_v47  ;;  %v13139_v47 = vld [vmem:[%s17448_s3 + $0x1d4] ss:$8 sps:$4 sm:$0xff]  }
 0x22a   : > { %v14276_v25 = vadd.f32 %v11036_v36, %v11035_v5  ;;  %v14278_v45 = vadd.f32 %v11128_v24, %v11127_v18  ;;  %2890 = vmatprep.mubr.bf16.mxu0 %v13138_v46 }
 0x22e   : > { %v11054_v60 = vpop.f32.mrb[16].mxu1  ;;  %v11198_v62 = vpop.f32.mrb[80].mxu0 }
 0x22f   : > { %v11055_v3 = vpop.f32.mrb[17].mxu1  ;;  %v11199_v5 = vpop.f32.mrb[81].mxu0 }
 0x230   : > { %v11056_v18 = vadd.f32 %v11055_v3, %v11054_v60  ;;  %v11057_v61 = vpop.f32.mrb[18].mxu1  ;;  %v14290_v36 = vadd.f32 %v11199_v5, %v11198_v62  ;;  %v11201_v24 = vpop.f32.mrb[82].mxu0 }
 0x231   : > { %v11058_v57 = vpop.f32.mrb[19].mxu1  ;;  %v11202_v23 = vpop.f32.mrb[83].mxu0  ;;  %2891 = vmatmul.mubr.bf16.vlgmr.msra.gmra.mrb[128].mxu0 %v13136_v1  ;;  %v13142_v1 = vld [vmem:[%s17448_s3 + $0x1e4] ss:$8 sps:$4 sm:$0xff]  }
 0x232   : > { %v11059_v41 = vadd.f32 %v11058_v57, %v11057_v61  ;;  %v14292_v52 = vadd.f32 %v11202_v23, %v11201_v24  ;;  %2898 = vmatprep.mubr.bf16.mxu0 %v13139_v47 }
 0x234   : > { %v1522_v22 = vpack.c.bf16 %v11059_v41, %v11056_v18 }
 0x236   : > { %v11060_v60 = vpop.f32.mrb[20].mxu1  ;;  %12102 = vmatprep.mubr.msk.bf16.mxu1 %vm805_vm0, %v1522_v22  ;;  %v11204_v62 = vpop.f32.mrb[84].mxu0 }
 0x237   : > { %v11061_v57 = vpop.f32.mrb[21].mxu1  ;;  %v11205_v46 = vpop.f32.mrb[85].mxu0 }
 0x238   : > { %v11062_v23 = vadd.f32 %v11061_v57, %v11060_v60  ;;  %v11063_v3 = vpop.f32.mrb[22].mxu1  ;;  %v14303_v41 = vadd.f32 %v11205_v46, %v11204_v62  ;;  %v11207_v5 = vpop.f32.mrb[86].mxu0  ;;  %v13141_v60 = vld [vmem:[%s17448_s3 + $0x1d0] ss:$8 sps:$4 sm:$0xff]  }
 0x239   : > { %v11064_v18 = vpop.f32.mrb[23].mxu1  ;;  %v11208_v61 = vpop.f32.mrb[87].mxu0  ;;  %2899 = vmatmul.mubr.bf16.gmra.mrb[132].mxu0 %v13141_v60  ;;  %v13145_v60 = vld [vmem:[%s17448_s3 + $0x1f4] ss:$8 sps:$4 sm:$0xff]  }
 0x23a   : > { %v11065_v24 = vadd.f32 %v11064_v18, %v11063_v3  ;;  %v14305_v30 = vadd.f32 %v11208_v61, %v11207_v5  ;;  %v13113_v5 = vld [vmem:[%s17449_s4 + $0x20] sm:$0xff]   ;;  %2906 = vmatprep.mubr.bf16.mxu0 %v13142_v1 }
 0x23c   : > { %v1523_v22 = vpack.c.bf16 %v11065_v24, %v11062_v23 }
 0x23e   : > { %v11066_v62 = vpop.f32.mrb[24].mxu1  ;;  %12103 = vmatmul.mubr.msk.bf16.vlgmr.msra.gmra.mrb[32].mxu1 %vm805_vm0, %v1523_v22  ;;  %v11210_v47 = vpop.f32.mrb[88].mxu0 }
 0x23f   : > { %v11067_v57 = vpop.f32.mrb[25].mxu1  ;;  %12111 = vmatpush3.bf16.msra.mxu1 %v14206_v38  ;;  %v11211_v46 = vpop.f32.mrb[89].mxu0 }
 0x240   : > { %v11068_v23 = vadd.f32 %v11067_v57, %v11066_v62  ;;  %v11069_v3 = vpop.f32.mrb[26].mxu1  ;;  %12112 = vmatprep.subr.bf16.mxu1 %v13112_v31  ;;  %v14323_v18 = vadd.f32 %v11211_v46, %v11210_v47  ;;  %v11213_v61 = vpop.f32.mrb[90].mxu0  ;;  %v13144_v57 = vld [vmem:[%s17448_s3 + $0x1e0] ss:$8 sps:$4 sm:$0xff]  }
 0x241   : > { %v11070_v24 = vpop.f32.mrb[27].mxu1  ;;  %v11214_v22 = vpop.f32.mrb[91].mxu0  ;;  %2907 = vmatmul.mubr.bf16.gmra.mrb[136].mxu0 %v13144_v57  ;;  %v17507_v57 = vpack.c.bf16 %v14258_v32, %v14254_v12  ;;  %v13120_v12 = vld [vmem:[%s17448_s3 + $0xd0] ss:$8 sps:$4 sm:$0xff]   ;;  %v13123_v32 = vld [vmem:[%s17448_s3 + $0xe0] ss:$8 sps:$4 sm:$0xff]  }
 0x242   : > { %v11071_v2 = vadd.f32 %v11070_v24, %v11069_v3  ;;  %v14325_v8 = vadd.f32 %v11214_v22, %v11213_v61  ;;  %2914 = vmatprep.mubr.bf16.mxu0 %v13145_v60  ;;  %v13147_v61 = vld [vmem:[%s17448_s3 + $0x1f0] ss:$8 sps:$4 sm:$0xff]   ;;  %v17505_v24 = vpack.c.bf16 %v14225_v20, %v14221_v7  ;;  %v13114_v22 = vld [vmem:[%s17449_s4 + $0x28] sm:$0xff]   ;;  %v17508_v7 = vpack.c.bf16 %v14276_v25, %v14272_v4 }
 0x243   : > { %12113 = vmatpush3.bf16.msra.mxu1 %v13112_v31  ;;  %v17509_v20 = vpack.c.bf16 %v14227_v21, %v14223_v17  ;;  %v13117_v17 = vld [vmem:[%s17448_s3 + $0xc4] ss:$8 sps:$4 sm:$0xff]   ;;  %v17512_v21 = vpack.c.bf16 %v14278_v45, %v14274_v6  ;;  %v13126_v45 = vld [vmem:[%s17448_s3 + $0xf0] ss:$8 sps:$4 sm:$0xff]  }
 0x244   : > { %v1524_v38 = vpack.c.bf16 %v11071_v2, %v11068_v23  ;;  %12122 = vmatprep.subr.bf16.mxu1 %v13113_v5 }
 0x246   : > { %v11072_v47 = vpop.f32.mrb[28].mxu1  ;;  %12106 = vmatprep.mubr.msk.bf16.mxu1 %vm805_vm0, %v1524_v38  ;;  %v17506_v38 = vpack.c.bf16 %v14237_v48, %v14233_v34  ;;  %v17510_v34 = vpack.c.bf16 %v14239_v51, %v14235_v44  ;;  %v17511_v48 = vpack.c.bf16 %v14260_v33, %v14256_v19  ;;  %v13115_v44 = vld [vmem:[%s17448_s3 + $0xc0] ss:$8 sps:$4 sm:$0xff]   ;;  %v13118_v51 = vld [vmem:[%s17448_s3 + $0xd4] ss:$8 sps:$4 sm:$0xff]   ;;  %v11216_v4 = vpop.f32.mrb[92].mxu0 }
 0x247   : > { %v11073_v1 = vpop.f32.mrb[29].mxu1  ;;  %v13121_v19 = vld [vmem:[%s17448_s3 + $0xe4] ss:$8 sps:$4 sm:$0xff]   ;;  %v13124_v33 = vld [vmem:[%s17448_s3 + $0xf4] ss:$8 sps:$4 sm:$0xff]   ;;  %v11217_v6 = vpop.f32.mrb[93].mxu0 }
 0x248   : > { %v11074_v46 = vadd.f32 %v11073_v1, %v11072_v47  ;;  %v11075_v3 = vpop.f32.mrb[30].mxu1  ;;  %v11219_v25 = vpop.f32.mrb[94].mxu0  ;;  %v14415_v47 = vadd.f32 %v11217_v6, %v11216_v4  ;;  %v14448_v6 = vld [vmem:[%s17449_s4 + $0x40] sm:$0xff]  }
 0x249   : > { %v11076_v31 = vpop.f32.mrb[31].mxu1  ;;  %2915 = vmatmul.mubr.bf16.gmra.mrb[140].mxu0 %v13147_v61 }
 0x24a   : > { %v11077_v2 = vadd.f32 %v11076_v31, %v11075_v3  ;;  %v13148_v3 = vld [vmem:[%s17449_s4 + $0x30] sm:$0xff]  }
 0x24c   : > { %v1525_v23 = vpack.c.bf16 %v11077_v2, %v11074_v46 }
 0x24e   : > { %12107 = vmatmul.mubr.msk.bf16.gmra.mrb[36].mxu1 %vm805_vm0, %v1525_v23 }
 0x24f   : > { %12114 = vmatprep.mubr.msk.bf16.mxu1 %vm805_vm0, %v17505_v24 }
 0x256   : > { %12115 = vmatmul.mubr.msk.bf16.vlgmr.msra.gmra.mrb[32].mxu1 %vm805_vm0, %v17506_v38 }
 0x257   : > { %12123 = vmatpush3.bf16.msra.mxu1 %v13113_v5  ;;  %12118 = vmatprep.mubr.msk.bf16.mxu1 %vm805_vm0, %v17507_v57  ;;  %v11220_v5 = vpop.f32.mrb[95].mxu0 }
 0x258   : > { %12124 = vmatprep.subr.bf16.mxu1 %v13114_v22  ;;  %v14417_v60 = vadd.f32 %v11220_v5, %v11219_v25  ;;  %v11244_v46 = vpop.f32.mrb[96].mxu0 }
 0x259   : > { %v11245_v31 = vpop.f32.mrb[97].mxu0 }
 0x25a   : > { %v11247_v2 = vpop.f32.mrb[98].mxu0  ;;  %v14424_v61 = vadd.f32 %v11245_v31, %v11244_v46 }
 0x25b   : > { %12125 = vmatpush3.bf16.msra.mxu1 %v13114_v22  ;;  %v11248_v23 = vpop.f32.mrb[99].mxu0  ;;  %v13149_v22 = vld [vmem:[%s17449_s4 + $0x38] sm:$0xff]  }
 0x25c   : > { %11136 = vmatprep.subr.bf16.mxu1 %v13887_v43  ;;  %v14426_v24 = vadd.f32 %v11248_v23, %v11247_v2  ;;  %v11250_v57 = vpop.f32.mrb[100].mxu0 }
 0x25e   : > { %12119 = vmatmul.mubr.msk.bf16.gmra.mrb[36].mxu1 %vm805_vm0, %v17508_v7  ;;  %v11251_v7 = vpop.f32.mrb[101].mxu0 }
 0x25f   : > { %12126 = vmatprep.mubr.msk.bf16.mxu1 %vm805_vm0, %v17509_v20  ;;  %v11253_v20 = vpop.f32.mrb[102].mxu0 }
 0x266   : > { %12127 = vmatmul.mubr.msk.bf16.vlgmr.msra.gmra.mrb[32].mxu1 %vm805_vm0, %v17510_v34  ;;  %v11254_v34 = vpop.f32.mrb[103].mxu0 }
 0x267   : > { %11137 = vmatpush3.bf16.msra.mxu1 %v13855_v50  ;;  %12130 = vmatprep.mubr.msk.bf16.mxu1 %vm805_vm0, %v17511_v48  ;;  %v14433_v48 = vadd.f32 %v11251_v7, %v11250_v57 }
 0x268   : > { %11138 = vmatprep.subr.bf16.mxu1 %v13885_v42 }
 0x26b   : > { %11139 = vmatpush3.bf16.msra.mxu1 %v13853_v49 }
 0x26c   : > { %11140 = vmatprep.subr.bf16.mxu1 %v13903_v59 }
 0x26e   : > { %12131 = vmatmul.mubr.msk.bf16.gmra.mrb[36].mxu1 %vm805_vm0, %v17512_v21 }
 0x26f   : > { %11141 = vmatpush3.bf16.msra.mxu1 %v13863_v0  ;;  %2010 = vmatprep.mubr.bf16.mxu1 %v13117_v17  ;;  %v14435_v17 = vadd.f32 %v11254_v34, %v11253_v20 }
 0x270   : > { %11142 = vmatprep.subr.bf16.mxu1 %v13899_v58 }
 0x273   : > { %11143 = vmatpush3.bf16.msra.mxu1 %v13861_v63 }
 0x274   : > { %11144 = vmatprep.subr.bf16.mxu1 %v13919_v11 }
 0x277   : > { %11145 = vmatpush3.bf16.msra.mxu1 %v13871_v14 }
 0x278   : > { %11146 = vmatprep.subr.bf16.mxu1 %v13915_v10 }
 0x27b   : > { %11147 = vmatpush3.bf16.msra.mxu1 %v13869_v13 }
 0x27c   : > { %11148 = vmatprep.subr.bf16.mxu1 %v13935_v29 }
 0x27f   : > { %11149 = vmatpush3.bf16.msra.mxu1 %v13879_v28 }
 0x280   : > { %11150 = vmatprep.subr.bf16.mxu1 %v13931_v26 }
 0x283   : > { %11151 = vmatpush3.bf16.msra.mxu1 %v13877_v27 }
 0x284   : > { %12134 = vmatprep.subr.bf16.mxu1 %v13148_v3 }
 0x286   : > { %2011 = vmatmul.mubr.bf16.vlgmr.msra.gmra.mrb[40].mxu1 %v13115_v44  ;;  %v11256_v44 = vpop.f32.mrb[104].mxu0 }
 0x287   : > { %2018 = vmatprep.mubr.bf16.mxu1 %v13118_v51  ;;  %12135 = vmatpush3.bf16.msra.mxu1 %v13148_v3  ;;  %v11257_v51 = vpop.f32.mrb[105].mxu0 }
 0x288   : > { %12136 = vmatprep.subr.bf16.mxu1 %v13149_v22 }
 0x28b   : > { %12137 = vmatpush3.bf16.msra.mxu1 %v13149_v22 }
 0x28c   : > { %12146 = vmatprep.subr.bf16.mxu1 %v14448_v6 }
 0x28e   : > { %2019 = vmatmul.mubr.bf16.gmra.mrb[44].mxu1 %v13120_v12  ;;  %v11259_v12 = vpop.f32.mrb[106].mxu0 }
 0x28f   : > { %2026 = vmatprep.mubr.bf16.mxu1 %v13121_v19  ;;  %v11260_v19 = vpop.f32.mrb[107].mxu0 }
 0x290   : > { %v11262_v4 = vpop.f32.mrb[108].mxu0 }
 0x291   : > { %v11263_v25 = vpop.f32.mrb[109].mxu0 }
 0x292   : > { %v11265_v5 = vpop.f32.mrb[110].mxu0  ;;  %v14451_v3 = vadd.f32 %v11263_v25, %v11262_v4 }
 0x293   : > { %v11266_v46 = vpop.f32.mrb[111].mxu0 }
 0x294   : > { %v14453_v31 = vadd.f32 %v11266_v46, %v11265_v5  ;;  %v11290_v23 = vpop.f32.mrb[112].mxu0 }
 0x295   : > { %v11291_v22 = vpop.f32.mrb[113].mxu0 }
 0x296   : > { %2027 = vmatmul.mubr.bf16.gmra.mrb[48].mxu1 %v13123_v32  ;;  %v14439_v32 = vadd.f32 %v11257_v51, %v11256_v44  ;;  %v11293_v57 = vpop.f32.mrb[114].mxu0  ;;  %v14457_v20 = vadd.f32 %v11291_v22, %v11290_v23 }
 0x297   : > { %2034 = vmatprep.mubr.bf16.mxu1 %v13124_v33  ;;  %v14441_v33 = vadd.f32 %v11260_v19, %v11259_v12  ;;  %v11294_v7 = vpop.f32.mrb[115].mxu0 }
 0x298   : > { %v14459_v34 = vadd.f32 %v11294_v7, %v11293_v57 }
 0x29e   : > { %2035 = vmatmul.mubr.bf16.gmra.mrb[52].mxu1 %v13126_v45 }
 0x2e4   : > { %v11296_v51 = vpop.f32.mrb[116].mxu0 }
 0x2e5   : > { %v11297_v12 = vpop.f32.mrb[117].mxu0 }
 0x2e6   : > { %v11299_v19 = vpop.f32.mrb[118].mxu0  ;;  %v14463_v25 = vadd.f32 %v11297_v12, %v11296_v51 }
 0x2e7   : > { %v11300_v4 = vpop.f32.mrb[119].mxu0 }
 0x2e8   : > { %v14465_v5 = vadd.f32 %v11300_v4, %v11299_v19 }
 0x2ee   : > { %v11302_v2 = vpop.f32.mrb[120].mxu0 }
 0x2ef   : > { %v11303_v45 = vpop.f32.mrb[121].mxu0 }
 0x2f0   : > { %v11305_v23 = vpop.f32.mrb[122].mxu0  ;;  %v14469_v57 = vadd.f32 %v11303_v45, %v11302_v2 }
 0x2f1   : > { %v11306_v22 = vpop.f32.mrb[123].mxu0 }
 0x2f2   : > { %v14471_v7 = vadd.f32 %v11306_v22, %v11305_v23 }
 0x2fc   : > { %v11308_v21 = vpop.f32.mrb[124].mxu0 }
 0x2fd   : > { %v11309_v38 = vpop.f32.mrb[125].mxu0 }
 0x2fe   : > { %v11311_v51 = vpop.f32.mrb[126].mxu0  ;;  %v14475_v19 = vadd.f32 %v11309_v38, %v11308_v21 }
 0x2ff   : > { %v11312_v12 = vpop.f32.mrb[127].mxu0 }
 0x300   : > { %v14477_v4 = vadd.f32 %v11312_v12, %v11311_v51 }
 0x304   : > { %v11336_v1 = vpop.f32.mrb[128].mxu0 }
 0x305   : > { %v11337_v62 = vpop.f32.mrb[129].mxu0 }
 0x306   : > { %v11339_v45 = vpop.f32.mrb[130].mxu0  ;;  %v14481_v23 = vadd.f32 %v11337_v62, %v11336_v1 }
 0x307   : > { %v11340_v2 = vpop.f32.mrb[131].mxu0 }
 0x308   : > { %v14483_v22 = vadd.f32 %v11340_v2, %v11339_v45 }
 0x30c   : > { %v11342_v39 = vpop.f32.mrb[132].mxu0 }
 0x30d   : > { %v11343_v9 = vpop.f32.mrb[133].mxu0 }
 0x30e   : > { %v14487_v38 = vadd.f32 %v11343_v9, %v11342_v39  ;;  %v11345_v21 = vpop.f32.mrb[134].mxu0 }
 0x30f   : > { %v11346_v51 = vpop.f32.mrb[135].mxu0 }
 0x310   : > { %v14489_v12 = vadd.f32 %v11346_v51, %v11345_v21 }
 0x314   : > { %v11348_v40 = vpop.f32.mrb[136].mxu0 }
 0x315   : > { %v11349_v54 = vpop.f32.mrb[137].mxu0 }
 0x316   : > { %v11351_v62 = vpop.f32.mrb[138].mxu0  ;;  %v14493_v45 = vadd.f32 %v11349_v54, %v11348_v40 }
 0x317   : > { %v11352_v1 = vpop.f32.mrb[139].mxu0 }
 0x318   : > { %v14495_v2 = vadd.f32 %v11352_v1, %v11351_v62 }
 0x31c   : > { %v11354_v9 = vpop.f32.mrb[140].mxu0 }
 0x31d   : > { %v11355_v39 = vpop.f32.mrb[141].mxu0 }
 0x31e   : > { %v14499_v15 = vadd.f32 %v11355_v39, %v11354_v9  ;;  %v11357_v21 = vpop.f32.mrb[142].mxu0 }
 0x31f   : > { %v11358_v51 = vpop.f32.mrb[143].mxu0 }
 0x320   : > { %v14501_v55 = vadd.f32 %v11358_v51, %v11357_v21  ;;  %v13151_v51 = vld [vmem:[%s17449_s4 + $0x48] sm:$0xff]  }
 0x359   : > { %v11152_v16 = vpop.f32.mrb[40].mxu1 }
 0x35a   : > { %v11153_v35 = vpop.f32.mrb[41].mxu1 }
 0x35b   : > { %v11154_v54 = vadd.f32 %v11153_v35, %v11152_v16  ;;  %v11155_v40 = vpop.f32.mrb[42].mxu1 }
 0x35c   : > { %v11156_v62 = vpop.f32.mrb[43].mxu1 }
 0x35d   : > { %v11157_v1 = vadd.f32 %v11156_v62, %v11155_v40 }
 0x35f   : > { %v2043_v53 = vpack.c.bf16 %v11157_v1, %v11154_v54 }
 0x361   : > { %v11158_v37 = vpop.f32.mrb[44].mxu1  ;;  %12138 = vmatprep.mubr.msk.bf16.mxu1 %vm805_vm0, %v2043_v53 }
 0x362   : > { %v11159_v44 = vpop.f32.mrb[45].mxu1 }
 0x363   : > { %v11160_v9 = vadd.f32 %v11159_v44, %v11158_v37  ;;  %v11161_v39 = vpop.f32.mrb[46].mxu1  ;;  %v13152_v37 = vld [vmem:[%s17449_s4 + $0x50] sm:$0xff]  }
 0x364   : > { %v11162_v56 = vpop.f32.mrb[47].mxu1 }
 0x365   : > { %v11163_v27 = vadd.f32 %v11162_v56, %v11161_v39  ;;  %v17513_v39 = vpack.c.bf16 %v14292_v52, %v14290_v36  ;;  %v13154_v52 = vld [vmem:[%s17449_s4 + $0x60] sm:$0xff]   ;;  %v17516_v36 = vpack.c.bf16 %v14417_v60, %v14415_v47  ;;  %v13156_v47 = vld [vmem:[%s17449_s4 + $0x70] sm:$0xff]   ;;  %v17520_v60 = vpack.c.bf16 %v14453_v31, %v14451_v3 }
 0x366   : > { %v17526_v3 = vpack.c.bf16 %v14489_v12, %v14487_v38  ;;  %v13160_v31 = vld [vmem:[%s17448_s3 + $0x204] ss:$8 sps:$4 sm:$0xff]  }
 0x367   : > { %v2044_v21 = vpack.c.bf16 %v11163_v27, %v11160_v9 }
 0x369   : > { %v11164_v46 = vpop.f32.mrb[48].mxu1  ;;  %12139 = vmatmul.mubr.msk.bf16.vlgmr.msra.gmra.mrb[32].mxu1 %vm805_vm0, %v2044_v21  ;;  %v13153_v21 = vld [vmem:[%s17449_s4 + $0x58] sm:$0xff]  }
 0x36a   : > { %v11165_v35 = vpop.f32.mrb[49].mxu1  ;;  %12147 = vmatpush3.bf16.msra.mxu1 %v14448_v6 }
 0x36b   : > { %v11166_v16 = vadd.f32 %v11165_v35, %v11164_v46  ;;  %v11167_v54 = vpop.f32.mrb[50].mxu1  ;;  %12148 = vmatprep.subr.bf16.mxu1 %v13151_v51  ;;  %v17515_v35 = vpack.c.bf16 %v14325_v8, %v14323_v18  ;;  %v13155_v8 = vld [vmem:[%s17449_s4 + $0x68] sm:$0xff]   ;;  %v17519_v18 = vpack.c.bf16 %v14441_v33, %v14439_v32  ;;  %v17524_v32 = vpack.c.bf16 %v14477_v4, %v14475_v19 }
 0x36c   : > { %v11168_v53 = vpop.f32.mrb[51].mxu1  ;;  %v17525_v33 = vpack.c.bf16 %v14483_v22, %v14481_v23 }
 0x36d   : > { %v11169_v56 = vadd.f32 %v11168_v53, %v11167_v54 }
 0x36e   : > { %12149 = vmatpush3.bf16.msra.mxu1 %v13151_v51  ;;  %v17514_v51 = vpack.c.bf16 %v14305_v30, %v14303_v41  ;;  %v17517_v30 = vpack.c.bf16 %v14426_v24, %v14424_v61  ;;  %v17518_v41 = vpack.c.bf16 %v14435_v17, %v14433_v48  ;;  %v17521_v61 = vpack.c.bf16 %v14459_v34, %v14457_v20  ;;  %v13157_v24 = vld [vmem:[%s17449_s4 + $0x78] sm:$0xff]  }
 0x36f   : > { %v2045_v27 = vpack.c.bf16 %v11169_v56, %v11166_v16  ;;  %12158 = vmatprep.subr.bf16.mxu1 %v13152_v37  ;;  %v17522_v48 = vpack.c.bf16 %v14465_v5, %v14463_v25  ;;  %v17523_v17 = vpack.c.bf16 %v14471_v7, %v14469_v57  ;;  %v17528_v20 = vpack.c.bf16 %v14501_v55, %v14499_v15 }
 0x371   : > { %v11170_v44 = vpop.f32.mrb[52].mxu1  ;;  %12142 = vmatprep.mubr.msk.bf16.mxu1 %vm805_vm0, %v2045_v27 }
 0x372   : > { %v11171_v40 = vpop.f32.mrb[53].mxu1 }
 0x373   : > { %v11172_v62 = vadd.f32 %v11171_v40, %v11170_v44  ;;  %v11173_v1 = vpop.f32.mrb[54].mxu1 }
 0x374   : > { %v11174_v9 = vpop.f32.mrb[55].mxu1 }
 0x375   : > { %v11175_v6 = vadd.f32 %v11174_v9, %v11173_v1  ;;  %v13172_v1 = vld [vmem:[%s17451_s6] sm:$0xff]  }
 0x376   : > { %12214 = vmatprep.mubr.msk.bf16.mxu0 %vm3301_vm1, %v13172_v1  ;;  %v10292_v9 = vld [vmem:[%s17450_s5] ss:$0 sm:$0xff] }
 0x377   : > { %v2046_v46 = vpack.c.bf16 %v11175_v6, %v11172_v62  ;;  %v3504_v1 = vld [vmem:[%s17454_s9] sm:$0xff] }
 0x379   : > { %12143 = vmatmul.mubr.msk.bf16.gmra.mrb[36].mxu1 %vm805_vm0, %v2046_v46 }
 0x37a   : > { %12150 = vmatprep.mubr.msk.bf16.mxu1 %vm805_vm0, %v17513_v39 }
 0x381   : > { %12151 = vmatmul.mubr.msk.bf16.vlgmr.msra.gmra.mrb[32].mxu1 %vm805_vm0, %v17514_v51 }
 0x382   : > { %12154 = vmatprep.mubr.msk.bf16.mxu1 %vm805_vm0, %v17515_v35  ;;  %12159 = vmatpush3.bf16.msra.mxu1 %v13152_v37 }
 0x383   : > { %12160 = vmatprep.subr.bf16.mxu1 %v13153_v21 }
 0x386   : > { %12161 = vmatpush3.bf16.msra.mxu1 %v13153_v21 }
 0x387   : > { %12170 = vmatprep.subr.bf16.mxu1 %v13154_v52 }
 0x389   : > { %12155 = vmatmul.mubr.msk.bf16.gmra.mrb[36].mxu1 %vm805_vm0, %v17516_v36 }
 0x38a   : > { %12162 = vmatprep.mubr.msk.bf16.mxu1 %vm805_vm0, %v17517_v30 }
 0x391   : > { %12163 = vmatmul.mubr.msk.bf16.vlgmr.msra.gmra.mrb[32].mxu1 %vm805_vm0, %v17518_v41 }
 0x392   : > { %12166 = vmatprep.mubr.msk.bf16.mxu1 %vm805_vm0, %v17519_v18  ;;  %12171 = vmatpush3.bf16.msra.mxu1 %v13154_v52 }
 0x393   : > { %12172 = vmatprep.subr.bf16.mxu1 %v13155_v8 }
 0x396   : > { %12173 = vmatpush3.bf16.msra.mxu1 %v13155_v8 }
 0x397   : > { %12182 = vmatprep.subr.bf16.mxu1 %v13156_v47 }
 0x399   : > { %12167 = vmatmul.mubr.msk.bf16.gmra.mrb[36].mxu1 %vm805_vm0, %v17520_v60 }
 0x39a   : > { %12174 = vmatprep.mubr.msk.bf16.mxu1 %vm805_vm0, %v17521_v61 }
 0x3a1   : > { %12175 = vmatmul.mubr.msk.bf16.vlgmr.msra.gmra.mrb[32].mxu1 %vm805_vm0, %v17522_v48 }
 0x3a2   : > { %12183 = vmatpush3.bf16.msra.mxu1 %v13156_v47  ;;  %12178 = vmatprep.mubr.msk.bf16.mxu1 %vm805_vm0, %v17523_v17 }
 0x3a3   : > { %12184 = vmatprep.subr.bf16.mxu1 %v13157_v24 }
 0x3a6   : > { %12185 = vmatpush3.bf16.msra.mxu1 %v13157_v24 }
 0x3a7   : > { %11366 = vmatprep.subr.bf16.mxu1 %v13887_v43  ;;  %v17527_v43 = vpack.c.bf16 %v14495_v2, %v14493_v45 }
 0x3a9   : > { %12179 = vmatmul.mubr.msk.bf16.gmra.mrb[36].mxu1 %vm805_vm0, %v17524_v32 }
 0x3aa   : > { %12186 = vmatprep.mubr.msk.bf16.mxu1 %vm805_vm0, %v17525_v33 }
 0x3b1   : > { %12187 = vmatmul.mubr.msk.bf16.vlgmr.msra.gmra.mrb[32].mxu1 %vm805_vm0, %v17526_v3 }
 0x3b2   : > { %11367 = vmatpush3.bf16.msra.mxu1 %v13855_v50  ;;  %12190 = vmatprep.mubr.msk.bf16.mxu1 %vm805_vm0, %v17527_v43  ;;  %v17529_v50 = vld [vmem:[#allocation2_spill] sm:$0xff] }
 0x3b3   : > { %11368 = vmatprep.subr.bf16.mxu1 %v13885_v42  ;;  %v13169_v42 = vld [vmem:[%s17448_s3 + $0x230] ss:$8 sps:$4 sm:$0xff]  }
 0x3b6   : > { %11369 = vmatpush3.bf16.msra.mxu1 %v13853_v49  ;;  %v13158_v49 = vld [vmem:[%s17448_s3 + $0x200] ss:$8 sps:$4 sm:$0xff]  }
 0x3b7   : > { %11370 = vmatprep.subr.bf16.mxu1 %v13903_v59  ;;  %v13171_v59 = vld [vmem:[%s17449_s4 + $0x88] sm:$0xff]  }
 0x3b9   : > { %12191 = vmatmul.mubr.msk.bf16.gmra.mrb[36].mxu1 %vm805_vm0, %v17528_v20 }
 0x3ba   : > { %11371 = vmatpush3.bf16.msra.mxu1 %v13863_v0  ;;  %3110 = vmatprep.mubr.bf16.mxu1 %v13160_v31  ;;  %v13163_v0 = vld [vmem:[%s17448_s3 + $0x210] ss:$8 sps:$4 sm:$0xff]  }
 0x3bb   : > { %11372 = vmatprep.subr.bf16.mxu1 %v13899_v58  ;;  %v13170_v58 = vld [vmem:[%s17449_s4 + $0x80] sm:$0xff]  }
 0x3be   : > { %11373 = vmatpush3.bf16.msra.mxu1 %v13861_v63  ;;  %v13161_v63 = vld [vmem:[%s17448_s3 + $0x214] ss:$8 sps:$4 sm:$0xff]  }
 0x3bf   : > { %11374 = vmatprep.subr.bf16.mxu1 %v13919_v11 }
 0x3c2   : > { %11375 = vmatpush3.bf16.msra.mxu1 %v13871_v14  ;;  %v13166_v14 = vld [vmem:[%s17448_s3 + $0x220] ss:$8 sps:$4 sm:$0xff]  }
 0x3c3   : > { %11376 = vmatprep.subr.bf16.mxu1 %v13915_v10 }
 0x3c6   : > { %11377 = vmatpush3.bf16.msra.mxu1 %v13869_v13  ;;  %v13164_v13 = vld [vmem:[%s17448_s3 + $0x224] ss:$8 sps:$4 sm:$0xff]  }
 0x3c7   : > { %11378 = vmatprep.subr.bf16.mxu1 %v13935_v29 }
 0x3ca   : > { %11379 = vmatpush3.bf16.msra.mxu1 %v13879_v28  ;;  %v13167_v28 = vld [vmem:[%s17448_s3 + $0x234] ss:$8 sps:$4 sm:$0xff]  }
 0x3cb   : > { %11380 = vmatprep.subr.bf16.mxu1 %v13931_v26 }
 0x3ce   : > { %11381 = vmatpush3.bf16.msra.mxu1 %v17529_v50 }
 0x3cf   : > { %12194 = vmatprep.subr.bf16.mxu1 %v13170_v58 }
 0x3d1   : > { %3111 = vmatmul.mubr.bf16.vlgmr.msra.gmra.mrb[56].mxu1 %v13158_v49 }
 0x3d2   : > { %3118 = vmatprep.mubr.bf16.mxu1 %v13161_v63  ;;  %12195 = vmatpush3.bf16.msra.mxu1 %v13170_v58  ;;  %v13178_v58 = vld [vmem:[%s17452_s7 + $0x10] sm:$0xff]  }
 0x3d3   : > { %12196 = vmatprep.subr.bf16.mxu1 %v13171_v59 }
 0x3d6   : > { %12197 = vmatpush3.bf16.msra.mxu1 %v13171_v59  ;;  %v13175_v59 = vld [vmem:[%s17451_s6 + $0x18] ss:$0 sps:$4 sm:$0x11]  }
 0x3d9   : > { %3119 = vmatmul.mubr.bf16.gmra.mrb[60].mxu1 %v13163_v0 }
 0x3da   : > { %3126 = vmatprep.mubr.bf16.mxu1 %v13164_v13  ;;  %v13176_v13 = vld [vmem:[%s17452_s7] sm:$0xff]  }
 0x3e1   : > { %3127 = vmatmul.mubr.bf16.gmra.mrb[64].mxu1 %v13166_v14  ;;  %v13173_v14 = vld [vmem:[%s17451_s6 + $0x8] sm:$0xff]  }
 0x3e2   : > { %3134 = vmatprep.mubr.bf16.mxu1 %v13167_v28  ;;  %v13174_v28 = vld [vmem:[%s17451_s6 + $0x10] sm:$0xff]  }
 0x3e9   : > { %3135 = vmatmul.mubr.bf16.gmra.mrb[68].mxu1 %v13169_v42  ;;  %v13177_v42 = vld [vmem:[%s17452_s7 + $0x8] sm:$0xff]  }
 0x4a4   : > { %v11382_v10 = vpop.f32.mrb[56].mxu1 }
 0x4a5   : > { %v11383_v11 = vpop.f32.mrb[57].mxu1 }
 0x4a6   : > { %v11384_v26 = vadd.f32 %v11383_v11, %v11382_v10  ;;  %v11385_v29 = vpop.f32.mrb[58].mxu1  ;;  %v13179_v10 = vld [vmem:[%s17452_s7 + $0x18] sm:$0xff]  }
 0x4a7   : > { %v11386_v55 = vpop.f32.mrb[59].mxu1 }
 0x4a8   : > { %v11387_v15 = vadd.f32 %v11386_v55, %v11385_v29 }
 0x4aa   : > { %v3143_v34 = vpack.c.bf16 %v11387_v15, %v11384_v26 }
 0x4ac   : > { %v11388_v25 = vpop.f32.mrb[60].mxu1  ;;  %12198 = vmatprep.mubr.msk.bf16.mxu1 %vm805_vm0, %v3143_v34 }
 0x4ad   : > { %v11389_v5 = vpop.f32.mrb[61].mxu1 }
 0x4ae   : > { %v11390_v57 = vadd.f32 %v11389_v5, %v11388_v25  ;;  %v11391_v7 = vpop.f32.mrb[62].mxu1 }
 0x4af   : > { %v11392_v19 = vpop.f32.mrb[63].mxu1 }
 0x4b0   : > { %v11393_v4 = vadd.f32 %v11392_v19, %v11391_v7 }
 0x4b2   : > { %v3144_v23 = vpack.c.bf16 %v11393_v4, %v11390_v57 }
 0x4b4   : > { %12199 = vmatmul.mubr.msk.bf16.vlgmr.msra.gmra.mrb[32].mxu1 %vm805_vm0, %v3144_v23  ;;  %v11394_v22 = vpop.f32.mrb[64].mxu1  ;;  %v13180_v23 = vld [vmem:[%s17455_s10] sm:$0xff]  }
 0x4b5   : > { %v11395_v38 = vpop.f32.mrb[65].mxu1 }
 0x4b6   : > { %v11396_v12 = vadd.f32 %v11395_v38, %v11394_v22  ;;  %v11397_v45 = vpop.f32.mrb[66].mxu1  ;;  %v10301_v22 = vld [vmem:[%s17453_s8] ss:$0 sm:$0xff] }
 0x4b7   : > { %v11398_v2 = vpop.f32.mrb[67].mxu1 }
 0x4b8   : > { %v11399_v16 = vadd.f32 %v11398_v2, %v11397_v45 }
 0x4ba   : > { %v3145_v54 = vpack.c.bf16 %v11399_v16, %v11396_v12 }
 0x4bc   : > { %v11400_v37 = vpop.f32.mrb[68].mxu1  ;;  %12202 = vmatprep.mubr.msk.bf16.mxu1 %vm805_vm0, %v3145_v54 }
 0x4bd   : > { %v11401_v53 = vpop.f32.mrb[69].mxu1 }
 0x4be   : > { %v11402_v56 = vadd.f32 %v11401_v53, %v11400_v37  ;;  %v11403_v27 = vpop.f32.mrb[70].mxu1 }
 0x4bf   : > { %v11404_v44 = vpop.f32.mrb[71].mxu1 }
 0x4c0   : > { %v11405_v40 = vadd.f32 %v11404_v44, %v11403_v27  ;;  %v3506_v44 = vld [vmem:[%s17454_s9 + $0x10] sm:$0xff] }
 0x4c2   : > { %v3146_v62 = vpack.c.bf16 %v11405_v40, %v11402_v56  ;;  %v3507_v40 = vld [vmem:[%s17454_s9 + $0x18] sm:$0xff] }
 0x4c4   : > { %12203 = vmatmul.mubr.msk.bf16.gmra.mrb[36].mxu1 %vm805_vm0, %v3146_v62 }
 0x587   : > { %v12200_v6 = vpop.f32.mrb[32].mxu1 }
 0x588   : > { %v3258_v46 = vadd.f32 %v12200_v6, %v10292_v9  ;;  %v3210_v39 = vpop.f32.mrb[33].mxu1 }
 0x589   : > { %v3256_v21 = vadd.f32 %v10292_v9, %v3210_v39  ;;  %v12201_v51 = vpop.f32.mrb[34].mxu1 }
 0x58a   : > { %v3259_v35 = vadd.f32 %v12201_v51, %v10292_v9  ;;  %v3213_v52 = vpop.f32.mrb[35].mxu1  ;;  %v3266_v30 = vmax.f32 %v3258_v46, 0.0 }
 0x58b   : > { %v3257_v36 = vadd.f32 %v10292_v9, %v3213_v52  ;;  %v3264_v41 = vmax.f32 %v3256_v21, 0.0 }
 0x58c   : > { %v3267_v8 = vmax.f32 %v3259_v35, 0.0 }
 0x58d   : > { %v3265_v18 = vmax.f32 %v3257_v36, 0.0 }
 0x58e   : > { %v14652_v47 = vpack.c.bf16 %v3267_v8, %v3266_v30 }
 0x58f   : > { %v14654_v60 = vpack.c.bf16 %v3265_v18, %v3264_v41 }
 0x591   : > { %12206 = vmatprep.subr.bf16.mxu0 %v14654_v60 }
 0x592   : > { %12207 = vmatpush3.bf16.msra.mxu0 %v14654_v60 }
 0x593   : > { %12208 = vmatprep.subr.bf16.mxu0 %v14652_v47 }
 0x596   : > { %12209 = vmatpush3.bf16.msra.mxu0 %v14652_v47 }
 0x597   : > { %v12204_v61 = vpop.f32.mrb[36].mxu1 }
 0x598   : > { %v3262_v24 = vadd.f32 %v12204_v61, %v10292_v9  ;;  %v3226_v48 = vpop.f32.mrb[37].mxu1 }
 0x599   : > { %v3260_v17 = vadd.f32 %v10292_v9, %v3226_v48  ;;  %v12205_v32 = vpop.f32.mrb[38].mxu1 }
 0x59a   : > { %v3263_v33 = vadd.f32 %v12205_v32, %v10292_v9  ;;  %v3229_v3 = vpop.f32.mrb[39].mxu1  ;;  %v3270_v31 = vmax.f32 %v3262_v24, 0.0  ;;  %v3510_v32 = vld [vmem:[%s17454_s9 + $0x30] sm:$0x3] }
 0x59b   : > { %v3261_v43 = vadd.f32 %v10292_v9, %v3229_v3  ;;  %v3268_v49 = vmax.f32 %v3260_v17, 0.0  ;;  %v3505_v9 = vld [vmem:[%s17454_s9 + $0x8] sm:$0xff] }
 0x59c   : > { %v3271_v20 = vmax.f32 %v3263_v33, 0.0  ;;  %v3508_v33 = vld [vmem:[%s17454_s9 + $0x20] sm:$0xff]  ;;  %v3509_v3 = vld [vmem:[%s17454_s9 + $0x28] sm:$0xff] }
 0x59d   : > { %v3269_v50 = vmax.f32 %v3261_v43, 0.0 }
 0x59e   : > { %v14660_v63 = vpack.c.bf16 %v3271_v20, %v3270_v31 }
 0x59f   : > { %v14662_v0 = vpack.c.bf16 %v3269_v50, %v3268_v49 }
 0x5a1   : > { %12210 = vmatprep.subr.bf16.mxu0 %v14662_v0 }
 0x5a2   : > { %12211 = vmatpush3.bf16.msra.mxu0 %v14662_v0 }
 0x5a3   : > { %12212 = vmatprep.subr.bf16.mxu0 %v14660_v63 }
 0x5a6   : > { %12213 = vmatpush3.bf16.msra.mxu0 %v14660_v63 }
 0x5a7   : > { %12222 = vmatprep.subr.bf16.mxu0 %v13176_v13 }
 0x5a9   : > { %12215 = vmatmul.mubr.msk.bf16.vlgmr.msra.gmra.mrb[144].mxu0 %vm3301_vm1, %v13173_v14 }
 0x5aa   : > { %12218 = vmatprep.mubr.msk.bf16.mxu0 %vm3301_vm1, %v13174_v28  ;;  %12223 = vmatpush3.bf16.msra.mxu0 %v13176_v13  ;;  %v13181_v28 = vld [vmem:[%s17455_s10 + $0x8] sm:$0xff]  }
 0x5ab   : > { %12224 = vmatprep.subr.bf16.mxu0 %v13177_v42 }
 0x5ae   : > { %12225 = vmatpush3.bf16.msra.mxu0 %v13177_v42  ;;  %v13182_v42 = vld [vmem:[%s17455_s10 + $0x10] sm:$0xff]  }
 0x5af   : > { %12226 = vmatprep.subr.bf16.mxu0 %v13178_v58 }
 0x5b1   : > { %12219 = vmatmul.mubr.msk.bf16.gmra.mrb[148].mxu0 %vm3301_vm1, %v13175_v59  ;;  %v13184_v59 = vld [vmem:[%s17457_s12 + $0x60] sm:$0xff]  }
 0x5b2   : > { %12227 = vmatpush3.bf16.msra.mxu0 %v13178_v58  ;;  %v13183_v58 = vld [vmem:[%s17455_s10 + $0x18] sm:$0xff]  }
 0x5b3   : > { %12228 = vmatprep.subr.bf16.mxu0 %v13179_v10 }
 0x5b6   : > { %12229 = vmatpush3.bf16.msra.mxu0 %v13179_v10  ;;  %v13185_v10 = vld [vmem:[%s17457_s12] sm:$0xff]  }
 0x67c   : > { %v12216_v11 = vpop.f32.mrb[144].mxu0 }
 0x67d   : > { %v3348_v26 = vpop.f32.mrb[145].mxu0 }
 0x67e   : > { %v12217_v29 = vpop.f32.mrb[146].mxu0 }
 0x67f   : > { %v3379_v55 = vpack.c.bf16 %v12217_v29, %v12216_v11  ;;  %v3351_v15 = vpop.f32.mrb[147].mxu0  ;;  %v17481_v11 = vmov 0   ;;  %v13187_v29 = vld [vmem:[%s17457_s12 + $0x8] sm:$0xff]  }
 0x680   : > { %v3378_v34 = vpack.c.bf16 %v3351_v15, %v3348_v26  ;;  %3768 = vmatprep.subr.bf16.mxu1 %v17481_v11  ;;  %v13186_v26 = vld [vmem:[%s17457_s12 + $0x68] sm:$0xff]   ;;  %v13189_v15 = vld [vmem:[%s17457_s12 + $0x10] sm:$0xff]  }
 0x681   : > { %3769 = vmatpush1.bf16.msra.mxu1 %v13185_v10  ;;  %v13228_v10 = vld [vmem:[%s17457_s12 + $0x160] sm:$0xff]  }
 0x682   : > { %12230 = vmatprep.mubr.msk.bf16.mxu0 %vm3301_vm1, %v3378_v34  ;;  %3770 = vmatprep.subr.bf16.mxu1 %v17481_v11  ;;  %v13190_v34 = vld [vmem:[%s17457_s12 + $0x78] sm:$0xff]  }
 0x683   : > { %12231 = vmatmul.mubr.msk.bf16.vlgmr.msra.gmra.mrb[152].mxu0 %vm3301_vm1, %v3379_v55  ;;  %v13188_v55 = vld [vmem:[%s17457_s12 + $0x70] sm:$0xff]  }
 0x684   : > { %v12220_v25 = vpop.f32.mrb[148].mxu0 }
 0x685   : > { %v3364_v5 = vpop.f32.mrb[149].mxu0  ;;  %v3381_v4 = vpack.c.bf16 %v12220_v25, %v12220_v25  ;;  %3771 = vmatpush1.bf16.msra.mxu1 %v13187_v29  ;;  %v13191_v25 = vld [vmem:[%s17457_s12 + $0x18] sm:$0xff]   ;;  %v13230_v29 = vld [vmem:[%s17457_s12 + $0x170] sm:$0xff]  }
 0x686   : > { %v12221_v57 = vpop.f32.mrb[150].mxu0  ;;  %3772 = vmatprep.subr.bf16.mxu1 %v17481_v11 }
 0x687   : > { %v3367_v7 = vpop.f32.mrb[151].mxu0  ;;  %v13193_v57 = vld [vmem:[%s17457_s12 + $0x20] sm:$0xff]  }
 0x688   : > { %v3380_v19 = vpack.c.bf16 %v3367_v7, %v3364_v5  ;;  %v13192_v5 = vld [vmem:[%s17457_s12 + $0x80] sm:$0xff]   ;;  %v13194_v7 = vld [vmem:[%s17457_s12 + $0x88] sm:$0xff]  }
 0x689   : > { %3773 = vmatpush1.bf16.msra.mxu1 %v13189_v15  ;;  %v13232_v15 = vld [vmem:[%s17457_s12 + $0x1e0] sm:$0xff]  }
 0x68a   : > { %12234 = vmatprep.mubr.msk.bf16.mxu0 %vm3301_vm1, %v3380_v19  ;;  %3774 = vmatprep.subr.bf16.mxu1 %v17481_v11  ;;  %v13195_v19 = vld [vmem:[%s17457_s12 + $0x28] sm:$0xff]  }
 0x68b   : > { %12235 = vmatmul.mubr.msk.bf16.gmra.mrb[156].mxu0 %vm3301_vm1, %v3381_v4  ;;  %v13196_v4 = vld [vmem:[%s17457_s12 + $0x90] sm:$0xff]  }
 0x68c   : > { %12246 = vmatprep.mubr.msk.bf16.mxu0 %vm3550_vm2, %v13180_v23  ;;  %v13197_v23 = vld [vmem:[%s17457_s12 + $0x30] sm:$0xff]  }
 0x68d   : > { %3775 = vmatpush1.bf16.msra.mxu1 %v13191_v25  ;;  %v13234_v25 = vld [vmem:[%s17457_s12 + $0x1f0] sm:$0xff]  }
 0x68e   : > { %3776 = vmatprep.subr.bf16.mxu1 %v17481_v11 }
 0x691   : > { %3777 = vmatpush1.bf16.msra.mxu1 %v13193_v57  ;;  %v13236_v57 = vld [vmem:[%s17457_s12 + $0x200] sm:$0xff]  }
 0x692   : > { %3778 = vmatprep.subr.bf16.mxu1 %v17481_v11 }
 0x695   : > { %3779 = vmatpush1.bf16.msra.mxu1 %v13195_v19  ;;  %v13268_v19 = vld [vmem:[%s17456_s11 + $0x20] sm:$0xff]  }
 0x696   : > { %3780 = vmatprep.subr.bf16.mxu1 %v17481_v11 }
 0x699   : > { %3781 = vmatpush1.bf16.msra.mxu1 %v13197_v23  ;;  %v13239_v23 = vld [vmem:[%s17457_s12 + $0x218] sm:$0xff]  }
 0x69a   : > { %3782 = vmatprep.subr.bf16.mxu1 %v17481_v11 }
 0x756   : > { %v12232_v38 = vpop.f32.mrb[152].mxu0 }
 0x757   : > { %v3476_v12 = vadd.f32 %v12232_v38, %v10301_v22  ;;  %v3467_v45 = vpop.f32.mrb[153].mxu0  ;;  %v13199_v38 = vld [vmem:[%s17457_s12 + $0x38] sm:$0xff]  }
 0x758   : > { %v3468_v2 = vadd.f32 %v10301_v22, %v3467_v45  ;;  %v12233_v16 = vpop.f32.mrb[154].mxu0  ;;  %3783 = vmatpush1.bf16.msra.mxu1 %v13199_v38  ;;  %v13201_v45 = vld [vmem:[%s17457_s12 + $0x40] sm:$0xff]   ;;  %v13241_v38 = vld [vmem:[%s17457_s12 + $0x228] sm:$0xff]  }
 0x759   : > { %v3499_v54 = vmax.f32 %v3476_v12, 0.0  ;;  %v3479_v37 = vadd.f32 %v12233_v16, %v10301_v22  ;;  %v3470_v53 = vpop.f32.mrb[155].mxu0  ;;  %v13200_v12 = vld [vmem:[%s17457_s12 + $0xa0] sm:$0xff]   ;;  %3784 = vmatprep.subr.bf16.mxu1 %v17481_v11  ;;  %v13203_v16 = vld [vmem:[%s17457_s12 + $0x48] sm:$0xff]  }
 0x75a   : > { %v3497_v56 = vmax.f32 %v3468_v2, 0.0  ;;  %v3471_v27 = vadd.f32 %v10301_v22, %v3470_v53  ;;  %v13202_v2 = vld [vmem:[%s17457_s12 + $0xa8] sm:$0xff]   ;;  %v13206_v53 = vld [vmem:[%s17457_s12 + $0xb8] sm:$0xff]  }
 0x75b   : > { %v3500_v62 = vmax.f32 %v3479_v37, 0.0  ;;  %v3513_v46 = vmul.f32 %v3506_v44, %v3499_v54  ;;  %v13204_v54 = vld [vmem:[%s17457_s12 + $0xb0] sm:$0xff]  }
 0x75c   : > { %v3498_v6 = vmax.f32 %v3471_v27, 0.0  ;;  %v3511_v51 = vmul.f32 %v3504_v1, %v3497_v56  ;;  %3785 = vmatpush1.bf16.msra.mxu1 %v13201_v45  ;;  %v13205_v37 = vld [vmem:[%s17457_s12 + $0x50] sm:$0xff]   ;;  %v13207_v56 = vld [vmem:[%s17457_s12 + $0x58] sm:$0xff]  }
 0x75d   : > { %v3514_v39 = vmul.f32 %v3507_v40, %v3500_v62  ;;  %3786 = vmatprep.subr.bf16.mxu1 %v17481_v11  ;;  %v13243_v45 = vld [vmem:[%s17457_s12 + $0x238] sm:$0xff]  }
 0x75e   : > { %v12236_v21 = vpop.f32.mrb[156].mxu0  ;;  %v3512_v35 = vmul.f32 %v3505_v9, %v3498_v6 }
 0x75f   : > { %v3492_v52 = vadd.f32 %v12236_v21, %v10301_v22  ;;  %v3483_v36 = vpop.f32.mrb[157].mxu0  ;;  %v3527_v30 = vpack.c.bf16 %v3514_v39, %v3513_v46 }
 0x760   : > { %v3484_v8 = vadd.f32 %v10301_v22, %v3483_v36  ;;  %v12237_v41 = vpop.f32.mrb[158].mxu0  ;;  %v3526_v18 = vpack.c.bf16 %v3512_v35, %v3511_v51  ;;  %3787 = vmatpush1.bf16.msra.mxu1 %v13203_v16  ;;  %v13245_v16 = vld [vmem:[%s17457_s12 + $0x248] sm:$0xff]  }
 0x761   : > { %v3486_v61 = vpop.f32.mrb[159].mxu0  ;;  %v3503_v24 = vmax.f32 %v3492_v52, 0.0  ;;  %3788 = vmatprep.subr.bf16.mxu1 %v17481_v11  ;;  %v13208_v52 = vld [vmem:[%s17457_s12 + $0xc0] sm:$0xff]  }
 0x762   : > { %v3501_v48 = vmax.f32 %v3484_v8, 0.0  ;;  %v3487_v17 = vadd.f32 %v10301_v22, %v3486_v61  ;;  %12238 = vmatprep.subr.bf16.mxu0 %v3526_v18  ;;  %v13198_v22 = vld [vmem:[%s17457_s12 + $0x98] sm:$0xff]   ;;  %v13209_v8 = vld [vmem:[%s17457_s12 + $0xc8] sm:$0xff]  }
 0x763   : > { %12239 = vmatpush3.bf16.msra.mxu0 %v3526_v18  ;;  %v3517_v31 = vmul.f32 %v3510_v32, %v3503_v24  ;;  %v13211_v24 = vld [vmem:[%s17457_s12 + $0xd8] sm:$0xff]   ;;  %v13213_v32 = vld [vmem:[%s17457_s12 + $0xe8] sm:$0xff]  }
 0x764   : > { %v3502_v43 = vmax.f32 %v3487_v17, 0.0  ;;  %12240 = vmatprep.subr.bf16.mxu0 %v3527_v30  ;;  %v3515_v20 = vmul.f32 %v3508_v33, %v3501_v48  ;;  %3789 = vmatpush1.bf16.msra.mxu1 %v13205_v37  ;;  %v13247_v37 = vld [vmem:[%s17457_s12 + $0x258] sm:$0xff]  }
 0x765   : > { %v3529_v13 = vpack.c.bf16 %v3517_v31, %v3517_v31  ;;  %3790 = vmatprep.subr.bf16.mxu1 %v17481_v11  ;;  %v13218_v31 = vld [vmem:[%s17457_s12 + $0x110] sm:$0xff]  }
 0x766   : > { %v3516_v49 = vmul.f32 %v3509_v3, %v3502_v43  ;;  %v13215_v3 = vld [vmem:[%s17457_s12 + $0xf8] sm:$0xff]   ;;  %v13217_v43 = vld [vmem:[%s17457_s12 + $0x108] sm:$0xff]  }
 0x767   : > { %12241 = vmatpush3.bf16.msra.mxu0 %v3527_v30  ;;  %v3565_v14 = vsel %vm3563_vm3, %v3529_v13, 0 }
 0x768   : > { %v3528_v50 = vpack.c.bf16 %v3516_v49, %v3515_v20  ;;  %3791 = vmatpush1.bf16.msra.mxu1 %v13207_v56  ;;  %v13219_v20 = vld [vmem:[%s17457_s12 + $0x118] sm:$0xff]   ;;  %v13220_v49 = vld [vmem:[%s17457_s12 + $0x120] sm:$0xff]   ;;  %v13249_v56 = vld [vmem:[%s17457_s12 + $0x268] sm:$0xff]  }
 0x76a   : > { %12242 = vmatprep.subr.bf16.mxu0 %v3528_v50 }
 0x76b   : > { %12243 = vmatpush3.bf16.msra.mxu0 %v3528_v50  ;;  %v13221_v50 = vld [vmem:[%s17457_s12 + $0x128] sm:$0xff]  }
 0x76c   : > { %12978 = vmatprep.subr.msk.bf16.mxu0 %vm3563_vm3, %v3529_v13  ;;  %v13222_v13 = vld [vmem:[%s17457_s12 + $0x130] sm:$0xff]  }
 0x76f   : > { %12245 = vmatpush3.bf16.msra.mxu0 %v3565_v14  ;;  %v13223_v14 = vld [vmem:[%s17457_s12 + $0x138] sm:$0xff]  }
 0x770   : > { %3942 = vmatprep.subr.bf16.mxu0 %v17481_v11 }
 0x772   : > { %12247 = vmatmul.mubr.msk.bf16.vlgmr.msra.gmra.mrb[160].mxu0 %vm3550_vm2, %v13181_v28  ;;  %v13224_v28 = vld [vmem:[%s17457_s12 + $0x140] sm:$0xff]  }
 0x773   : > { %12250 = vmatprep.mubr.msk.bf16.mxu0 %vm3550_vm2, %v13182_v42  ;;  %3943 = vmatpush1.bf16.msra.mxu0 %v13184_v59  ;;  %v13225_v42 = vld [vmem:[%s17457_s12 + $0x148] sm:$0xff]   ;;  %v13227_v59 = vld [vmem:[%s17457_s12 + $0x158] sm:$0xff]  }
 0x774   : > { %3944 = vmatprep.subr.bf16.mxu0 %v17481_v11 }
 0x777   : > { %3945 = vmatpush1.bf16.msra.mxu0 %v13186_v26  ;;  %v13229_v26 = vld [vmem:[%s17457_s12 + $0x168] sm:$0xff]  }
 0x778   : > { %3946 = vmatprep.subr.bf16.mxu0 %v17481_v11 }
 0x77a   : > { %12251 = vmatmul.mubr.msk.bf16.gmra.mrb[164].mxu0 %vm3550_vm2, %v13183_v58  ;;  %v13226_v58 = vld [vmem:[%s17457_s12 + $0x150] sm:$0xff]  }
 0x77b   : > { %3947 = vmatpush1.bf16.msra.mxu0 %v13188_v55  ;;  %v13231_v55 = vld [vmem:[%s17457_s12 + $0x178] sm:$0xff]  }
 0x77c   : > { %3948 = vmatprep.subr.bf16.mxu0 %v17481_v11 }
 0x77f   : > { %3949 = vmatpush1.bf16.msra.mxu0 %v13190_v34  ;;  %v13233_v34 = vld [vmem:[%s17457_s12 + $0x1e8] sm:$0xff]  }
 0x780   : > { %3950 = vmatprep.subr.bf16.mxu0 %v17481_v11 }
 0x783   : > { %3951 = vmatpush1.bf16.msra.mxu0 %v13192_v5  ;;  %v13235_v5 = vld [vmem:[%s17457_s12 + $0x1f8] sm:$0xff]  }
 0x784   : > { %3952 = vmatprep.subr.bf16.mxu0 %v17481_v11 }
 0x787   : > { %3953 = vmatpush1.bf16.msra.mxu0 %v13194_v7  ;;  %v13237_v7 = vld [vmem:[%s17457_s12 + $0x208] sm:$0xff]  }
 0x788   : > { %3954 = vmatprep.subr.bf16.mxu0 %v17481_v11 }
 0x78b   : > { %3955 = vmatpush1.bf16.msra.mxu0 %v13196_v4  ;;  %v13238_v4 = vld [vmem:[%s17457_s12 + $0x210] sm:$0xff]  }
 0x78c   : > { %3956 = vmatprep.subr.bf16.mxu0 %v17481_v11 }
 0x78f   : > { %3957 = vmatpush1.bf16.msra.mxu0 %v13198_v22  ;;  %v13240_v22 = vld [vmem:[%s17457_s12 + $0x220] sm:$0xff]  }
 0x790   : > { %3958 = vmatprep.subr.bf16.mxu0 %v17481_v11 }
 0x793   : > { %3959 = vmatpush1.bf16.msra.mxu0 %v13200_v12  ;;  %v13242_v12 = vld [vmem:[%s17457_s12 + $0x230] sm:$0xff]  }
 0x794   : > { %3960 = vmatprep.subr.bf16.mxu0 %v17481_v11 }
 0x797   : > { %3961 = vmatpush1.bf16.msra.mxu0 %v13202_v2  ;;  %v13244_v2 = vld [vmem:[%s17457_s12 + $0x240] sm:$0xff]  }
 0x798   : > { %3962 = vmatprep.subr.bf16.mxu0 %v17481_v11 }
 0x79b   : > { %3963 = vmatpush1.bf16.msra.mxu0 %v13204_v54  ;;  %v13246_v54 = vld [vmem:[%s17457_s12 + $0x250] sm:$0xff]  }
 0x79c   : > { %3964 = vmatprep.subr.bf16.mxu0 %v17481_v11 }
 0x79f   : > { %3965 = vmatpush1.bf16.msra.mxu0 %v13206_v53  ;;  %v13248_v53 = vld [vmem:[%s17457_s12 + $0x260] sm:$0xff]  }
 0x7a0   : > { %4311 = vmatprep.subr.bf16.mxu0 %v17481_v11 }
 0x845   : > { %v12248_v27 = vpop.f32.mrb[160].mxu0 }
 0x846   : > { %v3601_v44 = vpop.f32.mrb[161].mxu0 }
 0x847   : > { %v12249_v40 = vpop.f32.mrb[162].mxu0 }
 0x848   : > { %v3633_v62 = vpack.c.bf16 %v12249_v40, %v12248_v27  ;;  %v3604_v1 = vpop.f32.mrb[163].mxu0  ;;  %v13250_v27 = vld [vmem:[%s17457_s12 + $0x270] sm:$0xff]   ;;  %v13252_v40 = vld [vmem:[%s17457_s12 + $0x280] sm:$0xff]  }
 0x849   : > { %v3632_v9 = vpack.c.bf16 %v3604_v1, %v3601_v44  ;;  %v13251_v44 = vld [vmem:[%s17457_s12 + $0x278] sm:$0xff]   ;;  %v13254_v1 = vld [vmem:[%s17457_s12 + $0x290] sm:$0xff]  }
 0x84b   : > { %3640 = vrot.lane.b32.xlu0 %v3632_v9, %s13661_s19  ;;  %v13255_v9 = vld [vmem:[%s17457_s12 + $0x298] sm:$0xff]  }
 0x84d   : > { %v12252_v6 = vpop.f32.mrb[164].mxu0 }
 0x84e   : > { %v3617_v46 = vpop.f32.mrb[165].mxu0 }
 0x84f   : > { %3642 = vrot.lane.b32.xlu0 %v3633_v62, %s13661_s19  ;;  %v12253_v39 = vpop.f32.mrb[166].mxu0  ;;  %v13253_v62 = vld [vmem:[%s17457_s12 + $0x288] sm:$0xff]  }
 0x850   : > { %v3635_v21 = vpack.c.bf16 %v12253_v39, %v12252_v6  ;;  %v3620_v51 = vpop.f32.mrb[167].mxu0  ;;  %v13256_v6 = vld [vmem:[%s17457_s12 + $0x300] sm:$0xff]   ;;  %v13258_v39 = vld [vmem:[%s17457_s12 + $0x310] sm:$0xff]  }
 0x851   : > { %v3634_v35 = vpack.c.bf16 %v3620_v51, %v3617_v46  ;;  %v13257_v46 = vld [vmem:[%s17457_s12 + $0x308] sm:$0xff]   ;;  %v13260_v51 = vld [vmem:[%s17457_s12 + $0x320] sm:$0xff]  }
 0x853   : > { %3644 = vrot.lane.b32.xlu1 %v3634_v35, %s13661_s19  ;;  %v13261_v35 = vld [vmem:[%s17457_s12 + $0x328] sm:$0xff]  }
 0x857   : > { %3646 = vrot.lane.b32.xlu1 %v3635_v21, %s13661_s19  ;;  %v13259_v21 = vld [vmem:[%s17457_s12 + $0x318] sm:$0xff]  }
 0x8bd   : > { %v14842_v36 = vpop.permute.xlu0 %3640 }
 0x8be   : > { %10330 = vmatprep.mubr.msk.bf16.mxu1 %vm3301_vm1, %v14842_v36  ;;  %10370 = vmatprep.mubr.msk.bf16.mxu0 %vm3301_vm1, %v14842_v36  ;;  %v14851_v30 = vsel %vm3301_vm1, %v14654_v60, %v14842_v36  ;;  %v13210_v60 = vld [vmem:[%s17457_s12 + $0xd0] sm:$0xff]  }
 0x8bf   : > { %3801 = vmatmul.mubr.bf16.vlgmr.msra.gmra.mrb[72].mxu1 %v14851_v30  ;;  %3975 = vmatmul.mubr.bf16.vlgmr.msra.gmra.mrb[168].mxu0 %v14851_v30 }
 0x8c0   : > { %4312 = vmatpush1.bf16.msra.mxu0 %v13208_v52 }
 0x8c1   : > { %v14858_v41 = vpop.permute.xlu0 %3642  ;;  %4313 = vmatprep.subr.bf16.mxu0 %v17481_v11 }
 0x8c2   : > { %10331 = vmatprep.mubr.msk.bf16.mxu1 %vm3301_vm1, %v14858_v41  ;;  %10371 = vmatprep.mubr.msk.bf16.mxu0 %vm3301_vm1, %v14858_v41  ;;  %v14872_v18 = vsel %vm3301_vm1, %v14652_v47, %v14858_v41  ;;  %v13212_v47 = vld [vmem:[%s17457_s12 + $0xe0] sm:$0xff]  }
 0x8c4   : > { %4314 = vmatpush1.bf16.msra.mxu0 %v13209_v8 }
 0x8c5   : > { %4315 = vmatprep.subr.bf16.mxu0 %v17481_v11  ;;  %v14874_v61 = vpop.permute.xlu1 %3644 }
 0x8c6   : > { %v14893_v48 = vsel %vm3301_vm1, %v14662_v0, %v14874_v61  ;;  %v13214_v0 = vld [vmem:[%s17457_s12 + $0xf0] sm:$0xff]  }
 0x8c7   : > { %3809 = vmatmul.mubr.bf16.gmra.mrb[76].mxu1 %v14872_v18  ;;  %3983 = vmatmul.mubr.bf16.gmra.mrb[172].mxu0 %v14872_v18 }
 0x8c8   : > { %4316 = vmatpush1.bf16.msra.mxu0 %v13210_v60  ;;  %10332 = vmatprep.mubr.msk.bf16.mxu1 %vm3301_vm1, %v14874_v61 }
 0x8c9   : > { %4317 = vmatprep.subr.bf16.mxu0 %v17481_v11  ;;  %10372 = vmatprep.mubr.msk.bf16.mxu0 %vm3301_vm1, %v14874_v61  ;;  %v14895_v17 = vpop.permute.xlu1 %3646 }
 0x8ca   : > { %v14914_v33 = vsel %vm3301_vm1, %v14660_v63, %v14895_v17  ;;  %v13216_v63 = vld [vmem:[%s17457_s12 + $0x100] sm:$0xff]  }
 0x8cc   : > { %4318 = vmatpush1.bf16.msra.mxu0 %v13211_v24 }
 0x8cd   : > { %4319 = vmatprep.subr.bf16.mxu0 %v17481_v11 }
 0x8cf   : > { %3817 = vmatmul.mubr.bf16.gmra.mrb[80].mxu1 %v14893_v48  ;;  %3991 = vmatmul.mubr.bf16.gmra.mrb[176].mxu0 %v14893_v48 }
 0x8d0   : > { %4320 = vmatpush1.bf16.msra.mxu0 %v13212_v47  ;;  %10333 = vmatprep.mubr.msk.bf16.mxu1 %vm3301_vm1, %v14895_v17 }
 0x8d1   : > { %4321 = vmatprep.subr.bf16.mxu0 %v17481_v11  ;;  %10373 = vmatprep.mubr.msk.bf16.mxu0 %vm3301_vm1, %v14895_v17 }
 0x8d4   : > { %4322 = vmatpush1.bf16.msra.mxu0 %v13213_v32 }
 0x8d5   : > { %4323 = vmatprep.subr.bf16.mxu0 %v17481_v11 }
 0x8d7   : > { %3825 = vmatmul.mubr.bf16.gmra.mrb[84].mxu1 %v14914_v33  ;;  %3999 = vmatmul.mubr.bf16.gmra.mrb[180].mxu0 %v14914_v33 }
 0x8d8   : > { %4324 = vmatpush1.bf16.msra.mxu0 %v13214_v0  ;;  %10434 = vmatprep.mubr.msk.bf16.mxu0 %vm3301_vm1, %v14842_v36  ;;  %v13262_v0 = vld [vmem:[%s17457_s12 + $0x330] sm:$0xff]  }
 0x8d9   : > { %4325 = vmatprep.subr.bf16.mxu0 %v17481_v11  ;;  %12262 = vmatprep.mubr.msk.bf16.mxu1 %vm3301_vm1, %v13268_v19  ;;  %v13266_v19 = vld [vmem:[%s17457_s12 + $0x350] sm:$0xff]  }
 0x8dc   : > { %4326 = vmatpush1.bf16.msra.mxu0 %v13215_v3 }
 0x8dd   : > { %4327 = vmatprep.subr.bf16.mxu0 %v17481_v11 }
 0x8e0   : > { %4328 = vmatpush1.bf16.msra.mxu0 %v13216_v63 }
 0x8e1   : > { %4329 = vmatprep.subr.bf16.mxu0 %v17481_v11 }
 0x8e4   : > { %4330 = vmatpush1.bf16.msra.mxu0 %v13217_v43 }
 0x8e5   : > { %4331 = vmatprep.subr.bf16.mxu0 %v17481_v11 }
 0x8e8   : > { %4332 = vmatpush1.bf16.msra.mxu0 %v13218_v31 }
 0x8e9   : > { %4333 = vmatprep.subr.bf16.mxu0 %v17481_v11 }
 0x8ec   : > { %4334 = vmatpush1.bf16.msra.mxu0 %v13219_v20  ;;  %v13263_v20 = vld [vmem:[%s17457_s12 + $0x338] sm:$0xff]  }
 0x8ed   : > { %4591 = vmatprep.subr.bf16.mxu0 %v17481_v11 }
 0x8ef   : > { %4344 = vmatmul.mubr.bf16.vlgmr.msra.gmra.mrb[184].mxu0 %v14851_v30 }
 0x8f0   : > { %10435 = vmatprep.mubr.msk.bf16.mxu0 %vm3301_vm1, %v14858_v41  ;;  %4592 = vmatpush1.bf16.msra.mxu0 %v13220_v49 }
 0x8f1   : > { %4593 = vmatprep.subr.bf16.mxu0 %v17481_v11 }
 0x8f4   : > { %4594 = vmatpush1.bf16.msra.mxu0 %v13221_v50 }
 0x8f5   : > { %4595 = vmatprep.subr.bf16.mxu0 %v17481_v11 }
 0x8f7   : > { %4352 = vmatmul.mubr.bf16.gmra.mrb[188].mxu0 %v14872_v18 }
 0x8f8   : > { %10436 = vmatprep.mubr.msk.bf16.mxu0 %vm3301_vm1, %v14874_v61  ;;  %4596 = vmatpush1.bf16.msra.mxu0 %v13222_v13 }
 0x8f9   : > { %4597 = vmatprep.subr.bf16.mxu0 %v17481_v11 }
 0x8fc   : > { %4598 = vmatpush1.bf16.msra.mxu0 %v13223_v14 }
 0x8fd   : > { %4599 = vmatprep.subr.bf16.mxu0 %v17481_v11 }
 0x8ff   : > { %4360 = vmatmul.mubr.bf16.gmra.mrb[192].mxu0 %v14893_v48 }
 0x900   : > { %10437 = vmatprep.mubr.msk.bf16.mxu0 %vm3301_vm1, %v14895_v17  ;;  %4600 = vmatpush1.bf16.msra.mxu0 %v13224_v28 }
 0x901   : > { %4601 = vmatprep.subr.bf16.mxu0 %v17481_v11 }
 0x904   : > { %4602 = vmatpush1.bf16.msra.mxu0 %v13225_v42 }
 0x905   : > { %4603 = vmatprep.subr.bf16.mxu0 %v17481_v11 }
 0x907   : > { %4368 = vmatmul.mubr.bf16.gmra.mrb[196].mxu0 %v14914_v33 }
 0x908   : > { %4604 = vmatpush1.bf16.msra.mxu0 %v13226_v58  ;;  %10490 = vmatprep.mubr.msk.bf16.mxu0 %vm3301_vm1, %v14842_v36  ;;  %v13264_v58 = vld [vmem:[%s17457_s12 + $0x340] sm:$0xff]  }
 0x909   : > { %4605 = vmatprep.subr.bf16.mxu0 %v17481_v11 }
 0x90c   : > { %4606 = vmatpush1.bf16.msra.mxu0 %v13227_v59 }
 0x90d   : > { %4607 = vmatprep.subr.bf16.mxu0 %v17481_v11 }
 0x910   : > { %4608 = vmatpush1.bf16.msra.mxu0 %v13228_v10 }
 0x911   : > { %4609 = vmatprep.subr.bf16.mxu0 %v17481_v11 }
 0x914   : > { %4610 = vmatpush1.bf16.msra.mxu0 %v13229_v26 }
 0x915   : > { %4611 = vmatprep.subr.bf16.mxu0 %v17481_v11 }
 0x918   : > { %4612 = vmatpush1.bf16.msra.mxu0 %v13230_v29 }
 0x919   : > { %4613 = vmatprep.subr.bf16.mxu0 %v17481_v11 }
 0x91c   : > { %4614 = vmatpush1.bf16.msra.mxu0 %v13231_v55  ;;  %v13265_v55 = vld [vmem:[%s17457_s12 + $0x348] sm:$0xff]  }
 0x91d   : > { %5151 = vmatprep.subr.bf16.mxu0 %v17481_v11 }
 0x91f   : > { %4624 = vmatmul.mubr.bf16.vlgmr.msra.gmra.mrb[200].mxu0 %v14851_v30 }
 0x920   : > { %10491 = vmatprep.mubr.msk.bf16.mxu0 %vm3301_vm1, %v14858_v41  ;;  %5152 = vmatpush1.bf16.msra.mxu0 %v13232_v15 }
 0x921   : > { %5153 = vmatprep.subr.bf16.mxu0 %v17481_v11 }
 0x924   : > { %5154 = vmatpush1.bf16.msra.mxu0 %v13233_v34 }
 0x925   : > { %5155 = vmatprep.subr.bf16.mxu0 %v17481_v11 }
 0x927   : > { %4632 = vmatmul.mubr.bf16.gmra.mrb[204].mxu0 %v14872_v18 }
 0x928   : > { %10492 = vmatprep.mubr.msk.bf16.mxu0 %vm3301_vm1, %v14874_v61  ;;  %5156 = vmatpush1.bf16.msra.mxu0 %v13234_v25 }
 0x929   : > { %5157 = vmatprep.subr.bf16.mxu0 %v17481_v11 }
 0x92c   : > { %5158 = vmatpush1.bf16.msra.mxu0 %v13235_v5 }
 0x92d   : > { %5159 = vmatprep.subr.bf16.mxu0 %v17481_v11 }
 0x92f   : > { %4640 = vmatmul.mubr.bf16.gmra.mrb[208].mxu0 %v14893_v48 }
 0x930   : > { %10493 = vmatprep.mubr.msk.bf16.mxu0 %vm3301_vm1, %v14895_v17  ;;  %5160 = vmatpush1.bf16.msra.mxu0 %v13236_v57 }
 0x931   : > { %5161 = vmatprep.subr.bf16.mxu0 %v17481_v11 }
 0x934   : > { %5162 = vmatpush1.bf16.msra.mxu0 %v13237_v7 }
 0x935   : > { %5163 = vmatprep.subr.bf16.mxu0 %v17481_v11 }
 0x937   : > { %4648 = vmatmul.mubr.bf16.gmra.mrb[212].mxu0 %v14914_v33 }
 0x938   : > { %5164 = vmatpush1.bf16.msra.mxu0 %v13238_v4  ;;  %10602 = vmatprep.mubr.msk.bf16.mxu0 %vm3301_vm1, %v14842_v36 }
 0x939   : > { %5165 = vmatprep.subr.bf16.mxu0 %v17481_v11 }
 0x93c   : > { %5166 = vmatpush1.bf16.msra.mxu0 %v13239_v23 }
 0x93d   : > { %5167 = vmatprep.subr.bf16.mxu0 %v17481_v11 }
 0x940   : > { %5168 = vmatpush1.bf16.msra.mxu0 %v13240_v22 }
 0x941   : > { %5169 = vmatprep.subr.bf16.mxu0 %v17481_v11 }
 0x944   : > { %5170 = vmatpush1.bf16.msra.mxu0 %v13241_v38 }
 0x945   : > { %5171 = vmatprep.subr.bf16.mxu0 %v17481_v11 }
 0x948   : > { %5172 = vmatpush1.bf16.msra.mxu0 %v13242_v12  ;;  %v13267_v12 = vld [vmem:[%s17457_s12 + $0x358] sm:$0xff]  }
 0x949   : > { %5173 = vmatprep.subr.bf16.mxu0 %v17481_v11 }
 0x94c   : > { %5174 = vmatpush1.bf16.msra.mxu0 %v13243_v45 }
 0x94d   : > { %5431 = vmatprep.subr.bf16.mxu0 %v17481_v11 }
 0x94f   : > { %5184 = vmatmul.mubr.bf16.vlgmr.msra.gmra.mrb[216].mxu0 %v14851_v30 }
 0x950   : > { %10603 = vmatprep.mubr.msk.bf16.mxu0 %vm3301_vm1, %v14858_v41  ;;  %5432 = vmatpush1.bf16.msra.mxu0 %v13244_v2 }
 0x951   : > { %5433 = vmatprep.subr.bf16.mxu0 %v17481_v11 }
 0x954   : > { %5434 = vmatpush1.bf16.msra.mxu0 %v13245_v16 }
 0x955   : > { %5435 = vmatprep.subr.bf16.mxu0 %v17481_v11 }
 0x957   : > { %5192 = vmatmul.mubr.bf16.gmra.mrb[220].mxu0 %v14872_v18 }
 0x958   : > { %10604 = vmatprep.mubr.msk.bf16.mxu0 %vm3301_vm1, %v14874_v61  ;;  %5436 = vmatpush1.bf16.msra.mxu0 %v13246_v54 }
 0x959   : > { %5437 = vmatprep.subr.bf16.mxu0 %v17481_v11 }
 0x95c   : > { %5438 = vmatpush1.bf16.msra.mxu0 %v13247_v37 }
 0x95d   : > { %5439 = vmatprep.subr.bf16.mxu0 %v17481_v11 }
 0x95f   : > { %5200 = vmatmul.mubr.bf16.gmra.mrb[224].mxu0 %v14893_v48 }
 0x960   : > { %10605 = vmatprep.mubr.msk.bf16.mxu0 %vm3301_vm1, %v14895_v17  ;;  %5440 = vmatpush1.bf16.msra.mxu0 %v13248_v53 }
 0x961   : > { %5441 = vmatprep.subr.bf16.mxu0 %v17481_v11 }
 0x964   : > { %5442 = vmatpush1.bf16.msra.mxu0 %v13249_v56 }
 0x965   : > { %5443 = vmatprep.subr.bf16.mxu0 %v17481_v11 }
 0x967   : > { %5208 = vmatmul.mubr.bf16.gmra.mrb[228].mxu0 %v14914_v33 }
 0x968   : > { %5444 = vmatpush1.bf16.msra.mxu0 %v13250_v27  ;;  %10658 = vmatprep.mubr.msk.bf16.mxu0 %vm3301_vm1, %v14842_v36 }
 0x969   : > { %5445 = vmatprep.subr.bf16.mxu0 %v17481_v11 }
 0x96c   : > { %5446 = vmatpush1.bf16.msra.mxu0 %v13251_v44  ;;  %v17530_v44 = vld [vmem:[#allocation12_spill] sm:$0xff] }
 0x96d   : > { %5447 = vmatprep.subr.bf16.mxu0 %v17481_v11 }
 0x970   : > { %5448 = vmatpush1.bf16.msra.mxu0 %v13252_v40 }
 0x971   : > { %5449 = vmatprep.subr.bf16.mxu0 %v17481_v11 }
 0x974   : > { %5450 = vmatpush1.bf16.msra.mxu0 %v13253_v62 }
 0x975   : > { %5451 = vmatprep.subr.bf16.mxu0 %v17481_v11 }
 0x978   : > { %5452 = vmatpush1.bf16.msra.mxu0 %v13254_v1  ;;  %v17531_v1 = vld [vmem:[#allocation4_spill] sm:$0xff] }
 0x979   : > { %5453 = vmatprep.subr.bf16.mxu0 %v17481_v11 }
 0x97c   : > { %5454 = vmatpush1.bf16.msra.mxu0 %v13255_v9  ;;  %v13269_v9 = vld [vmem:[%s17456_s11 + $0x28] sm:$0xff]  }
 0x97d   : > { %5991 = vmatprep.subr.bf16.mxu0 %v17481_v11 }
 0x97f   : > { %5464 = vmatmul.mubr.bf16.vlgmr.msra.gmra.mrb[232].mxu0 %v14851_v30 }
 0x980   : > { %10659 = vmatprep.mubr.msk.bf16.mxu0 %vm3301_vm1, %v14858_v41  ;;  %5992 = vmatpush1.bf16.msra.mxu0 %v13256_v6  ;;  %v17532_v6 = vld [vmem:[#allocation11_spill] sm:$0xff] }
 0x981   : > { %5993 = vmatprep.subr.bf16.mxu0 %v17481_v11 }
 0x984   : > { %5994 = vmatpush1.bf16.msra.mxu0 %v13257_v46  ;;  %v13270_v46 = vld [vmem:[%s17456_s11 + $0x30] sm:$0xff]  }
 0x985   : > { %5995 = vmatprep.subr.bf16.mxu0 %v17481_v11 }
 0x987   : > { %5472 = vmatmul.mubr.bf16.gmra.mrb[236].mxu0 %v14872_v18 }
 0x988   : > { %10660 = vmatprep.mubr.msk.bf16.mxu0 %vm3301_vm1, %v14874_v61  ;;  %5996 = vmatpush1.bf16.msra.mxu0 %v13258_v39  ;;  %v17533_v39 = vld [vmem:[#allocation3_spill] sm:$0xff] }
 0x989   : > { %5997 = vmatprep.subr.bf16.mxu0 %v17481_v11 }
 0x98c   : > { %5998 = vmatpush1.bf16.msra.mxu0 %v13259_v21  ;;  %v17534_v21 = vld [vmem:[#allocation14_spill] sm:$0xff] }
 0x98d   : > { %5999 = vmatprep.subr.bf16.mxu0 %v17481_v11 }
 0x98f   : > { %5480 = vmatmul.mubr.bf16.gmra.mrb[240].mxu0 %v14893_v48 }
 0x990   : > { %10661 = vmatprep.mubr.msk.bf16.mxu0 %vm3301_vm1, %v14895_v17  ;;  %6000 = vmatpush1.bf16.msra.mxu0 %v13260_v51  ;;  %v17535_v51 = vld [vmem:[#allocation6_spill] sm:$0xff] }
 0x991   : > { %6001 = vmatprep.subr.bf16.mxu0 %v17481_v11 }
 0x992   : > { %v3802_v52 = vpop.f32.mrb[72].mxu1  ;;  %v3976_v8 = vpop.f32.mrb[168].mxu0 }
 0x993   : > { %v3804_v60 = vpop.f32.mrb[73].mxu1  ;;  %v3978_v24 = vpop.f32.mrb[169].mxu0 }
 0x994   : > { %6002 = vmatpush1.bf16.msra.mxu0 %v13261_v35  ;;  %v3805_v47 = vpop.f32.mrb[74].mxu1  ;;  %v3979_v32 = vpop.f32.mrb[170].mxu0  ;;  %v13271_v35 = vld [vmem:[%s17456_s11 + $0x38] sm:$0xff]   ;;  %v17538_v24 = vld [vmem:[#allocation16_spill] sm:$0xff] }
 0x995   : > { %v15160_v3 = vpack.c.bf16 %v3805_v47, %v3802_v52  ;;  %v4016_v63 = vpack.c.bf16 %v3979_v32, %v3976_v8  ;;  %v3807_v43 = vpop.f32.mrb[75].mxu1  ;;  %v3981_v31 = vpop.f32.mrb[171].mxu0  ;;  %6003 = vmatprep.subr.bf16.mxu0 %v17481_v11  ;;  %v17536_v52 = vld [vmem:[#allocation13_spill] sm:$0xff]  ;;  %v13272_v8 = vld [vmem:[%s17456_s11] sm:$0xff]   ;;  %v17539_v47 = vld [vmem:[#allocation8_spill] sm:$0xff] }
 0x996   : > { %v17537_v60 = vld [vmem:[#allocation5_spill] sm:$0xff]  ;;  %v13273_v32 = vld [vmem:[%s17456_s11 + $0x8] sm:$0xff]  }
 0x997   : > { %5488 = vmatmul.mubr.bf16.gmra.mrb[244].mxu0 %v14914_v33  ;;  %12254 = vmatprep.subr.bf16.mxu1 %v4016_v63 }
 0x998   : > { %6004 = vmatpush1.bf16.msra.mxu0 %v13262_v0  ;;  %10770 = vmatprep.mubr.msk.bf16.mxu0 %vm3301_vm1, %v14842_v36  ;;  %v17540_v0 = vld [vmem:[#allocation15_spill] sm:$0xff] }
 0x999   : > { %12255 = vmatpush3.bf16.msra.mxu1 %v4016_v63  ;;  %6005 = vmatprep.subr.bf16.mxu0 %v17481_v11 }
 0x99a   : > { %v3810_v49 = vpop.f32.mrb[76].mxu1  ;;  %v3984_v50 = vpop.f32.mrb[172].mxu0 }
 0x99b   : > { %v3812_v13 = vpop.f32.mrb[77].mxu1  ;;  %v3986_v14 = vpop.f32.mrb[173].mxu0 }
 0x99c   : > { %6006 = vmatpush1.bf16.msra.mxu0 %v13263_v20  ;;  %v3813_v28 = vpop.f32.mrb[78].mxu1  ;;  %v3987_v42 = vpop.f32.mrb[174].mxu0  ;;  %v17541_v20 = vld [vmem:[#allocation7_spill] sm:$0xff]  ;;  %v17542_v13 = vld [vmem:[#allocation18_spill] sm:$0xff] }
 0x99d   : > { %v3842_v59 = vpack.c.bf16 %v3813_v28, %v3810_v49  ;;  %v4017_v10 = vpack.c.bf16 %v3987_v42, %v3984_v50  ;;  %v3815_v26 = vpop.f32.mrb[79].mxu1  ;;  %v3989_v29 = vpop.f32.mrb[175].mxu0  ;;  %6007 = vmatprep.subr.bf16.mxu0 %v17481_v11  ;;  %v17543_v14 = vld [vmem:[#allocation10_spill] sm:$0xff]  ;;  %v13275_v28 = vld [vmem:[%s17456_s11 + $0x18] sm:$0xff]  }
 0x99e   : > { %v17544_v42 = vld [vmem:[#allocation17_spill] sm:$0xff] }
 0x99f   : > { %12256 = vmatprep.subr.bf16.mxu1 %v4017_v10 }
 0x9a0   : > { %6008 = vmatpush1.bf16.msra.mxu0 %v13264_v58  ;;  %12257 = vmatpush3.bf16.msra.mxu1 %v4017_v10  ;;  %v13396_v58 = vld [vmem:[%s17448_s3 + $0x4] ss:$8 sps:$4 sm:$0xff]  }
 0x9a1   : > { %6009 = vmatprep.subr.bf16.mxu0 %v17481_v11 }
 0x9a2   : > { %v3818_v15 = vpop.f32.mrb[80].mxu1  ;;  %v3992_v34 = vpop.f32.mrb[176].mxu0 }
 0x9a3   : > { %v3820_v25 = vpop.f32.mrb[81].mxu1  ;;  %v3994_v5 = vpop.f32.mrb[177].mxu0 }
 0x9a4   : > { %6010 = vmatpush1.bf16.msra.mxu0 %v13265_v55  ;;  %v3821_v57 = vpop.f32.mrb[82].mxu1  ;;  %v3995_v7 = vpop.f32.mrb[178].mxu0  ;;  %v17545_v55 = vld [vmem:[#allocation9_spill] sm:$0xff]  ;;  %v13397_v25 = vld [vmem:[%s17448_s3] ss:$8 sps:$4 sm:$0xff]  }
 0x9a5   : > { %v3843_v4 = vpack.c.bf16 %v3821_v57, %v3818_v15  ;;  %v4018_v23 = vpack.c.bf16 %v3995_v7, %v3992_v34  ;;  %v3823_v22 = vpop.f32.mrb[83].mxu1  ;;  %v3997_v38 = vpop.f32.mrb[179].mxu0  ;;  %6011 = vmatprep.subr.bf16.mxu0 %v17481_v11  ;;  %v13398_v5 = vld [vmem:[%s17448_s3 + $0x14] ss:$8 sps:$4 sm:$0xff]  }
 0x9a6   : > { %v13399_v22 = vld [vmem:[%s17448_s3 + $0x10] ss:$8 sps:$4 sm:$0xff]   ;;  %v13400_v38 = vld [vmem:[%s17448_s3 + $0x24] ss:$8 sps:$4 sm:$0xff]  }
 0x9a7   : > { %12258 = vmatprep.subr.bf16.mxu1 %v4018_v23 }
 0x9a8   : > { %6012 = vmatpush1.bf16.msra.mxu0 %v13266_v19  ;;  %12259 = vmatpush3.bf16.msra.mxu1 %v4018_v23 }
 0x9a9   : > { %6013 = vmatprep.subr.bf16.mxu0 %v17481_v11 }
 0x9aa   : > { %v3826_v45 = vpop.f32.mrb[84].mxu1  ;;  %v4000_v2 = vpop.f32.mrb[180].mxu0 }
 0x9ab   : > { %v3828_v16 = vpop.f32.mrb[85].mxu1  ;;  %v4002_v54 = vpop.f32.mrb[181].mxu0 }
 0x9ac   : > { %6014 = vmatpush1.bf16.msra.mxu0 %v13267_v12  ;;  %v3829_v37 = vpop.f32.mrb[86].mxu1  ;;  %v4003_v53 = vpop.f32.mrb[182].mxu0 }
 0x9ad   : > { %v3844_v56 = vpack.c.bf16 %v3829_v37, %v3826_v45  ;;  %v4019_v27 = vpack.c.bf16 %v4003_v53, %v4000_v2  ;;  %11508 = vmatprep.subr.bf16.mxu0 %v17530_v44  ;;  %v3831_v40 = vpop.f32.mrb[87].mxu1  ;;  %v4005_v62 = vpop.f32.mrb[183].mxu0  ;;  %v13401_v37 = vld [vmem:[%s17448_s3 + $0x20] ss:$8 sps:$4 sm:$0xff]  }
 0x9ae   : > { %v13277_v53 = vld [vmem:[%s17456_s11 + $0x48] sm:$0xff]   ;;  %v13403_v40 = vld [vmem:[%s17448_s3 + $0x30] ss:$8 sps:$4 sm:$0xff]  }
 0x9af   : > { %6024 = vmatmul.mubr.bf16.vlgmr.msra.gmra.mrb[248].mxu0 %v14851_v30  ;;  %12260 = vmatprep.subr.bf16.mxu1 %v4019_v27  ;;  %v13279_v62 = vld [vmem:[%s17456_s11 + $0x58] sm:$0xff]  }
 0x9b0   : > { %10771 = vmatprep.mubr.msk.bf16.mxu0 %vm3301_vm1, %v14858_v41  ;;  %11509 = vmatpush3.bf16.msra.mxu0 %v17531_v1 }
 0x9b1   : > { %12261 = vmatpush3.bf16.msra.mxu1 %v4019_v27  ;;  %11510 = vmatprep.subr.bf16.mxu0 %v17532_v6  ;;  %v13402_v27 = vld [vmem:[%s17448_s3 + $0x34] ss:$8 sps:$4 sm:$0xff]  }
 0x9b2   : > { %12270 = vmatprep.subr.bf16.mxu1 %v15160_v3 }
 0x9b4   : > { %11511 = vmatpush3.bf16.msra.mxu0 %v17533_v39  ;;  %12263 = vmatmul.mubr.msk.bf16.vlgmr.msra.gmra.mrb[88].mxu1 %vm3301_vm1, %v13269_v9  ;;  %v13404_v9 = vld [vmem:[%s17448_s3 + $0x44] ss:$8 sps:$4 sm:$0xff]  }
 0x9b5   : > { %12271 = vmatpush3.bf16.msra.mxu1 %v15160_v3  ;;  %11512 = vmatprep.subr.bf16.mxu0 %v17534_v21  ;;  %v13274_v3 = vld [vmem:[%s17456_s11 + $0x10] sm:$0xff]  }
 0x9b6   : > { %12272 = vmatprep.subr.bf16.mxu1 %v3842_v59  ;;  %12266 = vmatprep.mubr.msk.bf16.mxu1 %vm3301_vm1, %v13270_v46  ;;  %v13280_v46 = vld [vmem:[%s17456_s11 + $0x60] sm:$0xff]  }
 0x9b7   : > { %6032 = vmatmul.mubr.bf16.gmra.mrb[252].mxu0 %v14872_v18 }
 0x9b8   : > { %10772 = vmatprep.mubr.msk.bf16.mxu0 %vm3301_vm1, %v14874_v61  ;;  %11513 = vmatpush3.bf16.msra.mxu0 %v17535_v51 }
 0x9b9   : > { %12273 = vmatpush3.bf16.msra.mxu1 %v3842_v59  ;;  %11514 = vmatprep.subr.bf16.mxu0 %v17536_v52  ;;  %v13276_v59 = vld [vmem:[%s17456_s11 + $0x40] sm:$0xff]  }
 0x9ba   : > { %12274 = vmatprep.subr.bf16.mxu1 %v3843_v4 }
 0x9bc   : > { %11515 = vmatpush3.bf16.msra.mxu0 %v17537_v60  ;;  %12267 = vmatmul.mubr.msk.bf16.gmra.mrb[92].mxu1 %vm3301_vm1, %v13271_v35  ;;  %v13405_v35 = vld [vmem:[%s17448_s3 + $0x40] ss:$8 sps:$4 sm:$0xff]  }
 0x9bd   : > { %12275 = vmatpush3.bf16.msra.mxu1 %v3843_v4  ;;  %11516 = vmatprep.subr.bf16.mxu0 %v17538_v24 }
 0x9be   : > { %12276 = vmatprep.subr.bf16.mxu1 %v3844_v56  ;;  %12278 = vmatprep.mubr.msk.bf16.mxu1 %vm3301_vm1, %v13272_v8  ;;  %v13406_v8 = vld [vmem:[%s17448_s3 + $0x54] ss:$8 sps:$4 sm:$0xff]  }
 0x9bf   : > { %6040 = vmatmul.mubr.bf16.gmra.mrb[0].mxu0 %v14893_v48 }
 0x9c0   : > { %10773 = vmatprep.mubr.msk.bf16.mxu0 %vm3301_vm1, %v14895_v17  ;;  %11517 = vmatpush3.bf16.msra.mxu0 %v17539_v47 }
 0x9c1   : > { %12277 = vmatpush3.bf16.msra.mxu1 %v3844_v56  ;;  %11518 = vmatprep.subr.bf16.mxu0 %v17540_v0  ;;  %v13278_v56 = vld [vmem:[%s17456_s11 + $0x50] sm:$0xff]  }
 0x9c2   : > { %v4345_v63 = vpop.f32.mrb[184].mxu0 }
 0x9c3   : > { %v4347_v43 = vpop.f32.mrb[185].mxu0 }
 0x9c4   : > { %v4348_v31 = vpop.f32.mrb[186].mxu0  ;;  %11519 = vmatpush3.bf16.msra.mxu0 %v17541_v20  ;;  %12279 = vmatmul.mubr.msk.bf16.vlgmr.msra.gmra.mrb[88].mxu1 %vm3301_vm1, %v13273_v32 }
 0x9c5   : > { %v4385_v49 = vpack.c.bf16 %v4348_v31, %v4345_v63  ;;  %v4350_v50 = vpop.f32.mrb[187].mxu0  ;;  %11520 = vmatprep.subr.bf16.mxu0 %v17542_v13  ;;  %12282 = vmatprep.mubr.msk.bf16.mxu1 %vm3301_vm1, %v13274_v3 }
 0x9c6   : > { %v13408_v50 = vld [vmem:[%s17448_s3 + $0x64] ss:$8 sps:$4 sm:$0xff]  }
 0x9c7   : > { %12286 = vmatprep.subr.bf16.mxu1 %v4385_v49  ;;  %6048 = vmatmul.mubr.bf16.gmra.mrb[4].mxu0 %v14914_v33 }
 0x9c8   : > { %12287 = vmatpush3.bf16.msra.mxu1 %v4385_v49  ;;  %11521 = vmatpush3.bf16.msra.mxu0 %v17543_v14  ;;  %v13407_v49 = vld [vmem:[%s17448_s3 + $0x50] ss:$8 sps:$4 sm:$0xff]  }
 0x9c9   : > { %11522 = vmatprep.subr.bf16.mxu0 %v17544_v42  ;;  %6233 = vmatprep.mubr.bf16.mxu0 %v13396_v58 }
 0x9ca   : > { %v4353_v10 = vpop.f32.mrb[188].mxu0 }
 0x9cb   : > { %v4355_v26 = vpop.f32.mrb[189].mxu0 }
 0x9cc   : > { %v4356_v29 = vpop.f32.mrb[190].mxu0  ;;  %11523 = vmatpush3.bf16.msra.mxu0 %v17545_v55  ;;  %12283 = vmatmul.mubr.msk.bf16.gmra.mrb[92].mxu1 %vm3301_vm1, %v13275_v28 }
 0x9cd   : > { %v4386_v15 = vpack.c.bf16 %v4356_v29, %v4353_v10  ;;  %v4358_v34 = vpop.f32.mrb[191].mxu0  ;;  %11548 = vmatprep.subr.bf16.mxu0 %v17530_v44  ;;  %12294 = vmatprep.mubr.msk.bf16.mxu1 %vm3301_vm1, %v13276_v59  ;;  %v13409_v29 = vld [vmem:[%s17448_s3 + $0x60] ss:$8 sps:$4 sm:$0xff]  }
 0x9cf   : > { %12288 = vmatprep.subr.bf16.mxu1 %v4386_v15  ;;  %6234 = vmatmul.mubr.bf16.vlgmr.msra.gmra.mrb[8].mxu0 %v13397_v25 }
 0x9d0   : > { %12289 = vmatpush3.bf16.msra.mxu1 %v4386_v15  ;;  %11549 = vmatpush3.bf16.msra.mxu0 %v17531_v1  ;;  %v13410_v15 = vld [vmem:[%s17448_s3 + $0x74] ss:$8 sps:$4 sm:$0xff]  }
 0x9d1   : > { %11550 = vmatprep.subr.bf16.mxu0 %v17532_v6  ;;  %6241 = vmatprep.mubr.bf16.mxu0 %v13398_v5 }
 0x9d2   : > { %v4361_v57 = vpop.f32.mrb[192].mxu0 }
 0x9d3   : > { %v4363_v7 = vpop.f32.mrb[193].mxu0 }
 0x9d4   : > { %v4364_v19 = vpop.f32.mrb[194].mxu0  ;;  %11551 = vmatpush3.bf16.msra.mxu0 %v17533_v39 }
 0x9d5   : > { %v4387_v4 = vpack.c.bf16 %v4364_v19, %v4361_v57  ;;  %v4366_v23 = vpop.f32.mrb[195].mxu0  ;;  %11552 = vmatprep.subr.bf16.mxu0 %v17534_v21  ;;  %v13411_v19 = vld [vmem:[%s17448_s3 + $0x70] ss:$8 sps:$4 sm:$0xff]  }
 0x9d7   : > { %12290 = vmatprep.subr.bf16.mxu1 %v4387_v4  ;;  %6242 = vmatmul.mubr.bf16.gmra.mrb[12].mxu0 %v13399_v22 }
 0x9d8   : > { %12291 = vmatpush3.bf16.msra.mxu1 %v4387_v4  ;;  %11553 = vmatpush3.bf16.msra.mxu0 %v17535_v51  ;;  %v13412_v4 = vld [vmem:[%s17448_s3 + $0x84] ss:$8 sps:$4 sm:$0xff]  }
 0x9d9   : > { %11554 = vmatprep.subr.bf16.mxu0 %v17536_v52  ;;  %6249 = vmatprep.mubr.bf16.mxu0 %v13400_v38 }
 0x9da   : > { %v4369_v12 = vpop.f32.mrb[196].mxu0 }
 0x9db   : > { %v4371_v45 = vpop.f32.mrb[197].mxu0 }
 0x9dc   : > { %v4372_v2 = vpop.f32.mrb[198].mxu0  ;;  %11555 = vmatpush3.bf16.msra.mxu0 %v17537_v60 }
 0x9dd   : > { %v4388_v16 = vpack.c.bf16 %v4372_v2, %v4369_v12  ;;  %v4374_v54 = vpop.f32.mrb[199].mxu0  ;;  %11556 = vmatprep.subr.bf16.mxu0 %v17538_v24  ;;  %v13413_v2 = vld [vmem:[%s17448_s3 + $0x80] ss:$8 sps:$4 sm:$0xff]  }
 0x9de   : > { %v13282_v54 = vld [vmem:[%s17457_s12 + $0x180] sm:$0xff]  }
 0x9df   : > { %12292 = vmatprep.subr.bf16.mxu1 %v4388_v16  ;;  %6250 = vmatmul.mubr.bf16.gmra.mrb[16].mxu0 %v13401_v37  ;;  %v13414_v37 = vld [vmem:[%s17448_s3 + $0x94] ss:$8 sps:$4 sm:$0xff]  }
 0x9e0   : > { %12293 = vmatpush3.bf16.msra.mxu1 %v4388_v16  ;;  %11557 = vmatpush3.bf16.msra.mxu0 %v17539_v47  ;;  %v13281_v16 = vld [vmem:[%s17456_s11 + $0x68] sm:$0xff]  }
 0x9e1   : > { %11558 = vmatprep.subr.bf16.mxu0 %v17540_v0  ;;  %6257 = vmatprep.mubr.bf16.mxu0 %v13402_v27  ;;  %v13415_v27 = vld [vmem:[%s17448_s3 + $0x90] ss:$8 sps:$4 sm:$0xff]  }
 0x9e3   : > { %12295 = vmatmul.mubr.msk.bf16.vlgmr.msra.gmra.mrb[88].mxu1 %vm3301_vm1, %v13277_v53  ;;  %v13284_v53 = vld [vmem:[%s17456_s11 + $0x70] sm:$0xff]  }
 0x9e4   : > { %11559 = vmatpush3.bf16.msra.mxu0 %v17541_v20  ;;  %12298 = vmatprep.mubr.msk.bf16.mxu1 %vm3301_vm1, %v13278_v56  ;;  %v13283_v56 = vld [vmem:[%s17457_s12 + $0x188] sm:$0xff]  }
 0x9e5   : > { %11560 = vmatprep.subr.bf16.mxu0 %v17542_v13 }
 0x9e7   : > { %6258 = vmatmul.mubr.bf16.gmra.mrb[20].mxu0 %v13403_v40  ;;  %v13285_v40 = vld [vmem:[%s17456_s11 + $0x78] sm:$0xff]  }
 0x9e8   : > { %11561 = vmatpush3.bf16.msra.mxu0 %v17543_v14  ;;  %6302 = vmatprep.mubr.bf16.mxu0 %v13404_v9  ;;  %v13416_v9 = vld [vmem:[%s17448_s3 + $0xa4] ss:$8 sps:$4 sm:$0xff]  }
 0x9e9   : > { %11562 = vmatprep.subr.bf16.mxu0 %v17544_v42 }
 0x9eb   : > { %12299 = vmatmul.mubr.msk.bf16.gmra.mrb[92].mxu1 %vm3301_vm1, %v13279_v62  ;;  %v13286_v62 = vld [vmem:[%s17457_s12 + $0x190] sm:$0xff]  }
 0x9ec   : > { %11563 = vmatpush3.bf16.msra.mxu0 %v17545_v55  ;;  %12310 = vmatprep.mubr.msk.bf16.mxu1 %vm3301_vm1, %v13280_v46  ;;  %v13287_v46 = vld [vmem:[%s17457_s12 + $0x198] sm:$0xff]  }
 0x9ed   : > { %11600 = vmatprep.subr.bf16.mxu0 %v17530_v44 }
 0x9ef   : > { %6303 = vmatmul.mubr.bf16.vlgmr.msra.gmra.mrb[24].mxu0 %v13405_v35  ;;  %v13417_v35 = vld [vmem:[%s17448_s3 + $0xa0] ss:$8 sps:$4 sm:$0xff]  }
 0x9f0   : > { %11601 = vmatpush3.bf16.msra.mxu0 %v17531_v1  ;;  %6310 = vmatprep.mubr.bf16.mxu0 %v13406_v8  ;;  %v13288_v8 = vld [vmem:[%s17457_s12 + $0x1a0] sm:$0xff]  }
 0x9f1   : > { %11602 = vmatprep.subr.bf16.mxu0 %v17532_v6 }
 0x9f2   : > { %v4625_v32 = vpop.f32.mrb[200].mxu0 }
 0x9f3   : > { %v4627_v3 = vpop.f32.mrb[201].mxu0 }
 0x9f4   : > { %v4628_v63 = vpop.f32.mrb[202].mxu0  ;;  %11603 = vmatpush3.bf16.msra.mxu0 %v17533_v39 }
 0x9f5   : > { %v4665_v43 = vpack.c.bf16 %v4628_v63, %v4625_v32  ;;  %v4630_v31 = vpop.f32.mrb[203].mxu0  ;;  %11604 = vmatprep.subr.bf16.mxu0 %v17534_v21  ;;  %v13418_v32 = vld [vmem:[%s17448_s3 + $0xb4] ss:$8 sps:$4 sm:$0xff]  }
 0x9f6   : > { %v13289_v31 = vld [vmem:[%s17457_s12 + $0x1a8] sm:$0xff]  }
 0x9f7   : > { %12302 = vmatprep.subr.bf16.mxu1 %v4665_v43  ;;  %6311 = vmatmul.mubr.bf16.gmra.mrb[28].mxu0 %v13407_v49 }
 0x9f8   : > { %12303 = vmatpush3.bf16.msra.mxu1 %v4665_v43  ;;  %11605 = vmatpush3.bf16.msra.mxu0 %v17535_v51 }
 0x9f9   : > { %11606 = vmatprep.subr.bf16.mxu0 %v17536_v52  ;;  %6318 = vmatprep.mubr.bf16.mxu0 %v13408_v50 }
 0x9fa   : > { %v4633_v28 = vpop.f32.mrb[204].mxu0 }
 0x9fb   : > { %v4635_v58 = vpop.f32.mrb[205].mxu0 }
 0x9fc   : > { %v4636_v59 = vpop.f32.mrb[206].mxu0  ;;  %11607 = vmatpush3.bf16.msra.mxu0 %v17537_v60  ;;  %v13290_v58 = vld [vmem:[%s17457_s12 + $0x1b0] sm:$0xff]  }
 0x9fd   : > { %v4666_v10 = vpack.c.bf16 %v4636_v59, %v4633_v28  ;;  %v4638_v26 = vpop.f32.mrb[207].mxu0  ;;  %11608 = vmatprep.subr.bf16.mxu0 %v17538_v24  ;;  %v13419_v28 = vld [vmem:[%s17448_s3 + $0xb0] ss:$8 sps:$4 sm:$0xff]   ;;  %v13420_v59 = vld [vmem:[%s17448_s3 + $0x104] ss:$8 sps:$4 sm:$0xff]  }
 0x9ff   : > { %12304 = vmatprep.subr.bf16.mxu1 %v4666_v10  ;;  %6319 = vmatmul.mubr.bf16.gmra.mrb[32].mxu0 %v13409_v29 }
 0xa00   : > { %12305 = vmatpush3.bf16.msra.mxu1 %v4666_v10  ;;  %11609 = vmatpush3.bf16.msra.mxu0 %v17539_v47 }
 0xa01   : > { %11610 = vmatprep.subr.bf16.mxu0 %v17540_v0  ;;  %6326 = vmatprep.mubr.bf16.mxu0 %v13410_v15  ;;  %v13291_v15 = vld [vmem:[%s17457_s12 + $0x1b8] sm:$0xff]  }
 0xa02   : > { %v4641_v34 = vpop.f32.mrb[208].mxu0 }
 0xa03   : > { %v4643_v25 = vpop.f32.mrb[209].mxu0 }
 0xa04   : > { %v4644_v5 = vpop.f32.mrb[210].mxu0  ;;  %11611 = vmatpush3.bf16.msra.mxu0 %v17541_v20 }
 0xa05   : > { %v4667_v57 = vpack.c.bf16 %v4644_v5, %v4641_v34  ;;  %v4646_v7 = vpop.f32.mrb[211].mxu0  ;;  %11612 = vmatprep.subr.bf16.mxu0 %v17542_v13  ;;  %v13421_v5 = vld [vmem:[%s17448_s3 + $0x100] ss:$8 sps:$4 sm:$0xff]  }
 0xa07   : > { %12306 = vmatprep.subr.bf16.mxu1 %v4667_v57  ;;  %6327 = vmatmul.mubr.bf16.gmra.mrb[36].mxu0 %v13411_v19  ;;  %v13422_v19 = vld [vmem:[%s17448_s3 + $0x114] ss:$8 sps:$4 sm:$0xff]  }
 0xa08   : > { %12307 = vmatpush3.bf16.msra.mxu1 %v4667_v57  ;;  %11613 = vmatpush3.bf16.msra.mxu0 %v17543_v14  ;;  %v13292_v57 = vld [vmem:[%s17457_s12 + $0x1c0] sm:$0xff]  }
 0xa09   : > { %11614 = vmatprep.subr.bf16.mxu0 %v17544_v42  ;;  %6525 = vmatprep.mubr.bf16.mxu0 %v13412_v4 }
 0xa0a   : > { %v4649_v23 = vpop.f32.mrb[212].mxu0 }
 0xa0b   : > { %v4651_v22 = vpop.f32.mrb[213].mxu0 }
 0xa0c   : > { %v4652_v38 = vpop.f32.mrb[214].mxu0  ;;  %11615 = vmatpush3.bf16.msra.mxu0 %v17545_v55  ;;  %v13293_v22 = vld [vmem:[%s17457_s12 + $0x1c8] sm:$0xff]  }
 0xa0d   : > { %v4668_v12 = vpack.c.bf16 %v4652_v38, %v4649_v23  ;;  %v4654_v45 = vpop.f32.mrb[215].mxu0  ;;  %11692 = vmatprep.subr.bf16.mxu0 %v17530_v44 }
 0xa0e   : > { %v13423_v45 = vld [vmem:[%s17448_s3 + $0x110] ss:$8 sps:$4 sm:$0xff]  }
 0xa0f   : > { %12308 = vmatprep.subr.bf16.mxu1 %v4668_v12  ;;  %6526 = vmatmul.mubr.bf16.vlgmr.msra.gmra.mrb[40].mxu0 %v13413_v2  ;;  %v13294_v2 = vld [vmem:[%s17457_s12 + $0x1d0] sm:$0xff]  }
 0xa10   : > { %12309 = vmatpush3.bf16.msra.mxu1 %v4668_v12  ;;  %11693 = vmatpush3.bf16.msra.mxu0 %v17531_v1 }
 0xa11   : > { %11694 = vmatprep.subr.bf16.mxu0 %v17532_v6  ;;  %4871 = vmatprep.subr.bf16.mxu1 %v17481_v11 }
 0xa12   : > { %6533 = vmatprep.mubr.bf16.mxu0 %v13414_v37 }
 0xa13   : > { %12311 = vmatmul.mubr.msk.bf16.vlgmr.msra.gmra.mrb[88].mxu1 %vm3301_vm1, %v13281_v16 }
 0xa14   : > { %4872 = vmatpush1.bf16.msra.mxu1 %v13282_v54  ;;  %11695 = vmatpush3.bf16.msra.mxu0 %v17533_v39  ;;  %v13424_v54 = vld [vmem:[%s17448_s3 + $0x124] ss:$8 sps:$4 sm:$0xff]  }
 0xa15   : > { %11696 = vmatprep.subr.bf16.mxu0 %v17534_v21  ;;  %4873 = vmatprep.subr.bf16.mxu1 %v17481_v11 }
 0xa16   : > { %12314 = vmatprep.mubr.msk.bf16.mxu1 %vm3301_vm1, %v13284_v53 }
 0xa17   : > { %6534 = vmatmul.mubr.bf16.gmra.mrb[44].mxu0 %v13415_v27 }
 0xa18   : > { %4874 = vmatpush1.bf16.msra.mxu1 %v13283_v56  ;;  %11697 = vmatpush3.bf16.msra.mxu0 %v17535_v51  ;;  %v13295_v56 = vld [vmem:[%s17457_s12 + $0x1d8] sm:$0xff]  }
 0xa19   : > { %11698 = vmatprep.subr.bf16.mxu0 %v17536_v52  ;;  %4875 = vmatprep.subr.bf16.mxu1 %v17481_v11 }
 0xa1a   : > { %6541 = vmatprep.mubr.bf16.mxu0 %v13416_v9  ;;  %v13426_v9 = vld [vmem:[%s17448_s3 + $0x134] ss:$8 sps:$4 sm:$0xff]  }
 0xa1b   : > { %12315 = vmatmul.mubr.msk.bf16.gmra.mrb[92].mxu1 %vm3301_vm1, %v13285_v40 }
 0xa1c   : > { %4876 = vmatpush1.bf16.msra.mxu1 %v13286_v62  ;;  %10546 = vmatprep.mubr.msk.bf16.mxu1 %vm3301_vm1, %v14842_v36  ;;  %v13425_v62 = vld [vmem:[%s17448_s3 + $0x120] ss:$8 sps:$4 sm:$0xff]  }
 0xa1d   : > { %11699 = vmatpush3.bf16.msra.mxu0 %v17537_v60  ;;  %4877 = vmatprep.subr.bf16.mxu1 %v17481_v11 }
 0xa1e   : > { %11700 = vmatprep.subr.bf16.mxu0 %v17538_v24 }
 0xa1f   : > { %6542 = vmatmul.mubr.bf16.gmra.mrb[48].mxu0 %v13417_v35  ;;  %v13428_v35 = vld [vmem:[%s17448_s3 + $0x144] ss:$8 sps:$4 sm:$0xff]  }
 0xa20   : > { %4878 = vmatpush1.bf16.msra.mxu1 %v13287_v46  ;;  %6549 = vmatprep.mubr.bf16.mxu0 %v13418_v32  ;;  %v13427_v46 = vld [vmem:[%s17448_s3 + $0x130] ss:$8 sps:$4 sm:$0xff]   ;;  %v13430_v32 = vld [vmem:[%s17448_s3 + $0x154] ss:$8 sps:$4 sm:$0xff]  }
 0xa21   : > { %11701 = vmatpush3.bf16.msra.mxu0 %v17539_v47  ;;  %4879 = vmatprep.subr.bf16.mxu1 %v17481_v11 }
 0xa22   : > { %11702 = vmatprep.subr.bf16.mxu0 %v17540_v0  ;;  %v5185_v3 = vpop.f32.mrb[216].mxu0 }
 0xa23   : > { %v5187_v63 = vpop.f32.mrb[217].mxu0 }
 0xa24   : > { %4880 = vmatpush1.bf16.msra.mxu1 %v13288_v8  ;;  %v5188_v43 = vpop.f32.mrb[218].mxu0  ;;  %v13429_v8 = vld [vmem:[%s17448_s3 + $0x140] ss:$8 sps:$4 sm:$0xff]  }
 0xa25   : > { %v15411_v49 = vpack.c.bf16 %v5188_v43, %v5185_v3  ;;  %11703 = vmatpush3.bf16.msra.mxu0 %v17541_v20  ;;  %v5190_v50 = vpop.f32.mrb[219].mxu0  ;;  %4881 = vmatprep.subr.bf16.mxu1 %v17481_v11 }
 0xa26   : > { %11704 = vmatprep.subr.bf16.mxu0 %v17542_v13 }
 0xa27   : > { %6550 = vmatmul.mubr.bf16.gmra.mrb[52].mxu0 %v13419_v28  ;;  %v13431_v28 = vld [vmem:[%s17448_s3 + $0x150] ss:$8 sps:$4 sm:$0xff]  }
 0xa28   : > { %4882 = vmatpush1.bf16.msra.mxu1 %v13289_v31  ;;  %6833 = vmatprep.mubr.bf16.mxu0 %v13420_v59 }
 0xa29   : > { %11705 = vmatpush3.bf16.msra.mxu0 %v17543_v14  ;;  %4883 = vmatprep.subr.bf16.mxu1 %v17481_v11 }
 0xa2a   : > { %11706 = vmatprep.subr.bf16.mxu0 %v17544_v42  ;;  %v5193_v10 = vpop.f32.mrb[220].mxu0 }
 0xa2b   : > { %v5195_v26 = vpop.f32.mrb[221].mxu0 }
 0xa2c   : > { %4884 = vmatpush1.bf16.msra.mxu1 %v13290_v58  ;;  %v5196_v29 = vpop.f32.mrb[222].mxu0  ;;  %v13432_v58 = vld [vmem:[%s17448_s3 + $0x164] ss:$8 sps:$4 sm:$0xff]  }
 0xa2d   : > { %v15431_v34 = vpack.c.bf16 %v5196_v29, %v5193_v10  ;;  %11707 = vmatpush3.bf16.msra.mxu0 %v17545_v55  ;;  %v5198_v25 = vpop.f32.mrb[223].mxu0  ;;  %4885 = vmatprep.subr.bf16.mxu1 %v17481_v11 }
 0xa2e   : > { %11738 = vmatprep.subr.bf16.mxu0 %v17530_v44  ;;  %v13433_v25 = vld [vmem:[%s17448_s3 + $0x160] ss:$8 sps:$4 sm:$0xff]  }
 0xa30   : > { %4886 = vmatpush1.bf16.msra.mxu1 %v13291_v15  ;;  %6834 = vmatmul.mubr.bf16.vlgmr.msra.gmra.mrb[56].mxu0 %v13421_v5  ;;  %v13434_v5 = vld [vmem:[%s17448_s3 + $0x174] ss:$8 sps:$4 sm:$0xff]  }
 0xa31   : > { %11739 = vmatpush3.bf16.msra.mxu0 %v17531_v1  ;;  %4887 = vmatprep.subr.bf16.mxu1 %v17481_v11 }
 0xa32   : > { %11740 = vmatprep.subr.bf16.mxu0 %v17532_v6  ;;  %v5201_v7 = vpop.f32.mrb[224].mxu0  ;;  %6841 = vmatprep.mubr.bf16.mxu0 %v13422_v19 }
 0xa33   : > { %v5203_v4 = vpop.f32.mrb[225].mxu0 }
 0xa34   : > { %4888 = vmatpush1.bf16.msra.mxu1 %v13292_v57  ;;  %v5204_v23 = vpop.f32.mrb[226].mxu0 }
 0xa35   : > { %v15451_v38 = vpack.c.bf16 %v5204_v23, %v5201_v7  ;;  %11741 = vmatpush3.bf16.msra.mxu0 %v17533_v39  ;;  %v5206_v12 = vpop.f32.mrb[227].mxu0  ;;  %4889 = vmatprep.subr.bf16.mxu1 %v17481_v11 }
 0xa36   : > { %11742 = vmatprep.subr.bf16.mxu0 %v17534_v21  ;;  %v13436_v12 = vld [vmem:[%s17448_s3 + $0x184] ss:$8 sps:$4 sm:$0xff]  }
 0xa38   : > { %4890 = vmatpush1.bf16.msra.mxu1 %v13293_v22  ;;  %6842 = vmatmul.mubr.bf16.gmra.mrb[60].mxu0 %v13423_v45  ;;  %v13435_v22 = vld [vmem:[%s17448_s3 + $0x170] ss:$8 sps:$4 sm:$0xff]  }
 0xa39   : > { %11743 = vmatpush3.bf16.msra.mxu0 %v17535_v51  ;;  %4891 = vmatprep.subr.bf16.mxu1 %v17481_v11 }
 0xa3a   : > { %11744 = vmatprep.subr.bf16.mxu0 %v17536_v52  ;;  %v5209_v16 = vpop.f32.mrb[228].mxu0  ;;  %6849 = vmatprep.mubr.bf16.mxu0 %v13424_v54 }
 0xa3b   : > { %v5211_v37 = vpop.f32.mrb[229].mxu0 }
 0xa3c   : > { %4892 = vmatpush1.bf16.msra.mxu1 %v13294_v2  ;;  %v5212_v53 = vpop.f32.mrb[230].mxu0 }
 0xa3d   : > { %v15471_v27 = vpack.c.bf16 %v5212_v53, %v5209_v16  ;;  %11745 = vmatpush3.bf16.msra.mxu0 %v17537_v60  ;;  %v5214_v40 = vpop.f32.mrb[231].mxu0  ;;  %4893 = vmatprep.subr.bf16.mxu1 %v17481_v11  ;;  %v13437_v53 = vld [vmem:[%s17448_s3 + $0x180] ss:$8 sps:$4 sm:$0xff]  }
 0xa3e   : > { %11746 = vmatprep.subr.bf16.mxu0 %v17538_v24  ;;  %v13439_v40 = vld [vmem:[%s17448_s3 + $0x190] ss:$8 sps:$4 sm:$0xff]  }
 0xa40   : > { %4894 = vmatpush1.bf16.msra.mxu1 %v13295_v56  ;;  %6850 = vmatmul.mubr.bf16.gmra.mrb[64].mxu0 %v13425_v62  ;;  %v13438_v56 = vld [vmem:[%s17448_s3 + $0x194] ss:$8 sps:$4 sm:$0xff]   ;;  %v13440_v62 = vld [vmem:[%s17448_s3 + $0x1a4] ss:$8 sps:$4 sm:$0xff]  }
 0xa41   : > { %11747 = vmatpush3.bf16.msra.mxu0 %v17539_v47  ;;  %6857 = vmatprep.mubr.bf16.mxu0 %v13426_v9  ;;  %v13441_v9 = vld [vmem:[%s17448_s3 + $0x1a0] ss:$8 sps:$4 sm:$0xff]  }
 0xa42   : > { %11748 = vmatprep.subr.bf16.mxu0 %v17540_v0 }
 0xa43   : > { %4904 = vmatmul.mubr.bf16.vlgmr.msra.gmra.mrb[96].mxu1 %v14851_v30 }
 0xa44   : > { %10547 = vmatprep.mubr.msk.bf16.mxu1 %vm3301_vm1, %v14858_v41 }
 0xa45   : > { %11749 = vmatpush3.bf16.msra.mxu0 %v17541_v20 }
 0xa46   : > { %11750 = vmatprep.subr.bf16.mxu0 %v17542_v13 }
 0xa48   : > { %6858 = vmatmul.mubr.bf16.gmra.mrb[68].mxu0 %v13427_v46  ;;  %v13442_v46 = vld [vmem:[%s17448_s3 + $0x1b4] ss:$8 sps:$4 sm:$0xff]  }
 0xa49   : > { %11751 = vmatpush3.bf16.msra.mxu0 %v17543_v14  ;;  %6987 = vmatprep.mubr.bf16.mxu0 %v13428_v35 }
 0xa4a   : > { %11752 = vmatprep.subr.bf16.mxu0 %v17544_v42 }
 0xa4b   : > { %4912 = vmatmul.mubr.bf16.gmra.mrb[100].mxu1 %v14872_v18 }
 0xa4c   : > { %10548 = vmatprep.mubr.msk.bf16.mxu1 %vm3301_vm1, %v14874_v61 }
 0xa4d   : > { %11753 = vmatpush3.bf16.msra.mxu0 %v17545_v55 }
 0xa4e   : > { %11784 = vmatprep.subr.bf16.mxu0 %v17530_v44 }
 0xa50   : > { %6988 = vmatmul.mubr.bf16.vlgmr.msra.gmra.mrb[72].mxu0 %v13429_v8 }
 0xa51   : > { %11785 = vmatpush3.bf16.msra.mxu0 %v17531_v1  ;;  %6995 = vmatprep.mubr.bf16.mxu0 %v13430_v32 }
 0xa52   : > { %11786 = vmatprep.subr.bf16.mxu0 %v17532_v6  ;;  %v5465_v3 = vpop.f32.mrb[232].mxu0 }
 0xa53   : > { %4920 = vmatmul.mubr.bf16.gmra.mrb[104].mxu1 %v14893_v48  ;;  %v5467_v63 = vpop.f32.mrb[233].mxu0 }
 0xa54   : > { %10549 = vmatprep.mubr.msk.bf16.mxu1 %vm3301_vm1, %v14895_v17  ;;  %v5468_v43 = vpop.f32.mrb[234].mxu0 }
 0xa55   : > { %v15513_v31 = vpack.c.bf16 %v5468_v43, %v5465_v3  ;;  %11787 = vmatpush3.bf16.msra.mxu0 %v17533_v39  ;;  %v5470_v50 = vpop.f32.mrb[235].mxu0  ;;  %v13443_v43 = vld [vmem:[%s17448_s3 + $0x1b0] ss:$8 sps:$4 sm:$0xff]  }
 0xa56   : > { %11788 = vmatprep.subr.bf16.mxu0 %v17534_v21  ;;  %v13444_v50 = vld [vmem:[%s17448_s3 + $0x1c4] ss:$8 sps:$4 sm:$0xff]  }
 0xa58   : > { %6996 = vmatmul.mubr.bf16.gmra.mrb[76].mxu0 %v13431_v28 }
 0xa59   : > { %11789 = vmatpush3.bf16.msra.mxu0 %v17535_v51  ;;  %7003 = vmatprep.mubr.bf16.mxu0 %v13432_v58 }
 0xa5a   : > { %11790 = vmatprep.subr.bf16.mxu0 %v17536_v52  ;;  %v5473_v59 = vpop.f32.mrb[236].mxu0 }
 0xa5b   : > { %4928 = vmatmul.mubr.bf16.gmra.mrb[108].mxu1 %v14914_v33  ;;  %v5475_v10 = vpop.f32.mrb[237].mxu0 }
 0xa5c   : > { %v5476_v26 = vpop.f32.mrb[238].mxu0 }
 0xa5d   : > { %v15526_v29 = vpack.c.bf16 %v5476_v26, %v5473_v59  ;;  %11791 = vmatpush3.bf16.msra.mxu0 %v17537_v60  ;;  %v5478_v15 = vpop.f32.mrb[239].mxu0 }
 0xa5e   : > { %11792 = vmatprep.subr.bf16.mxu0 %v17538_v24  ;;  %v13445_v15 = vld [vmem:[%s17448_s3 + $0x1c0] ss:$8 sps:$4 sm:$0xff]  }
 0xa60   : > { %7004 = vmatmul.mubr.bf16.gmra.mrb[80].mxu0 %v13433_v25  ;;  %v13446_v25 = vld [vmem:[%s17448_s3 + $0x1d4] ss:$8 sps:$4 sm:$0xff]  }
 0xa61   : > { %11793 = vmatpush3.bf16.msra.mxu0 %v17539_v47  ;;  %7011 = vmatprep.mubr.bf16.mxu0 %v13434_v5 }
 0xa62   : > { %11794 = vmatprep.subr.bf16.mxu0 %v17540_v0  ;;  %v5481_v57 = vpop.f32.mrb[240].mxu0 }
 0xa63   : > { %v5483_v7 = vpop.f32.mrb[241].mxu0 }
 0xa64   : > { %v5484_v19 = vpop.f32.mrb[242].mxu0 }
 0xa65   : > { %v15538_v4 = vpack.c.bf16 %v5484_v19, %v5481_v57  ;;  %11795 = vmatpush3.bf16.msra.mxu0 %v17541_v20  ;;  %v5486_v23 = vpop.f32.mrb[243].mxu0 }
 0xa66   : > { %11796 = vmatprep.subr.bf16.mxu0 %v17542_v13 }
 0xa68   : > { %7012 = vmatmul.mubr.bf16.gmra.mrb[84].mxu0 %v13435_v22  ;;  %v13447_v22 = vld [vmem:[%s17448_s3 + $0x1d0] ss:$8 sps:$4 sm:$0xff]  }
 0xa69   : > { %11797 = vmatpush3.bf16.msra.mxu0 %v17543_v14  ;;  %7141 = vmatprep.mubr.bf16.mxu0 %v13436_v12  ;;  %v13448_v12 = vld [vmem:[%s17448_s3 + $0x1e4] ss:$8 sps:$4 sm:$0xff]  }
 0xa6a   : > { %11798 = vmatprep.subr.bf16.mxu0 %v17544_v42  ;;  %v5489_v45 = vpop.f32.mrb[244].mxu0 }
 0xa6b   : > { %v5491_v2 = vpop.f32.mrb[245].mxu0 }
 0xa6c   : > { %v5492_v16 = vpop.f32.mrb[246].mxu0 }
 0xa6d   : > { %v15550_v54 = vpack.c.bf16 %v5492_v16, %v5489_v45  ;;  %11799 = vmatpush3.bf16.msra.mxu0 %v17545_v55  ;;  %v5494_v37 = vpop.f32.mrb[247].mxu0 }
 0xa6e   : > { %11830 = vmatprep.subr.bf16.mxu0 %v17530_v44 }
 0xa70   : > { %7142 = vmatmul.mubr.bf16.vlgmr.msra.gmra.mrb[88].mxu0 %v13437_v53 }
 0xa71   : > { %11831 = vmatpush3.bf16.msra.mxu0 %v17531_v1  ;;  %7149 = vmatprep.mubr.bf16.mxu0 %v13438_v56  ;;  %v13449_v56 = vld [vmem:[%s17448_s3 + $0x1e0] ss:$8 sps:$4 sm:$0xff]  }
 0xa72   : > { %11832 = vmatprep.subr.bf16.mxu0 %v17532_v6 }
 0xa75   : > { %11833 = vmatpush3.bf16.msra.mxu0 %v17533_v39 }
 0xa76   : > { %11834 = vmatprep.subr.bf16.mxu0 %v17534_v21 }
 0xa78   : > { %7150 = vmatmul.mubr.bf16.gmra.mrb[92].mxu0 %v13439_v40  ;;  %v13450_v40 = vld [vmem:[%s17448_s3 + $0x1f4] ss:$8 sps:$4 sm:$0xff]  }
 0xa79   : > { %11835 = vmatpush3.bf16.msra.mxu0 %v17535_v51  ;;  %7157 = vmatprep.mubr.bf16.mxu0 %v13440_v62  ;;  %v13451_v62 = vld [vmem:[%s17448_s3 + $0x1f0] ss:$8 sps:$4 sm:$0xff]  }
 0xa7a   : > { %11836 = vmatprep.subr.bf16.mxu0 %v17536_v52 }
 0xa7d   : > { %11837 = vmatpush3.bf16.msra.mxu0 %v17537_v60 }
 0xa7e   : > { %11838 = vmatprep.subr.bf16.mxu0 %v17538_v24 }
 0xa80   : > { %7158 = vmatmul.mubr.bf16.gmra.mrb[96].mxu0 %v13441_v9  ;;  %v13452_v9 = vld [vmem:[%s17451_s6] sm:$0xff]  }
 0xa81   : > { %11839 = vmatpush3.bf16.msra.mxu0 %v17539_v47  ;;  %7165 = vmatprep.mubr.bf16.mxu0 %v13442_v46  ;;  %v13296_v46 = vld [vmem:[%s17456_s11 + $0x80] sm:$0xff]  }
 0xa82   : > { %11840 = vmatprep.subr.bf16.mxu0 %v17540_v0  ;;  %v6025_v35 = vpop.f32.mrb[248].mxu0  ;;  %12326 = vmatprep.mubr.msk.bf16.mxu1 %vm3301_vm1, %v13296_v46  ;;  %v13311_v46 = vld [vmem:[%s17457_s12 + $0x2b8] sm:$0xff]  }
 0xa83   : > { %v6027_v8 = vpop.f32.mrb[249].mxu0 }
 0xa84   : > { %v6028_v32 = vpop.f32.mrb[250].mxu0 }
 0xa85   : > { %v15582_v3 = vpack.c.bf16 %v6028_v32, %v6025_v35  ;;  %11841 = vmatpush3.bf16.msra.mxu0 %v17541_v20  ;;  %v6030_v63 = vpop.f32.mrb[251].mxu0 }
 0xa86   : > { %11842 = vmatprep.subr.bf16.mxu0 %v17542_v13 }
 0xa88   : > { %7166 = vmatmul.mubr.bf16.gmra.mrb[100].mxu0 %v13443_v43 }
 0xa89   : > { %11843 = vmatpush3.bf16.msra.mxu0 %v17543_v14  ;;  %7295 = vmatprep.mubr.bf16.mxu0 %v13444_v50 }
 0xa8a   : > { %11844 = vmatprep.subr.bf16.mxu0 %v17544_v42  ;;  %v6033_v28 = vpop.f32.mrb[252].mxu0 }
 0xa8b   : > { %v6035_v58 = vpop.f32.mrb[253].mxu0 }
 0xa8c   : > { %v6036_v59 = vpop.f32.mrb[254].mxu0 }
 0xa8d   : > { %v15594_v10 = vpack.c.bf16 %v6036_v59, %v6033_v28  ;;  %11845 = vmatpush3.bf16.msra.mxu0 %v17545_v55  ;;  %v6038_v26 = vpop.f32.mrb[255].mxu0 }
 0xa90   : > { %7296 = vmatmul.mubr.bf16.vlgmr.msra.gmra.mrb[104].mxu0 %v13445_v15 }
 0xa91   : > { %7303 = vmatprep.mubr.bf16.mxu0 %v13446_v25 }
 0xa92   : > { %v6041_v5 = vpop.f32.mrb[0].mxu0 }
 0xa93   : > { %v6043_v57 = vpop.f32.mrb[1].mxu0 }
 0xa94   : > { %v6044_v7 = vpop.f32.mrb[2].mxu0 }
 0xa95   : > { %v15603_v19 = vpack.c.bf16 %v6044_v7, %v6041_v5  ;;  %v6046_v23 = vpop.f32.mrb[3].mxu0 }
 0xa98   : > { %7304 = vmatmul.mubr.bf16.gmra.mrb[108].mxu0 %v13447_v22 }
 0xa99   : > { %7311 = vmatprep.mubr.bf16.mxu0 %v13448_v12 }
 0xa9a   : > { %v6049_v45 = vpop.f32.mrb[4].mxu0 }
 0xa9b   : > { %v6051_v2 = vpop.f32.mrb[5].mxu0 }
 0xa9c   : > { %v6052_v16 = vpop.f32.mrb[6].mxu0 }
 0xa9d   : > { %v15611_v37 = vpack.c.bf16 %v6052_v16, %v6049_v45  ;;  %v6054_v53 = vpop.f32.mrb[7].mxu0  ;;  %v13297_v16 = vld [vmem:[%s17456_s11 + $0x88] sm:$0xff]  }
 0xa9e   : > { %v13298_v53 = vld [vmem:[%s17456_s11 + $0x90] sm:$0xff]  }
 0xaa0   : > { %7312 = vmatmul.mubr.bf16.gmra.mrb[112].mxu0 %v13449_v56  ;;  %v13299_v56 = vld [vmem:[%s17456_s11 + $0x98] sm:$0xff]  }
 0xaa1   : > { %7319 = vmatprep.mubr.bf16.mxu0 %v13450_v40  ;;  %v13300_v40 = vld [vmem:[%s17456_s11 + $0xa0] sm:$0xff]  }
 0xaa8   : > { %7320 = vmatmul.mubr.bf16.gmra.mrb[116].mxu0 %v13451_v62  ;;  %v13308_v62 = vld [vmem:[%s17456_s11 + $0xd0] sm:$0xff]  }
 0xaa9   : > { %12514 = vmatprep.mubr.msk.bf16.mxu0 %vm3301_vm1, %v13452_v9  ;;  %v13310_v9 = vld [vmem:[%s17457_s12 + $0x2b0] sm:$0xff]  }
 0xb16   : > { %v4905_v35 = vpop.f32.mrb[96].mxu1 }
 0xb17   : > { %v4907_v8 = vpop.f32.mrb[97].mxu1 }
 0xb18   : > { %v4908_v32 = vpop.f32.mrb[98].mxu1  ;;  %v13313_v8 = vld [vmem:[%s17457_s12 + $0x2c8] sm:$0xff]  }
 0xb19   : > { %v4945_v63 = vpack.c.bf16 %v4908_v32, %v4905_v35  ;;  %v4910_v43 = vpop.f32.mrb[99].mxu1  ;;  %v13312_v35 = vld [vmem:[%s17457_s12 + $0x2c0] sm:$0xff]   ;;  %v13315_v32 = vld [vmem:[%s17457_s12 + $0x2d8] sm:$0xff]  }
 0xb1a   : > { %v13317_v43 = vld [vmem:[%s17457_s12 + $0x2e8] sm:$0xff]  }
 0xb1b   : > { %12318 = vmatprep.subr.bf16.mxu1 %v4945_v63 }
 0xb1c   : > { %12319 = vmatpush3.bf16.msra.mxu1 %v4945_v63  ;;  %v13316_v63 = vld [vmem:[%s17457_s12 + $0x2e0] sm:$0xff]  }
 0xb1e   : > { %v4913_v50 = vpop.f32.mrb[100].mxu1 }
 0xb1f   : > { %v4915_v28 = vpop.f32.mrb[101].mxu1 }
 0xb20   : > { %v4916_v58 = vpop.f32.mrb[102].mxu1  ;;  %v13319_v28 = vld [vmem:[%s17457_s12 + $0x2f8] sm:$0xff]  }
 0xb21   : > { %v4946_v59 = vpack.c.bf16 %v4916_v58, %v4913_v50  ;;  %v4918_v26 = vpop.f32.mrb[103].mxu1  ;;  %v13318_v50 = vld [vmem:[%s17457_s12 + $0x2f0] sm:$0xff]   ;;  %v11524_v58 = vpop.f32.mrb[8].mxu0 }
 0xb23   : > { %12320 = vmatprep.subr.bf16.mxu1 %v4946_v59 }
 0xb24   : > { %12321 = vmatpush3.bf16.msra.mxu1 %v4946_v59  ;;  %v11525_v59 = vpop.f32.mrb[9].mxu0 }
 0xb25   : > { %v11527_v26 = vpop.f32.mrb[10].mxu0 }
 0xb26   : > { %v4921_v15 = vpop.f32.mrb[104].mxu1 }
 0xb27   : > { %v4923_v25 = vpop.f32.mrb[105].mxu1 }
 0xb28   : > { %v4924_v5 = vpop.f32.mrb[106].mxu1 }
 0xb29   : > { %v4947_v57 = vpack.c.bf16 %v4924_v5, %v4921_v15  ;;  %v4926_v7 = vpop.f32.mrb[107].mxu1  ;;  %v11528_v15 = vpop.f32.mrb[11].mxu0 }
 0xb2a   : > { %v15752_v25 = vadd.f32 %v11528_v15, %v11527_v26 }
 0xb2b   : > { %12322 = vmatprep.subr.bf16.mxu1 %v4947_v57 }
 0xb2c   : > { %12323 = vmatpush3.bf16.msra.mxu1 %v4947_v57 }
 0xb2e   : > { %v4929_v23 = vpop.f32.mrb[108].mxu1 }
 0xb2f   : > { %v4931_v22 = vpop.f32.mrb[109].mxu1 }
 0xb30   : > { %v4932_v12 = vpop.f32.mrb[110].mxu1 }
 0xb31   : > { %v4948_v45 = vpack.c.bf16 %v4932_v12, %v4929_v23  ;;  %v4934_v2 = vpop.f32.mrb[111].mxu1 }
 0xb33   : > { %12324 = vmatprep.subr.bf16.mxu1 %v4948_v45 }
 0xb34   : > { %12325 = vmatpush3.bf16.msra.mxu1 %v4948_v45 }
 0xb35   : > { %12334 = vmatprep.subr.bf16.mxu1 %v15411_v49 }
 0xb37   : > { %12327 = vmatmul.mubr.msk.bf16.vlgmr.msra.gmra.mrb[88].mxu1 %vm3301_vm1, %v13297_v16 }
 0xb38   : > { %12335 = vmatpush3.bf16.msra.mxu1 %v15411_v49  ;;  %12330 = vmatprep.mubr.msk.bf16.mxu1 %vm3301_vm1, %v13298_v53  ;;  %v13301_v49 = vld [vmem:[%s17456_s11 + $0xa8] sm:$0xff]   ;;  %v13320_v53 = vld [vmem:[%s17456_s11 + $0xe0] sm:$0xff]  }
 0xb39   : > { %12336 = vmatprep.subr.bf16.mxu1 %v15431_v34 }
 0xb3c   : > { %12337 = vmatpush3.bf16.msra.mxu1 %v15431_v34  ;;  %v13302_v34 = vld [vmem:[%s17456_s11 + $0xb0] sm:$0xff]  }
 0xb3d   : > { %12338 = vmatprep.subr.bf16.mxu1 %v15451_v38 }
 0xb3f   : > { %12331 = vmatmul.mubr.msk.bf16.gmra.mrb[92].mxu1 %vm3301_vm1, %v13299_v56 }
 0xb40   : > { %12339 = vmatpush3.bf16.msra.mxu1 %v15451_v38  ;;  %12342 = vmatprep.mubr.msk.bf16.mxu1 %vm3301_vm1, %v13300_v40  ;;  %v13303_v38 = vld [vmem:[%s17456_s11 + $0xb8] sm:$0xff]  }
 0xb41   : > { %12340 = vmatprep.subr.bf16.mxu1 %v15471_v27 }
 0xb44   : > { %12341 = vmatpush3.bf16.msra.mxu1 %v15471_v27  ;;  %v13304_v27 = vld [vmem:[%s17456_s11 + $0xc0] sm:$0xff]  }
 0xb45   : > { %12350 = vmatprep.subr.bf16.mxu1 %v15513_v31 }
 0xb47   : > { %12343 = vmatmul.mubr.msk.bf16.vlgmr.msra.gmra.mrb[88].mxu1 %vm3301_vm1, %v13301_v49 }
 0xb48   : > { %12351 = vmatpush3.bf16.msra.mxu1 %v15513_v31  ;;  %12346 = vmatprep.mubr.msk.bf16.mxu1 %vm3301_vm1, %v13302_v34  ;;  %v13305_v31 = vld [vmem:[%s17456_s11 + $0xc8] sm:$0xff]  }
 0xb49   : > { %12352 = vmatprep.subr.bf16.mxu1 %v15526_v29 }
 0xb4c   : > { %12353 = vmatpush3.bf16.msra.mxu1 %v15526_v29  ;;  %v13306_v29 = vld [vmem:[%s17457_s12 + $0x2a0] sm:$0xff]  }
 0xb4d   : > { %12354 = vmatprep.subr.bf16.mxu1 %v15538_v4 }
 0xb4f   : > { %12347 = vmatmul.mubr.msk.bf16.gmra.mrb[92].mxu1 %vm3301_vm1, %v13303_v38 }
 0xb50   : > { %12355 = vmatpush3.bf16.msra.mxu1 %v15538_v4  ;;  %12358 = vmatprep.mubr.msk.bf16.mxu1 %vm3301_vm1, %v13304_v27  ;;  %v13307_v4 = vld [vmem:[%s17457_s12 + $0x2a8] sm:$0xff]  }
 0xb51   : > { %12356 = vmatprep.subr.bf16.mxu1 %v15550_v54 }
 0xb54   : > { %12357 = vmatpush3.bf16.msra.mxu1 %v15550_v54  ;;  %v13309_v54 = vld [vmem:[%s17456_s11 + $0xd8] sm:$0xff]  }
 0xb55   : > { %5711 = vmatprep.subr.bf16.mxu1 %v17481_v11 }
 0xb57   : > { %12359 = vmatmul.mubr.msk.bf16.vlgmr.msra.gmra.mrb[88].mxu1 %vm3301_vm1, %v13305_v31 }
 0xb58   : > { %5712 = vmatpush1.bf16.msra.mxu1 %v13306_v29  ;;  %12362 = vmatprep.mubr.msk.bf16.mxu1 %vm3301_vm1, %v13308_v62 }
 0xb59   : > { %5713 = vmatprep.subr.bf16.mxu1 %v17481_v11 }
 0xb5c   : > { %5714 = vmatpush1.bf16.msra.mxu1 %v13307_v4 }
 0xb5d   : > { %5715 = vmatprep.subr.bf16.mxu1 %v17481_v11 }
 0xb5f   : > { %12363 = vmatmul.mubr.msk.bf16.gmra.mrb[92].mxu1 %vm3301_vm1, %v13309_v54 }
 0xb60   : > { %5716 = vmatpush1.bf16.msra.mxu1 %v13310_v9  ;;  %10714 = vmatprep.mubr.msk.bf16.mxu1 %vm3301_vm1, %v14842_v36  ;;  %v13314_v36 = vld [vmem:[%s17457_s12 + $0x2d0] sm:$0xff]  }
 0xb61   : > { %5717 = vmatprep.subr.bf16.mxu1 %v17481_v11 }
 0xb64   : > { %5718 = vmatpush1.bf16.msra.mxu1 %v13311_v46 }
 0xb65   : > { %5719 = vmatprep.subr.bf16.mxu1 %v17481_v11 }
 0xb68   : > { %5720 = vmatpush1.bf16.msra.mxu1 %v13312_v35 }
 0xb69   : > { %5721 = vmatprep.subr.bf16.mxu1 %v17481_v11 }
 0xb6c   : > { %5722 = vmatpush1.bf16.msra.mxu1 %v13313_v8 }
 0xb6d   : > { %5723 = vmatprep.subr.bf16.mxu1 %v17481_v11 }
 0xb70   : > { %5724 = vmatpush1.bf16.msra.mxu1 %v13314_v36 }
 0xb71   : > { %5725 = vmatprep.subr.bf16.mxu1 %v17481_v11 }
 0xb74   : > { %5726 = vmatpush1.bf16.msra.mxu1 %v13315_v32 }
 0xb75   : > { %5727 = vmatprep.subr.bf16.mxu1 %v17481_v11 }
 0xb78   : > { %5728 = vmatpush1.bf16.msra.mxu1 %v13316_v63 }
 0xb79   : > { %5729 = vmatprep.subr.bf16.mxu1 %v17481_v11 }
 0xb7c   : > { %5730 = vmatpush1.bf16.msra.mxu1 %v13317_v43 }
 0xb7d   : > { %5731 = vmatprep.subr.bf16.mxu1 %v17481_v11 }
 0xb80   : > { %5732 = vmatpush1.bf16.msra.mxu1 %v13318_v50 }
 0xb81   : > { %5733 = vmatprep.subr.bf16.mxu1 %v17481_v11 }
 0xb84   : > { %5734 = vmatpush1.bf16.msra.mxu1 %v13319_v28 }
 0xb87   : > { %5744 = vmatmul.mubr.bf16.vlgmr.msra.gmra.mrb[112].mxu1 %v14851_v30  ;;  %v15750_v30 = vadd.f32 %v11525_v59, %v11524_v58 }
 0xb88   : > { %10715 = vmatprep.mubr.msk.bf16.mxu1 %vm3301_vm1, %v14858_v41 }
 0xb8f   : > { %5752 = vmatmul.mubr.bf16.gmra.mrb[116].mxu1 %v14872_v18  ;;  %v11530_v18 = vpop.f32.mrb[12].mxu0 }
 0xb90   : > { %10716 = vmatprep.mubr.msk.bf16.mxu1 %vm3301_vm1, %v14874_v61  ;;  %v11531_v61 = vpop.f32.mrb[13].mxu0 }
 0xb91   : > { %v11533_v5 = vpop.f32.mrb[14].mxu0  ;;  %v15756_v57 = vadd.f32 %v11531_v61, %v11530_v18 }
 0xb97   : > { %5760 = vmatmul.mubr.bf16.gmra.mrb[120].mxu1 %v14893_v48  ;;  %v11534_v48 = vpop.f32.mrb[15].mxu0 }
 0xb98   : > { %10717 = vmatprep.mubr.msk.bf16.mxu1 %vm3301_vm1, %v14895_v17  ;;  %v15758_v17 = vadd.f32 %v11534_v48, %v11533_v5  ;;  %v11536_v7 = vpop.f32.mrb[16].mxu0 }
 0xb99   : > { %v11537_v23 = vpop.f32.mrb[17].mxu0 }
 0xb9a   : > { %v11539_v22 = vpop.f32.mrb[18].mxu0  ;;  %v15762_v45 = vadd.f32 %v11537_v23, %v11536_v7 }
 0xb9b   : > { %v11540_v12 = vpop.f32.mrb[19].mxu0 }
 0xb9c   : > { %v15764_v2 = vadd.f32 %v11540_v12, %v11539_v22  ;;  %v11542_v56 = vpop.f32.mrb[20].mxu0 }
 0xb9d   : > { %v11543_v40 = vpop.f32.mrb[21].mxu0 }
 0xb9e   : > { %v11545_v49 = vpop.f32.mrb[22].mxu0  ;;  %v15772_v38 = vadd.f32 %v11543_v40, %v11542_v56 }
 0xb9f   : > { %5768 = vmatmul.mubr.bf16.gmra.mrb[124].mxu1 %v14914_v33  ;;  %v11546_v34 = vpop.f32.mrb[23].mxu0 }
 0xba0   : > { %12374 = vmatprep.mubr.msk.bf16.mxu1 %vm3301_vm1, %v13320_v53  ;;  %v15774_v27 = vadd.f32 %v11546_v34, %v11545_v49  ;;  %v11564_v29 = vpop.f32.mrb[24].mxu0 }
 0xba1   : > { %v11565_v62 = vpop.f32.mrb[25].mxu0 }
 0xba2   : > { %v11567_v4 = vpop.f32.mrb[26].mxu0  ;;  %v15778_v9 = vadd.f32 %v11565_v62, %v11564_v29 }
 0xba3   : > { %v11568_v54 = vpop.f32.mrb[27].mxu0 }
 0xba4   : > { %v15780_v46 = vadd.f32 %v11568_v54, %v11567_v4  ;;  %v11570_v8 = vpop.f32.mrb[28].mxu0 }
 0xba5   : > { %v11571_v36 = vpop.f32.mrb[29].mxu0 }
 0xba6   : > { %v6335_v35 = vpack.c.bf16 %v15780_v46, %v15778_v9  ;;  %v11573_v32 = vpop.f32.mrb[30].mxu0  ;;  %v15784_v43 = vadd.f32 %v11571_v36, %v11570_v8  ;;  %v13457_v9 = vld [vmem:[%s17449_s4 + $0x20] sm:$0xff]   ;;  %v17546_v46 = vpack.c.bf16 %v15752_v25, %v15750_v30  ;;  %v17549_v30 = vpack.c.bf16 %v15774_v27, %v15772_v38  ;;  %v13460_v38 = vld [vmem:[%s17449_s4 + $0x30] sm:$0xff]  }
 0xba7   : > { %v11574_v63 = vpop.f32.mrb[31].mxu0  ;;  %v13461_v27 = vld [vmem:[%s17448_s3 + $0xc0] ss:$8 sps:$4 sm:$0xff]  }
 0xba8   : > { %v15786_v50 = vadd.f32 %v11574_v63, %v11573_v32  ;;  %v11576_v58 = vpop.f32.mrb[32].mxu0 }
 0xba9   : > { %v11577_v59 = vpop.f32.mrb[33].mxu0 }
 0xbaa   : > { %v6336_v28 = vpack.c.bf16 %v15786_v50, %v15784_v43  ;;  %v15790_v26 = vadd.f32 %v11577_v59, %v11576_v58  ;;  %v11579_v15 = vpop.f32.mrb[34].mxu0  ;;  %v17548_v43 = vpack.c.bf16 %v15764_v2, %v15762_v45  ;;  %v13458_v50 = vld [vmem:[%s17449_s4 + $0x28] sm:$0xff]  }
 0xbab   : > { %v11580_v18 = vpop.f32.mrb[35].mxu0  ;;  %v13459_v2 = vld [vmem:[%s17448_s3 + $0xc4] ss:$8 sps:$4 sm:$0xff]  }
 0xbac   : > { %v15792_v61 = vadd.f32 %v11580_v18, %v11579_v15  ;;  %v11582_v5 = vpop.f32.mrb[36].mxu0 }
 0xbad   : > { %v11583_v7 = vpop.f32.mrb[37].mxu0 }
 0xbae   : > { %v6337_v48 = vpack.c.bf16 %v15792_v61, %v15790_v26  ;;  %v15796_v23 = vadd.f32 %v11583_v7, %v11582_v5  ;;  %v11585_v22 = vpop.f32.mrb[38].mxu0  ;;  %v13463_v26 = vld [vmem:[%s17449_s4 + $0x38] sm:$0xff]   ;;  %v15962_v61 = vld [vmem:[%s17449_s4 + $0x40] sm:$0xff]  }
 0xbaf   : > { %v11586_v12 = vpop.f32.mrb[39].mxu0 }
 0xbb0   : > { %v15798_v53 = vadd.f32 %v11586_v12, %v11585_v22  ;;  %v11616_v40 = vpop.f32.mrb[40].mxu0 }
 0xbb1   : > { %v11617_v49 = vpop.f32.mrb[41].mxu0 }
 0xbb2   : > { %v6338_v56 = vpack.c.bf16 %v15798_v53, %v15796_v23  ;;  %v11619_v34 = vpop.f32.mrb[42].mxu0  ;;  %v15802_v62 = vadd.f32 %v11617_v49, %v11616_v40  ;;  %v13466_v23 = vld [vmem:[%s17448_s3 + $0xe4] ss:$8 sps:$4 sm:$0xff]   ;;  %v13467_v53 = vld [vmem:[%s17448_s3 + $0xe0] ss:$8 sps:$4 sm:$0xff]  }
 0xbb3   : > { %v11620_v29 = vpop.f32.mrb[43].mxu0 }
 0xbb4   : > { %v15804_v4 = vadd.f32 %v11620_v29, %v11619_v34  ;;  %v11622_v8 = vpop.f32.mrb[44].mxu0 }
 0xbb5   : > { %v11623_v36 = vpop.f32.mrb[45].mxu0 }
 0xbb6   : > { %v15808_v32 = vadd.f32 %v11623_v36, %v11622_v8  ;;  %v11625_v63 = vpop.f32.mrb[46].mxu0  ;;  %v17550_v25 = vpack.c.bf16 %v15804_v4, %v15802_v62 }
 0xbb7   : > { %v11626_v58 = vpop.f32.mrb[47].mxu0 }
 0xbb8   : > { %v15810_v59 = vadd.f32 %v11626_v58, %v11625_v63  ;;  %v11628_v18 = vpop.f32.mrb[48].mxu0 }
 0xbb9   : > { %v11629_v5 = vpop.f32.mrb[49].mxu0 }
 0xbba   : > { %v11631_v7 = vpop.f32.mrb[50].mxu0  ;;  %v15814_v12 = vadd.f32 %v11629_v5, %v11628_v18 }
 0xbbb   : > { %v11632_v22 = vpop.f32.mrb[51].mxu0 }
 0xbbc   : > { %v15816_v40 = vadd.f32 %v11632_v22, %v11631_v7  ;;  %v11634_v34 = vpop.f32.mrb[52].mxu0 }
 0xbbd   : > { %v11635_v29 = vpop.f32.mrb[53].mxu0 }
 0xbbe   : > { %v15820_v8 = vadd.f32 %v11635_v29, %v11634_v34  ;;  %v11637_v36 = vpop.f32.mrb[54].mxu0 }
 0xbbf   : > { %v11638_v63 = vpop.f32.mrb[55].mxu0 }
 0xbc0   : > { %v15822_v58 = vadd.f32 %v11638_v63, %v11637_v36  ;;  %v11708_v62 = vpop.f32.mrb[56].mxu0 }
 0xbc1   : > { %v11709_v4 = vpop.f32.mrb[57].mxu0 }
 0xbc2   : > { %v17553_v45 = vpack.c.bf16 %v15822_v58, %v15820_v8  ;;  %v13469_v58 = vld [vmem:[%s17448_s3 + $0xf0] ss:$8 sps:$4 sm:$0xff]  }
 0xc5a   : > { %v5745_v15 = vpop.f32.mrb[112].mxu1 }
 0xc5b   : > { %v5747_v54 = vpop.f32.mrb[113].mxu1 }
 0xc5c   : > { %v5748_v18 = vpop.f32.mrb[114].mxu1 }
 0xc5d   : > { %v5785_v5 = vpack.c.bf16 %v5748_v18, %v5745_v15  ;;  %v5750_v7 = vpop.f32.mrb[115].mxu1 }
 0xc5f   : > { %12366 = vmatprep.subr.bf16.mxu1 %v5785_v5 }
 0xc60   : > { %12367 = vmatpush3.bf16.msra.mxu1 %v5785_v5  ;;  %v13456_v5 = vld [vmem:[%s17449_s4 + $0x8] sm:$0xff]  }
 0xc62   : > { %v5753_v22 = vpop.f32.mrb[116].mxu1 }
 0xc63   : > { %v5755_v49 = vpop.f32.mrb[117].mxu1 }
 0xc64   : > { %v5756_v31 = vpop.f32.mrb[118].mxu1  ;;  %v13455_v49 = vld [vmem:[%s17449_s4] sm:$0xff]  }
 0xc65   : > { %v5786_v16 = vpack.c.bf16 %v5756_v31, %v5753_v22  ;;  %v5758_v34 = vpop.f32.mrb[119].mxu1  ;;  %v13321_v31 = vld [vmem:[%s17456_s11 + $0xe8] sm:$0xff]  }
 0xc67   : > { %12368 = vmatprep.subr.bf16.mxu1 %v5786_v16 }
 0xc68   : > { %12369 = vmatpush3.bf16.msra.mxu1 %v5786_v16  ;;  %v13322_v16 = vld [vmem:[%s17456_s11 + $0xf0] sm:$0xff]  }
 0xc6a   : > { %v5761_v29 = vpop.f32.mrb[120].mxu1 }
 0xc6b   : > { %v5763_v36 = vpop.f32.mrb[121].mxu1 }
 0xc6c   : > { %v5764_v63 = vpop.f32.mrb[122].mxu1 }
 0xc6d   : > { %v5787_v33 = vpack.c.bf16 %v5764_v63, %v5761_v29  ;;  %v5766_v41 = vpop.f32.mrb[123].mxu1 }
 0xc6e   : > { %v13324_v41 = vld [vmem:[%s17456_s11 + $0x100] sm:$0xff]  }
 0xc6f   : > { %12370 = vmatprep.subr.bf16.mxu1 %v5787_v33 }
 0xc70   : > { %12371 = vmatpush3.bf16.msra.mxu1 %v5787_v33  ;;  %v13453_v33 = vld [vmem:[%s17449_s4 + $0x10] sm:$0xff]  }
 0xc72   : > { %v5769_v54 = vpop.f32.mrb[124].mxu1 }
 0xc73   : > { %v5771_v11 = vpop.f32.mrb[125].mxu1 }
 0xc74   : > { %v5772_v15 = vpop.f32.mrb[126].mxu1  ;;  %v13323_v11 = vld [vmem:[%s17456_s11 + $0xf8] sm:$0xff]  }
 0xc75   : > { %v5788_v18 = vpack.c.bf16 %v5772_v15, %v5769_v54  ;;  %v5774_v7 = vpop.f32.mrb[127].mxu1 }
 0xc77   : > { %12372 = vmatprep.subr.bf16.mxu1 %v5788_v18 }
 0xc78   : > { %12373 = vmatpush3.bf16.msra.mxu1 %v5788_v18 }
 0xc79   : > { %12382 = vmatprep.subr.bf16.mxu1 %v15582_v3 }
 0xc7b   : > { %12375 = vmatmul.mubr.msk.bf16.vlgmr.msra.gmra.mrb[88].mxu1 %vm3301_vm1, %v13321_v31 }
 0xc7c   : > { %12383 = vmatpush3.bf16.msra.mxu1 %v15582_v3  ;;  %12378 = vmatprep.mubr.msk.bf16.mxu1 %vm3301_vm1, %v13322_v16  ;;  %v13325_v3 = vld [vmem:[%s17456_s11 + $0x108] sm:$0xff]  }
 0xc7d   : > { %12384 = vmatprep.subr.bf16.mxu1 %v15594_v10 }
 0xc80   : > { %12385 = vmatpush3.bf16.msra.mxu1 %v15594_v10  ;;  %v13326_v10 = vld [vmem:[%s17456_s11 + $0x110] sm:$0xff]  }
 0xc81   : > { %12386 = vmatprep.subr.bf16.mxu1 %v15603_v19 }
 0xc83   : > { %12379 = vmatmul.mubr.msk.bf16.gmra.mrb[92].mxu1 %vm3301_vm1, %v13323_v11 }
 0xc84   : > { %12387 = vmatpush3.bf16.msra.mxu1 %v15603_v19  ;;  %12390 = vmatprep.mubr.msk.bf16.mxu1 %vm3301_vm1, %v13324_v41  ;;  %v13454_v19 = vld [vmem:[%s17449_s4 + $0x18] sm:$0xff]  }
 0xc85   : > { %12388 = vmatprep.subr.bf16.mxu1 %v15611_v37 }
 0xc88   : > { %12389 = vmatpush3.bf16.msra.mxu1 %v15611_v37  ;;  %v13327_v37 = vld [vmem:[%s17456_s11 + $0x118] sm:$0xff]  }
 0xc89   : > { %12398 = vmatprep.subr.bf16.mxu1 %v13453_v33 }
 0xc8b   : > { %12391 = vmatmul.mubr.msk.bf16.vlgmr.msra.gmra.mrb[88].mxu1 %vm3301_vm1, %v13325_v3 }
 0xc8c   : > { %12394 = vmatprep.mubr.msk.bf16.mxu1 %vm3301_vm1, %v13326_v10  ;;  %12399 = vmatpush3.bf16.msra.mxu1 %v13453_v33 }
 0xc8d   : > { %12400 = vmatprep.subr.bf16.mxu1 %v13454_v19 }
 0xc90   : > { %12401 = vmatpush3.bf16.msra.mxu1 %v13454_v19 }
 0xc91   : > { %12410 = vmatprep.subr.bf16.mxu1 %v13455_v49 }
 0xc93   : > { %12395 = vmatmul.mubr.msk.bf16.gmra.mrb[92].mxu1 %vm3301_vm1, %v13327_v37 }
 0xc94   : > { %12402 = vmatprep.mubr.msk.bf16.mxu1 %vm805_vm0, %v6335_v35  ;;  %v17547_v35 = vpack.c.bf16 %v15758_v17, %v15756_v57  ;;  %v17551_v57 = vpack.c.bf16 %v15810_v59, %v15808_v32  ;;  %v17552_v17 = vpack.c.bf16 %v15816_v40, %v15814_v12  ;;  %v15977_v32 = vadd.f32 %v11709_v4, %v11708_v62  ;;  %v11711_v59 = vpop.f32.mrb[58].mxu0 }
 0xc95   : > { %v11712_v12 = vpop.f32.mrb[59].mxu0 }
 0xc96   : > { %v15979_v40 = vadd.f32 %v11712_v12, %v11711_v59  ;;  %v11714_v8 = vpop.f32.mrb[60].mxu0 }
 0xc97   : > { %v11715_v22 = vpop.f32.mrb[61].mxu0 }
 0xc98   : > { %v15986_v29 = vadd.f32 %v11715_v22, %v11714_v8  ;;  %v11717_v36 = vpop.f32.mrb[62].mxu0 }
 0xc99   : > { %v11718_v63 = vpop.f32.mrb[63].mxu0 }
 0xc9a   : > { %v15988_v54 = vadd.f32 %v11718_v63, %v11717_v36  ;;  %v11720_v15 = vpop.f32.mrb[64].mxu0 }
 0xc9b   : > { %12403 = vmatmul.mubr.msk.bf16.vlgmr.msra.gmra.mrb[128].mxu1 %vm805_vm0, %v6336_v28  ;;  %v13462_v28 = vld [vmem:[%s17448_s3 + $0xd4] ss:$8 sps:$4 sm:$0xff]   ;;  %v11721_v18 = vpop.f32.mrb[65].mxu0 }
 0xc9c   : > { %12406 = vmatprep.mubr.msk.bf16.mxu1 %vm805_vm0, %v6337_v48  ;;  %12411 = vmatpush3.bf16.msra.mxu1 %v13455_v49  ;;  %v13465_v48 = vld [vmem:[%s17448_s3 + $0xd0] ss:$8 sps:$4 sm:$0xff]   ;;  %v15992_v31 = vadd.f32 %v11721_v18, %v11720_v15  ;;  %v11723_v16 = vpop.f32.mrb[66].mxu0 }
 0xc9d   : > { %12412 = vmatprep.subr.bf16.mxu1 %v13456_v5  ;;  %v11724_v11 = vpop.f32.mrb[67].mxu0 }
 0xc9e   : > { %v15994_v41 = vadd.f32 %v11724_v11, %v11723_v16  ;;  %v11726_v10 = vpop.f32.mrb[68].mxu0 }
 0xc9f   : > { %v11727_v33 = vpop.f32.mrb[69].mxu0 }
 0xca0   : > { %12413 = vmatpush3.bf16.msra.mxu1 %v13456_v5  ;;  %v11729_v19 = vpop.f32.mrb[70].mxu0  ;;  %v15998_v49 = vadd.f32 %v11727_v33, %v11726_v10 }
 0xca1   : > { %12422 = vmatprep.subr.bf16.mxu1 %v13457_v9  ;;  %v11730_v37 = vpop.f32.mrb[71].mxu0 }
 0xca2   : > { %v16000_v5 = vadd.f32 %v11730_v37, %v11729_v19 }
 0xca3   : > { %12407 = vmatmul.mubr.msk.bf16.gmra.mrb[132].mxu1 %vm805_vm0, %v6338_v56  ;;  %v13468_v56 = vld [vmem:[%s17448_s3 + $0xf4] ss:$8 sps:$4 sm:$0xff]  }
 0xca4   : > { %12414 = vmatprep.mubr.msk.bf16.mxu1 %vm805_vm0, %v17546_v46  ;;  %v11754_v46 = vpop.f32.mrb[72].mxu0 }
 0xcab   : > { %12415 = vmatmul.mubr.msk.bf16.vlgmr.msra.gmra.mrb[128].mxu1 %vm805_vm0, %v17547_v35  ;;  %v11755_v35 = vpop.f32.mrb[73].mxu0 }
 0xcac   : > { %12423 = vmatpush3.bf16.msra.mxu1 %v13457_v9  ;;  %12418 = vmatprep.mubr.msk.bf16.mxu1 %vm805_vm0, %v17548_v43  ;;  %v11757_v43 = vpop.f32.mrb[74].mxu0 }
 0xcad   : > { %12424 = vmatprep.subr.bf16.mxu1 %v13458_v50 }
 0xcb0   : > { %12425 = vmatpush3.bf16.msra.mxu1 %v13458_v50  ;;  %v11758_v50 = vpop.f32.mrb[75].mxu0 }
 0xcb1   : > { %11646 = vmatprep.subr.bf16.mxu1 %v17530_v44 }
 0xcb3   : > { %12419 = vmatmul.mubr.msk.bf16.gmra.mrb[132].mxu1 %vm805_vm0, %v17549_v30  ;;  %v16004_v30 = vadd.f32 %v11755_v35, %v11754_v46  ;;  %v10790_v35 = vld [vmem:[%s17458_s13] ss:$0 sm:$0xff] }
 0xcb4   : > { %12426 = vmatprep.mubr.msk.bf16.mxu1 %vm805_vm0, %v17550_v25  ;;  %v16006_v25 = vadd.f32 %v11758_v50, %v11757_v43 }
 0xcbb   : > { %12427 = vmatmul.mubr.msk.bf16.vlgmr.msra.gmra.mrb[128].mxu1 %vm805_vm0, %v17551_v57 }
 0xcbc   : > { %11647 = vmatpush3.bf16.msra.mxu1 %v17531_v1  ;;  %12430 = vmatprep.mubr.msk.bf16.mxu1 %vm805_vm0, %v17552_v17  ;;  %v11760_v17 = vpop.f32.mrb[76].mxu0 }
 0xcbd   : > { %11648 = vmatprep.subr.bf16.mxu1 %v17532_v6 }
 0xcc0   : > { %11649 = vmatpush3.bf16.msra.mxu1 %v17533_v39 }
 0xcc1   : > { %11650 = vmatprep.subr.bf16.mxu1 %v17534_v21 }
 0xcc3   : > { %12431 = vmatmul.mubr.msk.bf16.gmra.mrb[132].mxu1 %vm805_vm0, %v17553_v45  ;;  %v11761_v45 = vpop.f32.mrb[77].mxu0 }
 0xcc4   : > { %11651 = vmatpush3.bf16.msra.mxu1 %v17535_v51  ;;  %6679 = vmatprep.mubr.bf16.mxu1 %v13459_v2  ;;  %v11763_v2 = vpop.f32.mrb[78].mxu0 }
 0xcc5   : > { %11652 = vmatprep.subr.bf16.mxu1 %v17536_v52 }
 0xcc8   : > { %11653 = vmatpush3.bf16.msra.mxu1 %v17537_v60 }
 0xcc9   : > { %11654 = vmatprep.subr.bf16.mxu1 %v17538_v24 }
 0xccc   : > { %11655 = vmatpush3.bf16.msra.mxu1 %v17539_v47 }
 0xccd   : > { %11656 = vmatprep.subr.bf16.mxu1 %v17540_v0 }
 0xcd0   : > { %11657 = vmatpush3.bf16.msra.mxu1 %v17541_v20 }
 0xcd1   : > { %11658 = vmatprep.subr.bf16.mxu1 %v17542_v13 }
 0xcd4   : > { %11659 = vmatpush3.bf16.msra.mxu1 %v17543_v14 }
 0xcd5   : > { %11660 = vmatprep.subr.bf16.mxu1 %v17544_v42 }
 0xcd8   : > { %11661 = vmatpush3.bf16.msra.mxu1 %v17545_v55 }
 0xcd9   : > { %12434 = vmatprep.subr.bf16.mxu1 %v13460_v38 }
 0xcdb   : > { %6680 = vmatmul.mubr.bf16.vlgmr.msra.gmra.mrb[136].mxu1 %v13461_v27  ;;  %v16010_v27 = vadd.f32 %v11761_v45, %v11760_v17 }
 0xcdc   : > { %6687 = vmatprep.mubr.bf16.mxu1 %v13462_v28  ;;  %12435 = vmatpush3.bf16.msra.mxu1 %v13460_v38  ;;  %v11764_v38 = vpop.f32.mrb[79].mxu0 }
 0xcdd   : > { %12436 = vmatprep.subr.bf16.mxu1 %v13463_v26  ;;  %v16012_v28 = vadd.f32 %v11764_v38, %v11763_v2 }
 0xce0   : > { %12437 = vmatpush3.bf16.msra.mxu1 %v13463_v26 }
 0xce1   : > { %12446 = vmatprep.subr.bf16.mxu1 %v15962_v61 }
 0xce3   : > { %6688 = vmatmul.mubr.bf16.gmra.mrb[140].mxu1 %v13465_v48  ;;  %v11766_v48 = vpop.f32.mrb[80].mxu0 }
 0xce4   : > { %6695 = vmatprep.mubr.bf16.mxu1 %v13466_v23  ;;  %v11767_v23 = vpop.f32.mrb[81].mxu0 }
 0xce5   : > { %v16016_v62 = vadd.f32 %v11767_v23, %v11766_v48 }
 0xceb   : > { %6696 = vmatmul.mubr.bf16.gmra.mrb[144].mxu1 %v13467_v53  ;;  %v11769_v53 = vpop.f32.mrb[82].mxu0 }
 0xcec   : > { %6703 = vmatprep.mubr.bf16.mxu1 %v13468_v56  ;;  %v11770_v56 = vpop.f32.mrb[83].mxu0 }
 0xced   : > { %v16018_v4 = vadd.f32 %v11770_v56, %v11769_v53  ;;  %v11772_v12 = vpop.f32.mrb[84].mxu0 }
 0xcee   : > { %v11773_v8 = vpop.f32.mrb[85].mxu0 }
 0xcef   : > { %v16022_v36 = vadd.f32 %v11773_v8, %v11772_v12 }
 0xcf3   : > { %6704 = vmatmul.mubr.bf16.gmra.mrb[148].mxu1 %v13469_v58  ;;  %v11775_v58 = vpop.f32.mrb[86].mxu0 }
 0xcf4   : > { %v11776_v22 = vpop.f32.mrb[87].mxu0 }
 0xcf5   : > { %v16024_v63 = vadd.f32 %v11776_v22, %v11775_v58  ;;  %v11800_v18 = vpop.f32.mrb[88].mxu0 }
 0xcf6   : > { %v11801_v16 = vpop.f32.mrb[89].mxu0 }
 0xcf7   : > { %v11803_v11 = vpop.f32.mrb[90].mxu0  ;;  %v16028_v33 = vadd.f32 %v11801_v16, %v11800_v18 }
 0xcf8   : > { %v11804_v10 = vpop.f32.mrb[91].mxu0 }
 0xcf9   : > { %v16030_v19 = vadd.f32 %v11804_v10, %v11803_v11  ;;  %v11806_v46 = vpop.f32.mrb[92].mxu0 }
 0xcfa   : > { %v11807_v43 = vpop.f32.mrb[93].mxu0 }
 0xcfb   : > { %v11809_v50 = vpop.f32.mrb[94].mxu0  ;;  %v16037_v48 = vadd.f32 %v11807_v43, %v11806_v46 }
 0xcfc   : > { %v11810_v45 = vpop.f32.mrb[95].mxu0 }
 0xcfd   : > { %v16039_v23 = vadd.f32 %v11810_v45, %v11809_v50  ;;  %v11812_v11 = vpop.f32.mrb[96].mxu0 }
 0xcfe   : > { %v11813_v15 = vpop.f32.mrb[97].mxu0 }
 0xcff   : > { %v11815_v46 = vpop.f32.mrb[98].mxu0  ;;  %v16047_v59 = vadd.f32 %v11813_v15, %v11812_v11 }
 0xd00   : > { %v11816_v45 = vpop.f32.mrb[99].mxu0 }
 0xd01   : > { %v16049_v26 = vadd.f32 %v11816_v45, %v11815_v46 }
 0xd5e   : > { %v12392_v17 = vpop.f32.mrb[88].mxu1 }
 0xd5f   : > { %v6183_v2 = vadd.f32 %v12392_v17, %v10790_v35  ;;  %v6135_v38 = vpop.f32.mrb[89].mxu1 }
 0xd60   : > { %v6181_v53 = vadd.f32 %v10790_v35, %v6135_v38  ;;  %v12393_v56 = vpop.f32.mrb[90].mxu1 }
 0xd61   : > { %v6184_v12 = vadd.f32 %v12393_v56, %v10790_v35  ;;  %v6138_v8 = vpop.f32.mrb[91].mxu1  ;;  %v6191_v18 = vmax.f32 %v6183_v2, 0.0 }
 0xd62   : > { %v6182_v22 = vadd.f32 %v10790_v35, %v6138_v8  ;;  %v6189_v10 = vmax.f32 %v6181_v53, 0.0 }
 0xd63   : > { %v6192_v16 = vmax.f32 %v6184_v12, 0.0 }
 0xd64   : > { %v6190_v37 = vmax.f32 %v6182_v22, 0.0 }
 0xd65   : > { %v16043_v17 = vpack.c.bf16 %v6192_v16, %v6191_v18 }
 0xd66   : > { %v16045_v43 = vpack.c.bf16 %v6190_v37, %v6189_v10  ;;  %v12396_v50 = vpop.f32.mrb[92].mxu1  ;;  %v11818_v37 = vpop.f32.mrb[100].mxu0 }
 0xd67   : > { %17554 = vst [vmem:[#allocation2_spill] sm:$0xff] %v16043_v17  ;;  %v6187_v38 = vadd.f32 %v12396_v50, %v10790_v35  ;;  %v6151_v56 = vpop.f32.mrb[93].mxu1  ;;  %v11819_v50 = vpop.f32.mrb[101].mxu0 }
 0xd68   : > { %17555 = vst [vmem:[#allocation12_spill] sm:$0xff] %v16045_v43  ;;  %v6185_v8 = vadd.f32 %v10790_v35, %v6151_v56  ;;  %v12397_v2 = vpop.f32.mrb[94].mxu1  ;;  %v11821_v11 = vpop.f32.mrb[102].mxu0  ;;  %v16057_v45 = vadd.f32 %v11819_v50, %v11818_v37 }
 0xd69   : > { %v6188_v12 = vadd.f32 %v12397_v2, %v10790_v35  ;;  %v6154_v58 = vpop.f32.mrb[95].mxu1  ;;  %v6195_v18 = vmax.f32 %v6187_v38, 0.0  ;;  %v11822_v46 = vpop.f32.mrb[103].mxu0 }
 0xd6a   : > { %v6186_v22 = vadd.f32 %v10790_v35, %v6154_v58  ;;  %v6193_v10 = vmax.f32 %v6185_v8, 0.0  ;;  %v16059_v56 = vadd.f32 %v11822_v46, %v11821_v11  ;;  %v11846_v35 = vpop.f32.mrb[104].mxu0 }
 0xd6b   : > { %v6196_v16 = vmax.f32 %v6188_v12, 0.0  ;;  %v11847_v58 = vpop.f32.mrb[105].mxu0 }
 0xd6c   : > { %v6194_v57 = vmax.f32 %v6186_v22, 0.0  ;;  %v11849_v38 = vpop.f32.mrb[106].mxu0  ;;  %v16063_v8 = vadd.f32 %v11847_v58, %v11846_v35 }
 0xd6d   : > { %v16053_v9 = vpack.c.bf16 %v6196_v16, %v6195_v18  ;;  %v11850_v12 = vpop.f32.mrb[107].mxu0 }
 0xd6e   : > { %v16055_v15 = vpack.c.bf16 %v6194_v57, %v6193_v10  ;;  %v16065_v22 = vadd.f32 %v11850_v12, %v11849_v38  ;;  %v11852_v18 = vpop.f32.mrb[108].mxu0 }
 0xd6f   : > { %17556 = vst [vmem:[#allocation4_spill] sm:$0xff] %v16053_v9  ;;  %v11853_v16 = vpop.f32.mrb[109].mxu0 }
 0xd70   : > { %17557 = vst [vmem:[#allocation11_spill] sm:$0xff] %v16055_v15  ;;  %v16069_v37 = vadd.f32 %v11853_v16, %v11852_v18  ;;  %v11855_v10 = vpop.f32.mrb[110].mxu0 }
 0xd71   : > { %v11856_v50 = vpop.f32.mrb[111].mxu0 }
 0xd72   : > { %v16071_v11 = vadd.f32 %v11856_v50, %v11855_v10  ;;  %v11858_v2 = vpop.f32.mrb[112].mxu0 }
 0xd73   : > { %v11859_v53 = vpop.f32.mrb[113].mxu0 }
 0xd74   : > { %v11861_v35 = vpop.f32.mrb[114].mxu0  ;;  %v16075_v38 = vadd.f32 %v11859_v53, %v11858_v2 }
 0xd75   : > { %v11862_v58 = vpop.f32.mrb[115].mxu0 }
 0xd76   : > { %v16077_v12 = vadd.f32 %v11862_v58, %v11861_v35  ;;  %v11864_v18 = vpop.f32.mrb[116].mxu0 }
 0xd77   : > { %v11865_v16 = vpop.f32.mrb[117].mxu0 }
 0xd78   : > { %v16081_v3 = vadd.f32 %v11865_v16, %v11864_v18  ;;  %v11867_v10 = vpop.f32.mrb[118].mxu0 }
 0xd79   : > { %v11868_v50 = vpop.f32.mrb[119].mxu0 }
 0xd7a   : > { %v16083_v7 = vadd.f32 %v11868_v50, %v11867_v10 }
 0xdae   : > { %v11662_v34 = vpop.f32.mrb[136].mxu1 }
 0xdaf   : > { %v11663_v9 = vpop.f32.mrb[137].mxu1 }
 0xdb0   : > { %v11664_v53 = vadd.f32 %v11663_v9, %v11662_v34  ;;  %v11665_v2 = vpop.f32.mrb[138].mxu1 }
 0xdb1   : > { %v11666_v35 = vpop.f32.mrb[139].mxu1 }
 0xdb2   : > { %v11667_v58 = vadd.f32 %v11666_v35, %v11665_v2 }
 0xdb4   : > { %v6712_v15 = vpack.c.bf16 %v11667_v58, %v11664_v53  ;;  %v13470_v53 = vld [vmem:[%s17449_s4 + $0x48] sm:$0xff]  }
 0xdb6   : > { %v11668_v17 = vpop.f32.mrb[140].mxu1  ;;  %12438 = vmatprep.mubr.msk.bf16.mxu1 %vm805_vm0, %v6712_v15 }
 0xdb7   : > { %v11669_v57 = vpop.f32.mrb[141].mxu1 }
 0xdb8   : > { %v11670_v18 = vadd.f32 %v11669_v57, %v11668_v17  ;;  %v11671_v16 = vpop.f32.mrb[142].mxu1 }
 0xdb9   : > { %v11672_v43 = vpop.f32.mrb[143].mxu1 }
 0xdba   : > { %v11673_v55 = vadd.f32 %v11672_v43, %v11671_v16  ;;  %v17558_v16 = vpack.c.bf16 %v15979_v40, %v15977_v32  ;;  %v13473_v32 = vld [vmem:[%s17449_s4 + $0x60] sm:$0xff]   ;;  %v17561_v40 = vpack.c.bf16 %v16000_v5, %v15998_v49  ;;  %v13475_v49 = vld [vmem:[%s17449_s4 + $0x70] sm:$0xff]   ;;  %v17565_v5 = vpack.c.bf16 %v16024_v63, %v16022_v36 }
 0xdbc   : > { %v6713_v10 = vpack.c.bf16 %v11673_v55, %v11670_v18  ;;  %v13471_v55 = vld [vmem:[%s17449_s4 + $0x50] sm:$0xff]  }
 0xdbe   : > { %v11674_v50 = vpop.f32.mrb[144].mxu1  ;;  %12439 = vmatmul.mubr.msk.bf16.vlgmr.msra.gmra.mrb[128].mxu1 %vm805_vm0, %v6713_v10  ;;  %v17559_v10 = vpack.c.bf16 %v15988_v54, %v15986_v29  ;;  %v17562_v29 = vpack.c.bf16 %v16006_v25, %v16004_v30  ;;  %v17563_v54 = vpack.c.bf16 %v16012_v28, %v16010_v27  ;;  %v17566_v30 = vpack.c.bf16 %v16030_v19, %v16028_v33  ;;  %v13476_v28 = vld [vmem:[%s17449_s4 + $0x78] sm:$0xff]  }
 0xdbf   : > { %v11675_v46 = vpop.f32.mrb[145].mxu1  ;;  %12447 = vmatpush3.bf16.msra.mxu1 %v15962_v61  ;;  %v17567_v25 = vpack.c.bf16 %v16039_v23, %v16037_v48  ;;  %v17568_v27 = vpack.c.bf16 %v16049_v26, %v16047_v59  ;;  %v17571_v26 = vpack.c.bf16 %v16071_v11, %v16069_v37  ;;  %v17573_v59 = vpack.c.bf16 %v16083_v7, %v16081_v3 }
 0xdc0   : > { %v11676_v34 = vadd.f32 %v11675_v46, %v11674_v50  ;;  %v11677_v9 = vpop.f32.mrb[146].mxu1  ;;  %12448 = vmatprep.subr.bf16.mxu1 %v13470_v53  ;;  %v17560_v50 = vpack.c.bf16 %v15994_v41, %v15992_v31  ;;  %v17564_v31 = vpack.c.bf16 %v16018_v4, %v16016_v62  ;;  %v13474_v41 = vld [vmem:[%s17449_s4 + $0x68] sm:$0xff]   ;;  %v17569_v62 = vpack.c.bf16 %v16059_v56, %v16057_v45 }
 0xdc1   : > { %v11678_v15 = vpop.f32.mrb[147].mxu1  ;;  %v17570_v4 = vpack.c.bf16 %v16065_v22, %v16063_v8 }
 0xdc2   : > { %v11679_v2 = vadd.f32 %v11678_v15, %v11677_v9 }
 0xdc3   : > { %12449 = vmatpush3.bf16.msra.mxu1 %v13470_v53 }
 0xdc4   : > { %v6714_v17 = vpack.c.bf16 %v11679_v2, %v11676_v34  ;;  %12458 = vmatprep.subr.bf16.mxu1 %v13471_v55  ;;  %v13472_v34 = vld [vmem:[%s17449_s4 + $0x58] sm:$0xff]   ;;  %v13488_v2 = vld [vmem:[%s17457_s12 + $0x8] sm:$0xff]  }
 0xdc6   : > { %v11680_v43 = vpop.f32.mrb[148].mxu1  ;;  %12442 = vmatprep.mubr.msk.bf16.mxu1 %vm805_vm0, %v6714_v17 }
 0xdc7   : > { %v11681_v61 = vpop.f32.mrb[149].mxu1 }
 0xdc8   : > { %v11682_v57 = vadd.f32 %v11681_v61, %v11680_v43  ;;  %v11683_v46 = vpop.f32.mrb[150].mxu1  ;;  %v13489_v61 = vld [vmem:[%s17457_s12 + $0x10] sm:$0xff]  }
 0xdc9   : > { %v11684_v35 = vpop.f32.mrb[151].mxu1 }
 0xdca   : > { %v11685_v58 = vadd.f32 %v11684_v35, %v11683_v46 }
 0xdcc   : > { %v6715_v18 = vpack.c.bf16 %v11685_v58, %v11682_v57 }
 0xdce   : > { %12443 = vmatmul.mubr.msk.bf16.gmra.mrb[132].mxu1 %vm805_vm0, %v6715_v18  ;;  %v13490_v18 = vld [vmem:[%s17457_s12 + $0x18] sm:$0xff]  }
 0xdcf   : > { %12450 = vmatprep.mubr.msk.bf16.mxu1 %vm805_vm0, %v17558_v16 }
 0xdd6   : > { %12451 = vmatmul.mubr.msk.bf16.vlgmr.msra.gmra.mrb[128].mxu1 %vm805_vm0, %v17559_v10  ;;  %v13491_v10 = vld [vmem:[%s17457_s12 + $0x20] sm:$0xff]  }
 0xdd7   : > { %12454 = vmatprep.mubr.msk.bf16.mxu1 %vm805_vm0, %v17560_v50  ;;  %12459 = vmatpush3.bf16.msra.mxu1 %v13471_v55  ;;  %v13492_v50 = vld [vmem:[%s17457_s12 + $0x28] sm:$0xff]  }
 0xdd8   : > { %12460 = vmatprep.subr.bf16.mxu1 %v13472_v34 }
 0xddb   : > { %12461 = vmatpush3.bf16.msra.mxu1 %v13472_v34  ;;  %v13493_v34 = vld [vmem:[%s17457_s12 + $0x30] sm:$0xff]  }
 0xddc   : > { %12470 = vmatprep.subr.bf16.mxu1 %v13473_v32 }
 0xdde   : > { %12455 = vmatmul.mubr.msk.bf16.gmra.mrb[132].mxu1 %vm805_vm0, %v17561_v40  ;;  %v13495_v40 = vld [vmem:[%s17457_s12 + $0x40] sm:$0xff]  }
 0xddf   : > { %12462 = vmatprep.mubr.msk.bf16.mxu1 %vm805_vm0, %v17562_v29  ;;  %v13496_v29 = vld [vmem:[%s17457_s12 + $0x48] sm:$0xff]  }
 0xde6   : > { %12463 = vmatmul.mubr.msk.bf16.vlgmr.msra.gmra.mrb[128].mxu1 %vm805_vm0, %v17563_v54  ;;  %v13497_v54 = vld [vmem:[%s17457_s12 + $0x50] sm:$0xff]  }
 0xde7   : > { %12466 = vmatprep.mubr.msk.bf16.mxu1 %vm805_vm0, %v17564_v31  ;;  %12471 = vmatpush3.bf16.msra.mxu1 %v13473_v32  ;;  %v13494_v32 = vld [vmem:[%s17457_s12 + $0x38] sm:$0xff]  }
 0xde8   : > { %12472 = vmatprep.subr.bf16.mxu1 %v13474_v41  ;;  %v13498_v31 = vld [vmem:[%s17457_s12 + $0x58] sm:$0xff]  }
 0xdeb   : > { %12473 = vmatpush3.bf16.msra.mxu1 %v13474_v41 }
 0xdec   : > { %12482 = vmatprep.subr.bf16.mxu1 %v13475_v49 }
 0xdee   : > { %12467 = vmatmul.mubr.msk.bf16.gmra.mrb[132].mxu1 %vm805_vm0, %v17565_v5 }
 0xdef   : > { %12474 = vmatprep.mubr.msk.bf16.mxu1 %vm805_vm0, %v17566_v30 }
 0xdf6   : > { %12475 = vmatmul.mubr.msk.bf16.vlgmr.msra.gmra.mrb[128].mxu1 %vm805_vm0, %v17567_v25 }
 0xdf7   : > { %12483 = vmatpush3.bf16.msra.mxu1 %v13475_v49  ;;  %12478 = vmatprep.mubr.msk.bf16.mxu1 %vm805_vm0, %v17568_v27  ;;  %v13499_v49 = vld [vmem:[%s17450_s5] ss:$0 sm:$0xff] }
 0xdf8   : > { %12484 = vmatprep.subr.bf16.mxu1 %v13476_v28 }
 0xdfb   : > { %12485 = vmatpush3.bf16.msra.mxu1 %v13476_v28 }
 0xdfc   : > { %11876 = vmatprep.subr.bf16.mxu1 %v17530_v44  ;;  %v17572_v44 = vpack.c.bf16 %v16077_v12, %v16075_v38  ;;  %v13487_v38 = vld [vmem:[%s17457_s12] sm:$0xff]  }
 0xdfe   : > { %12479 = vmatmul.mubr.msk.bf16.gmra.mrb[132].mxu1 %vm805_vm0, %v17569_v62 }
 0xdff   : > { %12486 = vmatprep.mubr.msk.bf16.mxu1 %vm805_vm0, %v17570_v4 }
 0xe06   : > { %12487 = vmatmul.mubr.msk.bf16.vlgmr.msra.gmra.mrb[128].mxu1 %vm805_vm0, %v17571_v26 }
 0xe07   : > { %11877 = vmatpush3.bf16.msra.mxu1 %v17531_v1  ;;  %12490 = vmatprep.mubr.msk.bf16.mxu1 %vm805_vm0, %v17572_v44  ;;  %v13477_v1 = vld [vmem:[%s17448_s3 + $0x204] ss:$8 sps:$4 sm:$0xff]  }
 0xe08   : > { %11878 = vmatprep.subr.bf16.mxu1 %v17532_v6  ;;  %v17574_v6 = vld [vmem:[#allocation9_spill] sm:$0xff] }
 0xe0b   : > { %11879 = vmatpush3.bf16.msra.mxu1 %v17533_v39  ;;  %v13478_v39 = vld [vmem:[%s17449_s4 + $0x80] sm:$0xff]  }
 0xe0c   : > { %11880 = vmatprep.subr.bf16.mxu1 %v17534_v21  ;;  %v13479_v21 = vld [vmem:[%s17448_s3 + $0x200] ss:$8 sps:$4 sm:$0xff]  }
 0xe0e   : > { %12491 = vmatmul.mubr.msk.bf16.gmra.mrb[132].mxu1 %vm805_vm0, %v17573_v59 }
 0xe0f   : > { %11881 = vmatpush3.bf16.msra.mxu1 %v17535_v51  ;;  %7449 = vmatprep.mubr.bf16.mxu1 %v13477_v1  ;;  %v13480_v51 = vld [vmem:[%s17448_s3 + $0x214] ss:$8 sps:$4 sm:$0xff]  }
 0xe10   : > { %11882 = vmatprep.subr.bf16.mxu1 %v17536_v52  ;;  %v13481_v52 = vld [vmem:[%s17449_s4 + $0x88] sm:$0xff]  }
 0xe13   : > { %11883 = vmatpush3.bf16.msra.mxu1 %v17537_v60  ;;  %v17575_v60 = vmov 0  }
 0xe14   : > { %11884 = vmatprep.subr.bf16.mxu1 %v17538_v24  ;;  %v13482_v24 = vld [vmem:[%s17448_s3 + $0x210] ss:$8 sps:$4 sm:$0xff]  }
 0xe17   : > { %11885 = vmatpush3.bf16.msra.mxu1 %v17539_v47  ;;  %v13483_v47 = vld [vmem:[%s17448_s3 + $0x224] ss:$8 sps:$4 sm:$0xff]  }
 0xe18   : > { %11886 = vmatprep.subr.bf16.mxu1 %v17540_v0  ;;  %v13484_v0 = vld [vmem:[%s17448_s3 + $0x220] ss:$8 sps:$4 sm:$0xff]  }
 0xe1b   : > { %11887 = vmatpush3.bf16.msra.mxu1 %v17541_v20  ;;  %v13485_v20 = vld [vmem:[%s17448_s3 + $0x234] ss:$8 sps:$4 sm:$0xff]  }
 0xe1c   : > { %11888 = vmatprep.subr.bf16.mxu1 %v17542_v13  ;;  %v13486_v13 = vld [vmem:[%s17448_s3 + $0x230] ss:$8 sps:$4 sm:$0xff]  }
 0xe1f   : > { %11889 = vmatpush3.bf16.msra.mxu1 %v17543_v14 }
 0xe20   : > { %11890 = vmatprep.subr.bf16.mxu1 %v17544_v42 }
 0xe23   : > { %11891 = vmatpush3.bf16.msra.mxu1 %v17574_v6 }
 0xe24   : > { %12494 = vmatprep.subr.bf16.mxu1 %v13478_v39 }
 0xe26   : > { %7450 = vmatmul.mubr.bf16.vlgmr.msra.gmra.mrb[152].mxu1 %v13479_v21 }
 0xe27   : > { %7457 = vmatprep.mubr.bf16.mxu1 %v13480_v51  ;;  %12495 = vmatpush3.bf16.msra.mxu1 %v13478_v39 }
 0xe28   : > { %12496 = vmatprep.subr.bf16.mxu1 %v13481_v52 }
 0xe2b   : > { %12497 = vmatpush3.bf16.msra.mxu1 %v13481_v52 }
 0xe2c   : > { %7861 = vmatprep.subr.bf16.mxu1 %v17575_v60 }
 0xe2e   : > { %7458 = vmatmul.mubr.bf16.gmra.mrb[156].mxu1 %v13482_v24 }
 0xe2f   : > { %7465 = vmatprep.mubr.bf16.mxu1 %v13483_v47 }
 0xe36   : > { %7466 = vmatmul.mubr.bf16.gmra.mrb[160].mxu1 %v13484_v0 }
 0xe37   : > { %7473 = vmatprep.mubr.bf16.mxu1 %v13485_v20 }
 0xe3e   : > { %7474 = vmatmul.mubr.bf16.gmra.mrb[164].mxu1 %v13486_v13 }
 0xef9   : > { %v11892_v14 = vpop.f32.mrb[152].mxu1 }
 0xefa   : > { %v11893_v42 = vpop.f32.mrb[153].mxu1 }
 0xefb   : > { %v11894_v7 = vadd.f32 %v11893_v42, %v11892_v14  ;;  %v11895_v3 = vpop.f32.mrb[154].mxu1 }
 0xefc   : > { %v11896_v36 = vpop.f32.mrb[155].mxu1 }
 0xefd   : > { %v11897_v63 = vadd.f32 %v11896_v36, %v11895_v3 }
 0xeff   : > { %v7482_v33 = vpack.c.bf16 %v11897_v63, %v11894_v7 }
 0xf01   : > { %v11898_v19 = vpop.f32.mrb[156].mxu1  ;;  %12498 = vmatprep.mubr.msk.bf16.mxu1 %vm805_vm0, %v7482_v33  ;;  %v13500_v33 = vld [vmem:[%s17452_s7] sm:$0xff]  }
 0xf02   : > { %v11899_v48 = vpop.f32.mrb[157].mxu1 }
 0xf03   : > { %v11900_v23 = vadd.f32 %v11899_v48, %v11898_v19  ;;  %v11901_v45 = vpop.f32.mrb[158].mxu1  ;;  %v13501_v19 = vld [vmem:[%s17451_s6 + $0x8] sm:$0xff]   ;;  %v13502_v48 = vld [vmem:[%s17451_s6 + $0x10] sm:$0xff]  }
 0xf04   : > { %v11902_v56 = vpop.f32.mrb[159].mxu1 }
 0xf05   : > { %v11903_v8 = vadd.f32 %v11902_v56, %v11901_v45  ;;  %v13504_v45 = vld [vmem:[%s17452_s7 + $0x10] sm:$0xff]   ;;  %v13505_v56 = vld [vmem:[%s17451_s6 + $0x18] ss:$0 sps:$4 sm:$0x11]  }
 0xf07   : > { %v7483_v22 = vpack.c.bf16 %v11903_v8, %v11900_v23  ;;  %v13503_v23 = vld [vmem:[%s17452_s7 + $0x8] sm:$0xff]   ;;  %v13506_v8 = vld [vmem:[%s17452_s7 + $0x18] sm:$0xff]  }
 0xf09   : > { %12499 = vmatmul.mubr.msk.bf16.vlgmr.msra.gmra.mrb[128].mxu1 %vm805_vm0, %v7483_v22  ;;  %v11904_v37 = vpop.f32.mrb[160].mxu1 }
 0xf0a   : > { %v11905_v11 = vpop.f32.mrb[161].mxu1  ;;  %7862 = vmatpush1.bf16.msra.mxu1 %v13487_v38 }
 0xf0b   : > { %v11906_v12 = vadd.f32 %v11905_v11, %v11904_v37  ;;  %v11907_v9 = vpop.f32.mrb[162].mxu1  ;;  %7863 = vmatprep.subr.bf16.mxu1 %v17575_v60 }
 0xf0c   : > { %v11908_v53 = vpop.f32.mrb[163].mxu1 }
 0xf0d   : > { %v11909_v15 = vadd.f32 %v11908_v53, %v11907_v9 }
 0xf0e   : > { %7864 = vmatpush1.bf16.msra.mxu1 %v13488_v2 }
 0xf0f   : > { %v7484_v17 = vpack.c.bf16 %v11909_v15, %v11906_v12  ;;  %7865 = vmatprep.subr.bf16.mxu1 %v17575_v60 }
 0xf11   : > { %v11910_v55 = vpop.f32.mrb[164].mxu1  ;;  %12502 = vmatprep.mubr.msk.bf16.mxu1 %vm805_vm0, %v7484_v17 }
 0xf12   : > { %v11911_v43 = vpop.f32.mrb[165].mxu1  ;;  %7866 = vmatpush1.bf16.msra.mxu1 %v13489_v61  ;;  %v13507_v61 = vld [vmem:[%s17455_s10] sm:$0xff]  }
 0xf13   : > { %v11912_v57 = vadd.f32 %v11911_v43, %v11910_v55  ;;  %v11913_v46 = vpop.f32.mrb[166].mxu1  ;;  %7867 = vmatprep.subr.bf16.mxu1 %v17575_v60 }
 0xf14   : > { %v11914_v35 = vpop.f32.mrb[167].mxu1 }
 0xf15   : > { %v11915_v58 = vadd.f32 %v11914_v35, %v11913_v46  ;;  %v13508_v46 = vld [vmem:[%s17453_s8] ss:$0 sm:$0xff] }
 0xf16   : > { %7868 = vmatpush1.bf16.msra.mxu1 %v13490_v18 }
 0xf17   : > { %v7485_v16 = vpack.c.bf16 %v11915_v58, %v11912_v57  ;;  %7869 = vmatprep.subr.bf16.mxu1 %v17575_v60 }
 0xf19   : > { %12503 = vmatmul.mubr.msk.bf16.gmra.mrb[132].mxu1 %vm805_vm0, %v7485_v16 }
 0xf1a   : > { %7870 = vmatpush1.bf16.msra.mxu1 %v13491_v10 }
 0xf1b   : > { %7871 = vmatprep.subr.bf16.mxu1 %v17575_v60 }
 0xf1e   : > { %7872 = vmatpush1.bf16.msra.mxu1 %v13492_v50 }
 0xf1f   : > { %7873 = vmatprep.subr.bf16.mxu1 %v17575_v60 }
 0xf22   : > { %7874 = vmatpush1.bf16.msra.mxu1 %v13493_v34 }
 0xf23   : > { %7875 = vmatprep.subr.bf16.mxu1 %v17575_v60 }
 0xf26   : > { %7876 = vmatpush1.bf16.msra.mxu1 %v13494_v32 }
 0xf27   : > { %7877 = vmatprep.subr.bf16.mxu1 %v17575_v60 }
 0xf2a   : > { %7878 = vmatpush1.bf16.msra.mxu1 %v13495_v40 }
 0xf2b   : > { %7879 = vmatprep.subr.bf16.mxu1 %v17575_v60 }
 0xf2e   : > { %7880 = vmatpush1.bf16.msra.mxu1 %v13496_v29 }
 0xf2f   : > { %7881 = vmatprep.subr.bf16.mxu1 %v17575_v60 }
 0xf32   : > { %7882 = vmatpush1.bf16.msra.mxu1 %v13497_v54 }
 0xf33   : > { %7883 = vmatprep.subr.bf16.mxu1 %v17575_v60 }
 0xf36   : > { %7884 = vmatpush1.bf16.msra.mxu1 %v13498_v31  ;;  %v13509_v31 = vld [vmem:[%s17454_s9 + $0x10] sm:$0xff] }
 0xfdc   : > { %v12500_v41 = vpop.f32.mrb[128].mxu1 }
 0xfdd   : > { %v7573_v5 = vadd.f32 %v13499_v49, %v12500_v41  ;;  %v7532_v30 = vpop.f32.mrb[129].mxu1 }
 0xfde   : > { %v7571_v25 = vadd.f32 %v13499_v49, %v7532_v30  ;;  %v12501_v27 = vpop.f32.mrb[130].mxu1  ;;  %v13511_v30 = vld [vmem:[%s17454_s9] sm:$0xff] }
 0xfdf   : > { %v7574_v28 = vadd.f32 %v13499_v49, %v12501_v27  ;;  %v7535_v62 = vpop.f32.mrb[131].mxu1  ;;  %v7581_v26 = vmax.f32 %v7573_v5, 0.0  ;;  %v13512_v27 = vld [vmem:[%s17454_s9 + $0x8] sm:$0xff] }
 0xfe0   : > { %v7572_v4 = vadd.f32 %v13499_v49, %v7535_v62  ;;  %v7579_v59 = vmax.f32 %v7571_v25, 0.0 }
 0xfe1   : > { %v7582_v44 = vmax.f32 %v7574_v28, 0.0 }
 0xfe2   : > { %v7580_v1 = vmax.f32 %v7572_v4, 0.0 }
 0xfe3   : > { %v16278_v6 = vpack.c.bf16 %v7582_v44, %v7581_v26 }
 0xfe4   : > { %v16280_v39 = vpack.c.bf16 %v7580_v1, %v7579_v59 }
 0xfe6   : > { %12506 = vmatprep.subr.bf16.mxu0 %v16280_v39 }
 0xfe7   : > { %12507 = vmatpush3.bf16.msra.mxu0 %v16280_v39 }
 0xfe8   : > { %12508 = vmatprep.subr.bf16.mxu0 %v16278_v6 }
 0xfeb   : > { %12509 = vmatpush3.bf16.msra.mxu0 %v16278_v6 }
 0xfec   : > { %v12504_v21 = vpop.f32.mrb[132].mxu1 }
 0xfed   : > { %v7577_v51 = vadd.f32 %v13499_v49, %v12504_v21  ;;  %v7548_v52 = vpop.f32.mrb[133].mxu1 }
 0xfee   : > { %v7575_v24 = vadd.f32 %v13499_v49, %v7548_v52  ;;  %v12505_v47 = vpop.f32.mrb[134].mxu1 }
 0xfef   : > { %v7578_v0 = vadd.f32 %v13499_v49, %v12505_v47  ;;  %v7551_v20 = vpop.f32.mrb[135].mxu1  ;;  %v7585_v14 = vmax.f32 %v7577_v51, 0.0 }
 0xff0   : > { %v7576_v13 = vadd.f32 %v13499_v49, %v7551_v20  ;;  %v7583_v7 = vmax.f32 %v7575_v24, 0.0  ;;  %v13510_v49 = vld [vmem:[%s17454_s9 + $0x18] sm:$0xff]  ;;  %v13513_v20 = vld [vmem:[%s17454_s9 + $0x30] sm:$0x3] }
 0xff1   : > { %v7586_v42 = vmax.f32 %v7578_v0, 0.0 }
 0xff2   : > { %v7584_v3 = vmax.f32 %v7576_v13, 0.0 }
 0xff3   : > { %v16286_v36 = vpack.c.bf16 %v7586_v42, %v7585_v14  ;;  %v13514_v14 = vld [vmem:[%s17454_s9 + $0x20] sm:$0xff] }
 0xff4   : > { %v16288_v63 = vpack.c.bf16 %v7584_v3, %v7583_v7  ;;  %v13515_v7 = vld [vmem:[%s17454_s9 + $0x28] sm:$0xff] }
 0xff6   : > { %12510 = vmatprep.subr.bf16.mxu0 %v16288_v63 }
 0xff7   : > { %12511 = vmatpush3.bf16.msra.mxu0 %v16288_v63 }
 0xff8   : > { %12512 = vmatprep.subr.bf16.mxu0 %v16286_v36 }
 0xffb   : > { %12513 = vmatpush3.bf16.msra.mxu0 %v16286_v36 }
 0xffc   : > { %12522 = vmatprep.subr.bf16.mxu0 %v13500_v33 }
 0xffe   : > { %12515 = vmatmul.mubr.msk.bf16.vlgmr.msra.gmra.mrb[120].mxu0 %vm3301_vm1, %v13501_v19 }
 0xfff   : > { %12518 = vmatprep.mubr.msk.bf16.mxu0 %vm3301_vm1, %v13502_v48  ;;  %12523 = vmatpush3.bf16.msra.mxu0 %v13500_v33 }
0x1000   : > { %12524 = vmatprep.subr.bf16.mxu0 %v13503_v23 }
0x1003   : > { %12525 = vmatpush3.bf16.msra.mxu0 %v13503_v23  ;;  %v13516_v23 = vld [vmem:[%s17455_s10 + $0x8] sm:$0xff]  }
0x1004   : > { %12526 = vmatprep.subr.bf16.mxu0 %v13504_v45 }
0x1006   : > { %12519 = vmatmul.mubr.msk.bf16.gmra.mrb[124].mxu0 %vm3301_vm1, %v13505_v56  ;;  %v13518_v56 = vld [vmem:[%s17457_s12 + $0x60] sm:$0xff]  }
0x1007   : > { %12527 = vmatpush3.bf16.msra.mxu0 %v13504_v45  ;;  %v13517_v45 = vld [vmem:[%s17455_s10 + $0x10] sm:$0xff]  }
0x1008   : > { %12528 = vmatprep.subr.bf16.mxu0 %v13506_v8 }
0x100b   : > { %12529 = vmatpush3.bf16.msra.mxu0 %v13506_v8  ;;  %v13519_v8 = vld [vmem:[%s17457_s12 + $0x68] sm:$0xff]  }
0x10d1   : > { %v12516_v22 = vpop.f32.mrb[120].mxu0 }
0x10d2   : > { %v7625_v37 = vpop.f32.mrb[121].mxu0 }
0x10d3   : > { %v12517_v11 = vpop.f32.mrb[122].mxu0 }
0x10d4   : > { %v7656_v38 = vpack.c.bf16 %v12517_v11, %v12516_v22  ;;  %v7628_v12 = vpop.f32.mrb[123].mxu0  ;;  %v13520_v22 = vld [vmem:[%s17455_s10 + $0x18] sm:$0xff]  }
0x10d5   : > { %v7655_v9 = vpack.c.bf16 %v7628_v12, %v7625_v37  ;;  %v13521_v37 = vld [vmem:[%s17457_s12 + $0x70] sm:$0xff]   ;;  %v13522_v11 = vld [vmem:[%s17457_s12 + $0x78] sm:$0xff]   ;;  %v13524_v12 = vld [vmem:[%s17457_s12 + $0x88] sm:$0xff]  }
0x10d7   : > { %12530 = vmatprep.mubr.msk.bf16.mxu0 %vm3301_vm1, %v7655_v9  ;;  %v13525_v9 = vld [vmem:[%s17457_s12 + $0x90] sm:$0xff]  }
0x10d8   : > { %12531 = vmatmul.mubr.msk.bf16.vlgmr.msra.gmra.mrb[128].mxu0 %vm3301_vm1, %v7656_v38  ;;  %v13523_v38 = vld [vmem:[%s17457_s12 + $0x80] sm:$0xff]  }
0x10d9   : > { %v12520_v53 = vpop.f32.mrb[124].mxu0 }
0x10da   : > { %v7641_v15 = vpop.f32.mrb[125].mxu0  ;;  %v7658_v43 = vpack.c.bf16 %v12520_v53, %v12520_v53  ;;  %v13526_v53 = vld [vmem:[%s17457_s12 + $0x98] sm:$0xff]  }
0x10db   : > { %v12521_v2 = vpop.f32.mrb[126].mxu0 }
0x10dc   : > { %v7644_v17 = vpop.f32.mrb[127].mxu0  ;;  %v13528_v2 = vld [vmem:[%s17457_s12 + $0xa8] sm:$0xff]  }
0x10dd   : > { %v7657_v55 = vpack.c.bf16 %v7644_v17, %v7641_v15  ;;  %v13527_v15 = vld [vmem:[%s17457_s12 + $0xa0] sm:$0xff]   ;;  %v13529_v17 = vld [vmem:[%s17457_s12 + $0xb0] sm:$0xff]  }
0x10df   : > { %12534 = vmatprep.mubr.msk.bf16.mxu0 %vm3301_vm1, %v7657_v55  ;;  %v13530_v55 = vld [vmem:[%s17457_s12 + $0xb8] sm:$0xff]  }
0x10e0   : > { %12535 = vmatmul.mubr.msk.bf16.gmra.mrb[132].mxu0 %vm3301_vm1, %v7658_v43 }
0x10e1   : > { %12546 = vmatprep.mubr.msk.bf16.mxu0 %vm3550_vm2, %v13507_v61 }
0x11ab   : > { %v12532_v57 = vpop.f32.mrb[128].mxu0 }
0x11ac   : > { %v7714_v35 = vadd.f32 %v13508_v46, %v12532_v57  ;;  %v7705_v58 = vpop.f32.mrb[129].mxu0 }
0x11ad   : > { %v7706_v18 = vadd.f32 %v13508_v46, %v7705_v58  ;;  %v12533_v16 = vpop.f32.mrb[130].mxu0 }
0x11ae   : > { %v7737_v10 = vmax.f32 %v7714_v35, 0.0  ;;  %v7717_v50 = vadd.f32 %v13508_v46, %v12533_v16  ;;  %v7708_v34 = vpop.f32.mrb[131].mxu0 }
0x11af   : > { %v7735_v32 = vmax.f32 %v7706_v18, 0.0  ;;  %v7709_v40 = vadd.f32 %v13508_v46, %v7708_v34 }
0x11b0   : > { %v7738_v29 = vmax.f32 %v7717_v50, 0.0  ;;  %v7744_v41 = vmul.f32 %v13509_v31, %v7737_v10  ;;  %v13531_v31 = vld [vmem:[%s17457_s12 + $0xc0] sm:$0xff]  }
0x11b1   : > { %v7736_v54 = vmax.f32 %v7709_v40, 0.0  ;;  %v7742_v25 = vmul.f32 %v13511_v30, %v7735_v32 }
0x11b2   : > { %v7745_v5 = vmul.f32 %v13510_v49, %v7738_v29 }
0x11b3   : > { %v7743_v28 = vmul.f32 %v13512_v27, %v7736_v54  ;;  %v12536_v62 = vpop.f32.mrb[132].mxu0  ;;  %v13535_v27 = vld [vmem:[%s17457_s12 + $0xe0] sm:$0xff]  }
0x11b4   : > { %v7730_v4 = vadd.f32 %v13508_v46, %v12536_v62  ;;  %v7721_v26 = vpop.f32.mrb[133].mxu0  ;;  %v7750_v44 = vpack.c.bf16 %v7745_v5, %v7744_v41  ;;  %v13533_v5 = vld [vmem:[%s17457_s12 + $0xd0] sm:$0xff]  }
0x11b5   : > { %v7722_v59 = vadd.f32 %v13508_v46, %v7721_v26  ;;  %v12537_v1 = vpop.f32.mrb[134].mxu0  ;;  %v7749_v21 = vpack.c.bf16 %v7743_v28, %v7742_v25  ;;  %v13537_v62 = vld [vmem:[%s17457_s12 + $0xf0] sm:$0xff]   ;;  %v13540_v26 = vld [vmem:[%s17457_s12 + $0x100] sm:$0xff]  }
0x11b6   : > { %v7724_v51 = vpop.f32.mrb[135].mxu0  ;;  %v7741_v52 = vmax.f32 %v7730_v4, 0.0  ;;  %v13538_v4 = vld [vmem:[%s17456_s11 + $0x20] sm:$0xff]   ;;  %v13543_v1 = vld [vmem:[%s17457_s12 + $0x118] sm:$0xff]  }
0x11b7   : > { %v7739_v24 = vmax.f32 %v7722_v59, 0.0  ;;  %v7725_v47 = vadd.f32 %v13508_v46, %v7724_v51  ;;  %12538 = vmatprep.subr.bf16.mxu0 %v7749_v21  ;;  %v13542_v59 = vld [vmem:[%s17457_s12 + $0x110] sm:$0xff]   ;;  %v13545_v51 = vld [vmem:[%s17457_s12 + $0x128] sm:$0xff]  }
0x11b8   : > { %12539 = vmatpush3.bf16.msra.mxu0 %v7749_v21  ;;  %v7748_v13 = vmul.f32 %v13513_v20, %v7741_v52  ;;  %v13544_v21 = vld [vmem:[%s17457_s12 + $0x120] sm:$0xff]   ;;  %v13546_v52 = vld [vmem:[%s17457_s12 + $0x130] sm:$0xff]  }
0x11b9   : > { %v7740_v0 = vmax.f32 %v7725_v47, 0.0  ;;  %12540 = vmatprep.subr.bf16.mxu0 %v7750_v44  ;;  %v7746_v42 = vmul.f32 %v13514_v14, %v7739_v24  ;;  %v13547_v24 = vld [vmem:[%s17457_s12 + $0x138] sm:$0xff]   ;;  %v13548_v47 = vld [vmem:[%s17457_s12 + $0x140] sm:$0xff]   ;;  %v13550_v20 = vld [vmem:[%s17457_s12 + $0x150] sm:$0xff]  }
0x11ba   : > { %v7752_v19 = vpack.c.bf16 %v7748_v13, %v7748_v13  ;;  %v13551_v13 = vld [vmem:[%s17457_s12 + $0x158] sm:$0xff]   ;;  %v13552_v14 = vld [vmem:[%s17457_s12 + $0x160] sm:$0xff]  }
0x11bb   : > { %v7747_v3 = vmul.f32 %v13515_v7, %v7740_v0  ;;  %v13549_v0 = vld [vmem:[%s17457_s12 + $0x148] sm:$0xff]   ;;  %v13554_v7 = vld [vmem:[%s17457_s12 + $0x170] sm:$0xff]  }
0x11bc   : > { %12541 = vmatpush3.bf16.msra.mxu0 %v7750_v44  ;;  %v7754_v48 = vsel %vm3563_vm3, %v7752_v19, 0  ;;  %v13541_v44 = vld [vmem:[%s17457_s12 + $0x108] sm:$0xff]  }
0x11bd   : > { %v7751_v33 = vpack.c.bf16 %v7747_v3, %v7746_v42  ;;  %v13553_v42 = vld [vmem:[%s17457_s12 + $0x168] sm:$0xff]   ;;  %v13555_v3 = vld [vmem:[%s17457_s12 + $0x178] sm:$0xff]  }
0x11bf   : > { %12542 = vmatprep.subr.bf16.mxu0 %v7751_v33 }
0x11c0   : > { %12543 = vmatpush3.bf16.msra.mxu0 %v7751_v33  ;;  %v13556_v33 = vld [vmem:[%s17457_s12 + $0x1e0] sm:$0xff]  }
0x11c1   : > { %12979 = vmatprep.subr.msk.bf16.mxu0 %vm3563_vm3, %v7752_v19  ;;  %v13557_v19 = vld [vmem:[%s17457_s12 + $0x1e8] sm:$0xff]  }
0x11c4   : > { %12545 = vmatpush3.bf16.msra.mxu0 %v7754_v48  ;;  %v13558_v48 = vld [vmem:[%s17457_s12 + $0x1f0] sm:$0xff]  }
0x11c5   : > { %7930 = vmatprep.subr.bf16.mxu0 %v17575_v60 }
0x11c7   : > { %12547 = vmatmul.mubr.msk.bf16.vlgmr.msra.gmra.mrb[136].mxu0 %vm3550_vm2, %v13516_v23  ;;  %v13559_v23 = vld [vmem:[%s17457_s12 + $0x1f8] sm:$0xff]  }
0x11c8   : > { %12550 = vmatprep.mubr.msk.bf16.mxu0 %vm3550_vm2, %v13517_v45  ;;  %7931 = vmatpush1.bf16.msra.mxu0 %v13518_v56  ;;  %v13560_v45 = vld [vmem:[%s17457_s12 + $0x200] sm:$0xff]   ;;  %v13561_v56 = vld [vmem:[%s17457_s12 + $0x208] sm:$0xff]  }
0x11c9   : > { %7932 = vmatprep.subr.bf16.mxu0 %v17575_v60 }
0x11cc   : > { %7933 = vmatpush1.bf16.msra.mxu0 %v13519_v8  ;;  %v13562_v8 = vld [vmem:[%s17457_s12 + $0x210] sm:$0xff]  }
0x11cd   : > { %7934 = vmatprep.subr.bf16.mxu0 %v17575_v60 }
0x11cf   : > { %12551 = vmatmul.mubr.msk.bf16.gmra.mrb[140].mxu0 %vm3550_vm2, %v13520_v22  ;;  %v13563_v22 = vld [vmem:[%s17457_s12 + $0x218] sm:$0xff]  }
0x11d0   : > { %7935 = vmatpush1.bf16.msra.mxu0 %v13521_v37  ;;  %v13564_v37 = vld [vmem:[%s17457_s12 + $0x220] sm:$0xff]  }
0x11d1   : > { %7936 = vmatprep.subr.bf16.mxu0 %v17575_v60 }
0x11d4   : > { %7937 = vmatpush1.bf16.msra.mxu0 %v13522_v11  ;;  %v13565_v11 = vld [vmem:[%s17457_s12 + $0x228] sm:$0xff]  }
0x11d5   : > { %7938 = vmatprep.subr.bf16.mxu0 %v17575_v60 }
0x11d8   : > { %7939 = vmatpush1.bf16.msra.mxu0 %v13523_v38  ;;  %v13566_v38 = vld [vmem:[%s17457_s12 + $0x230] sm:$0xff]  }
0x11d9   : > { %7940 = vmatprep.subr.bf16.mxu0 %v17575_v60 }
0x11dc   : > { %7941 = vmatpush1.bf16.msra.mxu0 %v13524_v12  ;;  %v13567_v12 = vld [vmem:[%s17457_s12 + $0x238] sm:$0xff]  }
0x11dd   : > { %7942 = vmatprep.subr.bf16.mxu0 %v17575_v60 }
0x11e0   : > { %7943 = vmatpush1.bf16.msra.mxu0 %v13525_v9  ;;  %v13568_v9 = vld [vmem:[%s17457_s12 + $0x240] sm:$0xff]  }
0x11e1   : > { %7944 = vmatprep.subr.bf16.mxu0 %v17575_v60 }
0x11e4   : > { %7945 = vmatpush1.bf16.msra.mxu0 %v13526_v53  ;;  %v13569_v53 = vld [vmem:[%s17457_s12 + $0x248] sm:$0xff]  }
0x11e5   : > { %7946 = vmatprep.subr.bf16.mxu0 %v17575_v60 }
0x11e8   : > { %7947 = vmatpush1.bf16.msra.mxu0 %v13527_v15  ;;  %v13570_v15 = vld [vmem:[%s17457_s12 + $0x250] sm:$0xff]  }
0x11e9   : > { %7948 = vmatprep.subr.bf16.mxu0 %v17575_v60 }
0x11ec   : > { %7949 = vmatpush1.bf16.msra.mxu0 %v13528_v2  ;;  %v13571_v2 = vld [vmem:[%s17457_s12 + $0x258] sm:$0xff]  }
0x11ed   : > { %7950 = vmatprep.subr.bf16.mxu0 %v17575_v60 }
0x11f0   : > { %7951 = vmatpush1.bf16.msra.mxu0 %v13529_v17  ;;  %v13572_v17 = vld [vmem:[%s17457_s12 + $0x260] sm:$0xff]  }
0x11f1   : > { %7952 = vmatprep.subr.bf16.mxu0 %v17575_v60 }
0x11f4   : > { %7953 = vmatpush1.bf16.msra.mxu0 %v13530_v55  ;;  %v13573_v55 = vld [vmem:[%s17457_s12 + $0x268] sm:$0xff]  }
0x11f5   : > { %8129 = vmatprep.subr.bf16.mxu0 %v17575_v60 }
0x129a   : > { %v12548_v43 = vpop.f32.mrb[136].mxu0 }
0x129b   : > { %v7790_v61 = vpop.f32.mrb[137].mxu0 }
0x129c   : > { %v12549_v57 = vpop.f32.mrb[138].mxu0 }
0x129d   : > { %v7822_v46 = vpack.c.bf16 %v12549_v57, %v12548_v43  ;;  %v7793_v35 = vpop.f32.mrb[139].mxu0  ;;  %v13574_v43 = vld [vmem:[%s17457_s12 + $0x270] sm:$0xff]   ;;  %v13576_v57 = vld [vmem:[%s17457_s12 + $0x280] sm:$0xff]  }
0x129e   : > { %v7821_v58 = vpack.c.bf16 %v7793_v35, %v7790_v61  ;;  %v13575_v61 = vld [vmem:[%s17457_s12 + $0x278] sm:$0xff]   ;;  %v13578_v35 = vld [vmem:[%s17457_s12 + $0x290] sm:$0xff]  }
0x129f   : > { %7831 = vrot.lane.b32.xlu1 %v7822_v46, %s13661_s19  ;;  %v13577_v46 = vld [vmem:[%s17457_s12 + $0x288] sm:$0xff]  }
0x12a0   : > { %7829 = vrot.lane.b32.xlu0 %v7821_v58, %s13661_s19  ;;  %v13579_v58 = vld [vmem:[%s17457_s12 + $0x298] sm:$0xff]  }
0x12a2   : > { %v12552_v18 = vpop.f32.mrb[140].mxu0 }
0x12a3   : > { %v7806_v16 = vpop.f32.mrb[141].mxu0 }
0x12a4   : > { %v12553_v10 = vpop.f32.mrb[142].mxu0 }
0x12a5   : > { %v7824_v50 = vpack.c.bf16 %v12553_v10, %v12552_v18  ;;  %v7809_v34 = vpop.f32.mrb[143].mxu0  ;;  %v13580_v18 = vld [vmem:[%s17457_s12 + $0x300] sm:$0xff]   ;;  %v13582_v10 = vld [vmem:[%s17457_s12 + $0x310] sm:$0xff]  }
0x12a6   : > { %v7823_v32 = vpack.c.bf16 %v7809_v34, %v7806_v16  ;;  %v13581_v16 = vld [vmem:[%s17457_s12 + $0x308] sm:$0xff]   ;;  %v13584_v34 = vld [vmem:[%s17457_s12 + $0x320] sm:$0xff]  }
0x12a7   : > { %7835 = vrot.lane.b32.xlu1 %v7824_v50, %s13661_s19  ;;  %v13583_v50 = vld [vmem:[%s17457_s12 + $0x318] sm:$0xff]  }
0x12a8   : > { %7833 = vrot.lane.b32.xlu0 %v7823_v32, %s13661_s19 }
0x1311   : > { %v16428_v54 = vpop.permute.xlu1 %7831 }
0x1312   : > { %v16417_v40 = vpop.permute.xlu0 %7829  ;;  %v16447_v41 = vsel %vm3301_vm1, %v16278_v6, %v16428_v54  ;;  %v13534_v6 = vld [vmem:[%s17457_s12 + $0xd8] sm:$0xff]  }
0x1313   : > { %10839 = vmatprep.mubr.msk.bf16.mxu1 %vm3301_vm1, %v16417_v40  ;;  %10843 = vmatprep.mubr.msk.bf16.mxu0 %vm3301_vm1, %v16417_v40  ;;  %v16426_v29 = vsel %vm3301_vm1, %v16280_v39, %v16417_v40  ;;  %v13532_v39 = vld [vmem:[%s17457_s12 + $0xc8] sm:$0xff]  }
0x1314   : > { %7894 = vmatmul.mubr.bf16.vlgmr.msra.gmra.mrb[168].mxu1 %v16426_v29  ;;  %7963 = vmatmul.mubr.bf16.vlgmr.msra.gmra.mrb[144].mxu0 %v16426_v29 }
0x1315   : > { %8130 = vmatpush1.bf16.msra.mxu0 %v13531_v31  ;;  %10840 = vmatprep.mubr.msk.bf16.mxu1 %vm3301_vm1, %v16428_v54 }
0x1316   : > { %8131 = vmatprep.subr.bf16.mxu0 %v17575_v60  ;;  %10844 = vmatprep.mubr.msk.bf16.mxu0 %vm3301_vm1, %v16428_v54 }
0x1319   : > { %8132 = vmatpush1.bf16.msra.mxu0 %v13532_v39  ;;  %v16470_v25 = vpop.permute.xlu1 %7835 }
0x131a   : > { %8133 = vmatprep.subr.bf16.mxu0 %v17575_v60  ;;  %v16449_v49 = vpop.permute.xlu0 %7833  ;;  %v16489_v28 = vsel %vm3301_vm1, %v16286_v36, %v16470_v25  ;;  %v13539_v36 = vld [vmem:[%s17457_s12 + $0xf8] sm:$0xff]  }
0x131b   : > { %v16468_v30 = vsel %vm3301_vm1, %v16288_v63, %v16449_v49  ;;  %v13536_v63 = vld [vmem:[%s17457_s12 + $0xe8] sm:$0xff]  }
0x131c   : > { %7902 = vmatmul.mubr.bf16.gmra.mrb[172].mxu1 %v16447_v41  ;;  %7971 = vmatmul.mubr.bf16.gmra.mrb[148].mxu0 %v16447_v41 }
0x131d   : > { %8134 = vmatpush1.bf16.msra.mxu0 %v13533_v5  ;;  %10841 = vmatprep.mubr.msk.bf16.mxu1 %vm3301_vm1, %v16449_v49 }
0x131e   : > { %8135 = vmatprep.subr.bf16.mxu0 %v17575_v60  ;;  %10845 = vmatprep.mubr.msk.bf16.mxu0 %vm3301_vm1, %v16449_v49 }
0x1321   : > { %8136 = vmatpush1.bf16.msra.mxu0 %v13534_v6  ;;  %v13585_v6 = vld [vmem:[%s17457_s12 + $0x328] sm:$0xff]  }
0x1322   : > { %8137 = vmatprep.subr.bf16.mxu0 %v17575_v60 }
0x1324   : > { %7910 = vmatmul.mubr.bf16.gmra.mrb[176].mxu1 %v16468_v30  ;;  %7979 = vmatmul.mubr.bf16.gmra.mrb[152].mxu0 %v16468_v30 }
0x1325   : > { %8138 = vmatpush1.bf16.msra.mxu0 %v13535_v27  ;;  %10842 = vmatprep.mubr.msk.bf16.mxu1 %vm3301_vm1, %v16470_v25 }
0x1326   : > { %8139 = vmatprep.subr.bf16.mxu0 %v17575_v60  ;;  %10846 = vmatprep.mubr.msk.bf16.mxu0 %vm3301_vm1, %v16470_v25 }
0x1329   : > { %8140 = vmatpush1.bf16.msra.mxu0 %v13536_v63 }
0x132a   : > { %8141 = vmatprep.subr.bf16.mxu0 %v17575_v60 }
0x132c   : > { %7918 = vmatmul.mubr.bf16.gmra.mrb[180].mxu1 %v16489_v28  ;;  %7987 = vmatmul.mubr.bf16.gmra.mrb[156].mxu0 %v16489_v28 }
0x132d   : > { %8142 = vmatpush1.bf16.msra.mxu0 %v13537_v62  ;;  %10855 = vmatprep.mubr.msk.bf16.mxu0 %vm3301_vm1, %v16417_v40 }
0x132e   : > { %8143 = vmatprep.subr.bf16.mxu0 %v17575_v60  ;;  %12562 = vmatprep.mubr.msk.bf16.mxu1 %vm3301_vm1, %v13538_v4 }
0x1331   : > { %8144 = vmatpush1.bf16.msra.mxu0 %v13539_v36 }
0x1332   : > { %8145 = vmatprep.subr.bf16.mxu0 %v17575_v60 }
0x1335   : > { %8146 = vmatpush1.bf16.msra.mxu0 %v13540_v26 }
0x1336   : > { %8147 = vmatprep.subr.bf16.mxu0 %v17575_v60 }
0x1339   : > { %8148 = vmatpush1.bf16.msra.mxu0 %v13541_v44  ;;  %v13586_v44 = vld [vmem:[%s17457_s12 + $0x330] sm:$0xff]  }
0x133a   : > { %8149 = vmatprep.subr.bf16.mxu0 %v17575_v60 }
0x133d   : > { %8150 = vmatpush1.bf16.msra.mxu0 %v13542_v59 }
0x133e   : > { %8151 = vmatprep.subr.bf16.mxu0 %v17575_v60 }
0x1341   : > { %8152 = vmatpush1.bf16.msra.mxu0 %v13543_v1 }
0x1342   : > { %8271 = vmatprep.subr.bf16.mxu0 %v17575_v60 }
0x1344   : > { %8162 = vmatmul.mubr.bf16.vlgmr.msra.gmra.mrb[160].mxu0 %v16426_v29 }
0x1345   : > { %10856 = vmatprep.mubr.msk.bf16.mxu0 %vm3301_vm1, %v16428_v54  ;;  %8272 = vmatpush1.bf16.msra.mxu0 %v13544_v21 }
0x1346   : > { %8273 = vmatprep.subr.bf16.mxu0 %v17575_v60 }
0x1349   : > { %8274 = vmatpush1.bf16.msra.mxu0 %v13545_v51 }
0x134a   : > { %8275 = vmatprep.subr.bf16.mxu0 %v17575_v60 }
0x134c   : > { %8170 = vmatmul.mubr.bf16.gmra.mrb[164].mxu0 %v16447_v41 }
0x134d   : > { %10857 = vmatprep.mubr.msk.bf16.mxu0 %vm3301_vm1, %v16449_v49  ;;  %8276 = vmatpush1.bf16.msra.mxu0 %v13546_v52  ;;  %v13587_v52 = vld [vmem:[%s17457_s12 + $0x338] sm:$0xff]  }
0x134e   : > { %8277 = vmatprep.subr.bf16.mxu0 %v17575_v60 }
0x1351   : > { %8278 = vmatpush1.bf16.msra.mxu0 %v13547_v24 }
0x1352   : > { %8279 = vmatprep.subr.bf16.mxu0 %v17575_v60 }
0x1354   : > { %8178 = vmatmul.mubr.bf16.gmra.mrb[168].mxu0 %v16468_v30 }
0x1355   : > { %10858 = vmatprep.mubr.msk.bf16.mxu0 %vm3301_vm1, %v16470_v25  ;;  %8280 = vmatpush1.bf16.msra.mxu0 %v13548_v47 }
0x1356   : > { %8281 = vmatprep.subr.bf16.mxu0 %v17575_v60 }
0x1359   : > { %8282 = vmatpush1.bf16.msra.mxu0 %v13549_v0 }
0x135a   : > { %8283 = vmatprep.subr.bf16.mxu0 %v17575_v60 }
0x135c   : > { %8186 = vmatmul.mubr.bf16.gmra.mrb[172].mxu0 %v16489_v28 }
0x135d   : > { %8284 = vmatpush1.bf16.msra.mxu0 %v13550_v20  ;;  %10863 = vmatprep.mubr.msk.bf16.mxu0 %vm3301_vm1, %v16417_v40 }
0x135e   : > { %8285 = vmatprep.subr.bf16.mxu0 %v17575_v60 }
0x1361   : > { %8286 = vmatpush1.bf16.msra.mxu0 %v13551_v13 }
0x1362   : > { %8287 = vmatprep.subr.bf16.mxu0 %v17575_v60 }
0x1365   : > { %8288 = vmatpush1.bf16.msra.mxu0 %v13552_v14 }
0x1366   : > { %8289 = vmatprep.subr.bf16.mxu0 %v17575_v60 }
0x1369   : > { %8290 = vmatpush1.bf16.msra.mxu0 %v13553_v42  ;;  %v13588_v42 = vld [vmem:[%s17457_s12 + $0x340] sm:$0xff]  }
0x136a   : > { %8291 = vmatprep.subr.bf16.mxu0 %v17575_v60 }
0x136d   : > { %8292 = vmatpush1.bf16.msra.mxu0 %v13554_v7 }
0x136e   : > { %8293 = vmatprep.subr.bf16.mxu0 %v17575_v60 }
0x1371   : > { %8294 = vmatpush1.bf16.msra.mxu0 %v13555_v3 }
0x1372   : > { %8555 = vmatprep.subr.bf16.mxu0 %v17575_v60 }
0x1374   : > { %8304 = vmatmul.mubr.bf16.vlgmr.msra.gmra.mrb[176].mxu0 %v16426_v29 }
0x1375   : > { %10864 = vmatprep.mubr.msk.bf16.mxu0 %vm3301_vm1, %v16428_v54  ;;  %8556 = vmatpush1.bf16.msra.mxu0 %v13556_v33 }
0x1376   : > { %8557 = vmatprep.subr.bf16.mxu0 %v17575_v60 }
0x1379   : > { %8558 = vmatpush1.bf16.msra.mxu0 %v13557_v19 }
0x137a   : > { %8559 = vmatprep.subr.bf16.mxu0 %v17575_v60 }
0x137c   : > { %8312 = vmatmul.mubr.bf16.gmra.mrb[180].mxu0 %v16447_v41 }
0x137d   : > { %10865 = vmatprep.mubr.msk.bf16.mxu0 %vm3301_vm1, %v16449_v49  ;;  %8560 = vmatpush1.bf16.msra.mxu0 %v13558_v48  ;;  %v13589_v48 = vld [vmem:[%s17457_s12 + $0x348] sm:$0xff]  }
0x137e   : > { %8561 = vmatprep.subr.bf16.mxu0 %v17575_v60 }
0x1381   : > { %8562 = vmatpush1.bf16.msra.mxu0 %v13559_v23 }
0x1382   : > { %8563 = vmatprep.subr.bf16.mxu0 %v17575_v60 }
0x1384   : > { %8320 = vmatmul.mubr.bf16.gmra.mrb[184].mxu0 %v16468_v30 }
0x1385   : > { %10866 = vmatprep.mubr.msk.bf16.mxu0 %vm3301_vm1, %v16470_v25  ;;  %8564 = vmatpush1.bf16.msra.mxu0 %v13560_v45 }
0x1386   : > { %8565 = vmatprep.subr.bf16.mxu0 %v17575_v60 }
0x1389   : > { %8566 = vmatpush1.bf16.msra.mxu0 %v13561_v56 }
0x138a   : > { %8567 = vmatprep.subr.bf16.mxu0 %v17575_v60 }
0x138c   : > { %8328 = vmatmul.mubr.bf16.gmra.mrb[188].mxu0 %v16489_v28 }
0x138d   : > { %8568 = vmatpush1.bf16.msra.mxu0 %v13562_v8  ;;  %10879 = vmatprep.mubr.msk.bf16.mxu0 %vm3301_vm1, %v16417_v40 }
0x138e   : > { %8569 = vmatprep.subr.bf16.mxu0 %v17575_v60 }
0x1391   : > { %8570 = vmatpush1.bf16.msra.mxu0 %v13563_v22 }
0x1392   : > { %8571 = vmatprep.subr.bf16.mxu0 %v17575_v60 }
0x1395   : > { %8572 = vmatpush1.bf16.msra.mxu0 %v13564_v37 }
0x1396   : > { %8573 = vmatprep.subr.bf16.mxu0 %v17575_v60 }
0x1399   : > { %8574 = vmatpush1.bf16.msra.mxu0 %v13565_v11  ;;  %v13590_v11 = vld [vmem:[%s17457_s12 + $0x350] sm:$0xff]  }
0x139a   : > { %8575 = vmatprep.subr.bf16.mxu0 %v17575_v60 }
0x139d   : > { %8576 = vmatpush1.bf16.msra.mxu0 %v13566_v38  ;;  %v13328_v38 = vld [vmem:[%s17459_s14] sm:$0xff]  }
0x139e   : > { %8577 = vmatprep.subr.bf16.mxu0 %v17575_v60 }
0x13a1   : > { %8578 = vmatpush1.bf16.msra.mxu0 %v13567_v12 }
0x13a2   : > { %8697 = vmatprep.subr.bf16.mxu0 %v17575_v60 }
0x13a4   : > { %8588 = vmatmul.mubr.bf16.vlgmr.msra.gmra.mrb[192].mxu0 %v16426_v29 }
0x13a5   : > { %10880 = vmatprep.mubr.msk.bf16.mxu0 %vm3301_vm1, %v16428_v54  ;;  %8698 = vmatpush1.bf16.msra.mxu0 %v13568_v9 }
0x13a6   : > { %8699 = vmatprep.subr.bf16.mxu0 %v17575_v60 }
0x13a9   : > { %8700 = vmatpush1.bf16.msra.mxu0 %v13569_v53 }
0x13aa   : > { %8701 = vmatprep.subr.bf16.mxu0 %v17575_v60 }
0x13ac   : > { %8596 = vmatmul.mubr.bf16.gmra.mrb[196].mxu0 %v16447_v41 }
0x13ad   : > { %10881 = vmatprep.mubr.msk.bf16.mxu0 %vm3301_vm1, %v16449_v49  ;;  %8702 = vmatpush1.bf16.msra.mxu0 %v13570_v15 }
0x13ae   : > { %8703 = vmatprep.subr.bf16.mxu0 %v17575_v60 }
0x13b1   : > { %8704 = vmatpush1.bf16.msra.mxu0 %v13571_v2  ;;  %v13591_v2 = vld [vmem:[%s17457_s12 + $0x358] sm:$0xff]  }
0x13b2   : > { %8705 = vmatprep.subr.bf16.mxu0 %v17575_v60 }
0x13b4   : > { %8604 = vmatmul.mubr.bf16.gmra.mrb[200].mxu0 %v16468_v30 }
0x13b5   : > { %10882 = vmatprep.mubr.msk.bf16.mxu0 %vm3301_vm1, %v16470_v25  ;;  %8706 = vmatpush1.bf16.msra.mxu0 %v13572_v17 }
0x13b6   : > { %8707 = vmatprep.subr.bf16.mxu0 %v17575_v60 }
0x13b9   : > { %8708 = vmatpush1.bf16.msra.mxu0 %v13573_v55 }
0x13ba   : > { %8709 = vmatprep.subr.bf16.mxu0 %v17575_v60 }
0x13bc   : > { %8612 = vmatmul.mubr.bf16.gmra.mrb[204].mxu0 %v16489_v28 }
0x13bd   : > { %8710 = vmatpush1.bf16.msra.mxu0 %v13574_v43  ;;  %10887 = vmatprep.mubr.msk.bf16.mxu0 %vm3301_vm1, %v16417_v40 }
0x13be   : > { %8711 = vmatprep.subr.bf16.mxu0 %v17575_v60 }
0x13c1   : > { %8712 = vmatpush1.bf16.msra.mxu0 %v13575_v61 }
0x13c2   : > { %8713 = vmatprep.subr.bf16.mxu0 %v17575_v60 }
0x13c5   : > { %8714 = vmatpush1.bf16.msra.mxu0 %v13576_v57 }
0x13c6   : > { %8715 = vmatprep.subr.bf16.mxu0 %v17575_v60 }
0x13c9   : > { %8716 = vmatpush1.bf16.msra.mxu0 %v13577_v46 }
0x13ca   : > { %8717 = vmatprep.subr.bf16.mxu0 %v17575_v60 }
0x13cd   : > { %8718 = vmatpush1.bf16.msra.mxu0 %v13578_v35  ;;  %v13329_v35 = vld [vmem:[%s17459_s14 + $0x8] sm:$0xff]  }
0x13ce   : > { %8719 = vmatprep.subr.bf16.mxu0 %v17575_v60 }
0x13d1   : > { %8720 = vmatpush1.bf16.msra.mxu0 %v13579_v58  ;;  %v13330_v58 = vld [vmem:[%s17459_s14 + $0x10] sm:$0xff]  }
0x13d2   : > { %8981 = vmatprep.subr.bf16.mxu0 %v17575_v60 }
0x13d4   : > { %8730 = vmatmul.mubr.bf16.vlgmr.msra.gmra.mrb[208].mxu0 %v16426_v29 }
0x13d5   : > { %10888 = vmatprep.mubr.msk.bf16.mxu0 %vm3301_vm1, %v16428_v54  ;;  %8982 = vmatpush1.bf16.msra.mxu0 %v13580_v18  ;;  %v13592_v18 = vld [vmem:[%s17456_s11 + $0x28] sm:$0xff]  }
0x13d6   : > { %8983 = vmatprep.subr.bf16.mxu0 %v17575_v60 }
0x13d9   : > { %8984 = vmatpush1.bf16.msra.mxu0 %v13581_v16  ;;  %v13593_v16 = vld [vmem:[%s17456_s11 + $0x30] sm:$0xff]  }
0x13da   : > { %8985 = vmatprep.subr.bf16.mxu0 %v17575_v60 }
0x13dc   : > { %8738 = vmatmul.mubr.bf16.gmra.mrb[212].mxu0 %v16447_v41 }
0x13dd   : > { %10889 = vmatprep.mubr.msk.bf16.mxu0 %vm3301_vm1, %v16449_v49  ;;  %8986 = vmatpush1.bf16.msra.mxu0 %v13582_v10  ;;  %v13331_v10 = vld [vmem:[%s17459_s14 + $0x18] sm:$0xff]  }
0x13de   : > { %8987 = vmatprep.subr.bf16.mxu0 %v17575_v60 }
0x13e1   : > { %8988 = vmatpush1.bf16.msra.mxu0 %v13583_v50  ;;  %v13594_v50 = vld [vmem:[%s17456_s11 + $0x38] sm:$0xff]  }
0x13e2   : > { %8989 = vmatprep.subr.bf16.mxu0 %v17575_v60 }
0x13e4   : > { %8746 = vmatmul.mubr.bf16.gmra.mrb[216].mxu0 %v16468_v30 }
0x13e5   : > { %10890 = vmatprep.mubr.msk.bf16.mxu0 %vm3301_vm1, %v16470_v25  ;;  %8990 = vmatpush1.bf16.msra.mxu0 %v13584_v34  ;;  %v13595_v34 = vld [vmem:[%s17456_s11] sm:$0xff]  }
0x13e6   : > { %8991 = vmatprep.subr.bf16.mxu0 %v17575_v60 }
0x13e7   : > { %v7895_v32 = vpop.f32.mrb[168].mxu1  ;;  %v7964_v31 = vpop.f32.mrb[144].mxu0 }
0x13e8   : > { %v7897_v39 = vpop.f32.mrb[169].mxu1  ;;  %v7966_v5 = vpop.f32.mrb[145].mxu0 }
0x13e9   : > { %8992 = vmatpush1.bf16.msra.mxu0 %v13585_v6  ;;  %v7898_v27 = vpop.f32.mrb[170].mxu1  ;;  %v7967_v63 = vpop.f32.mrb[146].mxu0  ;;  %v13596_v39 = vld [vmem:[%s17456_s11 + $0x8] sm:$0xff]   ;;  %v13597_v6 = vld [vmem:[%s17456_s11 + $0x10] sm:$0xff]  }
0x13ea   : > { %v16735_v62 = vpack.c.bf16 %v7898_v27, %v7895_v32  ;;  %v7995_v4 = vpack.c.bf16 %v7967_v63, %v7964_v31  ;;  %v7900_v36 = vpop.f32.mrb[171].mxu1  ;;  %v7969_v26 = vpop.f32.mrb[147].mxu0  ;;  %8993 = vmatprep.subr.bf16.mxu0 %v17575_v60 }
0x13eb   : > { %v13598_v26 = vld [vmem:[%s17456_s11 + $0x18] sm:$0xff]  }
0x13ec   : > { %8754 = vmatmul.mubr.bf16.gmra.mrb[220].mxu0 %v16489_v28  ;;  %12554 = vmatprep.subr.bf16.mxu1 %v7995_v4 }
0x13ed   : > { %8994 = vmatpush1.bf16.msra.mxu0 %v13586_v44  ;;  %10903 = vmatprep.mubr.msk.bf16.mxu0 %vm3301_vm1, %v16417_v40 }
0x13ee   : > { %12555 = vmatpush3.bf16.msra.mxu1 %v7995_v4  ;;  %8995 = vmatprep.subr.bf16.mxu0 %v17575_v60 }
0x13ef   : > { %v7903_v59 = vpop.f32.mrb[172].mxu1  ;;  %v7972_v1 = vpop.f32.mrb[148].mxu0 }
0x13f0   : > { %v7905_v21 = vpop.f32.mrb[173].mxu1  ;;  %v7974_v51 = vpop.f32.mrb[149].mxu0 }
0x13f1   : > { %8996 = vmatpush1.bf16.msra.mxu0 %v13587_v52  ;;  %v7906_v24 = vpop.f32.mrb[174].mxu1  ;;  %v7975_v47 = vpop.f32.mrb[150].mxu0  ;;  %v17577_v51 = vld [vmem:[#allocation2_spill] sm:$0xff]  ;;  %v17578_v52 = vld [vmem:[#allocation11_spill] sm:$0xff] }
0x13f2   : > { %v7927_v0 = vpack.c.bf16 %v7906_v24, %v7903_v59  ;;  %v7996_v20 = vpack.c.bf16 %v7975_v47, %v7972_v1  ;;  %v7908_v13 = vpop.f32.mrb[175].mxu1  ;;  %v7977_v14 = vpop.f32.mrb[151].mxu0  ;;  %8997 = vmatprep.subr.bf16.mxu0 %v17575_v60  ;;  %v13599_v59 = vld [vmem:[%s17456_s11 + $0x40] sm:$0xff]  }
0x13f3   : > { %v17579_v14 = vld [vmem:[#allocation4_spill] sm:$0xff] }
0x13f4   : > { %12556 = vmatprep.subr.bf16.mxu1 %v7996_v20 }
0x13f5   : > { %8998 = vmatpush1.bf16.msra.mxu0 %v13588_v42  ;;  %12557 = vmatpush3.bf16.msra.mxu1 %v7996_v20 }
0x13f6   : > { %8999 = vmatprep.subr.bf16.mxu0 %v17575_v60 }
0x13f7   : > { %v7911_v7 = vpop.f32.mrb[176].mxu1  ;;  %v7980_v3 = vpop.f32.mrb[152].mxu0 }
0x13f8   : > { %v7913_v33 = vpop.f32.mrb[177].mxu1  ;;  %v7982_v19 = vpop.f32.mrb[153].mxu0 }
0x13f9   : > { %9000 = vmatpush1.bf16.msra.mxu0 %v13589_v48  ;;  %v7914_v23 = vpop.f32.mrb[178].mxu1  ;;  %v7983_v45 = vpop.f32.mrb[154].mxu0  ;;  %v13600_v48 = vld [vmem:[%s17456_s11 + $0x48] sm:$0xff]  }
0x13fa   : > { %v7928_v56 = vpack.c.bf16 %v7914_v23, %v7911_v7  ;;  %v7997_v8 = vpack.c.bf16 %v7983_v45, %v7980_v3  ;;  %v7916_v22 = vpop.f32.mrb[179].mxu1  ;;  %v7985_v37 = vpop.f32.mrb[155].mxu0  ;;  %9001 = vmatprep.subr.bf16.mxu0 %v17575_v60  ;;  %v13601_v23 = vld [vmem:[%s17456_s11 + $0x50] sm:$0xff]   ;;  %v13602_v45 = vld [vmem:[%s17456_s11 + $0x58] sm:$0xff]  }
0x13fc   : > { %12558 = vmatprep.subr.bf16.mxu1 %v7997_v8 }
0x13fd   : > { %9002 = vmatpush1.bf16.msra.mxu0 %v13590_v11  ;;  %12559 = vmatpush3.bf16.msra.mxu1 %v7997_v8 }
0x13fe   : > { %9003 = vmatprep.subr.bf16.mxu0 %v17575_v60 }
0x13ff   : > { %v7919_v12 = vpop.f32.mrb[180].mxu1  ;;  %v7988_v9 = vpop.f32.mrb[156].mxu0 }
0x1400   : > { %v7921_v53 = vpop.f32.mrb[181].mxu1  ;;  %v7990_v15 = vpop.f32.mrb[157].mxu0 }
0x1401   : > { %9004 = vmatpush1.bf16.msra.mxu0 %v13591_v2  ;;  %v7922_v17 = vpop.f32.mrb[182].mxu1  ;;  %v7991_v55 = vpop.f32.mrb[158].mxu0 }
0x1402   : > { %v7929_v43 = vpack.c.bf16 %v7922_v17, %v7919_v12  ;;  %v7998_v61 = vpack.c.bf16 %v7991_v55, %v7988_v9  ;;  %v7924_v57 = vpop.f32.mrb[183].mxu1  ;;  %v7993_v46 = vpop.f32.mrb[159].mxu0  ;;  %12698 = vmatprep.subr.bf16.mxu0 %v13328_v38 }
0x1404   : > { %9014 = vmatmul.mubr.bf16.vlgmr.msra.gmra.mrb[224].mxu0 %v16426_v29  ;;  %12560 = vmatprep.subr.bf16.mxu1 %v7998_v61 }
0x1405   : > { %10904 = vmatprep.mubr.msk.bf16.mxu0 %vm3301_vm1, %v16428_v54  ;;  %12561 = vmatpush3.bf16.msra.mxu1 %v7998_v61 }
0x1406   : > { %12570 = vmatprep.subr.bf16.mxu1 %v16735_v62  ;;  %12699 = vmatpush3.bf16.msra.mxu0 %v13328_v38 }
0x1407   : > { %12700 = vmatprep.subr.bf16.mxu0 %v13329_v35 }
0x1408   : > { %12563 = vmatmul.mubr.msk.bf16.vlgmr.msra.gmra.mrb[184].mxu1 %vm3301_vm1, %v13592_v18 }
0x1409   : > { %12571 = vmatpush3.bf16.msra.mxu1 %v16735_v62  ;;  %12566 = vmatprep.mubr.msk.bf16.mxu1 %vm3301_vm1, %v13593_v16  ;;  %v17576_v62 = vld [vmem:[#allocation12_spill] sm:$0xff] }
0x140a   : > { %12572 = vmatprep.subr.bf16.mxu1 %v7927_v0  ;;  %12701 = vmatpush3.bf16.msra.mxu0 %v13329_v35 }
0x140b   : > { %12702 = vmatprep.subr.bf16.mxu0 %v13330_v58 }
0x140c   : > { %9022 = vmatmul.mubr.bf16.gmra.mrb[228].mxu0 %v16447_v41 }
0x140d   : > { %10905 = vmatprep.mubr.msk.bf16.mxu0 %vm3301_vm1, %v16449_v49  ;;  %12573 = vmatpush3.bf16.msra.mxu1 %v7927_v0 }
0x140e   : > { %12574 = vmatprep.subr.bf16.mxu1 %v7928_v56  ;;  %12703 = vmatpush3.bf16.msra.mxu0 %v13330_v58 }
0x140f   : > { %12704 = vmatprep.subr.bf16.mxu0 %v13331_v10 }
0x1410   : > { %12567 = vmatmul.mubr.msk.bf16.gmra.mrb[188].mxu1 %vm3301_vm1, %v13594_v50  ;;  %v13605_v50 = vld [vmem:[%s17457_s12 + $0x180] sm:$0xff]  }
0x1411   : > { %12575 = vmatpush3.bf16.msra.mxu1 %v7928_v56  ;;  %12578 = vmatprep.mubr.msk.bf16.mxu1 %vm3301_vm1, %v13595_v34  ;;  %v13603_v56 = vld [vmem:[%s17456_s11 + $0x60] sm:$0xff]   ;;  %v13606_v34 = vld [vmem:[%s17456_s11 + $0x70] sm:$0xff]  }
0x1412   : > { %12576 = vmatprep.subr.bf16.mxu1 %v7929_v43  ;;  %12705 = vmatpush3.bf16.msra.mxu0 %v13331_v10  ;;  %v13604_v10 = vld [vmem:[%s17456_s11 + $0x68] sm:$0xff]  }
0x1414   : > { %9030 = vmatmul.mubr.bf16.gmra.mrb[232].mxu0 %v16468_v30 }
0x1415   : > { %10906 = vmatprep.mubr.msk.bf16.mxu0 %vm3301_vm1, %v16470_v25  ;;  %12577 = vmatpush3.bf16.msra.mxu1 %v7929_v43 }
0x1417   : > { %v8163_v32 = vpop.f32.mrb[160].mxu0 }
0x1418   : > { %v8165_v31 = vpop.f32.mrb[161].mxu0  ;;  %12579 = vmatmul.mubr.msk.bf16.vlgmr.msra.gmra.mrb[184].mxu1 %vm3301_vm1, %v13596_v39  ;;  %v13609_v39 = vld [vmem:[%s17457_s12 + $0x190] sm:$0xff]  }
0x1419   : > { %v8166_v5 = vpop.f32.mrb[162].mxu0  ;;  %12582 = vmatprep.mubr.msk.bf16.mxu1 %vm3301_vm1, %v13597_v6  ;;  %v13608_v31 = vld [vmem:[%s17456_s11 + $0x78] sm:$0xff]  }
0x141a   : > { %v8194_v27 = vpack.c.bf16 %v8166_v5, %v8163_v32  ;;  %v8168_v63 = vpop.f32.mrb[163].mxu0  ;;  %v13607_v32 = vld [vmem:[%s17457_s12 + $0x188] sm:$0xff]   ;;  %v13610_v5 = vld [vmem:[%s17457_s12 + $0x198] sm:$0xff]  }
0x141b   : > { %v13611_v63 = vld [vmem:[%s17457_s12 + $0x1a0] sm:$0xff]  }
0x141c   : > { %12586 = vmatprep.subr.bf16.mxu1 %v8194_v27  ;;  %9038 = vmatmul.mubr.bf16.gmra.mrb[236].mxu0 %v16489_v28 }
0x141d   : > { %12587 = vmatpush3.bf16.msra.mxu1 %v8194_v27  ;;  %12706 = vmatprep.mubr.msk.bf16.mxu0 %vm3301_vm1, %v17576_v62 }
0x141f   : > { %v8171_v4 = vpop.f32.mrb[164].mxu0 }
0x1420   : > { %v8173_v36 = vpop.f32.mrb[165].mxu0  ;;  %12583 = vmatmul.mubr.msk.bf16.gmra.mrb[188].mxu1 %vm3301_vm1, %v13598_v26  ;;  %v13612_v26 = vld [vmem:[%s17457_s12 + $0x1a8] sm:$0xff]  }
0x1421   : > { %v8174_v44 = vpop.f32.mrb[166].mxu0  ;;  %12594 = vmatprep.mubr.msk.bf16.mxu1 %vm3301_vm1, %v13599_v59 }
0x1422   : > { %v8195_v1 = vpack.c.bf16 %v8174_v44, %v8171_v4  ;;  %v8176_v21 = vpop.f32.mrb[167].mxu0 }
0x1424   : > { %12588 = vmatprep.subr.bf16.mxu1 %v8195_v1  ;;  %12707 = vmatmul.mubr.msk.bf16.vlgmr.msra.gmra.mrb[240].mxu0 %vm3301_vm1, %v17577_v51 }
0x1425   : > { %12589 = vmatpush3.bf16.msra.mxu1 %v8195_v1  ;;  %12710 = vmatprep.mubr.msk.bf16.mxu0 %vm3301_vm1, %v17578_v52  ;;  %v13613_v1 = vld [vmem:[%s17457_s12 + $0x1b0] sm:$0xff]  }
0x1427   : > { %v8179_v24 = vpop.f32.mrb[168].mxu0 }
0x1428   : > { %v8181_v47 = vpop.f32.mrb[169].mxu0 }
0x1429   : > { %v8182_v0 = vpop.f32.mrb[170].mxu0 }
0x142a   : > { %v8196_v20 = vpack.c.bf16 %v8182_v0, %v8179_v24  ;;  %v8184_v13 = vpop.f32.mrb[171].mxu0  ;;  %v13614_v24 = vld [vmem:[%s17457_s12 + $0x1b8] sm:$0xff]  }
0x142c   : > { %12590 = vmatprep.subr.bf16.mxu1 %v8196_v20  ;;  %12711 = vmatmul.mubr.msk.bf16.gmra.mrb[244].mxu0 %vm3301_vm1, %v17579_v14 }
0x142d   : > { %12591 = vmatpush3.bf16.msra.mxu1 %v8196_v20  ;;  %v13615_v20 = vld [vmem:[%s17457_s12 + $0x1c0] sm:$0xff]  }
0x142f   : > { %v8187_v42 = vpop.f32.mrb[172].mxu0 }
0x1430   : > { %v8189_v7 = vpop.f32.mrb[173].mxu0 }
0x1431   : > { %v8190_v3 = vpop.f32.mrb[174].mxu0  ;;  %v13616_v7 = vld [vmem:[%s17457_s12 + $0x1c8] sm:$0xff]  }
0x1432   : > { %v8197_v33 = vpack.c.bf16 %v8190_v3, %v8187_v42  ;;  %v8192_v19 = vpop.f32.mrb[175].mxu0 }
0x1433   : > { %v13617_v19 = vld [vmem:[%s17457_s12 + $0x1d0] sm:$0xff]  }
0x1434   : > { %12592 = vmatprep.subr.bf16.mxu1 %v8197_v33 }
0x1435   : > { %12593 = vmatpush3.bf16.msra.mxu1 %v8197_v33 }
0x1438   : > { %12595 = vmatmul.mubr.msk.bf16.vlgmr.msra.gmra.mrb[184].mxu1 %vm3301_vm1, %v13600_v48 }
0x1439   : > { %12598 = vmatprep.mubr.msk.bf16.mxu1 %vm3301_vm1, %v13601_v23 }
0x1440   : > { %12599 = vmatmul.mubr.msk.bf16.gmra.mrb[188].mxu1 %vm3301_vm1, %v13602_v45 }
0x1441   : > { %12610 = vmatprep.mubr.msk.bf16.mxu1 %vm3301_vm1, %v13603_v56  ;;  %v13618_v56 = vld [vmem:[%s17457_s12 + $0x1d8] sm:$0xff]  }
0x1447   : > { %v8305_v8 = vpop.f32.mrb[176].mxu0 }
0x1448   : > { %v8307_v22 = vpop.f32.mrb[177].mxu0 }
0x1449   : > { %v8308_v37 = vpop.f32.mrb[178].mxu0 }
0x144a   : > { %v8336_v11 = vpack.c.bf16 %v8308_v37, %v8305_v8  ;;  %v8310_v38 = vpop.f32.mrb[179].mxu0 }
0x144c   : > { %12602 = vmatprep.subr.bf16.mxu1 %v8336_v11 }
0x144d   : > { %12603 = vmatpush3.bf16.msra.mxu1 %v8336_v11 }
0x144f   : > { %v8313_v12 = vpop.f32.mrb[180].mxu0 }
0x1450   : > { %v8315_v9 = vpop.f32.mrb[181].mxu0 }
0x1451   : > { %v8316_v53 = vpop.f32.mrb[182].mxu0 }
0x1452   : > { %v8337_v15 = vpack.c.bf16 %v8316_v53, %v8313_v12  ;;  %v8318_v2 = vpop.f32.mrb[183].mxu0 }
0x1454   : > { %12604 = vmatprep.subr.bf16.mxu1 %v8337_v15 }
0x1455   : > { %12605 = vmatpush3.bf16.msra.mxu1 %v8337_v15  ;;  %v13619_v15 = vld [vmem:[%s17456_s11 + $0x80] sm:$0xff]  }
0x1457   : > { %v8321_v17 = vpop.f32.mrb[184].mxu0 }
0x1458   : > { %v8323_v55 = vpop.f32.mrb[185].mxu0 }
0x1459   : > { %v8324_v43 = vpop.f32.mrb[186].mxu0 }
0x145a   : > { %v8338_v61 = vpack.c.bf16 %v8324_v43, %v8321_v17  ;;  %v8326_v57 = vpop.f32.mrb[187].mxu0 }
0x145c   : > { %12606 = vmatprep.subr.bf16.mxu1 %v8338_v61 }
0x145d   : > { %12607 = vmatpush3.bf16.msra.mxu1 %v8338_v61 }
0x145f   : > { %v8329_v46 = vpop.f32.mrb[188].mxu0 }
0x1460   : > { %v8331_v35 = vpop.f32.mrb[189].mxu0 }
0x1461   : > { %v8332_v58 = vpop.f32.mrb[190].mxu0 }
0x1462   : > { %v8339_v18 = vpack.c.bf16 %v8332_v58, %v8329_v46  ;;  %v8334_v16 = vpop.f32.mrb[191].mxu0 }
0x1464   : > { %12608 = vmatprep.subr.bf16.mxu1 %v8339_v18 }
0x1465   : > { %12609 = vmatpush3.bf16.msra.mxu1 %v8339_v18 }
0x1466   : > { %8413 = vmatprep.subr.bf16.mxu1 %v17575_v60 }
0x1468   : > { %12611 = vmatmul.mubr.msk.bf16.vlgmr.msra.gmra.mrb[184].mxu1 %vm3301_vm1, %v13604_v10 }
0x1469   : > { %8414 = vmatpush1.bf16.msra.mxu1 %v13605_v50  ;;  %12614 = vmatprep.mubr.msk.bf16.mxu1 %vm3301_vm1, %v13606_v34 }
0x146a   : > { %8415 = vmatprep.subr.bf16.mxu1 %v17575_v60 }
0x146d   : > { %8416 = vmatpush1.bf16.msra.mxu1 %v13607_v32 }
0x146e   : > { %8417 = vmatprep.subr.bf16.mxu1 %v17575_v60 }
0x1470   : > { %12615 = vmatmul.mubr.msk.bf16.gmra.mrb[188].mxu1 %vm3301_vm1, %v13608_v31 }
0x1471   : > { %8418 = vmatpush1.bf16.msra.mxu1 %v13609_v39  ;;  %10871 = vmatprep.mubr.msk.bf16.mxu1 %vm3301_vm1, %v16417_v40 }
0x1472   : > { %8419 = vmatprep.subr.bf16.mxu1 %v17575_v60 }
0x1475   : > { %8420 = vmatpush1.bf16.msra.mxu1 %v13610_v5 }
0x1476   : > { %8421 = vmatprep.subr.bf16.mxu1 %v17575_v60 }
0x1477   : > { %v8589_v6 = vpop.f32.mrb[192].mxu0 }
0x1478   : > { %v8591_v27 = vpop.f32.mrb[193].mxu0 }
0x1479   : > { %8422 = vmatpush1.bf16.msra.mxu1 %v13611_v63  ;;  %v8592_v62 = vpop.f32.mrb[194].mxu0 }
0x147a   : > { %v16878_v4 = vpack.c.bf16 %v8592_v62, %v8589_v6  ;;  %v8594_v36 = vpop.f32.mrb[195].mxu0  ;;  %8423 = vmatprep.subr.bf16.mxu1 %v17575_v60 }
0x147d   : > { %8424 = vmatpush1.bf16.msra.mxu1 %v13612_v26 }
0x147e   : > { %8425 = vmatprep.subr.bf16.mxu1 %v17575_v60 }
0x147f   : > { %v8597_v44 = vpop.f32.mrb[196].mxu0 }
0x1480   : > { %v8599_v59 = vpop.f32.mrb[197].mxu0 }
0x1481   : > { %8426 = vmatpush1.bf16.msra.mxu1 %v13613_v1  ;;  %v8600_v21 = vpop.f32.mrb[198].mxu0 }
0x1482   : > { %v16888_v51 = vpack.c.bf16 %v8600_v21, %v8597_v44  ;;  %v8602_v52 = vpop.f32.mrb[199].mxu0  ;;  %8427 = vmatprep.subr.bf16.mxu1 %v17575_v60 }
0x1485   : > { %8428 = vmatpush1.bf16.msra.mxu1 %v13614_v24 }
0x1486   : > { %8429 = vmatprep.subr.bf16.mxu1 %v17575_v60 }
0x1487   : > { %v8605_v47 = vpop.f32.mrb[200].mxu0 }
0x1488   : > { %v8607_v0 = vpop.f32.mrb[201].mxu0 }
0x1489   : > { %8430 = vmatpush1.bf16.msra.mxu1 %v13615_v20  ;;  %v8608_v13 = vpop.f32.mrb[202].mxu0  ;;  %v16947_v20 = vld [vmem:[%s17460_s15] ss:$0 sm:$0xff] }
0x148a   : > { %v16898_v14 = vpack.c.bf16 %v8608_v13, %v8605_v47  ;;  %v8610_v42 = vpop.f32.mrb[203].mxu0  ;;  %8431 = vmatprep.subr.bf16.mxu1 %v17575_v60 }
0x148d   : > { %8432 = vmatpush1.bf16.msra.mxu1 %v13616_v7 }
0x148e   : > { %8433 = vmatprep.subr.bf16.mxu1 %v17575_v60 }
0x148f   : > { %v8613_v3 = vpop.f32.mrb[204].mxu0 }
0x1490   : > { %v8615_v33 = vpop.f32.mrb[205].mxu0 }
0x1491   : > { %8434 = vmatpush1.bf16.msra.mxu1 %v13617_v19  ;;  %v8616_v48 = vpop.f32.mrb[206].mxu0 }
0x1492   : > { %v16908_v23 = vpack.c.bf16 %v8616_v48, %v8613_v3  ;;  %v8618_v45 = vpop.f32.mrb[207].mxu0  ;;  %8435 = vmatprep.subr.bf16.mxu1 %v17575_v60 }
0x1495   : > { %8436 = vmatpush1.bf16.msra.mxu1 %v13618_v56 }
0x1498   : > { %8446 = vmatmul.mubr.bf16.vlgmr.msra.gmra.mrb[192].mxu1 %v16426_v29 }
0x1499   : > { %10872 = vmatprep.mubr.msk.bf16.mxu1 %vm3301_vm1, %v16428_v54 }
0x14a0   : > { %8454 = vmatmul.mubr.bf16.gmra.mrb[196].mxu1 %v16447_v41 }
0x14a1   : > { %10873 = vmatprep.mubr.msk.bf16.mxu1 %vm3301_vm1, %v16449_v49 }
0x14a7   : > { %v8731_v8 = vpop.f32.mrb[208].mxu0 }
0x14a8   : > { %8462 = vmatmul.mubr.bf16.gmra.mrb[200].mxu1 %v16468_v30  ;;  %v8733_v22 = vpop.f32.mrb[209].mxu0 }
0x14a9   : > { %10874 = vmatprep.mubr.msk.bf16.mxu1 %vm3301_vm1, %v16470_v25  ;;  %v8734_v37 = vpop.f32.mrb[210].mxu0 }
0x14aa   : > { %v16923_v11 = vpack.c.bf16 %v8734_v37, %v8731_v8  ;;  %v8736_v38 = vpop.f32.mrb[211].mxu0 }
0x14af   : > { %v8739_v12 = vpop.f32.mrb[212].mxu0 }
0x14b0   : > { %8470 = vmatmul.mubr.bf16.gmra.mrb[204].mxu1 %v16489_v28  ;;  %v8741_v9 = vpop.f32.mrb[213].mxu0 }
0x14b1   : > { %v8742_v53 = vpop.f32.mrb[214].mxu0  ;;  %12626 = vmatprep.mubr.msk.bf16.mxu1 %vm3301_vm1, %v13619_v15 }
0x14b2   : > { %v16930_v2 = vpack.c.bf16 %v8742_v53, %v8739_v12  ;;  %v8744_v17 = vpop.f32.mrb[215].mxu0 }
0x14b7   : > { %v8747_v55 = vpop.f32.mrb[216].mxu0 }
0x14b8   : > { %v8749_v43 = vpop.f32.mrb[217].mxu0 }
0x14b9   : > { %v8750_v61 = vpop.f32.mrb[218].mxu0 }
0x14ba   : > { %v16932_v57 = vpack.c.bf16 %v8750_v61, %v8747_v55  ;;  %v8752_v46 = vpop.f32.mrb[219].mxu0 }
0x14bf   : > { %v8755_v35 = vpop.f32.mrb[220].mxu0 }
0x14c0   : > { %v8757_v58 = vpop.f32.mrb[221].mxu0 }
0x14c1   : > { %v8758_v18 = vpop.f32.mrb[222].mxu0 }
0x14c2   : > { %v16934_v16 = vpack.c.bf16 %v8758_v18, %v8755_v35  ;;  %v8760_v10 = vpop.f32.mrb[223].mxu0 }
0x14d7   : > { %v9015_v50 = vpop.f32.mrb[224].mxu0 }
0x14d8   : > { %v9017_v34 = vpop.f32.mrb[225].mxu0 }
0x14d9   : > { %v9018_v32 = vpop.f32.mrb[226].mxu0 }
0x14da   : > { %v16936_v31 = vpack.c.bf16 %v9018_v32, %v9015_v50  ;;  %v9020_v39 = vpop.f32.mrb[227].mxu0 }
0x14df   : > { %v9023_v5 = vpop.f32.mrb[228].mxu0 }
0x14e0   : > { %v9025_v6 = vpop.f32.mrb[229].mxu0 }
0x14e1   : > { %v9026_v27 = vpop.f32.mrb[230].mxu0 }
0x14e2   : > { %v16938_v63 = vpack.c.bf16 %v9026_v27, %v9023_v5  ;;  %v9028_v62 = vpop.f32.mrb[231].mxu0 }
0x14e7   : > { %v9031_v36 = vpop.f32.mrb[232].mxu0 }
0x14e8   : > { %v9033_v26 = vpop.f32.mrb[233].mxu0 }
0x14e9   : > { %v9034_v44 = vpop.f32.mrb[234].mxu0 }
0x14ea   : > { %v16940_v59 = vpack.c.bf16 %v9034_v44, %v9031_v36  ;;  %v9036_v1 = vpop.f32.mrb[235].mxu0  ;;  %v13620_v44 = vld [vmem:[%s17456_s11 + $0x88] sm:$0xff]  }
0x14eb   : > { %v13621_v1 = vld [vmem:[%s17456_s11 + $0x90] sm:$0xff]  }
0x14ef   : > { %v9039_v21 = vpop.f32.mrb[236].mxu0 }
0x14f0   : > { %v9041_v52 = vpop.f32.mrb[237].mxu0 }
0x14f1   : > { %v9042_v24 = vpop.f32.mrb[238].mxu0  ;;  %v13630_v52 = vld [vmem:[%s17456_s11 + $0xd0] sm:$0xff]  }
0x14f2   : > { %v16942_v47 = vpack.c.bf16 %v9042_v24, %v9039_v21  ;;  %v9044_v0 = vpop.f32.mrb[239].mxu0  ;;  %v13622_v21 = vld [vmem:[%s17456_s11 + $0x98] sm:$0xff]  }
0x14f3   : > { %v13632_v24 = vld [vmem:[%s17456_s11 + $0xd8] sm:$0xff]   ;;  %v13633_v0 = vld [vmem:[%s17457_s12 + $0x2b0] sm:$0xff]  }
0x14f7   : > { %v12708_v13 = vpop.f32.mrb[240].mxu0 }
0x14f8   : > { %v16950_v42 = vadd.f32 %v12708_v13, %v16947_v20  ;;  %v9240_v7 = vpop.f32.mrb[241].mxu0  ;;  %v13634_v13 = vld [vmem:[%s17457_s12 + $0x2b8] sm:$0xff]  }
0x14f9   : > { %v16953_v3 = vadd.f32 %v16947_v20, %v9240_v7  ;;  %v12709_v33 = vpop.f32.mrb[242].mxu0  ;;  %v13635_v7 = vld [vmem:[%s17457_s12 + $0x2c0] sm:$0xff]  }
0x14fa   : > { %v16956_v19 = vadd.f32 %v12709_v33, %v16947_v20  ;;  %v9243_v48 = vpop.f32.mrb[243].mxu0  ;;  %v9310_v45 = vsel %vm9303_vm4, %v16950_v42, -inf  ;;  %v13637_v33 = vld [vmem:[%s17457_s12 + $0x2d0] sm:$0xff]  }
0x14fb   : > { %9311 = vmax.xlane.f32.xlu0 %v9310_v45  ;;  %v9304_v56 = vsel %vm9303_vm4, %v16953_v3, -inf  ;;  %v16963_v8 = vadd.f32 %v16947_v20, %v9243_v48  ;;  %v13638_v48 = vld [vmem:[%s17457_s12 + $0x2d8] sm:$0xff]   ;;  %v13639_v45 = vld [vmem:[%s17457_s12 + $0x2e0] sm:$0xff]  }
0x14fc   : > { %9305 = vmax.xlane.f32.xlu1 %v9304_v56  ;;  %v9313_v22 = vsel %vm9303_vm4, %v16956_v19, -inf  ;;  %v13640_v56 = vld [vmem:[%s17457_s12 + $0x2e8] sm:$0xff]  }
0x14fd   : > { %v9307_v53 = vsel %vm9303_vm4, %v16963_v8, -inf }
0x14ff   : > { %9314 = vmax.xlane.f32.xlu0 %v9313_v22  ;;  %v16967_v37 = vpop.f32.mrb[244].mxu0  ;;  %v13641_v22 = vld [vmem:[%s17457_s12 + $0x2f0] sm:$0xff]  }
0x1500   : > { %v16969_v38 = vpop.f32.mrb[245].mxu0 }
0x1501   : > { %v16971_v12 = vpop.f32.mrb[246].mxu0 }
0x1502   : > { %v16973_v9 = vpop.f32.mrb[247].mxu0 }
0x1503   : > { %9308 = vmax.xlane.f32.xlu0 %v9307_v53  ;;  %v13642_v53 = vld [vmem:[%s17457_s12 + $0x2f8] sm:$0xff]  }
0x156b   : > { %v8447_v15 = vpop.f32.mrb[192].mxu1 }
0x156c   : > { %v8449_v17 = vpop.f32.mrb[193].mxu1 }
0x156d   : > { %v8450_v55 = vpop.f32.mrb[194].mxu1 }
0x156e   : > { %v8478_v43 = vpack.c.bf16 %v8450_v55, %v8447_v15  ;;  %v8452_v61 = vpop.f32.mrb[195].mxu1  ;;  %v13643_v15 = vld [vmem:[%s17456_s11 + $0xe0] sm:$0xff]  }
0x1570   : > { %12618 = vmatprep.subr.bf16.mxu1 %v8478_v43 }
0x1571   : > { %12619 = vmatpush3.bf16.msra.mxu1 %v8478_v43 }
0x1573   : > { %v8455_v46 = vpop.f32.mrb[196].mxu1 }
0x1574   : > { %v8457_v35 = vpop.f32.mrb[197].mxu1 }
0x1575   : > { %v8458_v58 = vpop.f32.mrb[198].mxu1 }
0x1576   : > { %v8479_v18 = vpack.c.bf16 %v8458_v58, %v8455_v46  ;;  %v8460_v10 = vpop.f32.mrb[199].mxu1 }
0x1578   : > { %12620 = vmatprep.subr.bf16.mxu1 %v8479_v18 }
0x1579   : > { %12621 = vmatpush3.bf16.msra.mxu1 %v8479_v18 }
0x157b   : > { %v8463_v50 = vpop.f32.mrb[200].mxu1 }
0x157c   : > { %v8465_v34 = vpop.f32.mrb[201].mxu1 }
0x157d   : > { %v8466_v32 = vpop.f32.mrb[202].mxu1 }
0x157e   : > { %v8480_v39 = vpack.c.bf16 %v8466_v32, %v8463_v50  ;;  %v8468_v5 = vpop.f32.mrb[203].mxu1 }
0x157f   : > { %v13644_v5 = vld [vmem:[%s17456_s11 + $0xe8] sm:$0xff]  }
0x1580   : > { %12622 = vmatprep.subr.bf16.mxu1 %v8480_v39 }
0x1581   : > { %12623 = vmatpush3.bf16.msra.mxu1 %v8480_v39 }
0x1583   : > { %v8471_v6 = vpop.f32.mrb[204].mxu1 }
0x1584   : > { %v8473_v27 = vpop.f32.mrb[205].mxu1 }
0x1585   : > { %v8474_v62 = vpop.f32.mrb[206].mxu1  ;;  %v13646_v27 = vld [vmem:[%s17456_s11 + $0xf8] sm:$0xff]  }
0x1586   : > { %v8481_v36 = vpack.c.bf16 %v8474_v62, %v8471_v6  ;;  %v8476_v26 = vpop.f32.mrb[207].mxu1  ;;  %v13645_v6 = vld [vmem:[%s17456_s11 + $0xf0] sm:$0xff]   ;;  %v13650_v62 = vld [vmem:[%s17456_s11 + $0x118] sm:$0xff]  }
0x1588   : > { %12624 = vmatprep.subr.bf16.mxu1 %v8481_v36 }
0x1589   : > { %12625 = vmatpush3.bf16.msra.mxu1 %v8481_v36  ;;  %v13651_v36 = vld [vmem:[%s17458_s13] ss:$0 sm:$0xff] }
0x158a   : > { %12634 = vmatprep.subr.bf16.mxu1 %v16878_v4 }
0x158c   : > { %12627 = vmatmul.mubr.msk.bf16.vlgmr.msra.gmra.mrb[184].mxu1 %vm3301_vm1, %v13620_v44 }
0x158d   : > { %12635 = vmatpush3.bf16.msra.mxu1 %v16878_v4  ;;  %12630 = vmatprep.mubr.msk.bf16.mxu1 %vm3301_vm1, %v13621_v1  ;;  %v13623_v4 = vld [vmem:[%s17456_s11 + $0xa0] sm:$0xff]  }
0x158e   : > { %12636 = vmatprep.subr.bf16.mxu1 %v16888_v51 }
0x1591   : > { %12637 = vmatpush3.bf16.msra.mxu1 %v16888_v51  ;;  %v13624_v51 = vld [vmem:[%s17456_s11 + $0xa8] sm:$0xff]  }
0x1592   : > { %12638 = vmatprep.subr.bf16.mxu1 %v16898_v14 }
0x1594   : > { %12631 = vmatmul.mubr.msk.bf16.gmra.mrb[188].mxu1 %vm3301_vm1, %v13622_v21 }
0x1595   : > { %12639 = vmatpush3.bf16.msra.mxu1 %v16898_v14  ;;  %12642 = vmatprep.mubr.msk.bf16.mxu1 %vm3301_vm1, %v13623_v4  ;;  %v13625_v14 = vld [vmem:[%s17456_s11 + $0xb0] sm:$0xff]  }
0x1596   : > { %12640 = vmatprep.subr.bf16.mxu1 %v16908_v23 }
0x1599   : > { %12641 = vmatpush3.bf16.msra.mxu1 %v16908_v23  ;;  %v13626_v23 = vld [vmem:[%s17456_s11 + $0xb8] sm:$0xff]  }
0x159a   : > { %12650 = vmatprep.subr.bf16.mxu1 %v16923_v11 }
0x159c   : > { %12643 = vmatmul.mubr.msk.bf16.vlgmr.msra.gmra.mrb[184].mxu1 %vm3301_vm1, %v13624_v51 }
0x159d   : > { %12651 = vmatpush3.bf16.msra.mxu1 %v16923_v11  ;;  %12646 = vmatprep.mubr.msk.bf16.mxu1 %vm3301_vm1, %v13625_v14  ;;  %v13627_v11 = vld [vmem:[%s17456_s11 + $0xc0] sm:$0xff]  }
0x159e   : > { %12652 = vmatprep.subr.bf16.mxu1 %v16930_v2 }
0x15a1   : > { %12653 = vmatpush3.bf16.msra.mxu1 %v16930_v2  ;;  %v13628_v2 = vld [vmem:[%s17456_s11 + $0xc8] sm:$0xff]  }
0x15a2   : > { %12654 = vmatprep.subr.bf16.mxu1 %v16932_v57 }
0x15a4   : > { %12647 = vmatmul.mubr.msk.bf16.gmra.mrb[188].mxu1 %vm3301_vm1, %v13626_v23 }
0x15a5   : > { %12655 = vmatpush3.bf16.msra.mxu1 %v16932_v57  ;;  %12658 = vmatprep.mubr.msk.bf16.mxu1 %vm3301_vm1, %v13627_v11  ;;  %v13629_v57 = vld [vmem:[%s17457_s12 + $0x2a0] sm:$0xff]  }
0x15a6   : > { %12656 = vmatprep.subr.bf16.mxu1 %v16934_v16 }
0x15a9   : > { %12657 = vmatpush3.bf16.msra.mxu1 %v16934_v16  ;;  %v13631_v16 = vld [vmem:[%s17457_s12 + $0x2a8] sm:$0xff]  }
0x15aa   : > { %8839 = vmatprep.subr.bf16.mxu1 %v17575_v60 }
0x15ac   : > { %12659 = vmatmul.mubr.msk.bf16.vlgmr.msra.gmra.mrb[184].mxu1 %vm3301_vm1, %v13628_v2 }
0x15ad   : > { %8840 = vmatpush1.bf16.msra.mxu1 %v13629_v57  ;;  %12662 = vmatprep.mubr.msk.bf16.mxu1 %vm3301_vm1, %v13630_v52 }
0x15ae   : > { %8841 = vmatprep.subr.bf16.mxu1 %v17575_v60 }
0x15b1   : > { %8842 = vmatpush1.bf16.msra.mxu1 %v13631_v16 }
0x15b2   : > { %8843 = vmatprep.subr.bf16.mxu1 %v17575_v60 }
0x15b4   : > { %12663 = vmatmul.mubr.msk.bf16.gmra.mrb[188].mxu1 %vm3301_vm1, %v13632_v24 }
0x15b5   : > { %8844 = vmatpush1.bf16.msra.mxu1 %v13633_v0  ;;  %10895 = vmatprep.mubr.msk.bf16.mxu1 %vm3301_vm1, %v16417_v40  ;;  %v13636_v40 = vld [vmem:[%s17457_s12 + $0x2c8] sm:$0xff]  }
0x15b6   : > { %8845 = vmatprep.subr.bf16.mxu1 %v17575_v60 }
0x15b9   : > { %8846 = vmatpush1.bf16.msra.mxu1 %v13634_v13 }
0x15ba   : > { %8847 = vmatprep.subr.bf16.mxu1 %v17575_v60 }
0x15bd   : > { %8848 = vmatpush1.bf16.msra.mxu1 %v13635_v7 }
0x15be   : > { %8849 = vmatprep.subr.bf16.mxu1 %v17575_v60 }
0x15c1   : > { %8850 = vmatpush1.bf16.msra.mxu1 %v13636_v40 }
0x15c2   : > { %8851 = vmatprep.subr.bf16.mxu1 %v17575_v60 }
0x15c5   : > { %8852 = vmatpush1.bf16.msra.mxu1 %v13637_v33 }
0x15c6   : > { %8853 = vmatprep.subr.bf16.mxu1 %v17575_v60 }
0x15c9   : > { %8854 = vmatpush1.bf16.msra.mxu1 %v13638_v48 }
0x15ca   : > { %8855 = vmatprep.subr.bf16.mxu1 %v17575_v60 }
0x15cd   : > { %8856 = vmatpush1.bf16.msra.mxu1 %v13639_v45 }
0x15ce   : > { %8857 = vmatprep.subr.bf16.mxu1 %v17575_v60 }
0x15d1   : > { %8858 = vmatpush1.bf16.msra.mxu1 %v13640_v56 }
0x15d2   : > { %8859 = vmatprep.subr.bf16.mxu1 %v17575_v60 }
0x15d5   : > { %8860 = vmatpush1.bf16.msra.mxu1 %v13641_v22 }
0x15d6   : > { %8861 = vmatprep.subr.bf16.mxu1 %v17575_v60 }
0x15d9   : > { %8862 = vmatpush1.bf16.msra.mxu1 %v13642_v53 }
0x15dc   : > { %8872 = vmatmul.mubr.bf16.vlgmr.msra.gmra.mrb[208].mxu1 %v16426_v29 }
0x15dd   : > { %10896 = vmatprep.mubr.msk.bf16.mxu1 %vm3301_vm1, %v16428_v54 }
0x15e4   : > { %8880 = vmatmul.mubr.bf16.gmra.mrb[212].mxu1 %v16447_v41 }
0x15e5   : > { %10897 = vmatprep.mubr.msk.bf16.mxu1 %vm3301_vm1, %v16449_v49 }
0x15ec   : > { %8888 = vmatmul.mubr.bf16.gmra.mrb[216].mxu1 %v16468_v30 }
0x15ed   : > { %10898 = vmatprep.mubr.msk.bf16.mxu1 %vm3301_vm1, %v16470_v25 }
0x15f4   : > { %8896 = vmatmul.mubr.bf16.gmra.mrb[220].mxu1 %v16489_v28 }
0x15f5   : > { %12674 = vmatprep.mubr.msk.bf16.mxu1 %vm3301_vm1, %v13643_v15 }
0x16af   : > { %v8873_v29 = vpop.f32.mrb[208].mxu1 }
0x16b0   : > { %v8875_v54 = vpop.f32.mrb[209].mxu1 }
0x16b1   : > { %v8876_v17 = vpop.f32.mrb[210].mxu1 }
0x16b2   : > { %v8904_v41 = vpack.c.bf16 %v8876_v17, %v8873_v29  ;;  %v8878_v55 = vpop.f32.mrb[211].mxu1  ;;  %v9312_v17 = vpop.xlane.xlu0 %9311 }
0x16b4   : > { %12666 = vmatprep.subr.bf16.mxu1 %v8904_v41 }
0x16b5   : > { %12667 = vmatpush3.bf16.msra.mxu1 %v8904_v41 }
0x16b7   : > { %v8881_v49 = vpop.f32.mrb[212].mxu1 }
0x16b8   : > { %v8883_v30 = vpop.f32.mrb[213].mxu1 }
0x16b9   : > { %v8884_v43 = vpop.f32.mrb[214].mxu1  ;;  %v9315_v30 = vpop.xlane.xlu0 %9314 }
0x16ba   : > { %v8905_v61 = vpack.c.bf16 %v8884_v43, %v8881_v49  ;;  %v8886_v25 = vpop.f32.mrb[215].mxu1 }
0x16bc   : > { %12668 = vmatprep.subr.bf16.mxu1 %v8905_v61 }
0x16bd   : > { %12669 = vmatpush3.bf16.msra.mxu1 %v8905_v61 }
0x16bf   : > { %v8889_v28 = vpop.f32.mrb[216].mxu1 }
0x16c0   : > { %v8891_v46 = vpop.f32.mrb[217].mxu1 }
0x16c1   : > { %v8892_v35 = vpop.f32.mrb[218].mxu1 }
0x16c2   : > { %v8906_v58 = vpack.c.bf16 %v8892_v35, %v8889_v28  ;;  %v8894_v18 = vpop.f32.mrb[219].mxu1  ;;  %v9306_v35 = vpop.xlane.xlu1 %9305 }
0x16c4   : > { %12670 = vmatprep.subr.bf16.mxu1 %v8906_v58 }
0x16c5   : > { %12671 = vmatpush3.bf16.msra.mxu1 %v8906_v58 }
0x16c7   : > { %v8897_v10 = vpop.f32.mrb[220].mxu1 }
0x16c8   : > { %v8899_v50 = vpop.f32.mrb[221].mxu1 }
0x16c9   : > { %v8900_v34 = vpop.f32.mrb[222].mxu1 }
0x16ca   : > { %v8907_v32 = vpack.c.bf16 %v8900_v34, %v8897_v10  ;;  %v8902_v39 = vpop.f32.mrb[223].mxu1  ;;  %v9352_v10 = vsub.f32 %v16953_v3, %v9306_v35  ;;  %v17167_v34 = vadd.f32 %v16947_v20, %v16969_v38 }
0x16cc   : > { %12672 = vmatprep.subr.bf16.mxu1 %v8907_v32  ;;  %v9368_v3 = vmul.f32 1.442695, %v9352_v10 }
0x16cd   : > { %12673 = vmatpush3.bf16.msra.mxu1 %v8907_v32  ;;  %v9309_v32 = vpop.xlane.xlu0 %9308 }
0x16ce   : > { %12682 = vmatprep.subr.bf16.mxu1 %v16936_v31  ;;  %13332 = vpow2.f32 %v9368_v3 }
0x16d0   : > { %12675 = vmatmul.mubr.msk.bf16.vlgmr.msra.gmra.mrb[184].mxu1 %vm3301_vm1, %v13644_v5 }
0x16d1   : > { %12683 = vmatpush3.bf16.msra.mxu1 %v16936_v31  ;;  %12678 = vmatprep.mubr.msk.bf16.mxu1 %vm3301_vm1, %v13645_v6  ;;  %v13647_v31 = vld [vmem:[%s17456_s11 + $0x100] sm:$0xff]  }
0x16d2   : > { %12684 = vmatprep.subr.bf16.mxu1 %v16938_v63 }
0x16d5   : > { %12685 = vmatpush3.bf16.msra.mxu1 %v16938_v63  ;;  %v13648_v63 = vld [vmem:[%s17456_s11 + $0x108] sm:$0xff]  }
0x16d6   : > { %12686 = vmatprep.subr.bf16.mxu1 %v16940_v59 }
0x16d8   : > { %12679 = vmatmul.mubr.msk.bf16.gmra.mrb[188].mxu1 %vm3301_vm1, %v13646_v27 }
0x16d9   : > { %12687 = vmatpush3.bf16.msra.mxu1 %v16940_v59  ;;  %12690 = vmatprep.mubr.msk.bf16.mxu1 %vm3301_vm1, %v13647_v31  ;;  %v13649_v59 = vld [vmem:[%s17456_s11 + $0x110] sm:$0xff]  }
0x16da   : > { %12688 = vmatprep.subr.bf16.mxu1 %v16942_v47 }
0x16dd   : > { %12689 = vmatpush3.bf16.msra.mxu1 %v16942_v47 }
0x16e0   : > { %12691 = vmatmul.mubr.msk.bf16.vlgmr.msra.gmra.mrb[184].mxu1 %vm3301_vm1, %v13648_v63  ;;  %v9353_v63 = vsub.f32 %v16963_v8, %v9309_v32 }
0x16e1   : > { %12694 = vmatprep.mubr.msk.bf16.mxu1 %vm3301_vm1, %v13649_v59 }
0x16e2   : > { %v9370_v8 = vmul.f32 1.442695, %v9353_v63 }
0x16e4   : > { %13334 = vpow2.f32 %v9370_v8 }
0x16e8   : > { %12695 = vmatmul.mubr.msk.bf16.gmra.mrb[188].mxu1 %vm3301_vm1, %v13650_v62 }
0x16e9   : > { %9778 = vmatprep.mubr.bf16.mxu1 %v17575_v60 }
0x17b3   : > { %v12692_v47 = vpop.f32.mrb[184].mxu1 }
0x17b4   : > { %v9125_v26 = vadd.f32 %v13651_v36, %v12692_v47  ;;  %v9084_v44 = vpop.f32.mrb[185].mxu1  ;;  %v17182_v47 = vadd.f32 %v16947_v20, %v16973_v9 }
0x17b5   : > { %v9123_v1 = vadd.f32 %v13651_v36, %v9084_v44  ;;  %v12693_v21 = vpop.f32.mrb[186].mxu1 }
0x17b6   : > { %v9126_v4 = vadd.f32 %v13651_v36, %v12693_v21  ;;  %v9087_v51 = vpop.f32.mrb[187].mxu1  ;;  %v9133_v23 = vmax.f32 %v9125_v26, 0.0  ;;  %v9354_v26 = vsub.f32 %v16950_v42, %v9312_v17  ;;  %v17194_v21 = vadd.f32 %v16967_v37, %v16947_v20 }
0x17b7   : > { %v9124_v14 = vadd.f32 %v13651_v36, %v9087_v51  ;;  %v9131_v2 = vmax.f32 %v9123_v1, 0.0  ;;  %v9319_v9 = vsel %vm9303_vm4, %v17182_v47, -inf  ;;  %v9355_v42 = vsub.f32 %v16956_v19, %v9315_v30 }
0x17b8   : > { %v9134_v11 = vmax.f32 %v9126_v4, 0.0  ;;  %v9372_v4 = vmul.f32 1.442695, %v9354_v26  ;;  %v9322_v37 = vsel %vm9303_vm4, %v17194_v21, -inf }
0x17b9   : > { %v9132_v57 = vmax.f32 %v9124_v14, 0.0 }
0x17ba   : > { %v9140_v52 = vpack.c.bf16 %v9134_v11, %v9133_v23  ;;  %v17206_v23 = vadd.f32 %v16971_v12, %v16947_v20  ;;  %13336 = vpow2.f32 %v9372_v4  ;;  %v9374_v11 = vmul.f32 1.442695, %v9355_v42 }
0x17bb   : > { %v9139_v16 = vpack.c.bf16 %v9132_v57, %v9131_v2  ;;  %v12696_v24 = vpop.f32.mrb[188].mxu1  ;;  %v17214_v57 = vpop.eup %13332 }
0x17bc   : > { %v9129_v0 = vadd.f32 %v13651_v36, %v12696_v24  ;;  %v9100_v13 = vpop.f32.mrb[189].mxu1  ;;  %v9325_v2 = vsel %vm9303_vm4, %v17206_v23, -inf  ;;  %13338 = vpow2.f32 %v9374_v11  ;;  %v17218_v12 = vpop.eup %13334 }
0x17bd   : > { %v9127_v7 = vadd.f32 %v13651_v36, %v9100_v13  ;;  %v12697_v40 = vpop.f32.mrb[190].mxu1  ;;  %12714 = vmatprep.mubr.msk.bf16.mxu0 %vm3301_vm1, %v9139_v16 }
0x17be   : > { %v9130_v33 = vadd.f32 %v13651_v36, %v12697_v40  ;;  %v9103_v48 = vpop.f32.mrb[191].mxu1  ;;  %12715 = vmatmul.mubr.msk.bf16.gmra.mrb[248].mxu0 %vm3301_vm1, %v9140_v52  ;;  %v9137_v56 = vmax.f32 %v9129_v0, 0.0  ;;  %v9403_v52 = vsel %vm9303_vm4, %v17218_v12, 0.0 }
0x17bf   : > { %v9128_v45 = vadd.f32 %v13651_v36, %v9103_v48  ;;  %v9135_v53 = vmax.f32 %v9127_v7, 0.0  ;;  %v9316_v36 = vsel %vm9303_vm4, %v17167_v34, -inf }
0x17c0   : > { %v9138_v22 = vmax.f32 %v9130_v33, 0.0 }
0x17c1   : > { %v9136_v15 = vmax.f32 %v9128_v45, 0.0 }
0x17c2   : > { %v9142_v29 = vpack.c.bf16 %v9138_v22, %v9137_v56 }
0x17c3   : > { %v9141_v54 = vpack.c.bf16 %v9136_v15, %v9135_v53 }
0x17c4   : > { %v17222_v16 = vpop.eup %13336 }
0x17c5   : > { %12718 = vmatprep.mubr.msk.bf16.mxu0 %vm3301_vm1, %v9141_v54  ;;  %v9406_v24 = vsel %vm9303_vm4, %v17222_v16, 0.0 }
0x17c6   : > { %12719 = vmatmul.mubr.msk.bf16.gmra.mrb[252].mxu0 %vm3301_vm1, %v9142_v29  ;;  %v17226_v0 = vpop.eup %13338 }
0x17c7   : > { %9821 = vmatprep.mubr.bf16.mxu0 %v17575_v60  ;;  %v9409_v13 = vsel %vm9303_vm4, %v17226_v0, 0.0 }
0x1891   : > { %v12716_v41 = vpop.f32.mrb[248].mxu0 }
0x1892   : > { %v17147_v55 = vadd.f32 %v12716_v41, %v16947_v20  ;;  %v9272_v49 = vpop.f32.mrb[249].mxu0 }
0x1893   : > { %v17150_v43 = vadd.f32 %v16947_v20, %v9272_v49  ;;  %v12717_v61 = vpop.f32.mrb[250].mxu0 }
0x1894   : > { %v17153_v25 = vadd.f32 %v12717_v61, %v16947_v20  ;;  %v9275_v28 = vpop.f32.mrb[251].mxu0  ;;  %v9334_v46 = vsel %vm9303_vm4, %v17147_v55, -inf }
0x1895   : > { %v17158_v58 = vadd.f32 %v16947_v20, %v9275_v28  ;;  %9335 = vmax.xlane.f32.xlu1 %v9334_v46  ;;  %v9328_v18 = vsel %vm9303_vm4, %v17150_v43, -inf }
0x1896   : > { %9329 = vmax.xlane.f32.xlu0 %v9328_v18  ;;  %v9337_v50 = vsel %vm9303_vm4, %v17153_v25, -inf }
0x1897   : > { %v9331_v5 = vsel %vm9303_vm4, %v17158_v58, -inf }
0x1899   : > { %9338 = vmax.xlane.f32.xlu1 %v9337_v50  ;;  %v12720_v39 = vpop.f32.mrb[252].mxu0 }
0x189a   : > { %v17172_v6 = vadd.f32 %v12720_v39, %v16947_v20  ;;  %v9288_v27 = vpop.f32.mrb[253].mxu0  ;;  %9332 = vmax.xlane.f32.xlu0 %v9331_v5 }
0x189b   : > { %v12721_v31 = vpop.f32.mrb[254].mxu0  ;;  %v17176_v59 = vadd.f32 %v16947_v20, %v9288_v27 }
0x189c   : > { %v9291_v38 = vpop.f32.mrb[255].mxu0  ;;  %v9346_v62 = vsel %vm9303_vm4, %v17172_v6, -inf  ;;  %v17200_v51 = vadd.f32 %v12721_v31, %v16947_v20 }
0x189d   : > { %9347 = vmax.xlane.f32.xlu1 %v9346_v62  ;;  %v17188_v44 = vadd.f32 %v16947_v20, %v9291_v38  ;;  %v9340_v1 = vsel %vm9303_vm4, %v17176_v59, -inf  ;;  %v9400_v20 = vsel %vm9303_vm4, %v17214_v57, 0.0 }
0x189e   : > { %9317 = vmax.xlane.f32.xlu0 %v9316_v36  ;;  %v9349_v19 = vsel %vm9303_vm4, %v17200_v51, -inf }
0x189f   : > { %v9343_v14 = vsel %vm9303_vm4, %v17188_v44, -inf }
0x18a1   : > { %9341 = vmax.xlane.f32.xlu1 %v9340_v1 }
0x18a2   : > { %9320 = vmax.xlane.f32.xlu0 %v9319_v9 }
0x18a5   : > { %9344 = vmax.xlane.f32.xlu1 %v9343_v14 }
0x18a6   : > { %9323 = vmax.xlane.f32.xlu0 %v9322_v37 }
0x18a9   : > { %9350 = vmax.xlane.f32.xlu1 %v9349_v19 }
0x18aa   : > { %9326 = vmax.xlane.f32.xlu0 %v9325_v2 }
0x18ae   : > { %9401 = vadd.xlane.f32.xlu0 %v9400_v20 }
0x18b2   : > { %9404 = vadd.xlane.f32.xlu0 %v9403_v52 }
0x18b6   : > { %9407 = vadd.xlane.f32.xlu0 %v9406_v24 }
0x18ba   : > { %9410 = vadd.xlane.f32.xlu0 %v9409_v13 }
0x1922   : > { %v9336_v7 = vpop.xlane.xlu1 %9335 }
0x1923   : > { %v9362_v40 = vsub.f32 %v17147_v55, %v9336_v7  ;;  %v9330_v33 = vpop.xlane.xlu0 %9329 }
0x1924   : > { %v9360_v48 = vsub.f32 %v17150_v43, %v9330_v33  ;;  %v9556_v33 = vld [vmem:[%s17461_s16 + $0x20] sm:$0xff] }
0x1925   : > { %v9388_v45 = vmul.f32 1.442695, %v9362_v40  ;;  %v9552_v40 = vld [vmem:[%s17461_s16] sm:$0xff] }
0x1926   : > { %v9384_v56 = vmul.f32 1.442695, %v9360_v48  ;;  %v9339_v22 = vpop.xlane.xlu1 %9338  ;;  %v9553_v48 = vld [vmem:[%s17461_s16 + $0x8] sm:$0xff] }
0x1927   : > { %13340 = vpow2.f32 %v9388_v45  ;;  %v9363_v53 = vsub.f32 %v17153_v25, %v9339_v22  ;;  %v9333_v15 = vpop.xlane.xlu0 %9332  ;;  %v10924_v45 = vcombine.low %v9552_v40, %v9556_v33  ;;  %v9557_v22 = vld [vmem:[%s17461_s16 + $0x28] sm:$0xff] }
0x1928   : > { %13342 = vpow2.f32 %v9384_v56  ;;  %v9361_v54 = vsub.f32 %v17158_v58, %v9333_v15  ;;  %v10925_v56 = vcombine.high %v9552_v40, %v9556_v33  ;;  %v9564_v15 = vld [vmem:[%s17461_s16 + $0x60] sm:$0xff]  ;;  %v9577_v33 = vld [vmem:[%s17461_s16 + $0xc8] sm:$0xff] }
0x1929   : > { %v9390_v29 = vmul.f32 1.442695, %v9363_v53  ;;  %v9560_v53 = vld [vmem:[%s17461_s16 + $0x40] sm:$0xff] }
0x192a   : > { %v9348_v17 = vpop.xlane.xlu1 %9347  ;;  %v9386_v55 = vmul.f32 1.442695, %v9361_v54  ;;  %v10927_v54 = vcombine.high %v9553_v48, %v9557_v22  ;;  %9746 = vmatprep.subr.bf16.mxu1 %v10925_v56 }
0x192b   : > { %v9318_v41 = vpop.xlane.xlu0 %9317  ;;  %13344 = vpow2.f32 %v9390_v29  ;;  %v9366_v30 = vsub.f32 %v17172_v6, %v9348_v17  ;;  %v10926_v29 = vcombine.low %v9553_v48, %v9557_v22  ;;  %v10933_v17 = vcombine.high %v9560_v53, %v9564_v15  ;;  %9747 = vmatpush1.bf16.msra.mxu1 %v10924_v45 }
0x192c   : > { %v9356_v49 = vsub.f32 %v17167_v34, %v9318_v41  ;;  %v9561_v41 = vld [vmem:[%s17461_s16 + $0x48] sm:$0xff]  ;;  %9789 = vmatprep.subr.bf16.mxu0 %v10927_v54 }
0x192d   : > { %v9396_v35 = vmul.f32 1.442695, %v9366_v30  ;;  %9790 = vmatpush1.bf16.msra.mxu0 %v10926_v29  ;;  %9748 = vmatprep.subr.bf16.mxu1 %v10933_v17 }
0x192e   : > { %v9376_v43 = vmul.f32 1.442695, %v9356_v49  ;;  %v9342_v61 = vpop.xlane.xlu1 %9341  ;;  %v9565_v49 = vld [vmem:[%s17461_s16 + $0x68] sm:$0xff] }
0x192f   : > { %v9321_v28 = vpop.xlane.xlu0 %9320  ;;  %v9364_v58 = vsub.f32 %v17176_v59, %v9342_v61  ;;  %v10935_v30 = vcombine.high %v9561_v41, %v9565_v49  ;;  %v9569_v61 = vld [vmem:[%s17461_s16 + $0x88] sm:$0xff] }
0x1930   : > { %13346 = vpow2.f32 %v9376_v43  ;;  %v9357_v46 = vsub.f32 %v17182_v47, %v9321_v28  ;;  %v9572_v43 = vld [vmem:[%s17461_s16 + $0xa0] sm:$0xff]  ;;  %v9573_v28 = vld [vmem:[%s17461_s16 + $0xa8] sm:$0xff] }
0x1931   : > { %v17237_v25 = vpop.eup %13340  ;;  %13348 = vpow2.f32 %v9386_v55  ;;  %v9392_v5 = vmul.f32 1.442695, %v9364_v58  ;;  %v9568_v55 = vld [vmem:[%s17461_s16 + $0x80] sm:$0xff]  ;;  %9791 = vmatprep.subr.bf16.mxu0 %v10935_v30 }
0x1932   : > { %v9378_v18 = vmul.f32 1.442695, %v9357_v46  ;;  %v9345_v10 = vpop.xlane.xlu1 %9344  ;;  %v9430_v50 = vsel %vm9303_vm4, %v17237_v25, 0.0  ;;  %v17242_v34 = vpop.eup %13342  ;;  %v10932_v46 = vcombine.low %v9560_v53, %v9564_v15  ;;  %v10941_v58 = vcombine.high %v9568_v55, %v9572_v43 }
0x1933   : > { %9431 = vadd.xlane.f32.xlu1 %v9430_v50  ;;  %v9324_v32 = vpop.xlane.xlu0 %9323  ;;  %v9365_v6 = vsub.f32 %v17188_v44, %v9345_v10  ;;  %v9424_v3 = vsel %vm9303_vm4, %v17242_v34, 0.0  ;;  %v10940_v10 = vcombine.low %v9568_v55, %v9572_v43  ;;  %v10942_v50 = vcombine.low %v9569_v61, %v9573_v28 }
0x1934   : > { %13350 = vpow2.f32 %v9378_v18  ;;  %v9358_v39 = vsub.f32 %v17194_v21, %v9324_v32  ;;  %v10943_v18 = vcombine.high %v9569_v61, %v9573_v28  ;;  %9749 = vmatpush1.bf16.msra.mxu1 %v10932_v46  ;;  %v9559_v28 = vld [vmem:[%s17461_s16 + $0x38] sm:$0xff] }
0x1935   : > { %13352 = vpow2.f32 %v9396_v35  ;;  %v17248_v63 = vpop.eup %13344  ;;  %v9394_v62 = vmul.f32 1.442695, %v9365_v6  ;;  %v10934_v35 = vcombine.low %v9561_v41, %v9565_v49  ;;  %9750 = vmatprep.subr.bf16.mxu1 %v10941_v58  ;;  %v17352_v41 = vld [vmem:[%s17461_s16 + $0x30] sm:$0xff]  ;;  %v17357_v49 = vld [vmem:[%s17461_s16 + $0x18] sm:$0xff] }
0x1936   : > { %v9380_v27 = vmul.f32 1.442695, %v9358_v39  ;;  %v9351_v31 = vpop.xlane.xlu1 %9350  ;;  %v9433_v8 = vsel %vm9303_vm4, %v17248_v63, 0.0  ;;  %v10931_v58 = vcombine.high %v17357_v49, %v9559_v28 }
0x1937   : > { %9425 = vadd.xlane.f32.xlu1 %v9424_v3  ;;  %v9327_v59 = vpop.xlane.xlu0 %9326  ;;  %v9367_v47 = vsub.f32 %v17200_v51, %v9351_v31  ;;  %9792 = vmatpush1.bf16.msra.mxu0 %v10934_v35  ;;  %v10930_v35 = vcombine.low %v17357_v49, %v9559_v28 }
0x1938   : > { %13354 = vpow2.f32 %v9380_v27  ;;  %v9359_v38 = vsub.f32 %v17206_v23, %v9327_v59  ;;  %9793 = vmatprep.subr.bf16.mxu0 %v10943_v18  ;;  %9751 = vmatpush1.bf16.msra.mxu1 %v10940_v10 }
0x1939   : > { %13356 = vpow2.f32 %v9392_v5  ;;  %v9398_v21 = vmul.f32 1.442695, %v9367_v47 }
0x193a   : > { %v17252_v36 = vpop.eup %13346  ;;  %v9382_v26 = vmul.f32 1.442695, %v9359_v38 }
0x193b   : > { %v17256_v44 = vpop.eup %13348  ;;  %9434 = vadd.xlane.f32.xlu1 %v9433_v8  ;;  %v9412_v1 = vsel %vm9303_vm4, %v17252_v36, 0.0  ;;  %9794 = vmatpush1.bf16.msra.mxu0 %v10942_v50  ;;  %v9402_v32 = vpop.xlane.xlu0 %9401 }
0x193c   : > { %13358 = vpow2.f32 %v9382_v26  ;;  %9413 = vadd.xlane.f32.xlu0 %v9412_v1  ;;  %v9427_v4 = vsel %vm9303_vm4, %v17256_v44, 0.0 }
0x193d   : > { %13360 = vpow2.f32 %v9394_v62 }
0x193e   : > { %v17260_v9 = vpop.eup %13350  ;;  %13362 = vpow2.f32 %v9398_v21 }
0x193f   : > { %v17264_v42 = vpop.eup %13352  ;;  %9428 = vadd.xlane.f32.xlu1 %v9427_v4  ;;  %v9415_v51 = vsel %vm9303_vm4, %v17260_v9, 0.0  ;;  %v9405_v39 = vpop.xlane.xlu0 %9404  ;;  %13364 = vrcp.f32 %v9402_v32 }
0x1940   : > { %9416 = vadd.xlane.f32.xlu0 %v9415_v51  ;;  %v9442_v23 = vsel %vm9303_vm4, %v17264_v42, 0.0 }
0x1942   : > { %v17268_v14 = vpop.eup %13354 }
0x1943   : > { %v17272_v37 = vpop.eup %13356  ;;  %9443 = vadd.xlane.f32.xlu1 %v9442_v23  ;;  %v9418_v11 = vsel %vm9303_vm4, %v17268_v14, 0.0  ;;  %v9408_v6 = vpop.xlane.xlu0 %9407 }
0x1944   : > { %9419 = vadd.xlane.f32.xlu0 %v9418_v11  ;;  %v9436_v2 = vsel %vm9303_vm4, %v17272_v37, 0.0 }
0x1946   : > { %v17276_v19 = vpop.eup %13358 }
0x1947   : > { %v17280_v20 = vpop.eup %13360  ;;  %9437 = vadd.xlane.f32.xlu1 %v9436_v2  ;;  %v9421_v52 = vsel %vm9303_vm4, %v17276_v19, 0.0  ;;  %v9411_v3 = vpop.xlane.xlu0 %9410 }
0x1948   : > { %9422 = vadd.xlane.f32.xlu0 %v9421_v52  ;;  %v9439_v24 = vsel %vm9303_vm4, %v17280_v20, 0.0  ;;  %v17286_v13 = vpop.eup %13362 }
0x1949   : > { %v9445_v7 = vsel %vm9303_vm4, %v17286_v13, 0.0  ;;  %v13365_v38 = vpop.eup %13364 }
0x194a   : > { %v9449_v8 = vmul.f32 %v13365_v38, %v17214_v57  ;;  %v9576_v57 = vld [vmem:[%s17461_s16 + $0xc0] sm:$0xff] }
0x194b   : > { %9440 = vadd.xlane.f32.xlu1 %v9439_v24 }
0x194f   : > { %9446 = vadd.xlane.f32.xlu1 %v9445_v7 }
0x19c0   : > { %v9432_v5 = vpop.xlane.xlu1 %9431 }
0x19c4   : > { %v9426_v27 = vpop.xlane.xlu1 %9425 }
0x19c5   : > { %13366 = vrcp.f32 %v9426_v27 }
0x19c6   : > { %13368 = vrcp.f32 %v9405_v39 }
0x19c7   : > { %13370 = vrcp.f32 %v9432_v5 }
0x19c8   : > { %v9435_v31 = vpop.xlane.xlu1 %9434 }
0x19c9   : > { %v9414_v62 = vpop.xlane.xlu0 %9413 }
0x19cc   : > { %v9429_v59 = vpop.xlane.xlu1 %9428 }
0x19cd   : > { %13372 = vrcp.f32 %v9429_v59  ;;  %v9417_v4 = vpop.xlane.xlu0 %9416 }
0x19ce   : > { %13374 = vrcp.f32 %v9408_v6 }
0x19cf   : > { %v13367_v47 = vpop.eup %13366  ;;  %13376 = vrcp.f32 %v9435_v31 }
0x19d0   : > { %v9444_v26 = vpop.xlane.xlu1 %9443  ;;  %v9465_v1 = vmul.f32 %v13367_v47, %v17242_v34  ;;  %13378 = vrcp.f32 %v9411_v3  ;;  %v13369_v23 = vpop.eup %13368  ;;  %v9580_v34 = vld [vmem:[%s17461_s16 + $0xe0] sm:$0xff] }
0x19d1   : > { %v13371_v11 = vpop.eup %13370  ;;  %v9451_v24 = vmul.f32 %v13369_v23, %v17218_v12  ;;  %v9420_v48 = vpop.xlane.xlu0 %9419  ;;  %v10949_v56 = vcombine.high %v9576_v57, %v9580_v34  ;;  %v10948_v53 = vcombine.low %v9576_v57, %v9580_v34  ;;  %v9571_v57 = vld [vmem:[%s17461_s16 + $0x98] sm:$0xff] }
0x19d2   : > { %v12991_v21 = vpack.i.bf16 %v9449_v8, %v9465_v1  ;;  %v9469_v12 = vmul.f32 %v13371_v11, %v17237_v25  ;;  %v17347_v25 = vld [vmem:[%s17461_s16 + $0x10] sm:$0xff]  ;;  %v9575_v34 = vld [vmem:[%s17461_s16 + $0xb8] sm:$0xff] }
0x19d3   : > { %9752 = vmatprep.subr.bf16.mxu1 %v10949_v56  ;;  %v10928_v43 = vcombine.low %v17347_v25, %v17352_v41  ;;  %v10929_v61 = vcombine.high %v17347_v25, %v17352_v41  ;;  %v9578_v56 = vld [vmem:[%s17461_s16 + $0xd0] sm:$0xff] }
0x19d4   : > { %v9438_v51 = vpop.xlane.xlu1 %9437  ;;  %12992 = vxpose.xlu1.b32.start [1/8] (short) (narrow) %v12991_v21, 8  ;;  %9753 = vmatpush1.bf16.msra.mxu1 %v10948_v53  ;;  %v9583_v53 = vld [vmem:[%s17461_s16 + $0xf8] sm:$0xff] }
0x19d5   : > { %13380 = vrcp.f32 %v9438_v51  ;;  %v9423_v18 = vpop.xlane.xlu0 %9422  ;;  %9832 = vmatprep.subr.bf16.mxu1 %v10929_v61 }
0x19d6   : > { %13382 = vrcp.f32 %v9414_v62 }
0x19d7   : > { %v13373_v2 = vpop.eup %13372 }
0x19d8   : > { %v9441_v52 = vpop.xlane.xlu1 %9440  ;;  %v9467_v7 = vmul.f32 %v13373_v2, %v17256_v44  ;;  %v13375_v40 = vpop.eup %13374  ;;  %v9581_v44 = vld [vmem:[%s17461_s16 + $0xe8] sm:$0xff] }
0x19d9   : > { %13384 = vrcp.f32 %v9441_v52  ;;  %v13377_v22 = vpop.eup %13376  ;;  %v10950_v15 = vcombine.low %v9577_v33, %v9581_v44  ;;  %v10951_v29 = vcombine.high %v9577_v33, %v9581_v44  ;;  %v9453_v54 = vmul.f32 %v13375_v40, %v17222_v16  ;;  %v9574_v40 = vld [vmem:[%s17461_s16 + $0xb0] sm:$0xff] }
0x19da   : > { %v12993_v45 = vpack.i.bf16 %v9451_v24, %v9467_v7  ;;  %13386 = vrcp.f32 %v9417_v4  ;;  %v13379_v17 = vpop.eup %13378  ;;  %v9471_v30 = vmul.f32 %v13377_v22, %v17248_v63  ;;  %v9570_v24 = vld [vmem:[%s17461_s16 + $0x90] sm:$0xff]  ;;  %v9579_v22 = vld [vmem:[%s17461_s16 + $0xd8] sm:$0xff] }
0x19db   : > { %13388 = vrcp.f32 %v9444_v26  ;;  %9795 = vmatprep.subr.bf16.mxu0 %v10951_v29  ;;  %v12995_v55 = vpack.i.bf16 %v9453_v54, %v9469_v12  ;;  %v9455_v63 = vmul.f32 %v13379_v17, %v17226_v0  ;;  %v10947_v12 = vcombine.high %v9571_v57, %v9575_v34  ;;  %v9582_v44 = vld [vmem:[%s17461_s16 + $0xf0] sm:$0xff] }
0x19dc   : > { %12994 = vxpose.xlu1.b32.cont [2/8] (short) (narrow) %v12993_v45, 8  ;;  %13390 = vrcp.f32 %v9420_v48  ;;  %v9447_v16 = vpop.xlane.xlu1 %9446  ;;  %9796 = vmatpush1.bf16.msra.mxu0 %v10950_v15  ;;  %v10945_v45 = vcombine.high %v9570_v24, %v9574_v40  ;;  %v10944_v15 = vcombine.low %v9570_v24, %v9574_v40  ;;  %v10946_v29 = vcombine.low %v9571_v57, %v9575_v34 }
0x19dd   : > { %13392 = vrcp.f32 %v9447_v16  ;;  %9875 = vmatprep.subr.bf16.mxu0 %v10931_v58  ;;  %v12997_v50 = vpack.i.bf16 %v9455_v63, %v9471_v30  ;;  %v10953_v54 = vcombine.high %v9578_v56, %v9582_v44  ;;  %v10955_v17 = vcombine.high %v9579_v22, %v9583_v53 }
0x19de   : > { %13394 = vrcp.f32 %v9423_v18  ;;  %v10952_v25 = vcombine.low %v9578_v56, %v9582_v44  ;;  %v10954_v41 = vcombine.low %v9579_v22, %v9583_v53 }
0x19df   : > { %v13381_v46 = vpop.eup %13380 }
0x19e0   : > { %12996 = vxpose.xlu1.b32.cont [3/8] (short) (narrow) %v12995_v55, 8  ;;  %v13383_v10 = vpop.eup %13382  ;;  %v9473_v32 = vmul.f32 %v13381_v46, %v17272_v37 }
0x19e1   : > { %v9457_v5 = vmul.f32 %v13383_v10, %v17252_v36 }
0x19e3   : > { %v13385_v39 = vpop.eup %13384  ;;  %v12999_v31 = vpack.i.bf16 %v9457_v5, %v9473_v32 }
0x19e4   : > { %12998 = vxpose.xlu1.b32.cont [4/8] (short) (narrow) %v12997_v50, 8  ;;  %v13387_v6 = vpop.eup %13386  ;;  %v9475_v3 = vmul.f32 %v13385_v39, %v17280_v20 }
0x19e5   : > { %v13389_v27 = vpop.eup %13388  ;;  %v9459_v0 = vmul.f32 %v13387_v6, %v17260_v9  ;;  %v9562_v9 = vld [vmem:[%s17461_s16 + $0x50] sm:$0xff] }
0x19e6   : > { %v13391_v59 = vpop.eup %13390  ;;  %v9477_v47 = vmul.f32 %v13389_v27, %v17264_v42  ;;  %v9566_v42 = vld [vmem:[%s17461_s16 + $0x70] sm:$0xff] }
0x19e7   : > { %v13001_v38 = vpack.i.bf16 %v9459_v0, %v9475_v3  ;;  %v9461_v62 = vmul.f32 %v13391_v59, %v17268_v14  ;;  %v13393_v37 = vpop.eup %13392  ;;  %v10937_v2 = vcombine.high %v9562_v9, %v9566_v42  ;;  %v10936_v33 = vcombine.low %v9562_v9, %v9566_v42 }
0x19e8   : > { %13000 = vxpose.xlu1.b32.cont [5/8] (short) (narrow) %v12999_v31, 8  ;;  %v13395_v26 = vpop.eup %13394  ;;  %v9479_v36 = vmul.f32 %v13393_v37, %v17286_v13  ;;  %v9563_v13 = vld [vmem:[%s17461_s16 + $0x58] sm:$0xff] }
0x19e9   : > { %v13003_v8 = vpack.i.bf16 %v9461_v62, %v9477_v47  ;;  %v9463_v1 = vmul.f32 %v13395_v26, %v17276_v19  ;;  %v9567_v19 = vld [vmem:[%s17461_s16 + $0x78] sm:$0xff] }
0x19ea   : > { %v10939_v52 = vcombine.high %v9563_v13, %v9567_v19  ;;  %v10938_v48 = vcombine.low %v9563_v13, %v9567_v19 }
0x19eb   : > { %v13005_v21 = vpack.i.bf16 %v9463_v1, %v9479_v36 }
0x19ec   : > { %13002 = vxpose.xlu1.b32.cont [6/8] (short) (narrow) %v13001_v38, 8 }
0x19f0   : > { %13004 = vxpose.xlu1.b32.cont [7/8] (short) (narrow) %v13003_v8, 8 }
0x19f4   : > { %13006 = vxpose.xlu1.b32.end [8/8] (short) (narrow) %v13005_v21, 8 }
0x1a58   : > { %v13007_v20 = vpop.trf.xlu1 }
0x1a59   : > { %v13011_v4 = vunpack.i.h.bf16 %v13007_v20  ;;  %v13008_v51 = vunpack.i.l.bf16 %v13007_v20 }
0x1a5b   : > { %v9545_v14 = vpack.c.bf16 %v13008_v51, %v13008_v51  ;;  %v9512_v23 = vpack.c.bf16 %v13011_v4, %v13011_v4 }
0x1a5d   : > { %v9547_v11 = vrot.slane %v9545_v14, 4 }
0x1a5f   : > { %v9551_v7 = vsel %vm9548_vm5, %v9512_v23, %v9547_v11 }
0x1a60   : > { %10956 = vmatmul.mubr.msk.bf16.vlgmr.msra.gmra.mrb[224].mxu1 %vm3301_vm1, %v9551_v7  ;;  %10957 = vmatmul.mubr.msk.bf16.vlgmr.msra.gmra.mrb[0].mxu0 %vm3301_vm1, %v9551_v7 }
0x1a61   : > { %9833 = vmatpush1.bf16.msra.mxu1 %v10928_v43  ;;  %9876 = vmatpush1.bf16.msra.mxu0 %v10930_v35 }
0x1a62   : > { %9834 = vmatprep.subr.bf16.mxu1 %v10937_v2  ;;  %9877 = vmatprep.subr.bf16.mxu0 %v10939_v52 }
0x1a63   : > { %9864 = vmatprep.mubr.bf16.mxu1 %v17575_v60  ;;  %9907 = vmatprep.mubr.bf16.mxu0 %v17575_v60 }
0x1a65   : > { %9835 = vmatpush1.bf16.msra.mxu1 %v10936_v33  ;;  %9878 = vmatpush1.bf16.msra.mxu0 %v10938_v48 }
0x1a66   : > { %9836 = vmatprep.subr.bf16.mxu1 %v10945_v45  ;;  %9879 = vmatprep.subr.bf16.mxu0 %v10947_v12 }
0x1a69   : > { %9837 = vmatpush1.bf16.msra.mxu1 %v10944_v15  ;;  %9880 = vmatpush1.bf16.msra.mxu0 %v10946_v29 }
0x1a6a   : > { %9838 = vmatprep.subr.bf16.mxu1 %v10953_v54  ;;  %9881 = vmatprep.subr.bf16.mxu0 %v10955_v17 }
0x1a6d   : > { %9839 = vmatpush1.bf16.msra.mxu1 %v10952_v25  ;;  %9882 = vmatpush1.bf16.msra.mxu0 %v10954_v41 }
0x1a70   : > { %10958 = vmatmul.mubr.msk.bf16.vlgmr.msra.gmra.mrb[228].mxu1 %vm3301_vm1, %v9551_v7  ;;  %10959 = vmatmul.mubr.msk.bf16.vlgmr.msra.gmra.mrb[4].mxu0 %vm3301_vm1, %v9551_v7 }
0x1b33   : > { %v9780_v60 = vpop.f32.mrb[224].mxu1  ;;  %v9823_v49 = vpop.f32.mrb[0].mxu0 }
0x1b34   : > { %9918 = vst [vmem:[%s17424_s20] sm:$0xff] %v9780_v60  ;;  %9920 = vst [vmem:[%s17424_s20 + $0x10] sm:$0xff] %v9823_v49  ;;  %v9782_v16 = vpop.f32.mrb[225].mxu1  ;;  %v9825_v55 = vpop.f32.mrb[1].mxu0 }
0x1b35   : > { %9919 = vst [vmem:[%s17424_s20 + $0x8] sm:$0xff] %v9782_v16  ;;  %9921 = vst [vmem:[%s17424_s20 + $0x18] sm:$0xff] %v9825_v55  ;;  %v9784_v30 = vpop.f32.mrb[226].mxu1  ;;  %v9827_v43 = vpop.f32.mrb[2].mxu0 }
0x1b36   : > { %9926 = vst [vmem:[%s17424_s20 + $0x40] sm:$0xff] %v9784_v30  ;;  %9928 = vst [vmem:[%s17424_s20 + $0x50] sm:$0xff] %v9827_v43  ;;  %v9786_v61 = vpop.f32.mrb[227].mxu1  ;;  %v9829_v28 = vpop.f32.mrb[3].mxu0 }
0x1b37   : > { %9927 = vst [vmem:[%s17424_s20 + $0x48] sm:$0xff] %v9786_v61  ;;  %9929 = vst [vmem:[%s17424_s20 + $0x58] sm:$0xff] %v9829_v28 }
0x1b43   : > { %v9866_v46 = vpop.f32.mrb[228].mxu1  ;;  %v9909_v35 = vpop.f32.mrb[4].mxu0 }
0x1b44   : > { %9922 = vst [vmem:[%s17424_s20 + $0x20] sm:$0xff] %v9866_v46  ;;  %9924 = vst [vmem:[%s17424_s20 + $0x30] sm:$0xff] %v9909_v35  ;;  %v9868_v58 = vpop.f32.mrb[229].mxu1  ;;  %v9911_v18 = vpop.f32.mrb[5].mxu0 }
0x1b45   : > { %9923 = vst [vmem:[%s17424_s20 + $0x28] sm:$0xff] %v9868_v58  ;;  %9925 = vst [vmem:[%s17424_s20 + $0x38] sm:$0xff] %v9911_v18  ;;  %v9870_v63 = vpop.f32.mrb[230].mxu1  ;;  %v9913_v10 = vpop.f32.mrb[6].mxu0 }
0x1b46   : > { %9930 = vst [vmem:[%s17424_s20 + $0x60] sm:$0xff] %v9870_v63  ;;  %9932 = vst [vmem:[%s17424_s20 + $0x70] sm:$0xff] %v9913_v10  ;;  %v9872_v50 = vpop.f32.mrb[231].mxu1  ;;  %v9915_v32 = vpop.f32.mrb[7].mxu0 }
0x1b47   : > { %9931 = vst [vmem:[%s17424_s20 + $0x68] sm:$0xff] %v9872_v50  ;;  %9933 = vst [vmem:[%s17424_s20 + $0x78] sm:$0xff] %v9915_v32 }
0x1b48 PF: > { %s27_s24 = sadd.s32 1, %s13658_s24  }
0x1b49   : > { %p24_p4 = scmp.ge.s32.totalorder %s27_s24, 4  }
0x1b4b   :  { %26 = sbr.rel (!%p24_p4) target bundleno = 3 (0x3), region = 150 }

</bundles_post_ra>
